<compile_context>
chip_gen: v6e
topology: v6e:2x2x1
jax: 0.10.0
libtpu: 0.0.40
codegen_flags: <defaults>
</compile_context>

<pallas_src>
import jax
import jax.numpy as jnp
from jax.experimental import pallas as pl
from jax.experimental.pallas import tpu as pltpu


# ----------------------------------------------------------------------------
# Small in-kernel helpers
# ----------------------------------------------------------------------------
def _hardswish(x):
    return x * jnp.clip(x + 3.0, 0.0, 6.0) * (1.0 / 6.0)


def _mm(a, b):
    """MXU matmul: bf16 operands (weights are pre-cast), f32 accumulation."""
    return jnp.dot(a.astype(jnp.bfloat16), b.astype(jnp.bfloat16),
                   preferred_element_type=jnp.float32)


def _qkt(q, k):
    """q @ k.T on the MXU (bf16 operands, f32 accumulation)."""
    return jax.lax.dot_general(
        q.astype(jnp.bfloat16), k.astype(jnp.bfloat16),
        (((1,), (1,)), ((), ())), preferred_element_type=jnp.float32)


def _softmax_rows(s):
    s = s - jnp.max(s, axis=-1, keepdims=True)
    e = jnp.exp(s)
    return e / jnp.sum(e, axis=-1, keepdims=True)   # exact division (cheap at N<=17)


_VMEM = pl.BlockSpec(memory_space=pltpu.MemorySpace.VMEM)


# ----------------------------------------------------------------------------
# Pallas kernels (no grid: every operand is KB-scale and fits VMEM many times)
# ----------------------------------------------------------------------------
def _linear_bias_kernel(x_ref, w_ref, b_ref, o_ref):
    o_ref[...] = _mm(x_ref[...], w_ref[...]) + b_ref[...]


def _mlp_res_kernel(x_ref, w1_ref, b1_ref, w2_ref, b2_ref, o_ref):
    """x + fc2(Hardswish(fc1(x))) on flattened (B*N, C)."""
    x = x_ref[...]
    h = _hardswish(_mm(x, w1_ref[...]) + b1_ref[...])
    o_ref[...] = x + _mm(h, w2_ref[...]) + b2_ref[...]


def _layer_kernel(x_ref, wq_ref, bq_ref, wk_ref, bk_ref, wv_ref, bv_ref,
                  pw_ref, pb_ref, w1_ref, b1_ref, w2_ref, b2_ref,
                  xo_ref, cls_ref, rawlast_ref):
    """One full transformer layer: attention + residual + MLP + residual.

    Outputs:
      xo_ref      (B, N, C)  x + attn_raw + mlp_raw
      cls_ref     (B, N)     mean over heads of attention row 0
      rawlast_ref (B, C)     (attn_raw + mlp_raw) at the last token
    """
    B, N, _ = x_ref.shape
    num_heads = wq_ref.shape[0]
    inv_h = 1.0 / num_heads
    for b in range(B):                                   # B=2: unrolled
        x = x_ref[b]                                     # (N, C) f32
        xb = x.astype(jnp.bfloat16)
        attn_out = None
        cls_acc = None
        for h in range(num_heads):                       # per-head weights: no lane slices
            q = _mm(xb, wq_ref[h]) + bq_ref[h]           # (N, kd), kd^-0.5 pre-folded
            k = _mm(xb, wk_ref[h]) + bk_ref[h]           # (N, kd)
            v = _mm(xb, wv_ref[h]) + bv_ref[h]           # (N, d)
            attn = _softmax_rows(_qkt(q, k))             # (N, N)
            row0 = attn[0:1, :]                          # cls attention row
            cls_acc = row0 if cls_acc is None else cls_acc + row0
            o = _hardswish(_mm(attn, v))                 # (N, d)
            contrib = _mm(o, pw_ref[h])                  # (N, C) per-head proj block
            attn_out = contrib if attn_out is None else attn_out + contrib
        attn_raw = attn_out + pb_ref[...]                # (N, C)
        cls_ref[b:b + 1, :] = cls_acc * inv_h            # lane-dense (1, N) store
        y = x + attn_raw                                 # residual 1
        hid = _hardswish(_mm(y, w1_ref[...]) + b1_ref[...])
        mlp_raw = _mm(hid, w2_ref[...]) + b2_ref[...]
        xo_ref[b] = y + mlp_raw                          # residual 2
        rawlast_ref[b:b + 1, :] = attn_raw[N - 1:N, :] + mlp_raw[N - 1:N, :]


def _attn_sub_kernel(x_ref, xq_ref, wq_ref, bq_ref, wk_ref, bk_ref, wv_ref,
                     bv_ref, pw_ref, pb_ref, o_ref, cls_ref):
    """AttentionSubsample: kv/q projections + attention + Hardswish + proj."""
    B = x_ref.shape[0]
    num_heads = wq_ref.shape[0]
    inv_h = 1.0 / num_heads
    for b in range(B):
        xb = x_ref[b].astype(jnp.bfloat16)               # (N, C)  keys / values
        xqb = xq_ref[b].astype(jnp.bfloat16)             # (Nq, C) queries
        out = None
        cls_acc = None
        for h in range(num_heads):
            k = _mm(xb, wk_ref[h]) + bk_ref[h]           # (N, kd)
            v = _mm(xb, wv_ref[h]) + bv_ref[h]           # (N, d)
            q = _mm(xqb, wq_ref[h]) + bq_ref[h]          # (Nq, kd), scale pre-folded
            attn = _softmax_rows(_qkt(q, k))             # (Nq, N)
            row0 = attn[0:1, :]
            cls_acc = row0 if cls_acc is None else cls_acc + row0
            o = _hardswish(_mm(attn, v))                 # (Nq, d)
            contrib = _mm(o, pw_ref[h])                  # (Nq, E1)
            out = contrib if out is None else out + contrib
        o_ref[b] = out + pb_ref[...]
        cls_ref[b:b + 1, :] = cls_acc * inv_h


def _head_kernel(x_ref, w_ref, b_ref, o_ref):
    """Token mean (excluding cls) + fused, pre-averaged BN_Linear heads."""
    B, N, _ = x_ref.shape
    inv = 1.0 / (N - 1)
    rows = []
    for b in range(B):
        xb = x_ref[b]                                    # (N, C)
        rows.append(jnp.sum(xb[1:, :], axis=0, keepdims=True) * inv)
    feat = jnp.concatenate(rows, axis=0) if B > 1 else rows[0]   # (B, C)
    o_ref[...] = _mm(feat, w_ref[...]) + b_ref[...]


# ----------------------------------------------------------------------------
# Kernel wrappers
# ----------------------------------------------------------------------------
def linear_bias(x2d, p):
    M = x2d.shape[0]
    O = p["w"].shape[1]
    return pl.pallas_call(
        _linear_bias_kernel,
        out_shape=jax.ShapeDtypeStruct((M, O), jnp.float32),
        in_specs=[_VMEM] * 3, out_specs=_VMEM,
    )(x2d, p["w"], p["b"])


def mlp_residual(x, p):
    B, N, C = x.shape
    y = pl.pallas_call(
        _mlp_res_kernel,
        out_shape=jax.ShapeDtypeStruct((B * N, C), jnp.float32),
        in_specs=[_VMEM] * 5, out_specs=_VMEM,
    )(x.reshape(B * N, C), p["w1"], p["b1"], p["w2"], p["b2"])
    return y.reshape(B, N, C)


def fused_layer(x, ap, mp):
    """Attention + residual + MLP + residual in one pallas_call."""
    B, N, C = x.shape
    xo, cls_full, raw_last = pl.pallas_call(
        _layer_kernel,
        out_shape=[jax.ShapeDtypeStruct((B, N, C), jnp.float32),
                   jax.ShapeDtypeStruct((B, N), jnp.float32),
                   jax.ShapeDtypeStruct((B, C), jnp.float32)],
        in_specs=[_VMEM] * 13,
        out_specs=[_VMEM] * 3,
    )(x, ap["wq"], ap["bq"], ap["wk"], ap["bk"], ap["wv"], ap["bv"],
      ap["pw"], ap["pb"], mp["w1"], mp["b1"], mp["w2"], mp["b2"])
    return xo, cls_full, raw_last


def heads(x, p):
    B = x.shape[0]
    nc = p["w"].shape[1]
    return pl.pallas_call(
        _head_kernel,
        out_shape=jax.ShapeDtypeStruct((B, nc), jnp.float32),
        in_specs=[_VMEM] * 3, out_specs=_VMEM,
    )(x, p["w"], p["b"])


# ----------------------------------------------------------------------------
# Model config (small, consistent with the LeViT constructor)
# ----------------------------------------------------------------------------
CFG = dict(
    img_size=16, patch_size=4, in_chans=3, num_classes=10,
    embed_dim=[32, 48], key_dim=[8, 8], depth=[2, 2], num_heads=[2, 2],
    attn_ratio=[2, 2], mlp_ratio=[2, 2],
    down_ops=[["Subsample", 8, 2, 2, 2, 2]],
    prune_ratio=([1.0, 0.5, 0.5, 0.5], [0.5, 0.5]),
)
RESOLUTION0 = CFG["img_size"] // CFG["patch_size"]           # 4
RESOLUTION1 = (RESOLUTION0 - 1) // 2 + 1                      # 2

# sigmoid(learn_tradeoff = 0) == 0.5 (learn_tradeoff_mode=True, eval).
TRADEOFF = 0.5


# ----------------------------------------------------------------------------
# Parameter init (deterministic, shapes follow the module's __init__)
# ----------------------------------------------------------------------------
class KeyGen:
    def __init__(self, key):
        self.key = key

    def __call__(self):
        self.key, k = jax.random.split(self.key)
        return k


_EPS = 1e-5


def init_linear_bn(kg, a, b):
    return dict(
        w=jax.random.normal(kg(), (a, b), jnp.float32) * (1.0 / a ** 0.5),
        scale=(1.0 + 0.1 * jax.random.normal(kg(), (b,), jnp.float32))
        / jnp.sqrt(1.0 + _EPS),
        shift=0.1 * jax.random.normal(kg(), (b,), jnp.float32),
    )


def init_bn_linear(kg, a, b):
    return dict(
        bn_scale=(1.0 + 0.1 * jax.random.normal(kg(), (a,), jnp.float32))
        / jnp.sqrt(1.0 + _EPS),
        bn_shift=0.1 * jax.random.normal(kg(), (a,), jnp.float32),
        w=0.02 * jax.random.normal(kg(), (a, b), jnp.float32),
        b=jnp.zeros((b,), jnp.float32),
    )


def init_attention(kg, dim, key_dim, num_heads, attn_ratio):
    d = attn_ratio * key_dim
    dh = d * num_heads
    h = dh + key_dim * num_heads * 2
    return dict(qkv=init_linear_bn(kg, dim, h), proj=init_linear_bn(kg, dh, dim))


def init_mlp(kg, dim, hidden):
    return dict(fc1=init_linear_bn(kg, dim, hidden), fc2=init_linear_bn(kg, hidden, dim))


def init_params(seed=0):
    kg = KeyGen(jax.random.PRNGKey(seed))
    E0, E1 = CFG["embed_dim"]
    p = CFG["patch_size"]
    n_tok0 = RESOLUTION0 ** 2 + 1
    return dict(
        cls_token=0.02 * jax.random.normal(kg(), (1, 1, E0), jnp.float32),
        poss=0.02 * jax.random.normal(kg(), (1, n_tok0, E0), jnp.float32),
        patch_embed=init_linear_bn(kg, CFG["in_chans"] * p * p, E0),
        attn0=init_attention(kg, E0, 8, 2, 2),
        mlp0=init_mlp(kg, E0, E0 * 2),
        attn1=init_attention(kg, E0, 8, 2, 2),
        mlp1=init_mlp(kg, E0, E0 * 2),
        sub=dict(
            kv=init_linear_bn(kg, E0, 32 + 16),     # dh + nh_kd
            q=init_linear_bn(kg, E0, 16),           # nh_kd
            proj=init_linear_bn(kg, 32, E1),        # dh -> out_dim
            poss=0.02 * jax.random.normal(kg(), (1, n_tok0, E0), jnp.float32),
        ),
        ffn=init_mlp(kg, E1, E1 * 2),
        attn2=init_attention(kg, E1, 8, 2, 2),
        mlp2=init_mlp(kg, E1, E1 * 2),
        attn3=init_attention(kg, E1, 8, 2, 2),
        mlp3=init_mlp(kg, E1, E1 * 2),
        head=init_bn_linear(kg, E1, CFG["num_classes"]),
        head_dist=init_bn_linear(kg, E1, CFG["num_classes"]),
    )


# ----------------------------------------------------------------------------
# Parameter prep: fold BN into weights, split per head, pre-cast to bf16.
# Done ONCE, outside jit / outside the kernels.
# ----------------------------------------------------------------------------
def _prep_linear_bn(p):
    return dict(w=(p["w"] * p["scale"][None, :]).astype(jnp.bfloat16),
                b=p["shift"].reshape(1, -1).astype(jnp.float32))


def _prep_mlp(p):
    return dict(
        w1=(p["fc1"]["w"] * p["fc1"]["scale"][None, :]).astype(jnp.bfloat16),
        b1=p["fc1"]["shift"].reshape(1, -1).astype(jnp.float32),
        w2=(p["fc2"]["w"] * p["fc2"]["scale"][None, :]).astype(jnp.bfloat16),
        b2=p["fc2"]["shift"].reshape(1, -1).astype(jnp.float32),
    )


def _prep_attention(p, key_dim, num_heads, d):
    """qkv columns -> per-head (C, kd)/(C, d) stacks; proj rows -> (nh, d, C)."""
    per = 2 * key_dim + d
    scale = key_dim ** -0.5
    w = p["qkv"]["w"] * p["qkv"]["scale"][None, :]
    b = p["qkv"]["shift"]
    wq = jnp.stack([w[:, h * per: h * per + key_dim] for h in range(num_heads)]) * scale
    bq = jnp.stack([b[h * per: h * per + key_dim] for h in range(num_heads)])[:, None, :] * scale
    wk = jnp.stack([w[:, h * per + key_dim: h * per + 2 * key_dim] for h in range(num_heads)])
    bk = jnp.stack([b[h * per + key_dim: h * per + 2 * key_dim] for h in range(num_heads)])[:, None, :]
    wv = jnp.stack([w[:, h * per + 2 * key_dim: h * per + per] for h in range(num_heads)])
    bv = jnp.stack([b[h * per + 2 * key_dim: h * per + per] for h in range(num_heads)])[:, None, :]
    pw = p["proj"]["w"] * p["proj"]["scale"][None, :]
    c_out = pw.shape[1]
    pw = pw.reshape(num_heads, d, c_out)                 # head-major rows already
    pb = p["proj"]["shift"].reshape(1, c_out)
    return dict(wq=wq.astype(jnp.bfloat16), bq=bq.astype(jnp.float32),
                wk=wk.astype(jnp.bfloat16), bk=bk.astype(jnp.float32),
                wv=wv.astype(jnp.bfloat16), bv=bv.astype(jnp.float32),
                pw=pw.astype(jnp.bfloat16), pb=pb.astype(jnp.float32))


def _prep_subsample(p, key_dim, num_heads, d):
    per = key_dim + d
    scale = key_dim ** -0.5
    wkv = p["kv"]["w"] * p["kv"]["scale"][None, :]
    bkv = p["kv"]["shift"]
    wk = jnp.stack([wkv[:, h * per: h * per + key_dim] for h in range(num_heads)])
    bk = jnp.stack([bkv[h * per: h * per + key_dim] for h in range(num_heads)])[:, None, :]
    wv = jnp.stack([wkv[:, h * per + key_dim: h * per + per] for h in range(num_heads)])
    bv = jnp.stack([bkv[h * per + key_dim: h * per + per] for h in range(num_heads)])[:, None, :]
    wq_full = p["q"]["w"] * p["q"]["scale"][None, :] * scale
    bq_full = p["q"]["shift"] * scale
    wq = jnp.stack([wq_full[:, h * key_dim:(h + 1) * key_dim] for h in range(num_heads)])
    bq = jnp.stack([bq_full[h * key_dim:(h + 1) * key_dim] for h in range(num_heads)])[:, None, :]
    pw = p["proj"]["w"] * p["proj"]["scale"][None, :]
    e1 = pw.shape[1]
    pw = pw.reshape(num_heads, d, e1)
    pb = p["proj"]["shift"].reshape(1, e1)
    return dict(wq=wq.astype(jnp.bfloat16), bq=bq.astype(jnp.float32),
                wk=wk.astype(jnp.bfloat16), bk=bk.astype(jnp.float32),
                wv=wv.astype(jnp.bfloat16), bv=bv.astype(jnp.float32),
                pw=pw.astype(jnp.bfloat16), pb=pb.astype(jnp.float32),
                poss=p["poss"])


def _prep_head(h1, h2):
    """Fold BN into each head and average both heads into ONE matmul."""
    def fold(h):
        w = h["bn_scale"][:, None] * h["w"]
        b = h["bn_shift"] @ h["w"] + h["b"]
        return w, b
    w1, b1 = fold(h1)
    w2, b2 = fold(h2)
    return dict(w=(0.5 * (w1 + w2)).astype(jnp.bfloat16),
                b=(0.5 * (b1 + b2)).reshape(1, -1).astype(jnp.float32))


def prepare_params(params):
    return dict(
        cls_token=params["cls_token"],
        poss=params["poss"],
        patch_embed=_prep_linear_bn(params["patch_embed"]),
        attn0=_prep_attention(params["attn0"], 8, 2, 16),
        mlp0=_prep_mlp(params["mlp0"]),
        attn1=_prep_attention(params["attn1"], 8, 2, 16),
        mlp1=_prep_mlp(params["mlp1"]),
        sub=_prep_subsample(params["sub"], 8, 2, 16),
        ffn=_prep_mlp(params["ffn"]),
        attn2=_prep_attention(params["attn2"], 8, 2, 16),
        mlp2=_prep_mlp(params["mlp2"]),
        attn3=_prep_attention(params["attn3"], 8, 2, 16),
        mlp3=_prep_mlp(params["mlp3"]),
        head=_prep_head(params["head"], params["head_dist"]),
    )


# ----------------------------------------------------------------------------
# Evo-ViT glue (token sorting / merging bookkeeping stays in plain JAX)
# ----------------------------------------------------------------------------
def merge_tokens_jax(x_drop, score):
    weight = score / jnp.sum(score, axis=1, keepdims=True)
    return jnp.sum(weight[..., None] * x_drop, axis=1, keepdims=True)


def subsample_tokens(x, stride, resolution):
    B, _, C = x.shape
    x = x.reshape(B, resolution, resolution, C)[:, ::stride, ::stride]
    return x.reshape(B, -1, C)


def _update_global_attn(global_attn, cls_full, n_tokens):
    """Mirrors the Attention.forward global_attn bookkeeping (eval mode)."""
    if global_attn is None:                       # global_attn == 0 branch
        return cls_full[:, 1:]
    if global_attn.shape[1] - n_tokens + 2 == 1:
        cls_attn = cls_full[:, 1:]
        return (1.0 - TRADEOFF) * global_attn + TRADEOFF * cls_attn
    cls_attn = cls_full[:, 1:-1]
    upd = (1.0 - TRADEOFF) * global_attn[:, : n_tokens - 2] + TRADEOFF * cls_attn
    return jnp.concatenate([upd, global_attn[:, n_tokens - 2:]], axis=1)


def stage_module(x_, layers, global_attn, ori_indices, prune_ratio):
    """StageModule.forward (eval path); each layer = one fused Pallas kernel."""
    x = x_[:, 1:]
    B, N, C = x.shape
    N_ = int(N * prune_ratio)
    order = jnp.argsort(-global_attn, axis=1)     # descending
    cat = jnp.concatenate([x, global_attn[..., None], ori_indices[..., None]], axis=-1)
    cat = jnp.take_along_axis(cat, order[..., None], axis=1)
    x_sorted = cat[:, :, :-2]
    global_attn = cat[:, :, -2]
    ori_indices = cat[:, :, -1]
    x_ = jnp.concatenate([x_[:, :1], x_sorted], axis=1)

    x = x_[:, : N_ + 1]
    x_drop = x_[:, N_ + 1:]
    merge_weight = global_attn[:, N_:]
    add_token = merge_tokens_jax(x_drop, merge_weight)
    x = jnp.concatenate([x, add_token], axis=1)

    raw_total = jnp.zeros((B, 1, C), x.dtype)
    for attn_p, mlp_p in layers:
        n_cur = x.shape[1]
        x, cls_full, raw_last = fused_layer(x, attn_p, mlp_p)
        global_attn = _update_global_attn(global_attn, cls_full, n_cur)
        raw_total = raw_total + raw_last[:, None, :]
    x_drop = x_drop + raw_total
    x = x[:, :-1]
    x_ = jnp.concatenate([x, x_drop], axis=1)
    return x_, global_attn, ori_indices


def attention_subsample(x, sp, global_attn, ori_indices):
    """AttentionSubsample.forward (eval path)."""
    stride, resolution, resolution_ = 2, RESOLUTION0, RESOLUTION1

    old_scale = jnp.sum(global_attn, axis=1, keepdims=True)
    x_patch = x[:, 1:]
    order = jnp.argsort(ori_indices, axis=1)      # back to original spatial order
    cat = jnp.concatenate([x_patch, global_attn[..., None], ori_indices[..., None]], axis=-1)
    cat = jnp.take_along_axis(cat, order[..., None], axis=1)
    x_patch = cat[:, :, :-2]
    ga_oi = subsample_tokens(cat[:, :, -2:], stride, resolution)
    global_attn = ga_oi[:, :, 0]
    ori_indices = ga_oi[:, :, 1]

    x = jnp.concatenate([x[:, :1], x_patch], axis=1)
    x = x + sp["poss"]
    B, N, _ = x.shape
    xq = jnp.concatenate([x[:, :1], subsample_tokens(x[:, 1:], stride, resolution)], axis=1)
    Nq = resolution_ ** 2 + 1
    E1 = sp["pw"].shape[-1]

    out, cls_full = pl.pallas_call(
        _attn_sub_kernel,
        out_shape=[jax.ShapeDtypeStruct((B, Nq, E1), jnp.float32),
                   jax.ShapeDtypeStruct((B, N), jnp.float32)],
        in_specs=[_VMEM] * 10,
        out_specs=[_VMEM] * 2,
    )(x, xq, sp["wq"], sp["bq"], sp["wk"], sp["bk"], sp["wv"], sp["bv"],
      sp["pw"], sp["pb"])

    cls_attn = cls_full[:, 1:]
    cls_attn = subsample_tokens(cls_attn[..., None], stride, resolution)[..., 0]
    global_attn = (1.0 - TRADEOFF) * global_attn + TRADEOFF * cls_attn
    new_scale = jnp.sum(global_attn, axis=1, keepdims=True)
    global_attn = global_attn * (old_scale / new_scale)
    return out, global_attn, ori_indices


# ----------------------------------------------------------------------------
# Full LeViT forward (stage_wise_prune=True, eval mode, distillation + clsc)
# ----------------------------------------------------------------------------
def levit_forward(kp, x_img):
    B, Cin, _, _ = x_img.shape
    pch = CFG["patch_size"]
    r = RESOLUTION0
    E0, _ = CFG["embed_dim"]

    # patch embed (Conv2d_BN k=stride=patch) via im2col + fused matmul+bias
    xp = x_img.reshape(B, Cin, r, pch, r, pch).transpose(0, 2, 4, 1, 3, 5)
    xp = xp.reshape(B * r * r, Cin * pch * pch)
    x = linear_bias(xp, kp["patch_embed"]).reshape(B, r * r, E0)

    ori_indices = jnp.broadcast_to(
        jnp.arange(r * r, dtype=jnp.float32)[None, :], (B, r * r))
    cls = jnp.broadcast_to(kp["cls_token"], (B, 1, E0))
    x = jnp.concatenate([cls, x], axis=1)
    x = x + kp["poss"]

    # ---- stage 0, layer 0 (prune_ratio == 1): fused attn+mlp layer ----
    n_cur = x.shape[1]
    x, cls_full, _ = fused_layer(x, kp["attn0"], kp["mlp0"])
    global_attn = _update_global_attn(None, cls_full, n_cur)

    # ---- stage 0 StageModule (layer 1, prune) ----
    x, global_attn, ori_indices = stage_module(
        x, [(kp["attn1"], kp["mlp1"])],
        global_attn, ori_indices, CFG["prune_ratio"][1][0])

    # ---- AttentionSubsample ----
    x, global_attn, ori_indices = attention_subsample(
        x, kp["sub"], global_attn, ori_indices)

    # ---- FFN after subsample (Residual, out_raw=False) ----
    x = mlp_residual(x, kp["ffn"])

    # ---- stage 1 StageModule (layers 2 & 3, prune) ----
    x, global_attn, ori_indices = stage_module(
        x, [(kp["attn2"], kp["mlp2"]), (kp["attn3"], kp["mlp3"])],
        global_attn, ori_indices, CFG["prune_ratio"][1][1])

    # ---- heads (eval: distillation + clsc -> averaged heads, fused kernel) ----
    return heads(x, kp["head"])


if __name__ == "__main__":
    params = init_params(0)
    kp = prepare_params(params)          # fold BN, split per head, cast bf16 (once)
    x = jax.random.normal(jax.random.PRNGKey(0), (2, 3, 16, 16), jnp.float32)
    fwd = jax.jit(levit_forward)
    out = fwd(kp, x)
    out = jax.block_until_ready(out)
    assert out.shape == (2, CFG["num_classes"])
    assert bool(jnp.all(jnp.isfinite(out)))
    print("KERNEL_OK")
</pallas_src>

<mosaic_0001>
module attributes {stable_mosaic.version = 11 : i64} {
  func.func @_linear_bias_kernel(%arg0: memref<32x48xf32, #tpu.memory_space<vmem>>, %arg1: memref<48x32xbf16, #tpu.memory_space<vmem>>, %arg2: memref<1x32xf32, #tpu.memory_space<vmem>>, %arg3: memref<32x32xf32, #tpu.memory_space<vmem>>) attributes {dimension_semantics = [], scalar_prefetch = 0 : i64, scratch_operands = 0 : i64, tpu.core_type = #tpu.core_type<tc>} {
    %c0 = arith.constant 0 : index
    %c0_0 = arith.constant 0 : index
    %0 = vector.load %arg0[%c0, %c0_0] : memref<32x48xf32, #tpu.memory_space<vmem>>, vector<32x48xf32>
    %c0_1 = arith.constant 0 : index
    %c0_2 = arith.constant 0 : index
    %1 = vector.load %arg1[%c0_1, %c0_2] : memref<48x32xbf16, #tpu.memory_space<vmem>>, vector<48x32xbf16>
    %2 = arith.truncf %0 : vector<32x48xf32> to vector<32x48xbf16>
    %cst = arith.constant dense<0.000000e+00> : vector<32x32xf32>
    %3 = tpu.matmul %2, %1, %cst {dimension_numbers = #tpu.dot_dimension_numbers<[1], [0], [0], [1], [0, 0, 1, 1], [], []>} : vector<32x48xbf16>, vector<48x32xbf16>, vector<32x32xf32> -> vector<32x32xf32>
    %c0_3 = arith.constant 0 : index
    %c0_4 = arith.constant 0 : index
    %4 = vector.load %arg2[%c0_3, %c0_4] : memref<1x32xf32, #tpu.memory_space<vmem>>, vector<1x32xf32>
    %5 = vector.broadcast %4 : vector<1x32xf32> to vector<32x32xf32>
    %6 = arith.addf %3, %5 : vector<32x32xf32>
    %c0_5 = arith.constant 0 : index
    %c0_6 = arith.constant 0 : index
    %7 = vector.load %arg3[%c0_5, %c0_6] : memref<32x32xf32, #tpu.memory_space<vmem>>, vector<32x32xf32>
    tpu.vector_store %arg3[%c0_5, %c0_6], %6 {strides = array<i32>} : memref<32x32xf32, #tpu.memory_space<vmem>>, vector<32x32xf32>,
    return
  }
}

module attributes {stable_mosaic.version = 11 : i64} {
  func.func @_layer_kernel(%arg0: memref<2x17x32xf32, #tpu.memory_space<vmem>>, %arg1: memref<2x32x8xbf16, #tpu.memory_space<vmem>>, %arg2: memref<2x1x8xf32, #tpu.memory_space<vmem>>, %arg3: memref<2x32x8xbf16, #tpu.memory_space<vmem>>, %arg4: memref<2x1x8xf32, #tpu.memory_space<vmem>>, %arg5: memref<2x32x16xbf16, #tpu.memory_space<vmem>>, %arg6: memref<2x1x16xf32, #tpu.memory_space<vmem>>, %arg7: memref<2x16x32xbf16, #tpu.memory_space<vmem>>, %arg8: memref<1x32xf32, #tpu.memory_space<vmem>>, %arg9: memref<32x64xbf16, #tpu.memory_space<vmem>>, %arg10: memref<1x64xf32, #tpu.memory_space<vmem>>, %arg11: memref<64x32xbf16, #tpu.memory_space<vmem>>, %arg12: memref<1x32xf32, #tpu.memory_space<vmem>>, %arg13: memref<2x17x32xf32, #tpu.memory_space<vmem>>, %arg14: memref<2x17xf32, #tpu.memory_space<vmem>>, %arg15: memref<2x32xf32, #tpu.memory_space<vmem>>) attributes {dimension_semantics = [], scalar_prefetch = 0 : i64, scratch_operands = 0 : i64, tpu.core_type = #tpu.core_type<tc>} {
    %c0 = arith.constant 0 : index
    %c0_0 = arith.constant 0 : index
    %c0_1 = arith.constant 0 : index
    %0 = vector.load %arg0[%c0, %c0_0, %c0_1] : memref<2x17x32xf32, #tpu.memory_space<vmem>>, vector<1x17x32xf32>
    %1 = vector.shape_cast %0 : vector<1x17x32xf32> to vector<17x32xf32>
    %2 = arith.truncf %1 : vector<17x32xf32> to vector<17x32xbf16>
    %c0_2 = arith.constant 0 : index
    %c0_3 = arith.constant 0 : index
    %c0_4 = arith.constant 0 : index
    %3 = vector.load %arg1[%c0_2, %c0_3, %c0_4] : memref<2x32x8xbf16, #tpu.memory_space<vmem>>, vector<1x32x8xbf16>
    %4 = vector.shape_cast %3 : vector<1x32x8xbf16> to vector<32x8xbf16>
    %cst = arith.constant dense<0.000000e+00> : vector<17x8xf32>
    %5 = tpu.matmul %2, %4, %cst {dimension_numbers = #tpu.dot_dimension_numbers<[1], [0], [0], [1], [0, 0, 1, 1], [], []>} : vector<17x32xbf16>, vector<32x8xbf16>, vector<17x8xf32> -> vector<17x8xf32>
    %c0_5 = arith.constant 0 : index
    %c0_6 = arith.constant 0 : index
    %c0_7 = arith.constant 0 : index
    %6 = vector.load %arg2[%c0_5, %c0_6, %c0_7] : memref<2x1x8xf32, #tpu.memory_space<vmem>>, vector<1x1x8xf32>
    %7 = vector.shape_cast %6 : vector<1x1x8xf32> to vector<1x8xf32>
    %8 = vector.broadcast %7 : vector<1x8xf32> to vector<17x8xf32>
    %9 = arith.addf %5, %8 : vector<17x8xf32>
    %c0_8 = arith.constant 0 : index
    %c0_9 = arith.constant 0 : index
    %c0_10 = arith.constant 0 : index
    %10 = vector.load %arg3[%c0_8, %c0_9, %c0_10] : memref<2x32x8xbf16, #tpu.memory_space<vmem>>, vector<1x32x8xbf16>
    %11 = vector.shape_cast %10 : vector<1x32x8xbf16> to vector<32x8xbf16>
    %cst_11 = arith.constant dense<0.000000e+00> : vector<17x8xf32>
    %12 = tpu.matmul %2, %11, %cst_11 {dimension_numbers = #tpu.dot_dimension_numbers<[1], [0], [0], [1], [0, 0, 1, 1], [], []>} : vector<17x32xbf16>, vector<32x8xbf16>, vector<17x8xf32> -> vector<17x8xf32>
    %c0_12 = arith.constant 0 : index
    %c0_13 = arith.constant 0 : index
    %c0_14 = arith.constant 0 : index
    %13 = vector.load %arg4[%c0_12, %c0_13, %c0_14] : memref<2x1x8xf32, #tpu.memory_space<vmem>>, vector<1x1x8xf32>
    %14 = vector.shape_cast %13 : vector<1x1x8xf32> to vector<1x8xf32>
    %15 = vector.broadcast %14 : vector<1x8xf32> to vector<17x8xf32>
    %16 = arith.addf %12, %15 : vector<17x8xf32>
    %c0_15 = arith.constant 0 : index
    %c0_16 = arith.constant 0 : index
    %c0_17 = arith.constant 0 : index
    %17 = vector.load %arg5[%c0_15, %c0_16, %c0_17] : memref<2x32x16xbf16, #tpu.memory_space<vmem>>, vector<1x32x16xbf16>
    %18 = vector.shape_cast %17 : vector<1x32x16xbf16> to vector<32x16xbf16>
    %cst_18 = arith.constant dense<0.000000e+00> : vector<17x16xf32>
    %19 = tpu.matmul %2, %18, %cst_18 {dimension_numbers = #tpu.dot_dimension_numbers<[1], [0], [0], [1], [0, 0, 1, 1], [], []>} : vector<17x32xbf16>, vector<32x16xbf16>, vector<17x16xf32> -> vector<17x16xf32>
    %c0_19 = arith.constant 0 : index
    %c0_20 = arith.constant 0 : index
    %c0_21 = arith.constant 0 : index
    %20 = vector.load %arg6[%c0_19, %c0_20, %c0_21] : memref<2x1x16xf32, #tpu.memory_space<vmem>>, vector<1x1x16xf32>
    %21 = vector.shape_cast %20 : vector<1x1x16xf32> to vector<1x16xf32>
    %22 = vector.broadcast %21 : vector<1x16xf32> to vector<17x16xf32>
    %23 = arith.addf %19, %22 : vector<17x16xf32>
    %24 = arith.truncf %9 : vector<17x8xf32> to vector<17x8xbf16>
    %25 = arith.truncf %16 : vector<17x8xf32> to vector<17x8xbf16>
    %cst_22 = arith.constant dense<0.000000e+00> : vector<17x17xf32>
    %26 = tpu.matmul %24, %25, %cst_22 {dimension_numbers = #tpu.dot_dimension_numbers<[1], [1], [0], [0], [0, 0, 1, 0], [], []>} : vector<17x8xbf16>, vector<17x8xbf16>, vector<17x17xf32> -> vector<17x17xf32>
    %cst_23 = arith.constant dense<0xFF800000> : vector<17xf32>
    %27 = vector.multi_reduction <maximumf>, %26, %cst_23 [1] : vector<17x17xf32> to vector<17xf32>
    %28 = vector.shape_cast %27 : vector<17xf32> to vector<17x1xf32>
    %29 = vector.broadcast %28 : vector<17x1xf32> to vector<17x17xf32>
    %30 = arith.subf %26, %29 : vector<17x17xf32>
    %31 = math.exp %30 : vector<17x17xf32>
    %cst_24 = arith.constant dense<0.000000e+00> : vector<17xf32>
    %32 = vector.multi_reduction <add>, %31, %cst_24 [1] : vector<17x17xf32> to vector<17xf32>
    %33 = vector.shape_cast %32 : vector<17xf32> to vector<17x1xf32>
    %34 = vector.broadcast %33 : vector<17x1xf32> to vector<17x17xf32>
    %35 = arith.divf %31, %34 : vector<17x17xf32>
    %36 = vector.extract_strided_slice %35 {offsets = [0, 0], sizes = [1, 17], strides = [1, 1]} : vector<17x17xf32> to vector<1x17xf32>
    %37 = arith.truncf %35 : vector<17x17xf32> to vector<17x17xbf16>
    %38 = arith.truncf %23 : vector<17x16xf32> to vector<17x16xbf16>
    %cst_25 = arith.constant dense<0.000000e+00> : vector<17x16xf32>
    %39 = tpu.matmul %37, %38, %cst_25 {dimension_numbers = #tpu.dot_dimension_numbers<[1], [0], [0], [1], [0, 0, 1, 1], [], []>} : vector<17x17xbf16>, vector<17x16xbf16>, vector<17x16xf32> -> vector<17x16xf32>
    %cst_26 = arith.constant 3.000000e+00 : f32
    %40 = vector.broadcast %cst_26 : f32 to vector<17x16xf32>
    %41 = arith.addf %39, %40 : vector<17x16xf32>
    %cst_27 = arith.constant 0.000000e+00 : f32
    %cst_28 = arith.constant 6.000000e+00 : f32
    %42 = vector.broadcast %cst_27 : f32 to vector<17x16xf32>
    %43 = arith.maximumf %42, %41 : vector<17x16xf32>
    %44 = vector.broadcast %cst_28 : f32 to vector<17x16xf32>
    %45 = arith.minimumf %44, %43 : vector<17x16xf32>
    %46 = arith.mulf %39, %45 : vector<17x16xf32>
    %cst_29 = arith.constant 0.166666672 : f32
    %47 = vector.broadcast %cst_29 : f32 to vector<17x16xf32>
    %48 = arith.mulf %46, %47 : vector<17x16xf32>
    %c0_30 = arith.constant 0 : index
    %c0_31 = arith.constant 0 : index
    %c0_32 = arith.constant 0 : index
    %49 = vector.load %arg7[%c0_30, %c0_31, %c0_32] : memref<2x16x32xbf16, #tpu.memory_space<vmem>>, vector<1x16x32xbf16>
    %50 = vector.shape_cast %49 : vector<1x16x32xbf16> to vector<16x32xbf16>
    %51 = arith.truncf %48 : vector<17x16xf32> to vector<17x16xbf16>
    %cst_33 = arith.constant dense<0.000000e+00> : vector<17x32xf32>
    %52 = tpu.matmul %51, %50, %cst_33 {dimension_numbers = #tpu.dot_dimension_numbers<[1], [0], [0], [1], [0, 0, 1, 1], [], []>} : vector<17x16xbf16>, vector<16x32xbf16>, vector<17x32xf32> -> vector<17x32xf32>
    %c1 = arith.constant 1 : index
    %c0_34 = arith.constant 0 : index
    %c0_35 = arith.constant 0 : index
    %53 = vector.load %arg1[%c1, %c0_34, %c0_35] : memref<2x32x8xbf16, #tpu.memory_space<vmem>>, vector<1x32x8xbf16>
    %54 = vector.shape_cast %53 : vector<1x32x8xbf16> to vector<32x8xbf16>
    %cst_36 = arith.constant dense<0.000000e+00> : vector<17x8xf32>
    %55 = tpu.matmul %2, %54, %cst_36 {dimension_numbers = #tpu.dot_dimension_numbers<[1], [0], [0], [1], [0, 0, 1, 1], [], []>} : vector<17x32xbf16>, vector<32x8xbf16>, vector<17x8xf32> -> vector<17x8xf32>
    %c1_37 = arith.constant 1 : index
    %c0_38 = arith.constant 0 : index
    %c0_39 = arith.constant 0 : index
    %56 = vector.load %arg2[%c1_37, %c0_38, %c0_39] : memref<2x1x8xf32, #tpu.memory_space<vmem>>, vector<1x1x8xf32>
    %57 = vector.shape_cast %56 : vector<1x1x8xf32> to vector<1x8xf32>
    %58 = vector.broadcast %57 : vector<1x8xf32> to vector<17x8xf32>
    %59 = arith.addf %55, %58 : vector<17x8xf32>
    %c1_40 = arith.constant 1 : index
    %c0_41 = arith.constant 0 : index
    %c0_42 = arith.constant 0 : index
    %60 = vector.load %arg3[%c1_40, %c0_41, %c0_42] : memref<2x32x8xbf16, #tpu.memory_space<vmem>>, vector<1x32x8xbf16>
    %61 = vector.shape_cast %60 : vector<1x32x8xbf16> to vector<32x8xbf16>
    %cst_43 = arith.constant dense<0.000000e+00> : vector<17x8xf32>
    %62 = tpu.matmul %2, %61, %cst_43 {dimension_numbers = #tpu.dot_dimension_numbers<[1], [0], [0], [1], [0, 0, 1, 1], [], []>} : vector<17x32xbf16>, vector<32x8xbf16>, vector<17x8xf32> -> vector<17x8xf32>
    %c1_44 = arith.constant 1 : index
    %c0_45 = arith.constant 0 : index
    %c0_46 = arith.constant 0 : index
    %63 = vector.load %arg4[%c1_44, %c0_45, %c0_46] : memref<2x1x8xf32, #tpu.memory_space<vmem>>, vector<1x1x8xf32>
    %64 = vector.shape_cast %63 : vector<1x1x8xf32> to vector<1x8xf32>
    %65 = vector.broadcast %64 : vector<1x8xf32> to vector<17x8xf32>
    %66 = arith.addf %62, %65 : vector<17x8xf32>
    %c1_47 = arith.constant 1 : index
    %c0_48 = arith.constant 0 : index
    %c0_49 = arith.constant 0 : index
    %67 = vector.load %arg5[%c1_47, %c0_48, %c0_49] : memref<2x32x16xbf16, #tpu.memory_space<vmem>>, vector<1x32x16xbf16>
    %68 = vector.shape_cast %67 : vector<1x32x16xbf16> to vector<32x16xbf16>
    %cst_50 = arith.constant dense<0.000000e+00> : vector<17x16xf32>
    %69 = tpu.matmul %2, %68, %cst_50 {dimension_numbers = #tpu.dot_dimension_numbers<[1], [0], [0], [1], [0, 0, 1, 1], [], []>} : vector<17x32xbf16>, vector<32x16xbf16>, vector<17x16xf32> -> vector<17x16xf32>
    %c1_51 = arith.constant 1 : index
    %c0_52 = arith.constant 0 : index
    %c0_53 = arith.constant 0 : index
    %70 = vector.load %arg6[%c1_51, %c0_52, %c0_53] : memref<2x1x16xf32, #tpu.memory_space<vmem>>, vector<1x1x16xf32>
    %71 = vector.shape_cast %70 : vector<1x1x16xf32> to vector<1x16xf32>
    %72 = vector.broadcast %71 : vector<1x16xf32> to vector<17x16xf32>
    %73 = arith.addf %69, %72 : vector<17x16xf32>
    %74 = arith.truncf %59 : vector<17x8xf32> to vector<17x8xbf16>
    %75 = arith.truncf %66 : vector<17x8xf32> to vector<17x8xbf16>
    %cst_54 = arith.constant dense<0.000000e+00> : vector<17x17xf32>
    %76 = tpu.matmul %74, %75, %cst_54 {dimension_numbers = #tpu.dot_dimension_numbers<[1], [1], [0], [0], [0, 0, 1, 0], [], []>} : vector<17x8xbf16>, vector<17x8xbf16>, vector<17x17xf32> -> vector<17x17xf32>
    %cst_55 = arith.constant dense<0xFF800000> : vector<17xf32>
    %77 = vector.multi_reduction <maximumf>, %76, %cst_55 [1] : vector<17x17xf32> to vector<17xf32>
    %78 = vector.shape_cast %77 : vector<17xf32> to vector<17x1xf32>
    %79 = vector.broadcast %78 : vector<17x1xf32> to vector<17x17xf32>
    %80 = arith.subf %76, %79 : vector<17x17xf32>
    %81 = math.exp %80 : vector<17x17xf32>
    %cst_56 = arith.constant dense<0.000000e+00> : vector<17xf32>
    %82 = vector.multi_reduction <add>, %81, %cst_56 [1] : vector<17x17xf32> to vector<17xf32>
    %83 = vector.shape_cast %82 : vector<17xf32> to vector<17x1xf32>
    %84 = vector.broadcast %83 : vector<17x1xf32> to vector<17x17xf32>
    %85 = arith.divf %81, %84 : vector<17x17xf32>
    %86 = vector.extract_strided_slice %85 {offsets = [0, 0], sizes = [1, 17], strides = [1, 1]} : vector<17x17xf32> to vector<1x17xf32>
    %87 = arith.addf %36, %86 : vector<1x17xf32>
    %88 = arith.truncf %85 : vector<17x17xf32> to vector<17x17xbf16>
    %89 = arith.truncf %73 : vector<17x16xf32> to vector<17x16xbf16>
    %cst_57 = arith.constant dense<0.000000e+00> : vector<17x16xf32>
    %90 = tpu.matmul %88, %89, %cst_57 {dimension_numbers = #tpu.dot_dimension_numbers<[1], [0], [0], [1], [0, 0, 1, 1], [], []>} : vector<17x17xbf16>, vector<17x16xbf16>, vector<17x16xf32> -> vector<17x16xf32>
    %cst_58 = arith.constant 3.000000e+00 : f32
    %91 = vector.broadcast %cst_58 : f32 to vector<17x16xf32>
    %92 = arith.addf %90, %91 : vector<17x16xf32>
    %cst_59 = arith.constant 0.000000e+00 : f32
    %cst_60 = arith.constant 6.000000e+00 : f32
    %93 = vector.broadcast %cst_59 : f32 to vector<17x16xf32>
    %94 = arith.maximumf %93, %92 : vector<17x16xf32>
    %95 = vector.broadcast %cst_60 : f32 to vector<17x16xf32>
    %96 = arith.minimumf %95, %94 : vector<17x16xf32>
    %97 = arith.mulf %90, %96 : vector<17x16xf32>
    %cst_61 = arith.constant 0.166666672 : f32
    %98 = vector.broadcast %cst_61 : f32 to vector<17x16xf32>
    %99 = arith.mulf %97, %98 : vector<17x16xf32>
    %c1_62 = arith.constant 1 : index
    %c0_63 = arith.constant 0 : index
    %c0_64 = arith.constant 0 : index
    %100 = vector.load %arg7[%c1_62, %c0_63, %c0_64] : memref<2x16x32xbf16, #tpu.memory_space<vmem>>, vector<1x16x32xbf16>
    %101 = vector.shape_cast %100 : vector<1x16x32xbf16> to vector<16x32xbf16>
    %102 = arith.truncf %99 : vector<17x16xf32> to vector<17x16xbf16>
    %cst_65 = arith.constant dense<0.000000e+00> : vector<17x32xf32>
    %103 = tpu.matmul %102, %101, %cst_65 {dimension_numbers = #tpu.dot_dimension_numbers<[1], [0], [0], [1], [0, 0, 1, 1], [], []>} : vector<17x16xbf16>, vector<16x32xbf16>, vector<17x32xf32> -> vector<17x32xf32>
    %104 = arith.addf %52, %103 : vector<17x32xf32>
    %c0_66 = arith.constant 0 : index
    %c0_67 = arith.constant 0 : index
    %105 = vector.load %arg8[%c0_66, %c0_67] : memref<1x32xf32, #tpu.memory_space<vmem>>, vector<1x32xf32>
    %106 = vector.broadcast %105 : vector<1x32xf32> to vector<17x32xf32>
    %107 = arith.addf %104, %106 : vector<17x32xf32>
    %cst_68 = arith.constant 5.000000e-01 : f32
    %108 = vector.broadcast %cst_68 : f32 to vector<1x17xf32>
    %109 = arith.mulf %87, %108 : vector<1x17xf32>
    %c0_69 = arith.constant 0 : index
    %c0_70 = arith.constant 0 : index
    %110 = vector.load %arg14[%c0_69, %c0_70] : memref<2x17xf32, #tpu.memory_space<vmem>>, vector<1x17xf32>
    tpu.vector_store %arg14[%c0_69, %c0_70], %109 {strides = array<i32>} : memref<2x17xf32, #tpu.memory_space<vmem>>, vector<1x17xf32>,
    %111 = arith.addf %1, %107 : vector<17x32xf32>
    %c0_71 = arith.constant 0 : index
    %c0_72 = arith.constant 0 : index
    %112 = vector.load %arg9[%c0_71, %c0_72] : memref<32x64xbf16, #tpu.memory_space<vmem>>, vector<32x64xbf16>
    %113 = arith.truncf %111 : vector<17x32xf32> to vector<17x32xbf16>
    %cst_73 = arith.constant dense<0.000000e+00> : vector<17x64xf32>
    %114 = tpu.matmul %113, %112, %cst_73 {dimension_numbers = #tpu.dot_dimension_numbers<[1], [0], [0], [1], [0, 0, 1, 1], [], []>} : vector<17x32xbf16>, vector<32x64xbf16>, vector<17x64xf32> -> vector<17x64xf32>
    %c0_74 = arith.constant 0 : index
    %c0_75 = arith.constant 0 : index
    %115 = vector.load %arg10[%c0_74, %c0_75] : memref<1x64xf32, #tpu.memory_space<vmem>>, vector<1x64xf32>
    %116 = vector.broadcast %115 : vector<1x64xf32> to vector<17x64xf32>
    %117 = arith.addf %114, %116 : vector<17x64xf32>
    %cst_76 = arith.constant 3.000000e+00 : f32
    %118 = vector.broadcast %cst_76 : f32 to vector<17x64xf32>
    %119 = arith.addf %117, %118 : vector<17x64xf32>
    %cst_77 = arith.constant 0.000000e+00 : f32
    %cst_78 = arith.constant 6.000000e+00 : f32
    %120 = vector.broadcast %cst_77 : f32 to vector<17x64xf32>
    %121 = arith.maximumf %120, %119 : vector<17x64xf32>
    %122 = vector.broadcast %cst_78 : f32 to vector<17x64xf32>
    %123 = arith.minimumf %122, %121 : vector<17x64xf32>
    %124 = arith.mulf %117, %123 : vector<17x64xf32>
    %cst_79 = arith.constant 0.166666672 : f32
    %125 = vector.broadcast %cst_79 : f32 to vector<17x64xf32>
    %126 = arith.mulf %124, %125 : vector<17x64xf32>
    %c0_80 = arith.constant 0 : index
    %c0_81 = arith.constant 0 : index
    %127 = vector.load %arg11[%c0_80, %c0_81] : memref<64x32xbf16, #tpu.memory_space<vmem>>, vector<64x32xbf16>
    %128 = arith.truncf %126 : vector<17x64xf32> to vector<17x64xbf16>
    %cst_82 = arith.constant dense<0.000000e+00> : vector<17x32xf32>
    %129 = tpu.matmul %128, %127, %cst_82 {dimension_numbers = #tpu.dot_dimension_numbers<[1], [0], [0], [1], [0, 0, 1, 1], [], []>} : vector<17x64xbf16>, vector<64x32xbf16>, vector<17x32xf32> -> vector<17x32xf32>
    %c0_83 = arith.constant 0 : index
    %c0_84 = arith.constant 0 : index
    %130 = vector.load %arg12[%c0_83, %c0_84] : memref<1x32xf32, #tpu.memory_space<vmem>>, vector<1x32xf32>
    %131 = vector.broadcast %130 : vector<1x32xf32> to vector<17x32xf32>
    %132 = arith.addf %129, %131 : vector<17x32xf32>
    %133 = arith.addf %111, %132 : vector<17x32xf32>
    %c0_85 = arith.constant 0 : index
    %c0_86 = arith.constant 0 : index
    %c0_87 = arith.constant 0 : index
    %134 = vector.load %arg13[%c0_85, %c0_86, %c0_87] : memref<2x17x32xf32, #tpu.memory_space<vmem>>, vector<1x17x32xf32>
    %135 = vector.shape_cast %134 : vector<1x17x32xf32> to vector<17x32xf32>
    %136 = vector.shape_cast %133 : vector<17x32xf32> to vector<1x17x32xf32>
    tpu.vector_store %arg13[%c0_85, %c0_86, %c0_87], %136 {strides = array<i32>} : memref<2x17x32xf32, #tpu.memory_space<vmem>>, vector<1x17x32xf32>,
    %137 = vector.extract_strided_slice %107 {offsets = [16, 0], sizes = [1, 32], strides = [1, 1]} : vector<17x32xf32> to vector<1x32xf32>
    %138 = vector.extract_strided_slice %132 {offsets = [16, 0], sizes = [1, 32], strides = [1, 1]} : vector<17x32xf32> to vector<1x32xf32>
    %139 = arith.addf %137, %138 : vector<1x32xf32>
    %c0_88 = arith.constant 0 : index
    %c0_89 = arith.constant 0 : index
    %140 = vector.load %arg15[%c0_88, %c0_89] : memref<2x32xf32, #tpu.memory_space<vmem>>, vector<1x32xf32>
    tpu.vector_store %arg15[%c0_88, %c0_89], %139 {strides = array<i32>} : memref<2x32xf32, #tpu.memory_space<vmem>>, vector<1x32xf32>,
    %c1_90 = arith.constant 1 : index
    %c0_91 = arith.constant 0 : index
    %c0_92 = arith.constant 0 : index
    %141 = vector.load %arg0[%c1_90, %c0_91, %c0_92] : memref<2x17x32xf32, #tpu.memory_space<vmem>>, vector<1x17x32xf32>
    %142 = vector.shape_cast %141 : vector<1x17x32xf32> to vector<17x32xf32>
    %143 = arith.truncf %142 : vector<17x32xf32> to vector<17x32xbf16>
    %c0_93 = arith.constant 0 : index
    %c0_94 = arith.constant 0 : index
    %c0_95 = arith.constant 0 : index
    %144 = vector.load %arg1[%c0_93, %c0_94, %c0_95] : memref<2x32x8xbf16, #tpu.memory_space<vmem>>, vector<1x32x8xbf16>
    %145 = vector.shape_cast %144 : vector<1x32x8xbf16> to vector<32x8xbf16>
    %cst_96 = arith.constant dense<0.000000e+00> : vector<17x8xf32>
    %146 = tpu.matmul %143, %145, %cst_96 {dimension_numbers = #tpu.dot_dimension_numbers<[1], [0], [0], [1], [0, 0, 1, 1], [], []>} : vector<17x32xbf16>, vector<32x8xbf16>, vector<17x8xf32> -> vector<17x8xf32>
    %c0_97 = arith.constant 0 : index
    %c0_98 = arith.constant 0 : index
    %c0_99 = arith.constant 0 : index
    %147 = vector.load %arg2[%c0_97, %c0_98, %c0_99] : memref<2x1x8xf32, #tpu.memory_space<vmem>>, vector<1x1x8xf32>
    %148 = vector.shape_cast %147 : vector<1x1x8xf32> to vector<1x8xf32>
    %149 = vector.broadcast %148 : vector<1x8xf32> to vector<17x8xf32>
    %150 = arith.addf %146, %149 : vector<17x8xf32>
    %c0_100 = arith.constant 0 : index
    %c0_101 = arith.constant 0 : index
    %c0_102 = arith.constant 0 : index
    %151 = vector.load %arg3[%c0_100, %c0_101, %c0_102] : memref<2x32x8xbf16, #tpu.memory_space<vmem>>, vector<1x32x8xbf16>
    %152 = vector.shape_cast %151 : vector<1x32x8xbf16> to vector<32x8xbf16>
    %cst_103 = arith.constant dense<0.000000e+00> : vector<17x8xf32>
    %153 = tpu.matmul %143, %152, %cst_103 {dimension_numbers = #tpu.dot_dimension_numbers<[1], [0], [0], [1], [0, 0, 1, 1], [], []>} : vector<17x32xbf16>, vector<32x8xbf16>, vector<17x8xf32> -> vector<17x8xf32>
    %c0_104 = arith.constant 0 : index
    %c0_105 = arith.constant 0 : index
    %c0_106 = arith.constant 0 : index
    %154 = vector.load %arg4[%c0_104, %c0_105, %c0_106] : memref<2x1x8xf32, #tpu.memory_space<vmem>>, vector<1x1x8xf32>
    %155 = vector.shape_cast %154 : vector<1x1x8xf32> to vector<1x8xf32>
    %156 = vector.broadcast %155 : vector<1x8xf32> to vector<17x8xf32>
    %157 = arith.addf %153, %156 : vector<17x8xf32>
    %c0_107 = arith.constant 0 : index
    %c0_108 = arith.constant 0 : index
    %c0_109 = arith.constant 0 : index
    %158 = vector.load %arg5[%c0_107, %c0_108, %c0_109] : memref<2x32x16xbf16, #tpu.memory_space<vmem>>, vector<1x32x16xbf16>
    %159 = vector.shape_cast %158 : vector<1x32x16xbf16> to vector<32x16xbf16>
    %cst_110 = arith.constant dense<0.000000e+00> : vector<17x16xf32>
    %160 = tpu.matmul %143, %159, %cst_110 {dimension_numbers = #tpu.dot_dimension_numbers<[1], [0], [0], [1], [0, 0, 1, 1], [], []>} : vector<17x32xbf16>, vector<32x16xbf16>, vector<17x16xf32> -> vector<17x16xf32>
    %c0_111 = arith.constant 0 : index
    %c0_112 = arith.constant 0 : index
    %c0_113 = arith.constant 0 : index
    %161 = vector.load %arg6[%c0_111, %c0_112, %c0_113] : memref<2x1x16xf32, #tpu.memory_space<vmem>>, vector<1x1x16xf32>
    %162 = vector.shape_cast %161 : vector<1x1x16xf32> to vector<1x16xf32>
    %163 = vector.broadcast %162 : vector<1x16xf32> to vector<17x16xf32>
    %164 = arith.addf %160, %163 : vector<17x16xf32>
    %165 = arith.truncf %150 : vector<17x8xf32> to vector<17x8xbf16>
    %166 = arith.truncf %157 : vector<17x8xf32> to vector<17x8xbf16>
    %cst_114 = arith.constant dense<0.000000e+00> : vector<17x17xf32>
    %167 = tpu.matmul %165, %166, %cst_114 {dimension_numbers = #tpu.dot_dimension_numbers<[1], [1], [0], [0], [0, 0, 1, 0], [], []>} : vector<17x8xbf16>, vector<17x8xbf16>, vector<17x17xf32> -> vector<17x17xf32>
    %cst_115 = arith.constant dense<0xFF800000> : vector<17xf32>
    %168 = vector.multi_reduction <maximumf>, %167, %cst_115 [1] : vector<17x17xf32> to vector<17xf32>
    %169 = vector.shape_cast %168 : vector<17xf32> to vector<17x1xf32>
    %170 = vector.broadcast %169 : vector<17x1xf32> to vector<17x17xf32>
    %171 = arith.subf %167, %170 : vector<17x17xf32>
    %172 = math.exp %171 : vector<17x17xf32>
    %cst_116 = arith.constant dense<0.000000e+00> : vector<17xf32>
    %173 = vector.multi_reduction <add>, %172, %cst_116 [1] : vector<17x17xf32> to vector<17xf32>
    %174 = vector.shape_cast %173 : vector<17xf32> to vector<17x1xf32>
    %175 = vector.broadcast %174 : vector<17x1xf32> to vector<17x17xf32>
    %176 = arith.divf %172, %175 : vector<17x17xf32>
    %177 = vector.extract_strided_slice %176 {offsets = [0, 0], sizes = [1, 17], strides = [1, 1]} : vector<17x17xf32> to vector<1x17xf32>
    %178 = arith.truncf %176 : vector<17x17xf32> to vector<17x17xbf16>
    %179 = arith.truncf %164 : vector<17x16xf32> to vector<17x16xbf16>
    %cst_117 = arith.constant dense<0.000000e+00> : vector<17x16xf32>
    %180 = tpu.matmul %178, %179, %cst_117 {dimension_numbers = #tpu.dot_dimension_numbers<[1], [0], [0], [1], [0, 0, 1, 1], [], []>} : vector<17x17xbf16>, vector<17x16xbf16>, vector<17x16xf32> -> vector<17x16xf32>
    %cst_118 = arith.constant 3.000000e+00 : f32
    %181 = vector.broadcast %cst_118 : f32 to vector<17x16xf32>
    %182 = arith.addf %180, %181 : vector<17x16xf32>
    %cst_119 = arith.constant 0.000000e+00 : f32
    %cst_120 = arith.constant 6.000000e+00 : f32
    %183 = vector.broadcast %cst_119 : f32 to vector<17x16xf32>
    %184 = arith.maximumf %183, %182 : vector<17x16xf32>
    %185 = vector.broadcast %cst_120 : f32 to vector<17x16xf32>
    %186 = arith.minimumf %185, %184 : vector<17x16xf32>
    %187 = arith.mulf %180, %186 : vector<17x16xf32>
    %cst_121 = arith.constant 0.166666672 : f32
    %188 = vector.broadcast %cst_121 : f32 to vector<17x16xf32>
    %189 = arith.mulf %187, %188 : vector<17x16xf32>
    %c0_122 = arith.constant 0 : index
    %c0_123 = arith.constant 0 : index
    %c0_124 = arith.constant 0 : index
    %190 = vector.load %arg7[%c0_122, %c0_123, %c0_124] : memref<2x16x32xbf16, #tpu.memory_space<vmem>>, vector<1x16x32xbf16>
    %191 = vector.shape_cast %190 : vector<1x16x32xbf16> to vector<16x32xbf16>
    %192 = arith.truncf %189 : vector<17x16xf32> to vector<17x16xbf16>
    %cst_125 = arith.constant dense<0.000000e+00> : vector<17x32xf32>
    %193 = tpu.matmul %192, %191, %cst_125 {dimension_numbers = #tpu.dot_dimension_numbers<[1], [0], [0], [1], [0, 0, 1, 1], [], []>} : vector<17x16xbf16>, vector<16x32xbf16>, vector<17x32xf32> -> vector<17x32xf32>
    %c1_126 = arith.constant 1 : index
    %c0_127 = arith.constant 0 : index
    %c0_128 = arith.constant 0 : index
    %194 = vector.load %arg1[%c1_126, %c0_127, %c0_128] : memref<2x32x8xbf16, #tpu.memory_space<vmem>>, vector<1x32x8xbf16>
    %195 = vector.shape_cast %194 : vector<1x32x8xbf16> to vector<32x8xbf16>
    %cst_129 = arith.constant dense<0.000000e+00> : vector<17x8xf32>
    %196 = tpu.matmul %143, %195, %cst_129 {dimension_numbers = #tpu.dot_dimension_numbers<[1], [0], [0], [1], [0, 0, 1, 1], [], []>} : vector<17x32xbf16>, vector<32x8xbf16>, vector<17x8xf32> -> vector<17x8xf32>
    %c1_130 = arith.constant 1 : index
    %c0_131 = arith.constant 0 : index
    %c0_132 = arith.constant 0 : index
    %197 = vector.load %arg2[%c1_130, %c0_131, %c0_132] : memref<2x1x8xf32, #tpu.memory_space<vmem>>, vector<1x1x8xf32>
    %198 = vector.shape_cast %197 : vector<1x1x8xf32> to vector<1x8xf32>
    %199 = vector.broadcast %198 : vector<1x8xf32> to vector<17x8xf32>
    %200 = arith.addf %196, %199 : vector<17x8xf32>
    %c1_133 = arith.constant 1 : index
    %c0_134 = arith.constant 0 : index
    %c0_135 = arith.constant 0 : index
    %201 = vector.load %arg3[%c1_133, %c0_134, %c0_135] : memref<2x32x8xbf16, #tpu.memory_space<vmem>>, vector<1x32x8xbf16>
    %202 = vector.shape_cast %201 : vector<1x32x8xbf16> to vector<32x8xbf16>
    %cst_136 = arith.constant dense<0.000000e+00> : vector<17x8xf32>
    %203 = tpu.matmul %143, %202, %cst_136 {dimension_numbers = #tpu.dot_dimension_numbers<[1], [0], [0], [1], [0, 0, 1, 1], [], []>} : vector<17x32xbf16>, vector<32x8xbf16>, vector<17x8xf32> -> vector<17x8xf32>
    %c1_137 = arith.constant 1 : index
    %c0_138 = arith.constant 0 : index
    %c0_139 = arith.constant 0 : index
    %204 = vector.load %arg4[%c1_137, %c0_138, %c0_139] : memref<2x1x8xf32, #tpu.memory_space<vmem>>, vector<1x1x8xf32>
    %205 = vector.shape_cast %204 : vector<1x1x8xf32> to vector<1x8xf32>
    %206 = vector.broadcast %205 : vector<1x8xf32> to vector<17x8xf32>
    %207 = arith.addf %203, %206 : vector<17x8xf32>
    %c1_140 = arith.constant 1 : index
    %c0_141 = arith.constant 0 : index
    %c0_142 = arith.constant 0 : index
    %208 = vector.load %arg5[%c1_140, %c0_141, %c0_142] : memref<2x32x16xbf16, #tpu.memory_space<vmem>>, vector<1x32x16xbf16>
    %209 = vector.shape_cast %208 : vector<1x32x16xbf16> to vector<32x16xbf16>
    %cst_143 = arith.constant dense<0.000000e+00> : vector<17x16xf32>
    %210 = tpu.matmul %143, %209, %cst_143 {dimension_numbers = #tpu.dot_dimension_numbers<[1], [0], [0], [1], [0, 0, 1, 1], [], []>} : vector<17x32xbf16>, vector<32x16xbf16>, vector<17x16xf32> -> vector<17x16xf32>
    %c1_144 = arith.constant 1 : index
    %c0_145 = arith.constant 0 : index
    %c0_146 = arith.constant 0 : index
    %211 = vector.load %arg6[%c1_144, %c0_145, %c0_146] : memref<2x1x16xf32, #tpu.memory_space<vmem>>, vector<1x1x16xf32>
    %212 = vector.shape_cast %211 : vector<1x1x16xf32> to vector<1x16xf32>
    %213 = vector.broadcast %212 : vector<1x16xf32> to vector<17x16xf32>
    %214 = arith.addf %210, %213 : vector<17x16xf32>
    %215 = arith.truncf %200 : vector<17x8xf32> to vector<17x8xbf16>
    %216 = arith.truncf %207 : vector<17x8xf32> to vector<17x8xbf16>
    %cst_147 = arith.constant dense<0.000000e+00> : vector<17x17xf32>
    %217 = tpu.matmul %215, %216, %cst_147 {dimension_numbers = #tpu.dot_dimension_numbers<[1], [1], [0], [0], [0, 0, 1, 0], [], []>} : vector<17x8xbf16>, vector<17x8xbf16>, vector<17x17xf32> -> vector<17x17xf32>
    %cst_148 = arith.constant dense<0xFF800000> : vector<17xf32>
    %218 = vector.multi_reduction <maximumf>, %217, %cst_148 [1] : vector<17x17xf32> to vector<17xf32>
    %219 = vector.shape_cast %218 : vector<17xf32> to vector<17x1xf32>
    %220 = vector.broadcast %219 : vector<17x1xf32> to vector<17x17xf32>
    %221 = arith.subf %217, %220 : vector<17x17xf32>
    %222 = math.exp %221 : vector<17x17xf32>
    %cst_149 = arith.constant dense<0.000000e+00> : vector<17xf32>
    %223 = vector.multi_reduction <add>, %222, %cst_149 [1] : vector<17x17xf32> to vector<17xf32>
    %224 = vector.shape_cast %223 : vector<17xf32> to vector<17x1xf32>
    %225 = vector.broadcast %224 : vector<17x1xf32> to vector<17x17xf32>
    %226 = arith.divf %222, %225 : vector<17x17xf32>
    %227 = vector.extract_strided_slice %226 {offsets = [0, 0], sizes = [1, 17], strides = [1, 1]} : vector<17x17xf32> to vector<1x17xf32>
    %228 = arith.addf %177, %227 : vector<1x17xf32>
    %229 = arith.truncf %226 : vector<17x17xf32> to vector<17x17xbf16>
    %230 = arith.truncf %214 : vector<17x16xf32> to vector<17x16xbf16>
    %cst_150 = arith.constant dense<0.000000e+00> : vector<17x16xf32>
    %231 = tpu.matmul %229, %230, %cst_150 {dimension_numbers = #tpu.dot_dimension_numbers<[1], [0], [0], [1], [0, 0, 1, 1], [], []>} : vector<17x17xbf16>, vector<17x16xbf16>, vector<17x16xf32> -> vector<17x16xf32>
    %cst_151 = arith.constant 3.000000e+00 : f32
    %232 = vector.broadcast %cst_151 : f32 to vector<17x16xf32>
    %233 = arith.addf %231, %232 : vector<17x16xf32>
    %cst_152 = arith.constant 0.000000e+00 : f32
    %cst_153 = arith.constant 6.000000e+00 : f32
    %234 = vector.broadcast %cst_152 : f32 to vector<17x16xf32>
    %235 = arith.maximumf %234, %233 : vector<17x16xf32>
    %236 = vector.broadcast %cst_153 : f32 to vector<17x16xf32>
    %237 = arith.minimumf %236, %235 : vector<17x16xf32>
    %238 = arith.mulf %231, %237 : vector<17x16xf32>
    %cst_154 = arith.constant 0.166666672 : f32
    %239 = vector.broadcast %cst_154 : f32 to vector<17x16xf32>
    %240 = arith.mulf %238, %239 : vector<17x16xf32>
    %c1_155 = arith.constant 1 : index
    %c0_156 = arith.constant 0 : index
    %c0_157 = arith.constant 0 : index
    %241 = vector.load %arg7[%c1_155, %c0_156, %c0_157] : memref<2x16x32xbf16, #tpu.memory_space<vmem>>, vector<1x16x32xbf16>
    %242 = vector.shape_cast %241 : vector<1x16x32xbf16> to vector<16x32xbf16>
    %243 = arith.truncf %240 : vector<17x16xf32> to vector<17x16xbf16>
    %cst_158 = arith.constant dense<0.000000e+00> : vector<17x32xf32>
    %244 = tpu.matmul %243, %242, %cst_158 {dimension_numbers = #tpu.dot_dimension_numbers<[1], [0], [0], [1], [0, 0, 1, 1], [], []>} : vector<17x16xbf16>, vector<16x32xbf16>, vector<17x32xf32> -> vector<17x32xf32>
    %245 = arith.addf %193, %244 : vector<17x32xf32>
    %c0_159 = arith.constant 0 : index
    %c0_160 = arith.constant 0 : index
    %246 = vector.load %arg8[%c0_159, %c0_160] : memref<1x32xf32, #tpu.memory_space<vmem>>, vector<1x32xf32>
    %247 = vector.broadcast %246 : vector<1x32xf32> to vector<17x32xf32>
    %248 = arith.addf %245, %247 : vector<17x32xf32>
    %cst_161 = arith.constant 5.000000e-01 : f32
    %249 = vector.broadcast %cst_161 : f32 to vector<1x17xf32>
    %250 = arith.mulf %228, %249 : vector<1x17xf32>
    %c1_162 = arith.constant 1 : index
    %c0_163 = arith.constant 0 : index
    %251 = vector.load %arg14[%c1_162, %c0_163] : memref<2x17xf32, #tpu.memory_space<vmem>>, vector<1x17xf32>
    tpu.vector_store %arg14[%c1_162, %c0_163], %250 {strides = array<i32>} : memref<2x17xf32, #tpu.memory_space<vmem>>, vector<1x17xf32>,
    %252 = arith.addf %142, %248 : vector<17x32xf32>
    %c0_164 = arith.constant 0 : index
    %c0_165 = arith.constant 0 : index
    %253 = vector.load %arg9[%c0_164, %c0_165] : memref<32x64xbf16, #tpu.memory_space<vmem>>, vector<32x64xbf16>
    %254 = arith.truncf %252 : vector<17x32xf32> to vector<17x32xbf16>
    %cst_166 = arith.constant dense<0.000000e+00> : vector<17x64xf32>
    %255 = tpu.matmul %254, %253, %cst_166 {dimension_numbers = #tpu.dot_dimension_numbers<[1], [0], [0], [1], [0, 0, 1, 1], [], []>} : vector<17x32xbf16>, vector<32x64xbf16>, vector<17x64xf32> -> vector<17x64xf32>
    %c0_167 = arith.constant 0 : index
    %c0_168 = arith.constant 0 : index
    %256 = vector.load %arg10[%c0_167, %c0_168] : memref<1x64xf32, #tpu.memory_space<vmem>>, vector<1x64xf32>
    %257 = vector.broadcast %256 : vector<1x64xf32> to vector<17x64xf32>
    %258 = arith.addf %255, %257 : vector<17x64xf32>
    %cst_169 = arith.constant 3.000000e+00 : f32
    %259 = vector.broadcast %cst_169 : f32 to vector<17x64xf32>
    %260 = arith.addf %258, %259 : vector<17x64xf32>
    %cst_170 = arith.constant 0.000000e+00 : f32
    %cst_171 = arith.constant 6.000000e+00 : f32
    %261 = vector.broadcast %cst_170 : f32 to vector<17x64xf32>
    %262 = arith.maximumf %261, %260 : vector<17x64xf32>
    %263 = vector.broadcast %cst_171 : f32 to vector<17x64xf32>
    %264 = arith.minimumf %263, %262 : vector<17x64xf32>
    %265 = arith.mulf %258, %264 : vector<17x64xf32>
    %cst_172 = arith.constant 0.166666672 : f32
    %266 = vector.broadcast %cst_172 : f32 to vector<17x64xf32>
    %267 = arith.mulf %265, %266 : vector<17x64xf32>
    %c0_173 = arith.constant 0 : index
    %c0_174 = arith.constant 0 : index
    %268 = vector.load %arg11[%c0_173, %c0_174] : memref<64x32xbf16, #tpu.memory_space<vmem>>, vector<64x32xbf16>
    %269 = arith.truncf %267 : vector<17x64xf32> to vector<17x64xbf16>
    %cst_175 = arith.constant dense<0.000000e+00> : vector<17x32xf32>
    %270 = tpu.matmul %269, %268, %cst_175 {dimension_numbers = #tpu.dot_dimension_numbers<[1], [0], [0], [1], [0, 0, 1, 1], [], []>} : vector<17x64xbf16>, vector<64x32xbf16>, vector<17x32xf32> -> vector<17x32xf32>
    %c0_176 = arith.constant 0 : index
    %c0_177 = arith.constant 0 : index
    %271 = vector.load %arg12[%c0_176, %c0_177] : memref<1x32xf32, #tpu.memory_space<vmem>>, vector<1x32xf32>
    %272 = vector.broadcast %271 : vector<1x32xf32> to vector<17x32xf32>
    %273 = arith.addf %270, %272 : vector<17x32xf32>
    %274 = arith.addf %252, %273 : vector<17x32xf32>
    %c1_178 = arith.constant 1 : index
    %c0_179 = arith.constant 0 : index
    %c0_180 = arith.constant 0 : index
    %275 = vector.load %arg13[%c1_178, %c0_179, %c0_180] : memref<2x17x32xf32, #tpu.memory_space<vmem>>, vector<1x17x32xf32>
    %276 = vector.shape_cast %275 : vector<1x17x32xf32> to vector<17x32xf32>
    %277 = vector.shape_cast %274 : vector<17x32xf32> to vector<1x17x32xf32>
    tpu.vector_store %arg13[%c1_178, %c0_179, %c0_180], %277 {strides = array<i32>} : memref<2x17x32xf32, #tpu.memory_space<vmem>>, vector<1x17x32xf32>,
    %278 = vector.extract_strided_slice %248 {offsets = [16, 0], sizes = [1, 32], strides = [1, 1]} : vector<17x32xf32> to vector<1x32xf32>
    %279 = vector.extract_strided_slice %273 {offsets = [16, 0], sizes = [1, 32], strides = [1, 1]} : vector<17x32xf32> to vector<1x32xf32>
    %280 = arith.addf %278, %279 : vector<1x32xf32>
    %c1_181 = arith.constant 1 : index
    %c0_182 = arith.constant 0 : index
    %281 = vector.load %arg15[%c1_181, %c0_182] : memref<2x32xf32, #tpu.memory_space<vmem>>, vector<1x32xf32>
    tpu.vector_store %arg15[%c1_181, %c0_182], %280 {strides = array<i32>} : memref<2x32xf32, #tpu.memory_space<vmem>>, vector<1x32xf32>,
    return
  }
}

module attributes {stable_mosaic.version = 11 : i64} {
  func.func @_layer_kernel(%arg0: memref<2x10x32xf32, #tpu.memory_space<vmem>>, %arg1: memref<2x32x8xbf16, #tpu.memory_space<vmem>>, %arg2: memref<2x1x8xf32, #tpu.memory_space<vmem>>, %arg3: memref<2x32x8xbf16, #tpu.memory_space<vmem>>, %arg4: memref<2x1x8xf32, #tpu.memory_space<vmem>>, %arg5: memref<2x32x16xbf16, #tpu.memory_space<vmem>>, %arg6: memref<2x1x16xf32, #tpu.memory_space<vmem>>, %arg7: memref<2x16x32xbf16, #tpu.memory_space<vmem>>, %arg8: memref<1x32xf32, #tpu.memory_space<vmem>>, %arg9: memref<32x64xbf16, #tpu.memory_space<vmem>>, %arg10: memref<1x64xf32, #tpu.memory_space<vmem>>, %arg11: memref<64x32xbf16, #tpu.memory_space<vmem>>, %arg12: memref<1x32xf32, #tpu.memory_space<vmem>>, %arg13: memref<2x10x32xf32, #tpu.memory_space<vmem>>, %arg14: memref<2x10xf32, #tpu.memory_space<vmem>>, %arg15: memref<2x32xf32, #tpu.memory_space<vmem>>) attributes {dimension_semantics = [], scalar_prefetch = 0 : i64, scratch_operands = 0 : i64, tpu.core_type = #tpu.core_type<tc>} {
    %c0 = arith.constant 0 : index
    %c0_0 = arith.constant 0 : index
    %c0_1 = arith.constant 0 : index
    %0 = vector.load %arg0[%c0, %c0_0, %c0_1] : memref<2x10x32xf32, #tpu.memory_space<vmem>>, vector<1x10x32xf32>
    %1 = vector.shape_cast %0 : vector<1x10x32xf32> to vector<10x32xf32>
    %2 = arith.truncf %1 : vector<10x32xf32> to vector<10x32xbf16>
    %c0_2 = arith.constant 0 : index
    %c0_3 = arith.constant 0 : index
    %c0_4 = arith.constant 0 : index
    %3 = vector.load %arg1[%c0_2, %c0_3, %c0_4] : memref<2x32x8xbf16, #tpu.memory_space<vmem>>, vector<1x32x8xbf16>
    %4 = vector.shape_cast %3 : vector<1x32x8xbf16> to vector<32x8xbf16>
    %cst = arith.constant dense<0.000000e+00> : vector<10x8xf32>
    %5 = tpu.matmul %2, %4, %cst {dimension_numbers = #tpu.dot_dimension_numbers<[1], [0], [0], [1], [0, 0, 1, 1], [], []>} : vector<10x32xbf16>, vector<32x8xbf16>, vector<10x8xf32> -> vector<10x8xf32>
    %c0_5 = arith.constant 0 : index
    %c0_6 = arith.constant 0 : index
    %c0_7 = arith.constant 0 : index
    %6 = vector.load %arg2[%c0_5, %c0_6, %c0_7] : memref<2x1x8xf32, #tpu.memory_space<vmem>>, vector<1x1x8xf32>
    %7 = vector.shape_cast %6 : vector<1x1x8xf32> to vector<1x8xf32>
    %8 = vector.broadcast %7 : vector<1x8xf32> to vector<10x8xf32>
    %9 = arith.addf %5, %8 : vector<10x8xf32>
    %c0_8 = arith.constant 0 : index
    %c0_9 = arith.constant 0 : index
    %c0_10 = arith.constant 0 : index
    %10 = vector.load %arg3[%c0_8, %c0_9, %c0_10] : memref<2x32x8xbf16, #tpu.memory_space<vmem>>, vector<1x32x8xbf16>
    %11 = vector.shape_cast %10 : vector<1x32x8xbf16> to vector<32x8xbf16>
    %cst_11 = arith.constant dense<0.000000e+00> : vector<10x8xf32>
    %12 = tpu.matmul %2, %11, %cst_11 {dimension_numbers = #tpu.dot_dimension_numbers<[1], [0], [0], [1], [0, 0, 1, 1], [], []>} : vector<10x32xbf16>, vector<32x8xbf16>, vector<10x8xf32> -> vector<10x8xf32>
    %c0_12 = arith.constant 0 : index
    %c0_13 = arith.constant 0 : index
    %c0_14 = arith.constant 0 : index
    %13 = vector.load %arg4[%c0_12, %c0_13, %c0_14] : memref<2x1x8xf32, #tpu.memory_space<vmem>>, vector<1x1x8xf32>
    %14 = vector.shape_cast %13 : vector<1x1x8xf32> to vector<1x8xf32>
    %15 = vector.broadcast %14 : vector<1x8xf32> to vector<10x8xf32>
    %16 = arith.addf %12, %15 : vector<10x8xf32>
    %c0_15 = arith.constant 0 : index
    %c0_16 = arith.constant 0 : index
    %c0_17 = arith.constant 0 : index
    %17 = vector.load %arg5[%c0_15, %c0_16, %c0_17] : memref<2x32x16xbf16, #tpu.memory_space<vmem>>, vector<1x32x16xbf16>
    %18 = vector.shape_cast %17 : vector<1x32x16xbf16> to vector<32x16xbf16>
    %cst_18 = arith.constant dense<0.000000e+00> : vector<10x16xf32>
    %19 = tpu.matmul %2, %18, %cst_18 {dimension_numbers = #tpu.dot_dimension_numbers<[1], [0], [0], [1], [0, 0, 1, 1], [], []>} : vector<10x32xbf16>, vector<32x16xbf16>, vector<10x16xf32> -> vector<10x16xf32>
    %c0_19 = arith.constant 0 : index
    %c0_20 = arith.constant 0 : index
    %c0_21 = arith.constant 0 : index
    %20 = vector.load %arg6[%c0_19, %c0_20, %c0_21] : memref<2x1x16xf32, #tpu.memory_space<vmem>>, vector<1x1x16xf32>
    %21 = vector.shape_cast %20 : vector<1x1x16xf32> to vector<1x16xf32>
    %22 = vector.broadcast %21 : vector<1x16xf32> to vector<10x16xf32>
    %23 = arith.addf %19, %22 : vector<10x16xf32>
    %24 = arith.truncf %9 : vector<10x8xf32> to vector<10x8xbf16>
    %25 = arith.truncf %16 : vector<10x8xf32> to vector<10x8xbf16>
    %cst_22 = arith.constant dense<0.000000e+00> : vector<10x10xf32>
    %26 = tpu.matmul %24, %25, %cst_22 {dimension_numbers = #tpu.dot_dimension_numbers<[1], [1], [0], [0], [0, 0, 1, 0], [], []>} : vector<10x8xbf16>, vector<10x8xbf16>, vector<10x10xf32> -> vector<10x10xf32>
    %cst_23 = arith.constant dense<0xFF800000> : vector<10xf32>
    %27 = vector.multi_reduction <maximumf>, %26, %cst_23 [1] : vector<10x10xf32> to vector<10xf32>
    %28 = vector.shape_cast %27 : vector<10xf32> to vector<10x1xf32>
    %29 = vector.broadcast %28 : vector<10x1xf32> to vector<10x10xf32>
    %30 = arith.subf %26, %29 : vector<10x10xf32>
    %31 = math.exp %30 : vector<10x10xf32>
    %cst_24 = arith.constant dense<0.000000e+00> : vector<10xf32>
    %32 = vector.multi_reduction <add>, %31, %cst_24 [1] : vector<10x10xf32> to vector<10xf32>
    %33 = vector.shape_cast %32 : vector<10xf32> to vector<10x1xf32>
    %34 = vector.broadcast %33 : vector<10x1xf32> to vector<10x10xf32>
    %35 = arith.divf %31, %34 : vector<10x10xf32>
    %36 = vector.extract_strided_slice %35 {offsets = [0, 0], sizes = [1, 10], strides = [1, 1]} : vector<10x10xf32> to vector<1x10xf32>
    %37 = arith.truncf %35 : vector<10x10xf32> to vector<10x10xbf16>
    %38 = arith.truncf %23 : vector<10x16xf32> to vector<10x16xbf16>
    %cst_25 = arith.constant dense<0.000000e+00> : vector<10x16xf32>
    %39 = tpu.matmul %37, %38, %cst_25 {dimension_numbers = #tpu.dot_dimension_numbers<[1], [0], [0], [1], [0, 0, 1, 1], [], []>} : vector<10x10xbf16>, vector<10x16xbf16>, vector<10x16xf32> -> vector<10x16xf32>
    %cst_26 = arith.constant 3.000000e+00 : f32
    %40 = vector.broadcast %cst_26 : f32 to vector<10x16xf32>
    %41 = arith.addf %39, %40 : vector<10x16xf32>
    %cst_27 = arith.constant 0.000000e+00 : f32
    %cst_28 = arith.constant 6.000000e+00 : f32
    %42 = vector.broadcast %cst_27 : f32 to vector<10x16xf32>
    %43 = arith.maximumf %42, %41 : vector<10x16xf32>
    %44 = vector.broadcast %cst_28 : f32 to vector<10x16xf32>
    %45 = arith.minimumf %44, %43 : vector<10x16xf32>
    %46 = arith.mulf %39, %45 : vector<10x16xf32>
    %cst_29 = arith.constant 0.166666672 : f32
    %47 = vector.broadcast %cst_29 : f32 to vector<10x16xf32>
    %48 = arith.mulf %46, %47 : vector<10x16xf32>
    %c0_30 = arith.constant 0 : index
    %c0_31 = arith.constant 0 : index
    %c0_32 = arith.constant 0 : index
    %49 = vector.load %arg7[%c0_30, %c0_31, %c0_32] : memref<2x16x32xbf16, #tpu.memory_space<vmem>>, vector<1x16x32xbf16>
    %50 = vector.shape_cast %49 : vector<1x16x32xbf16> to vector<16x32xbf16>
    %51 = arith.truncf %48 : vector<10x16xf32> to vector<10x16xbf16>
    %cst_33 = arith.constant dense<0.000000e+00> : vector<10x32xf32>
    %52 = tpu.matmul %51, %50, %cst_33 {dimension_numbers = #tpu.dot_dimension_numbers<[1], [0], [0], [1], [0, 0, 1, 1], [], []>} : vector<10x16xbf16>, vector<16x32xbf16>, vector<10x32xf32> -> vector<10x32xf32>
    %c1 = arith.constant 1 : index
    %c0_34 = arith.constant 0 : index
    %c0_35 = arith.constant 0 : index
    %53 = vector.load %arg1[%c1, %c0_34, %c0_35] : memref<2x32x8xbf16, #tpu.memory_space<vmem>>, vector<1x32x8xbf16>
    %54 = vector.shape_cast %53 : vector<1x32x8xbf16> to vector<32x8xbf16>
    %cst_36 = arith.constant dense<0.000000e+00> : vector<10x8xf32>
    %55 = tpu.matmul %2, %54, %cst_36 {dimension_numbers = #tpu.dot_dimension_numbers<[1], [0], [0], [1], [0, 0, 1, 1], [], []>} : vector<10x32xbf16>, vector<32x8xbf16>, vector<10x8xf32> -> vector<10x8xf32>
    %c1_37 = arith.constant 1 : index
    %c0_38 = arith.constant 0 : index
    %c0_39 = arith.constant 0 : index
    %56 = vector.load %arg2[%c1_37, %c0_38, %c0_39] : memref<2x1x8xf32, #tpu.memory_space<vmem>>, vector<1x1x8xf32>
    %57 = vector.shape_cast %56 : vector<1x1x8xf32> to vector<1x8xf32>
    %58 = vector.broadcast %57 : vector<1x8xf32> to vector<10x8xf32>
    %59 = arith.addf %55, %58 : vector<10x8xf32>
    %c1_40 = arith.constant 1 : index
    %c0_41 = arith.constant 0 : index
    %c0_42 = arith.constant 0 : index
    %60 = vector.load %arg3[%c1_40, %c0_41, %c0_42] : memref<2x32x8xbf16, #tpu.memory_space<vmem>>, vector<1x32x8xbf16>
    %61 = vector.shape_cast %60 : vector<1x32x8xbf16> to vector<32x8xbf16>
    %cst_43 = arith.constant dense<0.000000e+00> : vector<10x8xf32>
    %62 = tpu.matmul %2, %61, %cst_43 {dimension_numbers = #tpu.dot_dimension_numbers<[1], [0], [0], [1], [0, 0, 1, 1], [], []>} : vector<10x32xbf16>, vector<32x8xbf16>, vector<10x8xf32> -> vector<10x8xf32>
    %c1_44 = arith.constant 1 : index
    %c0_45 = arith.constant 0 : index
    %c0_46 = arith.constant 0 : index
    %63 = vector.load %arg4[%c1_44, %c0_45, %c0_46] : memref<2x1x8xf32, #tpu.memory_space<vmem>>, vector<1x1x8xf32>
    %64 = vector.shape_cast %63 : vector<1x1x8xf32> to vector<1x8xf32>
    %65 = vector.broadcast %64 : vector<1x8xf32> to vector<10x8xf32>
    %66 = arith.addf %62, %65 : vector<10x8xf32>
    %c1_47 = arith.constant 1 : index
    %c0_48 = arith.constant 0 : index
    %c0_49 = arith.constant 0 : index
    %67 = vector.load %arg5[%c1_47, %c0_48, %c0_49] : memref<2x32x16xbf16, #tpu.memory_space<vmem>>, vector<1x32x16xbf16>
    %68 = vector.shape_cast %67 : vector<1x32x16xbf16> to vector<32x16xbf16>
    %cst_50 = arith.constant dense<0.000000e+00> : vector<10x16xf32>
    %69 = tpu.matmul %2, %68, %cst_50 {dimension_numbers = #tpu.dot_dimension_numbers<[1], [0], [0], [1], [0, 0, 1, 1], [], []>} : vector<10x32xbf16>, vector<32x16xbf16>, vector<10x16xf32> -> vector<10x16xf32>
    %c1_51 = arith.constant 1 : index
    %c0_52 = arith.constant 0 : index
    %c0_53 = arith.constant 0 : index
    %70 = vector.load %arg6[%c1_51, %c0_52, %c0_53] : memref<2x1x16xf32, #tpu.memory_space<vmem>>, vector<1x1x16xf32>
    %71 = vector.shape_cast %70 : vector<1x1x16xf32> to vector<1x16xf32>
    %72 = vector.broadcast %71 : vector<1x16xf32> to vector<10x16xf32>
    %73 = arith.addf %69, %72 : vector<10x16xf32>
    %74 = arith.truncf %59 : vector<10x8xf32> to vector<10x8xbf16>
    %75 = arith.truncf %66 : vector<10x8xf32> to vector<10x8xbf16>
    %cst_54 = arith.constant dense<0.000000e+00> : vector<10x10xf32>
    %76 = tpu.matmul %74, %75, %cst_54 {dimension_numbers = #tpu.dot_dimension_numbers<[1], [1], [0], [0], [0, 0, 1, 0], [], []>} : vector<10x8xbf16>, vector<10x8xbf16>, vector<10x10xf32> -> vector<10x10xf32>
    %cst_55 = arith.constant dense<0xFF800000> : vector<10xf32>
    %77 = vector.multi_reduction <maximumf>, %76, %cst_55 [1] : vector<10x10xf32> to vector<10xf32>
    %78 = vector.shape_cast %77 : vector<10xf32> to vector<10x1xf32>
    %79 = vector.broadcast %78 : vector<10x1xf32> to vector<10x10xf32>
    %80 = arith.subf %76, %79 : vector<10x10xf32>
    %81 = math.exp %80 : vector<10x10xf32>
    %cst_56 = arith.constant dense<0.000000e+00> : vector<10xf32>
    %82 = vector.multi_reduction <add>, %81, %cst_56 [1] : vector<10x10xf32> to vector<10xf32>
    %83 = vector.shape_cast %82 : vector<10xf32> to vector<10x1xf32>
    %84 = vector.broadcast %83 : vector<10x1xf32> to vector<10x10xf32>
    %85 = arith.divf %81, %84 : vector<10x10xf32>
    %86 = vector.extract_strided_slice %85 {offsets = [0, 0], sizes = [1, 10], strides = [1, 1]} : vector<10x10xf32> to vector<1x10xf32>
    %87 = arith.addf %36, %86 : vector<1x10xf32>
    %88 = arith.truncf %85 : vector<10x10xf32> to vector<10x10xbf16>
    %89 = arith.truncf %73 : vector<10x16xf32> to vector<10x16xbf16>
    %cst_57 = arith.constant dense<0.000000e+00> : vector<10x16xf32>
    %90 = tpu.matmul %88, %89, %cst_57 {dimension_numbers = #tpu.dot_dimension_numbers<[1], [0], [0], [1], [0, 0, 1, 1], [], []>} : vector<10x10xbf16>, vector<10x16xbf16>, vector<10x16xf32> -> vector<10x16xf32>
    %cst_58 = arith.constant 3.000000e+00 : f32
    %91 = vector.broadcast %cst_58 : f32 to vector<10x16xf32>
    %92 = arith.addf %90, %91 : vector<10x16xf32>
    %cst_59 = arith.constant 0.000000e+00 : f32
    %cst_60 = arith.constant 6.000000e+00 : f32
    %93 = vector.broadcast %cst_59 : f32 to vector<10x16xf32>
    %94 = arith.maximumf %93, %92 : vector<10x16xf32>
    %95 = vector.broadcast %cst_60 : f32 to vector<10x16xf32>
    %96 = arith.minimumf %95, %94 : vector<10x16xf32>
    %97 = arith.mulf %90, %96 : vector<10x16xf32>
    %cst_61 = arith.constant 0.166666672 : f32
    %98 = vector.broadcast %cst_61 : f32 to vector<10x16xf32>
    %99 = arith.mulf %97, %98 : vector<10x16xf32>
    %c1_62 = arith.constant 1 : index
    %c0_63 = arith.constant 0 : index
    %c0_64 = arith.constant 0 : index
    %100 = vector.load %arg7[%c1_62, %c0_63, %c0_64] : memref<2x16x32xbf16, #tpu.memory_space<vmem>>, vector<1x16x32xbf16>
    %101 = vector.shape_cast %100 : vector<1x16x32xbf16> to vector<16x32xbf16>
    %102 = arith.truncf %99 : vector<10x16xf32> to vector<10x16xbf16>
    %cst_65 = arith.constant dense<0.000000e+00> : vector<10x32xf32>
    %103 = tpu.matmul %102, %101, %cst_65 {dimension_numbers = #tpu.dot_dimension_numbers<[1], [0], [0], [1], [0, 0, 1, 1], [], []>} : vector<10x16xbf16>, vector<16x32xbf16>, vector<10x32xf32> -> vector<10x32xf32>
    %104 = arith.addf %52, %103 : vector<10x32xf32>
    %c0_66 = arith.constant 0 : index
    %c0_67 = arith.constant 0 : index
    %105 = vector.load %arg8[%c0_66, %c0_67] : memref<1x32xf32, #tpu.memory_space<vmem>>, vector<1x32xf32>
    %106 = vector.broadcast %105 : vector<1x32xf32> to vector<10x32xf32>
    %107 = arith.addf %104, %106 : vector<10x32xf32>
    %cst_68 = arith.constant 5.000000e-01 : f32
    %108 = vector.broadcast %cst_68 : f32 to vector<1x10xf32>
    %109 = arith.mulf %87, %108 : vector<1x10xf32>
    %c0_69 = arith.constant 0 : index
    %c0_70 = arith.constant 0 : index
    %110 = vector.load %arg14[%c0_69, %c0_70] : memref<2x10xf32, #tpu.memory_space<vmem>>, vector<1x10xf32>
    tpu.vector_store %arg14[%c0_69, %c0_70], %109 {strides = array<i32>} : memref<2x10xf32, #tpu.memory_space<vmem>>, vector<1x10xf32>,
    %111 = arith.addf %1, %107 : vector<10x32xf32>
    %c0_71 = arith.constant 0 : index
    %c0_72 = arith.constant 0 : index
    %112 = vector.load %arg9[%c0_71, %c0_72] : memref<32x64xbf16, #tpu.memory_space<vmem>>, vector<32x64xbf16>
    %113 = arith.truncf %111 : vector<10x32xf32> to vector<10x32xbf16>
    %cst_73 = arith.constant dense<0.000000e+00> : vector<10x64xf32>
    %114 = tpu.matmul %113, %112, %cst_73 {dimension_numbers = #tpu.dot_dimension_numbers<[1], [0], [0], [1], [0, 0, 1, 1], [], []>} : vector<10x32xbf16>, vector<32x64xbf16>, vector<10x64xf32> -> vector<10x64xf32>
    %c0_74 = arith.constant 0 : index
    %c0_75 = arith.constant 0 : index
    %115 = vector.load %arg10[%c0_74, %c0_75] : memref<1x64xf32, #tpu.memory_space<vmem>>, vector<1x64xf32>
    %116 = vector.broadcast %115 : vector<1x64xf32> to vector<10x64xf32>
    %117 = arith.addf %114, %116 : vector<10x64xf32>
    %cst_76 = arith.constant 3.000000e+00 : f32
    %118 = vector.broadcast %cst_76 : f32 to vector<10x64xf32>
    %119 = arith.addf %117, %118 : vector<10x64xf32>
    %cst_77 = arith.constant 0.000000e+00 : f32
    %cst_78 = arith.constant 6.000000e+00 : f32
    %120 = vector.broadcast %cst_77 : f32 to vector<10x64xf32>
    %121 = arith.maximumf %120, %119 : vector<10x64xf32>
    %122 = vector.broadcast %cst_78 : f32 to vector<10x64xf32>
    %123 = arith.minimumf %122, %121 : vector<10x64xf32>
    %124 = arith.mulf %117, %123 : vector<10x64xf32>
    %cst_79 = arith.constant 0.166666672 : f32
    %125 = vector.broadcast %cst_79 : f32 to vector<10x64xf32>
    %126 = arith.mulf %124, %125 : vector<10x64xf32>
    %c0_80 = arith.constant 0 : index
    %c0_81 = arith.constant 0 : index
    %127 = vector.load %arg11[%c0_80, %c0_81] : memref<64x32xbf16, #tpu.memory_space<vmem>>, vector<64x32xbf16>
    %128 = arith.truncf %126 : vector<10x64xf32> to vector<10x64xbf16>
    %cst_82 = arith.constant dense<0.000000e+00> : vector<10x32xf32>
    %129 = tpu.matmul %128, %127, %cst_82 {dimension_numbers = #tpu.dot_dimension_numbers<[1], [0], [0], [1], [0, 0, 1, 1], [], []>} : vector<10x64xbf16>, vector<64x32xbf16>, vector<10x32xf32> -> vector<10x32xf32>
    %c0_83 = arith.constant 0 : index
    %c0_84 = arith.constant 0 : index
    %130 = vector.load %arg12[%c0_83, %c0_84] : memref<1x32xf32, #tpu.memory_space<vmem>>, vector<1x32xf32>
    %131 = vector.broadcast %130 : vector<1x32xf32> to vector<10x32xf32>
    %132 = arith.addf %129, %131 : vector<10x32xf32>
    %133 = arith.addf %111, %132 : vector<10x32xf32>
    %c0_85 = arith.constant 0 : index
    %c0_86 = arith.constant 0 : index
    %c0_87 = arith.constant 0 : index
    %134 = vector.load %arg13[%c0_85, %c0_86, %c0_87] : memref<2x10x32xf32, #tpu.memory_space<vmem>>, vector<1x10x32xf32>
    %135 = vector.shape_cast %134 : vector<1x10x32xf32> to vector<10x32xf32>
    %136 = vector.shape_cast %133 : vector<10x32xf32> to vector<1x10x32xf32>
    tpu.vector_store %arg13[%c0_85, %c0_86, %c0_87], %136 {strides = array<i32>} : memref<2x10x32xf32, #tpu.memory_space<vmem>>, vector<1x10x32xf32>,
    %137 = vector.extract_strided_slice %107 {offsets = [9, 0], sizes = [1, 32], strides = [1, 1]} : vector<10x32xf32> to vector<1x32xf32>
    %138 = vector.extract_strided_slice %132 {offsets = [9, 0], sizes = [1, 32], strides = [1, 1]} : vector<10x32xf32> to vector<1x32xf32>
    %139 = arith.addf %137, %138 : vector<1x32xf32>
    %c0_88 = arith.constant 0 : index
    %c0_89 = arith.constant 0 : index
    %140 = vector.load %arg15[%c0_88, %c0_89] : memref<2x32xf32, #tpu.memory_space<vmem>>, vector<1x32xf32>
    tpu.vector_store %arg15[%c0_88, %c0_89], %139 {strides = array<i32>} : memref<2x32xf32, #tpu.memory_space<vmem>>, vector<1x32xf32>,
    %c1_90 = arith.constant 1 : index
    %c0_91 = arith.constant 0 : index
    %c0_92 = arith.constant 0 : index
    %141 = vector.load %arg0[%c1_90, %c0_91, %c0_92] : memref<2x10x32xf32, #tpu.memory_space<vmem>>, vector<1x10x32xf32>
    %142 = vector.shape_cast %141 : vector<1x10x32xf32> to vector<10x32xf32>
    %143 = arith.truncf %142 : vector<10x32xf32> to vector<10x32xbf16>
    %c0_93 = arith.constant 0 : index
    %c0_94 = arith.constant 0 : index
    %c0_95 = arith.constant 0 : index
    %144 = vector.load %arg1[%c0_93, %c0_94, %c0_95] : memref<2x32x8xbf16, #tpu.memory_space<vmem>>, vector<1x32x8xbf16>
    %145 = vector.shape_cast %144 : vector<1x32x8xbf16> to vector<32x8xbf16>
    %cst_96 = arith.constant dense<0.000000e+00> : vector<10x8xf32>
    %146 = tpu.matmul %143, %145, %cst_96 {dimension_numbers = #tpu.dot_dimension_numbers<[1], [0], [0], [1], [0, 0, 1, 1], [], []>} : vector<10x32xbf16>, vector<32x8xbf16>, vector<10x8xf32> -> vector<10x8xf32>
    %c0_97 = arith.constant 0 : index
    %c0_98 = arith.constant 0 : index
    %c0_99 = arith.constant 0 : index
    %147 = vector.load %arg2[%c0_97, %c0_98, %c0_99] : memref<2x1x8xf32, #tpu.memory_space<vmem>>, vector<1x1x8xf32>
    %148 = vector.shape_cast %147 : vector<1x1x8xf32> to vector<1x8xf32>
    %149 = vector.broadcast %148 : vector<1x8xf32> to vector<10x8xf32>
    %150 = arith.addf %146, %149 : vector<10x8xf32>
    %c0_100 = arith.constant 0 : index
    %c0_101 = arith.constant 0 : index
    %c0_102 = arith.constant 0 : index
    %151 = vector.load %arg3[%c0_100, %c0_101, %c0_102] : memref<2x32x8xbf16, #tpu.memory_space<vmem>>, vector<1x32x8xbf16>
    %152 = vector.shape_cast %151 : vector<1x32x8xbf16> to vector<32x8xbf16>
    %cst_103 = arith.constant dense<0.000000e+00> : vector<10x8xf32>
    %153 = tpu.matmul %143, %152, %cst_103 {dimension_numbers = #tpu.dot_dimension_numbers<[1], [0], [0], [1], [0, 0, 1, 1], [], []>} : vector<10x32xbf16>, vector<32x8xbf16>, vector<10x8xf32> -> vector<10x8xf32>
    %c0_104 = arith.constant 0 : index
    %c0_105 = arith.constant 0 : index
    %c0_106 = arith.constant 0 : index
    %154 = vector.load %arg4[%c0_104, %c0_105, %c0_106] : memref<2x1x8xf32, #tpu.memory_space<vmem>>, vector<1x1x8xf32>
    %155 = vector.shape_cast %154 : vector<1x1x8xf32> to vector<1x8xf32>
    %156 = vector.broadcast %155 : vector<1x8xf32> to vector<10x8xf32>
    %157 = arith.addf %153, %156 : vector<10x8xf32>
    %c0_107 = arith.constant 0 : index
    %c0_108 = arith.constant 0 : index
    %c0_109 = arith.constant 0 : index
    %158 = vector.load %arg5[%c0_107, %c0_108, %c0_109] : memref<2x32x16xbf16, #tpu.memory_space<vmem>>, vector<1x32x16xbf16>
    %159 = vector.shape_cast %158 : vector<1x32x16xbf16> to vector<32x16xbf16>
    %cst_110 = arith.constant dense<0.000000e+00> : vector<10x16xf32>
    %160 = tpu.matmul %143, %159, %cst_110 {dimension_numbers = #tpu.dot_dimension_numbers<[1], [0], [0], [1], [0, 0, 1, 1], [], []>} : vector<10x32xbf16>, vector<32x16xbf16>, vector<10x16xf32> -> vector<10x16xf32>
    %c0_111 = arith.constant 0 : index
    %c0_112 = arith.constant 0 : index
    %c0_113 = arith.constant 0 : index
    %161 = vector.load %arg6[%c0_111, %c0_112, %c0_113] : memref<2x1x16xf32, #tpu.memory_space<vmem>>, vector<1x1x16xf32>
    %162 = vector.shape_cast %161 : vector<1x1x16xf32> to vector<1x16xf32>
    %163 = vector.broadcast %162 : vector<1x16xf32> to vector<10x16xf32>
    %164 = arith.addf %160, %163 : vector<10x16xf32>
    %165 = arith.truncf %150 : vector<10x8xf32> to vector<10x8xbf16>
    %166 = arith.truncf %157 : vector<10x8xf32> to vector<10x8xbf16>
    %cst_114 = arith.constant dense<0.000000e+00> : vector<10x10xf32>
    %167 = tpu.matmul %165, %166, %cst_114 {dimension_numbers = #tpu.dot_dimension_numbers<[1], [1], [0], [0], [0, 0, 1, 0], [], []>} : vector<10x8xbf16>, vector<10x8xbf16>, vector<10x10xf32> -> vector<10x10xf32>
    %cst_115 = arith.constant dense<0xFF800000> : vector<10xf32>
    %168 = vector.multi_reduction <maximumf>, %167, %cst_115 [1] : vector<10x10xf32> to vector<10xf32>
    %169 = vector.shape_cast %168 : vector<10xf32> to vector<10x1xf32>
    %170 = vector.broadcast %169 : vector<10x1xf32> to vector<10x10xf32>
    %171 = arith.subf %167, %170 : vector<10x10xf32>
    %172 = math.exp %171 : vector<10x10xf32>
    %cst_116 = arith.constant dense<0.000000e+00> : vector<10xf32>
    %173 = vector.multi_reduction <add>, %172, %cst_116 [1] : vector<10x10xf32> to vector<10xf32>
    %174 = vector.shape_cast %173 : vector<10xf32> to vector<10x1xf32>
    %175 = vector.broadcast %174 : vector<10x1xf32> to vector<10x10xf32>
    %176 = arith.divf %172, %175 : vector<10x10xf32>
    %177 = vector.extract_strided_slice %176 {offsets = [0, 0], sizes = [1, 10], strides = [1, 1]} : vector<10x10xf32> to vector<1x10xf32>
    %178 = arith.truncf %176 : vector<10x10xf32> to vector<10x10xbf16>
    %179 = arith.truncf %164 : vector<10x16xf32> to vector<10x16xbf16>
    %cst_117 = arith.constant dense<0.000000e+00> : vector<10x16xf32>
    %180 = tpu.matmul %178, %179, %cst_117 {dimension_numbers = #tpu.dot_dimension_numbers<[1], [0], [0], [1], [0, 0, 1, 1], [], []>} : vector<10x10xbf16>, vector<10x16xbf16>, vector<10x16xf32> -> vector<10x16xf32>
    %cst_118 = arith.constant 3.000000e+00 : f32
    %181 = vector.broadcast %cst_118 : f32 to vector<10x16xf32>
    %182 = arith.addf %180, %181 : vector<10x16xf32>
    %cst_119 = arith.constant 0.000000e+00 : f32
    %cst_120 = arith.constant 6.000000e+00 : f32
    %183 = vector.broadcast %cst_119 : f32 to vector<10x16xf32>
    %184 = arith.maximumf %183, %182 : vector<10x16xf32>
    %185 = vector.broadcast %cst_120 : f32 to vector<10x16xf32>
    %186 = arith.minimumf %185, %184 : vector<10x16xf32>
    %187 = arith.mulf %180, %186 : vector<10x16xf32>
    %cst_121 = arith.constant 0.166666672 : f32
    %188 = vector.broadcast %cst_121 : f32 to vector<10x16xf32>
    %189 = arith.mulf %187, %188 : vector<10x16xf32>
    %c0_122 = arith.constant 0 : index
    %c0_123 = arith.constant 0 : index
    %c0_124 = arith.constant 0 : index
    %190 = vector.load %arg7[%c0_122, %c0_123, %c0_124] : memref<2x16x32xbf16, #tpu.memory_space<vmem>>, vector<1x16x32xbf16>
    %191 = vector.shape_cast %190 : vector<1x16x32xbf16> to vector<16x32xbf16>
    %192 = arith.truncf %189 : vector<10x16xf32> to vector<10x16xbf16>
    %cst_125 = arith.constant dense<0.000000e+00> : vector<10x32xf32>
    %193 = tpu.matmul %192, %191, %cst_125 {dimension_numbers = #tpu.dot_dimension_numbers<[1], [0], [0], [1], [0, 0, 1, 1], [], []>} : vector<10x16xbf16>, vector<16x32xbf16>, vector<10x32xf32> -> vector<10x32xf32>
    %c1_126 = arith.constant 1 : index
    %c0_127 = arith.constant 0 : index
    %c0_128 = arith.constant 0 : index
    %194 = vector.load %arg1[%c1_126, %c0_127, %c0_128] : memref<2x32x8xbf16, #tpu.memory_space<vmem>>, vector<1x32x8xbf16>
    %195 = vector.shape_cast %194 : vector<1x32x8xbf16> to vector<32x8xbf16>
    %cst_129 = arith.constant dense<0.000000e+00> : vector<10x8xf32>
    %196 = tpu.matmul %143, %195, %cst_129 {dimension_numbers = #tpu.dot_dimension_numbers<[1], [0], [0], [1], [0, 0, 1, 1], [], []>} : vector<10x32xbf16>, vector<32x8xbf16>, vector<10x8xf32> -> vector<10x8xf32>
    %c1_130 = arith.constant 1 : index
    %c0_131 = arith.constant 0 : index
    %c0_132 = arith.constant 0 : index
    %197 = vector.load %arg2[%c1_130, %c0_131, %c0_132] : memref<2x1x8xf32, #tpu.memory_space<vmem>>, vector<1x1x8xf32>
    %198 = vector.shape_cast %197 : vector<1x1x8xf32> to vector<1x8xf32>
    %199 = vector.broadcast %198 : vector<1x8xf32> to vector<10x8xf32>
    %200 = arith.addf %196, %199 : vector<10x8xf32>
    %c1_133 = arith.constant 1 : index
    %c0_134 = arith.constant 0 : index
    %c0_135 = arith.constant 0 : index
    %201 = vector.load %arg3[%c1_133, %c0_134, %c0_135] : memref<2x32x8xbf16, #tpu.memory_space<vmem>>, vector<1x32x8xbf16>
    %202 = vector.shape_cast %201 : vector<1x32x8xbf16> to vector<32x8xbf16>
    %cst_136 = arith.constant dense<0.000000e+00> : vector<10x8xf32>
    %203 = tpu.matmul %143, %202, %cst_136 {dimension_numbers = #tpu.dot_dimension_numbers<[1], [0], [0], [1], [0, 0, 1, 1], [], []>} : vector<10x32xbf16>, vector<32x8xbf16>, vector<10x8xf32> -> vector<10x8xf32>
    %c1_137 = arith.constant 1 : index
    %c0_138 = arith.constant 0 : index
    %c0_139 = arith.constant 0 : index
    %204 = vector.load %arg4[%c1_137, %c0_138, %c0_139] : memref<2x1x8xf32, #tpu.memory_space<vmem>>, vector<1x1x8xf32>
    %205 = vector.shape_cast %204 : vector<1x1x8xf32> to vector<1x8xf32>
    %206 = vector.broadcast %205 : vector<1x8xf32> to vector<10x8xf32>
    %207 = arith.addf %203, %206 : vector<10x8xf32>
    %c1_140 = arith.constant 1 : index
    %c0_141 = arith.constant 0 : index
    %c0_142 = arith.constant 0 : index
    %208 = vector.load %arg5[%c1_140, %c0_141, %c0_142] : memref<2x32x16xbf16, #tpu.memory_space<vmem>>, vector<1x32x16xbf16>
    %209 = vector.shape_cast %208 : vector<1x32x16xbf16> to vector<32x16xbf16>
    %cst_143 = arith.constant dense<0.000000e+00> : vector<10x16xf32>
    %210 = tpu.matmul %143, %209, %cst_143 {dimension_numbers = #tpu.dot_dimension_numbers<[1], [0], [0], [1], [0, 0, 1, 1], [], []>} : vector<10x32xbf16>, vector<32x16xbf16>, vector<10x16xf32> -> vector<10x16xf32>
    %c1_144 = arith.constant 1 : index
    %c0_145 = arith.constant 0 : index
    %c0_146 = arith.constant 0 : index
    %211 = vector.load %arg6[%c1_144, %c0_145, %c0_146] : memref<2x1x16xf32, #tpu.memory_space<vmem>>, vector<1x1x16xf32>
    %212 = vector.shape_cast %211 : vector<1x1x16xf32> to vector<1x16xf32>
    %213 = vector.broadcast %212 : vector<1x16xf32> to vector<10x16xf32>
    %214 = arith.addf %210, %213 : vector<10x16xf32>
    %215 = arith.truncf %200 : vector<10x8xf32> to vector<10x8xbf16>
    %216 = arith.truncf %207 : vector<10x8xf32> to vector<10x8xbf16>
    %cst_147 = arith.constant dense<0.000000e+00> : vector<10x10xf32>
    %217 = tpu.matmul %215, %216, %cst_147 {dimension_numbers = #tpu.dot_dimension_numbers<[1], [1], [0], [0], [0, 0, 1, 0], [], []>} : vector<10x8xbf16>, vector<10x8xbf16>, vector<10x10xf32> -> vector<10x10xf32>
    %cst_148 = arith.constant dense<0xFF800000> : vector<10xf32>
    %218 = vector.multi_reduction <maximumf>, %217, %cst_148 [1] : vector<10x10xf32> to vector<10xf32>
    %219 = vector.shape_cast %218 : vector<10xf32> to vector<10x1xf32>
    %220 = vector.broadcast %219 : vector<10x1xf32> to vector<10x10xf32>
    %221 = arith.subf %217, %220 : vector<10x10xf32>
    %222 = math.exp %221 : vector<10x10xf32>
    %cst_149 = arith.constant dense<0.000000e+00> : vector<10xf32>
    %223 = vector.multi_reduction <add>, %222, %cst_149 [1] : vector<10x10xf32> to vector<10xf32>
    %224 = vector.shape_cast %223 : vector<10xf32> to vector<10x1xf32>
    %225 = vector.broadcast %224 : vector<10x1xf32> to vector<10x10xf32>
    %226 = arith.divf %222, %225 : vector<10x10xf32>
    %227 = vector.extract_strided_slice %226 {offsets = [0, 0], sizes = [1, 10], strides = [1, 1]} : vector<10x10xf32> to vector<1x10xf32>
    %228 = arith.addf %177, %227 : vector<1x10xf32>
    %229 = arith.truncf %226 : vector<10x10xf32> to vector<10x10xbf16>
    %230 = arith.truncf %214 : vector<10x16xf32> to vector<10x16xbf16>
    %cst_150 = arith.constant dense<0.000000e+00> : vector<10x16xf32>
    %231 = tpu.matmul %229, %230, %cst_150 {dimension_numbers = #tpu.dot_dimension_numbers<[1], [0], [0], [1], [0, 0, 1, 1], [], []>} : vector<10x10xbf16>, vector<10x16xbf16>, vector<10x16xf32> -> vector<10x16xf32>
    %cst_151 = arith.constant 3.000000e+00 : f32
    %232 = vector.broadcast %cst_151 : f32 to vector<10x16xf32>
    %233 = arith.addf %231, %232 : vector<10x16xf32>
    %cst_152 = arith.constant 0.000000e+00 : f32
    %cst_153 = arith.constant 6.000000e+00 : f32
    %234 = vector.broadcast %cst_152 : f32 to vector<10x16xf32>
    %235 = arith.maximumf %234, %233 : vector<10x16xf32>
    %236 = vector.broadcast %cst_153 : f32 to vector<10x16xf32>
    %237 = arith.minimumf %236, %235 : vector<10x16xf32>
    %238 = arith.mulf %231, %237 : vector<10x16xf32>
    %cst_154 = arith.constant 0.166666672 : f32
    %239 = vector.broadcast %cst_154 : f32 to vector<10x16xf32>
    %240 = arith.mulf %238, %239 : vector<10x16xf32>
    %c1_155 = arith.constant 1 : index
    %c0_156 = arith.constant 0 : index
    %c0_157 = arith.constant 0 : index
    %241 = vector.load %arg7[%c1_155, %c0_156, %c0_157] : memref<2x16x32xbf16, #tpu.memory_space<vmem>>, vector<1x16x32xbf16>
    %242 = vector.shape_cast %241 : vector<1x16x32xbf16> to vector<16x32xbf16>
    %243 = arith.truncf %240 : vector<10x16xf32> to vector<10x16xbf16>
    %cst_158 = arith.constant dense<0.000000e+00> : vector<10x32xf32>
    %244 = tpu.matmul %243, %242, %cst_158 {dimension_numbers = #tpu.dot_dimension_numbers<[1], [0], [0], [1], [0, 0, 1, 1], [], []>} : vector<10x16xbf16>, vector<16x32xbf16>, vector<10x32xf32> -> vector<10x32xf32>
    %245 = arith.addf %193, %244 : vector<10x32xf32>
    %c0_159 = arith.constant 0 : index
    %c0_160 = arith.constant 0 : index
    %246 = vector.load %arg8[%c0_159, %c0_160] : memref<1x32xf32, #tpu.memory_space<vmem>>, vector<1x32xf32>
    %247 = vector.broadcast %246 : vector<1x32xf32> to vector<10x32xf32>
    %248 = arith.addf %245, %247 : vector<10x32xf32>
    %cst_161 = arith.constant 5.000000e-01 : f32
    %249 = vector.broadcast %cst_161 : f32 to vector<1x10xf32>
    %250 = arith.mulf %228, %249 : vector<1x10xf32>
    %c1_162 = arith.constant 1 : index
    %c0_163 = arith.constant 0 : index
    %251 = vector.load %arg14[%c1_162, %c0_163] : memref<2x10xf32, #tpu.memory_space<vmem>>, vector<1x10xf32>
    tpu.vector_store %arg14[%c1_162, %c0_163], %250 {strides = array<i32>} : memref<2x10xf32, #tpu.memory_space<vmem>>, vector<1x10xf32>,
    %252 = arith.addf %142, %248 : vector<10x32xf32>
    %c0_164 = arith.constant 0 : index
    %c0_165 = arith.constant 0 : index
    %253 = vector.load %arg9[%c0_164, %c0_165] : memref<32x64xbf16, #tpu.memory_space<vmem>>, vector<32x64xbf16>
    %254 = arith.truncf %252 : vector<10x32xf32> to vector<10x32xbf16>
    %cst_166 = arith.constant dense<0.000000e+00> : vector<10x64xf32>
    %255 = tpu.matmul %254, %253, %cst_166 {dimension_numbers = #tpu.dot_dimension_numbers<[1], [0], [0], [1], [0, 0, 1, 1], [], []>} : vector<10x32xbf16>, vector<32x64xbf16>, vector<10x64xf32> -> vector<10x64xf32>
    %c0_167 = arith.constant 0 : index
    %c0_168 = arith.constant 0 : index
    %256 = vector.load %arg10[%c0_167, %c0_168] : memref<1x64xf32, #tpu.memory_space<vmem>>, vector<1x64xf32>
    %257 = vector.broadcast %256 : vector<1x64xf32> to vector<10x64xf32>
    %258 = arith.addf %255, %257 : vector<10x64xf32>
    %cst_169 = arith.constant 3.000000e+00 : f32
    %259 = vector.broadcast %cst_169 : f32 to vector<10x64xf32>
    %260 = arith.addf %258, %259 : vector<10x64xf32>
    %cst_170 = arith.constant 0.000000e+00 : f32
    %cst_171 = arith.constant 6.000000e+00 : f32
    %261 = vector.broadcast %cst_170 : f32 to vector<10x64xf32>
    %262 = arith.maximumf %261, %260 : vector<10x64xf32>
    %263 = vector.broadcast %cst_171 : f32 to vector<10x64xf32>
    %264 = arith.minimumf %263, %262 : vector<10x64xf32>
    %265 = arith.mulf %258, %264 : vector<10x64xf32>
    %cst_172 = arith.constant 0.166666672 : f32
    %266 = vector.broadcast %cst_172 : f32 to vector<10x64xf32>
    %267 = arith.mulf %265, %266 : vector<10x64xf32>
    %c0_173 = arith.constant 0 : index
    %c0_174 = arith.constant 0 : index
    %268 = vector.load %arg11[%c0_173, %c0_174] : memref<64x32xbf16, #tpu.memory_space<vmem>>, vector<64x32xbf16>
    %269 = arith.truncf %267 : vector<10x64xf32> to vector<10x64xbf16>
    %cst_175 = arith.constant dense<0.000000e+00> : vector<10x32xf32>
    %270 = tpu.matmul %269, %268, %cst_175 {dimension_numbers = #tpu.dot_dimension_numbers<[1], [0], [0], [1], [0, 0, 1, 1], [], []>} : vector<10x64xbf16>, vector<64x32xbf16>, vector<10x32xf32> -> vector<10x32xf32>
    %c0_176 = arith.constant 0 : index
    %c0_177 = arith.constant 0 : index
    %271 = vector.load %arg12[%c0_176, %c0_177] : memref<1x32xf32, #tpu.memory_space<vmem>>, vector<1x32xf32>
    %272 = vector.broadcast %271 : vector<1x32xf32> to vector<10x32xf32>
    %273 = arith.addf %270, %272 : vector<10x32xf32>
    %274 = arith.addf %252, %273 : vector<10x32xf32>
    %c1_178 = arith.constant 1 : index
    %c0_179 = arith.constant 0 : index
    %c0_180 = arith.constant 0 : index
    %275 = vector.load %arg13[%c1_178, %c0_179, %c0_180] : memref<2x10x32xf32, #tpu.memory_space<vmem>>, vector<1x10x32xf32>
    %276 = vector.shape_cast %275 : vector<1x10x32xf32> to vector<10x32xf32>
    %277 = vector.shape_cast %274 : vector<10x32xf32> to vector<1x10x32xf32>
    tpu.vector_store %arg13[%c1_178, %c0_179, %c0_180], %277 {strides = array<i32>} : memref<2x10x32xf32, #tpu.memory_space<vmem>>, vector<1x10x32xf32>,
    %278 = vector.extract_strided_slice %248 {offsets = [9, 0], sizes = [1, 32], strides = [1, 1]} : vector<10x32xf32> to vector<1x32xf32>
    %279 = vector.extract_strided_slice %273 {offsets = [9, 0], sizes = [1, 32], strides = [1, 1]} : vector<10x32xf32> to vector<1x32xf32>
    %280 = arith.addf %278, %279 : vector<1x32xf32>
    %c1_181 = arith.constant 1 : index
    %c0_182 = arith.constant 0 : index
    %281 = vector.load %arg15[%c1_181, %c0_182] : memref<2x32xf32, #tpu.memory_space<vmem>>, vector<1x32xf32>
    tpu.vector_store %arg15[%c1_181, %c0_182], %280 {strides = array<i32>} : memref<2x32xf32, #tpu.memory_space<vmem>>, vector<1x32xf32>,
    return
  }
}

module attributes {stable_mosaic.version = 11 : i64} {
  func.func @_attn_sub_kernel(%arg0: memref<2x17x32xf32, #tpu.memory_space<vmem>>, %arg1: memref<2x5x32xf32, #tpu.memory_space<vmem>>, %arg2: memref<2x32x8xbf16, #tpu.memory_space<vmem>>, %arg3: memref<2x1x8xf32, #tpu.memory_space<vmem>>, %arg4: memref<2x32x8xbf16, #tpu.memory_space<vmem>>, %arg5: memref<2x1x8xf32, #tpu.memory_space<vmem>>, %arg6: memref<2x32x16xbf16, #tpu.memory_space<vmem>>, %arg7: memref<2x1x16xf32, #tpu.memory_space<vmem>>, %arg8: memref<2x16x48xbf16, #tpu.memory_space<vmem>>, %arg9: memref<1x48xf32, #tpu.memory_space<vmem>>, %arg10: memref<2x5x48xf32, #tpu.memory_space<vmem>>, %arg11: memref<2x17xf32, #tpu.memory_space<vmem>>) attributes {dimension_semantics = [], scalar_prefetch = 0 : i64, scratch_operands = 0 : i64, tpu.core_type = #tpu.core_type<tc>} {
    %c0 = arith.constant 0 : index
    %c0_0 = arith.constant 0 : index
    %c0_1 = arith.constant 0 : index
    %0 = vector.load %arg0[%c0, %c0_0, %c0_1] : memref<2x17x32xf32, #tpu.memory_space<vmem>>, vector<1x17x32xf32>
    %1 = vector.shape_cast %0 : vector<1x17x32xf32> to vector<17x32xf32>
    %2 = arith.truncf %1 : vector<17x32xf32> to vector<17x32xbf16>
    %c0_2 = arith.constant 0 : index
    %c0_3 = arith.constant 0 : index
    %c0_4 = arith.constant 0 : index
    %3 = vector.load %arg1[%c0_2, %c0_3, %c0_4] : memref<2x5x32xf32, #tpu.memory_space<vmem>>, vector<1x5x32xf32>
    %4 = vector.shape_cast %3 : vector<1x5x32xf32> to vector<5x32xf32>
    %5 = arith.truncf %4 : vector<5x32xf32> to vector<5x32xbf16>
    %c0_5 = arith.constant 0 : index
    %c0_6 = arith.constant 0 : index
    %c0_7 = arith.constant 0 : index
    %6 = vector.load %arg4[%c0_5, %c0_6, %c0_7] : memref<2x32x8xbf16, #tpu.memory_space<vmem>>, vector<1x32x8xbf16>
    %7 = vector.shape_cast %6 : vector<1x32x8xbf16> to vector<32x8xbf16>
    %cst = arith.constant dense<0.000000e+00> : vector<17x8xf32>
    %8 = tpu.matmul %2, %7, %cst {dimension_numbers = #tpu.dot_dimension_numbers<[1], [0], [0], [1], [0, 0, 1, 1], [], []>} : vector<17x32xbf16>, vector<32x8xbf16>, vector<17x8xf32> -> vector<17x8xf32>
    %c0_8 = arith.constant 0 : index
    %c0_9 = arith.constant 0 : index
    %c0_10 = arith.constant 0 : index
    %9 = vector.load %arg5[%c0_8, %c0_9, %c0_10] : memref<2x1x8xf32, #tpu.memory_space<vmem>>, vector<1x1x8xf32>
    %10 = vector.shape_cast %9 : vector<1x1x8xf32> to vector<1x8xf32>
    %11 = vector.broadcast %10 : vector<1x8xf32> to vector<17x8xf32>
    %12 = arith.addf %8, %11 : vector<17x8xf32>
    %c0_11 = arith.constant 0 : index
    %c0_12 = arith.constant 0 : index
    %c0_13 = arith.constant 0 : index
    %13 = vector.load %arg6[%c0_11, %c0_12, %c0_13] : memref<2x32x16xbf16, #tpu.memory_space<vmem>>, vector<1x32x16xbf16>
    %14 = vector.shape_cast %13 : vector<1x32x16xbf16> to vector<32x16xbf16>
    %cst_14 = arith.constant dense<0.000000e+00> : vector<17x16xf32>
    %15 = tpu.matmul %2, %14, %cst_14 {dimension_numbers = #tpu.dot_dimension_numbers<[1], [0], [0], [1], [0, 0, 1, 1], [], []>} : vector<17x32xbf16>, vector<32x16xbf16>, vector<17x16xf32> -> vector<17x16xf32>
    %c0_15 = arith.constant 0 : index
    %c0_16 = arith.constant 0 : index
    %c0_17 = arith.constant 0 : index
    %16 = vector.load %arg7[%c0_15, %c0_16, %c0_17] : memref<2x1x16xf32, #tpu.memory_space<vmem>>, vector<1x1x16xf32>
    %17 = vector.shape_cast %16 : vector<1x1x16xf32> to vector<1x16xf32>
    %18 = vector.broadcast %17 : vector<1x16xf32> to vector<17x16xf32>
    %19 = arith.addf %15, %18 : vector<17x16xf32>
    %c0_18 = arith.constant 0 : index
    %c0_19 = arith.constant 0 : index
    %c0_20 = arith.constant 0 : index
    %20 = vector.load %arg2[%c0_18, %c0_19, %c0_20] : memref<2x32x8xbf16, #tpu.memory_space<vmem>>, vector<1x32x8xbf16>
    %21 = vector.shape_cast %20 : vector<1x32x8xbf16> to vector<32x8xbf16>
    %cst_21 = arith.constant dense<0.000000e+00> : vector<5x8xf32>
    %22 = tpu.matmul %5, %21, %cst_21 {dimension_numbers = #tpu.dot_dimension_numbers<[1], [0], [0], [1], [0, 0, 1, 1], [], []>} : vector<5x32xbf16>, vector<32x8xbf16>, vector<5x8xf32> -> vector<5x8xf32>
    %c0_22 = arith.constant 0 : index
    %c0_23 = arith.constant 0 : index
    %c0_24 = arith.constant 0 : index
    %23 = vector.load %arg3[%c0_22, %c0_23, %c0_24] : memref<2x1x8xf32, #tpu.memory_space<vmem>>, vector<1x1x8xf32>
    %24 = vector.shape_cast %23 : vector<1x1x8xf32> to vector<1x8xf32>
    %25 = vector.broadcast %24 : vector<1x8xf32> to vector<5x8xf32>
    %26 = arith.addf %22, %25 : vector<5x8xf32>
    %27 = arith.truncf %26 : vector<5x8xf32> to vector<5x8xbf16>
    %28 = arith.truncf %12 : vector<17x8xf32> to vector<17x8xbf16>
    %cst_25 = arith.constant dense<0.000000e+00> : vector<5x17xf32>
    %29 = tpu.matmul %27, %28, %cst_25 {dimension_numbers = #tpu.dot_dimension_numbers<[1], [1], [0], [0], [0, 0, 1, 0], [], []>} : vector<5x8xbf16>, vector<17x8xbf16>, vector<5x17xf32> -> vector<5x17xf32>
    %cst_26 = arith.constant dense<0xFF800000> : vector<5xf32>
    %30 = vector.multi_reduction <maximumf>, %29, %cst_26 [1] : vector<5x17xf32> to vector<5xf32>
    %31 = vector.shape_cast %30 : vector<5xf32> to vector<5x1xf32>
    %32 = vector.broadcast %31 : vector<5x1xf32> to vector<5x17xf32>
    %33 = arith.subf %29, %32 : vector<5x17xf32>
    %34 = math.exp %33 : vector<5x17xf32>
    %cst_27 = arith.constant dense<0.000000e+00> : vector<5xf32>
    %35 = vector.multi_reduction <add>, %34, %cst_27 [1] : vector<5x17xf32> to vector<5xf32>
    %36 = vector.shape_cast %35 : vector<5xf32> to vector<5x1xf32>
    %37 = vector.broadcast %36 : vector<5x1xf32> to vector<5x17xf32>
    %38 = arith.divf %34, %37 : vector<5x17xf32>
    %39 = vector.extract_strided_slice %38 {offsets = [0, 0], sizes = [1, 17], strides = [1, 1]} : vector<5x17xf32> to vector<1x17xf32>
    %40 = arith.truncf %38 : vector<5x17xf32> to vector<5x17xbf16>
    %41 = arith.truncf %19 : vector<17x16xf32> to vector<17x16xbf16>
    %cst_28 = arith.constant dense<0.000000e+00> : vector<5x16xf32>
    %42 = tpu.matmul %40, %41, %cst_28 {dimension_numbers = #tpu.dot_dimension_numbers<[1], [0], [0], [1], [0, 0, 1, 1], [], []>} : vector<5x17xbf16>, vector<17x16xbf16>, vector<5x16xf32> -> vector<5x16xf32>
    %cst_29 = arith.constant 3.000000e+00 : f32
    %43 = vector.broadcast %cst_29 : f32 to vector<5x16xf32>
    %44 = arith.addf %42, %43 : vector<5x16xf32>
    %cst_30 = arith.constant 0.000000e+00 : f32
    %cst_31 = arith.constant 6.000000e+00 : f32
    %45 = vector.broadcast %cst_30 : f32 to vector<5x16xf32>
    %46 = arith.maximumf %45, %44 : vector<5x16xf32>
    %47 = vector.broadcast %cst_31 : f32 to vector<5x16xf32>
    %48 = arith.minimumf %47, %46 : vector<5x16xf32>
    %49 = arith.mulf %42, %48 : vector<5x16xf32>
    %cst_32 = arith.constant 0.166666672 : f32
    %50 = vector.broadcast %cst_32 : f32 to vector<5x16xf32>
    %51 = arith.mulf %49, %50 : vector<5x16xf32>
    %c0_33 = arith.constant 0 : index
    %c0_34 = arith.constant 0 : index
    %c0_35 = arith.constant 0 : index
    %52 = vector.load %arg8[%c0_33, %c0_34, %c0_35] : memref<2x16x48xbf16, #tpu.memory_space<vmem>>, vector<1x16x48xbf16>
    %53 = vector.shape_cast %52 : vector<1x16x48xbf16> to vector<16x48xbf16>
    %54 = arith.truncf %51 : vector<5x16xf32> to vector<5x16xbf16>
    %cst_36 = arith.constant dense<0.000000e+00> : vector<5x48xf32>
    %55 = tpu.matmul %54, %53, %cst_36 {dimension_numbers = #tpu.dot_dimension_numbers<[1], [0], [0], [1], [0, 0, 1, 1], [], []>} : vector<5x16xbf16>, vector<16x48xbf16>, vector<5x48xf32> -> vector<5x48xf32>
    %c1 = arith.constant 1 : index
    %c0_37 = arith.constant 0 : index
    %c0_38 = arith.constant 0 : index
    %56 = vector.load %arg4[%c1, %c0_37, %c0_38] : memref<2x32x8xbf16, #tpu.memory_space<vmem>>, vector<1x32x8xbf16>
    %57 = vector.shape_cast %56 : vector<1x32x8xbf16> to vector<32x8xbf16>
    %cst_39 = arith.constant dense<0.000000e+00> : vector<17x8xf32>
    %58 = tpu.matmul %2, %57, %cst_39 {dimension_numbers = #tpu.dot_dimension_numbers<[1], [0], [0], [1], [0, 0, 1, 1], [], []>} : vector<17x32xbf16>, vector<32x8xbf16>, vector<17x8xf32> -> vector<17x8xf32>
    %c1_40 = arith.constant 1 : index
    %c0_41 = arith.constant 0 : index
    %c0_42 = arith.constant 0 : index
    %59 = vector.load %arg5[%c1_40, %c0_41, %c0_42] : memref<2x1x8xf32, #tpu.memory_space<vmem>>, vector<1x1x8xf32>
    %60 = vector.shape_cast %59 : vector<1x1x8xf32> to vector<1x8xf32>
    %61 = vector.broadcast %60 : vector<1x8xf32> to vector<17x8xf32>
    %62 = arith.addf %58, %61 : vector<17x8xf32>
    %c1_43 = arith.constant 1 : index
    %c0_44 = arith.constant 0 : index
    %c0_45 = arith.constant 0 : index
    %63 = vector.load %arg6[%c1_43, %c0_44, %c0_45] : memref<2x32x16xbf16, #tpu.memory_space<vmem>>, vector<1x32x16xbf16>
    %64 = vector.shape_cast %63 : vector<1x32x16xbf16> to vector<32x16xbf16>
    %cst_46 = arith.constant dense<0.000000e+00> : vector<17x16xf32>
    %65 = tpu.matmul %2, %64, %cst_46 {dimension_numbers = #tpu.dot_dimension_numbers<[1], [0], [0], [1], [0, 0, 1, 1], [], []>} : vector<17x32xbf16>, vector<32x16xbf16>, vector<17x16xf32> -> vector<17x16xf32>
    %c1_47 = arith.constant 1 : index
    %c0_48 = arith.constant 0 : index
    %c0_49 = arith.constant 0 : index
    %66 = vector.load %arg7[%c1_47, %c0_48, %c0_49] : memref<2x1x16xf32, #tpu.memory_space<vmem>>, vector<1x1x16xf32>
    %67 = vector.shape_cast %66 : vector<1x1x16xf32> to vector<1x16xf32>
    %68 = vector.broadcast %67 : vector<1x16xf32> to vector<17x16xf32>
    %69 = arith.addf %65, %68 : vector<17x16xf32>
    %c1_50 = arith.constant 1 : index
    %c0_51 = arith.constant 0 : index
    %c0_52 = arith.constant 0 : index
    %70 = vector.load %arg2[%c1_50, %c0_51, %c0_52] : memref<2x32x8xbf16, #tpu.memory_space<vmem>>, vector<1x32x8xbf16>
    %71 = vector.shape_cast %70 : vector<1x32x8xbf16> to vector<32x8xbf16>
    %cst_53 = arith.constant dense<0.000000e+00> : vector<5x8xf32>
    %72 = tpu.matmul %5, %71, %cst_53 {dimension_numbers = #tpu.dot_dimension_numbers<[1], [0], [0], [1], [0, 0, 1, 1], [], []>} : vector<5x32xbf16>, vector<32x8xbf16>, vector<5x8xf32> -> vector<5x8xf32>
    %c1_54 = arith.constant 1 : index
    %c0_55 = arith.constant 0 : index
    %c0_56 = arith.constant 0 : index
    %73 = vector.load %arg3[%c1_54, %c0_55, %c0_56] : memref<2x1x8xf32, #tpu.memory_space<vmem>>, vector<1x1x8xf32>
    %74 = vector.shape_cast %73 : vector<1x1x8xf32> to vector<1x8xf32>
    %75 = vector.broadcast %74 : vector<1x8xf32> to vector<5x8xf32>
    %76 = arith.addf %72, %75 : vector<5x8xf32>
    %77 = arith.truncf %76 : vector<5x8xf32> to vector<5x8xbf16>
    %78 = arith.truncf %62 : vector<17x8xf32> to vector<17x8xbf16>
    %cst_57 = arith.constant dense<0.000000e+00> : vector<5x17xf32>
    %79 = tpu.matmul %77, %78, %cst_57 {dimension_numbers = #tpu.dot_dimension_numbers<[1], [1], [0], [0], [0, 0, 1, 0], [], []>} : vector<5x8xbf16>, vector<17x8xbf16>, vector<5x17xf32> -> vector<5x17xf32>
    %cst_58 = arith.constant dense<0xFF800000> : vector<5xf32>
    %80 = vector.multi_reduction <maximumf>, %79, %cst_58 [1] : vector<5x17xf32> to vector<5xf32>
    %81 = vector.shape_cast %80 : vector<5xf32> to vector<5x1xf32>
    %82 = vector.broadcast %81 : vector<5x1xf32> to vector<5x17xf32>
    %83 = arith.subf %79, %82 : vector<5x17xf32>
    %84 = math.exp %83 : vector<5x17xf32>
    %cst_59 = arith.constant dense<0.000000e+00> : vector<5xf32>
    %85 = vector.multi_reduction <add>, %84, %cst_59 [1] : vector<5x17xf32> to vector<5xf32>
    %86 = vector.shape_cast %85 : vector<5xf32> to vector<5x1xf32>
    %87 = vector.broadcast %86 : vector<5x1xf32> to vector<5x17xf32>
    %88 = arith.divf %84, %87 : vector<5x17xf32>
    %89 = vector.extract_strided_slice %88 {offsets = [0, 0], sizes = [1, 17], strides = [1, 1]} : vector<5x17xf32> to vector<1x17xf32>
    %90 = arith.addf %39, %89 : vector<1x17xf32>
    %91 = arith.truncf %88 : vector<5x17xf32> to vector<5x17xbf16>
    %92 = arith.truncf %69 : vector<17x16xf32> to vector<17x16xbf16>
    %cst_60 = arith.constant dense<0.000000e+00> : vector<5x16xf32>
    %93 = tpu.matmul %91, %92, %cst_60 {dimension_numbers = #tpu.dot_dimension_numbers<[1], [0], [0], [1], [0, 0, 1, 1], [], []>} : vector<5x17xbf16>, vector<17x16xbf16>, vector<5x16xf32> -> vector<5x16xf32>
    %cst_61 = arith.constant 3.000000e+00 : f32
    %94 = vector.broadcast %cst_61 : f32 to vector<5x16xf32>
    %95 = arith.addf %93, %94 : vector<5x16xf32>
    %cst_62 = arith.constant 0.000000e+00 : f32
    %cst_63 = arith.constant 6.000000e+00 : f32
    %96 = vector.broadcast %cst_62 : f32 to vector<5x16xf32>
    %97 = arith.maximumf %96, %95 : vector<5x16xf32>
    %98 = vector.broadcast %cst_63 : f32 to vector<5x16xf32>
    %99 = arith.minimumf %98, %97 : vector<5x16xf32>
    %100 = arith.mulf %93, %99 : vector<5x16xf32>
    %cst_64 = arith.constant 0.166666672 : f32
    %101 = vector.broadcast %cst_64 : f32 to vector<5x16xf32>
    %102 = arith.mulf %100, %101 : vector<5x16xf32>
    %c1_65 = arith.constant 1 : index
    %c0_66 = arith.constant 0 : index
    %c0_67 = arith.constant 0 : index
    %103 = vector.load %arg8[%c1_65, %c0_66, %c0_67] : memref<2x16x48xbf16, #tpu.memory_space<vmem>>, vector<1x16x48xbf16>
    %104 = vector.shape_cast %103 : vector<1x16x48xbf16> to vector<16x48xbf16>
    %105 = arith.truncf %102 : vector<5x16xf32> to vector<5x16xbf16>
    %cst_68 = arith.constant dense<0.000000e+00> : vector<5x48xf32>
    %106 = tpu.matmul %105, %104, %cst_68 {dimension_numbers = #tpu.dot_dimension_numbers<[1], [0], [0], [1], [0, 0, 1, 1], [], []>} : vector<5x16xbf16>, vector<16x48xbf16>, vector<5x48xf32> -> vector<5x48xf32>
    %107 = arith.addf %55, %106 : vector<5x48xf32>
    %c0_69 = arith.constant 0 : index
    %c0_70 = arith.constant 0 : index
    %108 = vector.load %arg9[%c0_69, %c0_70] : memref<1x48xf32, #tpu.memory_space<vmem>>, vector<1x48xf32>
    %109 = vector.broadcast %108 : vector<1x48xf32> to vector<5x48xf32>
    %110 = arith.addf %107, %109 : vector<5x48xf32>
    %c0_71 = arith.constant 0 : index
    %c0_72 = arith.constant 0 : index
    %c0_73 = arith.constant 0 : index
    %111 = vector.load %arg10[%c0_71, %c0_72, %c0_73] : memref<2x5x48xf32, #tpu.memory_space<vmem>>, vector<1x5x48xf32>
    %112 = vector.shape_cast %111 : vector<1x5x48xf32> to vector<5x48xf32>
    %113 = vector.shape_cast %110 : vector<5x48xf32> to vector<1x5x48xf32>
    tpu.vector_store %arg10[%c0_71, %c0_72, %c0_73], %113 {strides = array<i32>} : memref<2x5x48xf32, #tpu.memory_space<vmem>>, vector<1x5x48xf32>,
    %cst_74 = arith.constant 5.000000e-01 : f32
    %114 = vector.broadcast %cst_74 : f32 to vector<1x17xf32>
    %115 = arith.mulf %90, %114 : vector<1x17xf32>
    %c0_75 = arith.constant 0 : index
    %c0_76 = arith.constant 0 : index
    %116 = vector.load %arg11[%c0_75, %c0_76] : memref<2x17xf32, #tpu.memory_space<vmem>>, vector<1x17xf32>
    tpu.vector_store %arg11[%c0_75, %c0_76], %115 {strides = array<i32>} : memref<2x17xf32, #tpu.memory_space<vmem>>, vector<1x17xf32>,
    %c1_77 = arith.constant 1 : index
    %c0_78 = arith.constant 0 : index
    %c0_79 = arith.constant 0 : index
    %117 = vector.load %arg0[%c1_77, %c0_78, %c0_79] : memref<2x17x32xf32, #tpu.memory_space<vmem>>, vector<1x17x32xf32>
    %118 = vector.shape_cast %117 : vector<1x17x32xf32> to vector<17x32xf32>
    %119 = arith.truncf %118 : vector<17x32xf32> to vector<17x32xbf16>
    %c1_80 = arith.constant 1 : index
    %c0_81 = arith.constant 0 : index
    %c0_82 = arith.constant 0 : index
    %120 = vector.load %arg1[%c1_80, %c0_81, %c0_82] : memref<2x5x32xf32, #tpu.memory_space<vmem>>, vector<1x5x32xf32>
    %121 = vector.shape_cast %120 : vector<1x5x32xf32> to vector<5x32xf32>
    %122 = arith.truncf %121 : vector<5x32xf32> to vector<5x32xbf16>
    %c0_83 = arith.constant 0 : index
    %c0_84 = arith.constant 0 : index
    %c0_85 = arith.constant 0 : index
    %123 = vector.load %arg4[%c0_83, %c0_84, %c0_85] : memref<2x32x8xbf16, #tpu.memory_space<vmem>>, vector<1x32x8xbf16>
    %124 = vector.shape_cast %123 : vector<1x32x8xbf16> to vector<32x8xbf16>
    %cst_86 = arith.constant dense<0.000000e+00> : vector<17x8xf32>
    %125 = tpu.matmul %119, %124, %cst_86 {dimension_numbers = #tpu.dot_dimension_numbers<[1], [0], [0], [1], [0, 0, 1, 1], [], []>} : vector<17x32xbf16>, vector<32x8xbf16>, vector<17x8xf32> -> vector<17x8xf32>
    %c0_87 = arith.constant 0 : index
    %c0_88 = arith.constant 0 : index
    %c0_89 = arith.constant 0 : index
    %126 = vector.load %arg5[%c0_87, %c0_88, %c0_89] : memref<2x1x8xf32, #tpu.memory_space<vmem>>, vector<1x1x8xf32>
    %127 = vector.shape_cast %126 : vector<1x1x8xf32> to vector<1x8xf32>
    %128 = vector.broadcast %127 : vector<1x8xf32> to vector<17x8xf32>
    %129 = arith.addf %125, %128 : vector<17x8xf32>
    %c0_90 = arith.constant 0 : index
    %c0_91 = arith.constant 0 : index
    %c0_92 = arith.constant 0 : index
    %130 = vector.load %arg6[%c0_90, %c0_91, %c0_92] : memref<2x32x16xbf16, #tpu.memory_space<vmem>>, vector<1x32x16xbf16>
    %131 = vector.shape_cast %130 : vector<1x32x16xbf16> to vector<32x16xbf16>
    %cst_93 = arith.constant dense<0.000000e+00> : vector<17x16xf32>
    %132 = tpu.matmul %119, %131, %cst_93 {dimension_numbers = #tpu.dot_dimension_numbers<[1], [0], [0], [1], [0, 0, 1, 1], [], []>} : vector<17x32xbf16>, vector<32x16xbf16>, vector<17x16xf32> -> vector<17x16xf32>
    %c0_94 = arith.constant 0 : index
    %c0_95 = arith.constant 0 : index
    %c0_96 = arith.constant 0 : index
    %133 = vector.load %arg7[%c0_94, %c0_95, %c0_96] : memref<2x1x16xf32, #tpu.memory_space<vmem>>, vector<1x1x16xf32>
    %134 = vector.shape_cast %133 : vector<1x1x16xf32> to vector<1x16xf32>
    %135 = vector.broadcast %134 : vector<1x16xf32> to vector<17x16xf32>
    %136 = arith.addf %132, %135 : vector<17x16xf32>
    %c0_97 = arith.constant 0 : index
    %c0_98 = arith.constant 0 : index
    %c0_99 = arith.constant 0 : index
    %137 = vector.load %arg2[%c0_97, %c0_98, %c0_99] : memref<2x32x8xbf16, #tpu.memory_space<vmem>>, vector<1x32x8xbf16>
    %138 = vector.shape_cast %137 : vector<1x32x8xbf16> to vector<32x8xbf16>
    %cst_100 = arith.constant dense<0.000000e+00> : vector<5x8xf32>
    %139 = tpu.matmul %122, %138, %cst_100 {dimension_numbers = #tpu.dot_dimension_numbers<[1], [0], [0], [1], [0, 0, 1, 1], [], []>} : vector<5x32xbf16>, vector<32x8xbf16>, vector<5x8xf32> -> vector<5x8xf32>
    %c0_101 = arith.constant 0 : index
    %c0_102 = arith.constant 0 : index
    %c0_103 = arith.constant 0 : index
    %140 = vector.load %arg3[%c0_101, %c0_102, %c0_103] : memref<2x1x8xf32, #tpu.memory_space<vmem>>, vector<1x1x8xf32>
    %141 = vector.shape_cast %140 : vector<1x1x8xf32> to vector<1x8xf32>
    %142 = vector.broadcast %141 : vector<1x8xf32> to vector<5x8xf32>
    %143 = arith.addf %139, %142 : vector<5x8xf32>
    %144 = arith.truncf %143 : vector<5x8xf32> to vector<5x8xbf16>
    %145 = arith.truncf %129 : vector<17x8xf32> to vector<17x8xbf16>
    %cst_104 = arith.constant dense<0.000000e+00> : vector<5x17xf32>
    %146 = tpu.matmul %144, %145, %cst_104 {dimension_numbers = #tpu.dot_dimension_numbers<[1], [1], [0], [0], [0, 0, 1, 0], [], []>} : vector<5x8xbf16>, vector<17x8xbf16>, vector<5x17xf32> -> vector<5x17xf32>
    %cst_105 = arith.constant dense<0xFF800000> : vector<5xf32>
    %147 = vector.multi_reduction <maximumf>, %146, %cst_105 [1] : vector<5x17xf32> to vector<5xf32>
    %148 = vector.shape_cast %147 : vector<5xf32> to vector<5x1xf32>
    %149 = vector.broadcast %148 : vector<5x1xf32> to vector<5x17xf32>
    %150 = arith.subf %146, %149 : vector<5x17xf32>
    %151 = math.exp %150 : vector<5x17xf32>
    %cst_106 = arith.constant dense<0.000000e+00> : vector<5xf32>
    %152 = vector.multi_reduction <add>, %151, %cst_106 [1] : vector<5x17xf32> to vector<5xf32>
    %153 = vector.shape_cast %152 : vector<5xf32> to vector<5x1xf32>
    %154 = vector.broadcast %153 : vector<5x1xf32> to vector<5x17xf32>
    %155 = arith.divf %151, %154 : vector<5x17xf32>
    %156 = vector.extract_strided_slice %155 {offsets = [0, 0], sizes = [1, 17], strides = [1, 1]} : vector<5x17xf32> to vector<1x17xf32>
    %157 = arith.truncf %155 : vector<5x17xf32> to vector<5x17xbf16>
    %158 = arith.truncf %136 : vector<17x16xf32> to vector<17x16xbf16>
    %cst_107 = arith.constant dense<0.000000e+00> : vector<5x16xf32>
    %159 = tpu.matmul %157, %158, %cst_107 {dimension_numbers = #tpu.dot_dimension_numbers<[1], [0], [0], [1], [0, 0, 1, 1], [], []>} : vector<5x17xbf16>, vector<17x16xbf16>, vector<5x16xf32> -> vector<5x16xf32>
    %cst_108 = arith.constant 3.000000e+00 : f32
    %160 = vector.broadcast %cst_108 : f32 to vector<5x16xf32>
    %161 = arith.addf %159, %160 : vector<5x16xf32>
    %cst_109 = arith.constant 0.000000e+00 : f32
    %cst_110 = arith.constant 6.000000e+00 : f32
    %162 = vector.broadcast %cst_109 : f32 to vector<5x16xf32>
    %163 = arith.maximumf %162, %161 : vector<5x16xf32>
    %164 = vector.broadcast %cst_110 : f32 to vector<5x16xf32>
    %165 = arith.minimumf %164, %163 : vector<5x16xf32>
    %166 = arith.mulf %159, %165 : vector<5x16xf32>
    %cst_111 = arith.constant 0.166666672 : f32
    %167 = vector.broadcast %cst_111 : f32 to vector<5x16xf32>
    %168 = arith.mulf %166, %167 : vector<5x16xf32>
    %c0_112 = arith.constant 0 : index
    %c0_113 = arith.constant 0 : index
    %c0_114 = arith.constant 0 : index
    %169 = vector.load %arg8[%c0_112, %c0_113, %c0_114] : memref<2x16x48xbf16, #tpu.memory_space<vmem>>, vector<1x16x48xbf16>
    %170 = vector.shape_cast %169 : vector<1x16x48xbf16> to vector<16x48xbf16>
    %171 = arith.truncf %168 : vector<5x16xf32> to vector<5x16xbf16>
    %cst_115 = arith.constant dense<0.000000e+00> : vector<5x48xf32>
    %172 = tpu.matmul %171, %170, %cst_115 {dimension_numbers = #tpu.dot_dimension_numbers<[1], [0], [0], [1], [0, 0, 1, 1], [], []>} : vector<5x16xbf16>, vector<16x48xbf16>, vector<5x48xf32> -> vector<5x48xf32>
    %c1_116 = arith.constant 1 : index
    %c0_117 = arith.constant 0 : index
    %c0_118 = arith.constant 0 : index
    %173 = vector.load %arg4[%c1_116, %c0_117, %c0_118] : memref<2x32x8xbf16, #tpu.memory_space<vmem>>, vector<1x32x8xbf16>
    %174 = vector.shape_cast %173 : vector<1x32x8xbf16> to vector<32x8xbf16>
    %cst_119 = arith.constant dense<0.000000e+00> : vector<17x8xf32>
    %175 = tpu.matmul %119, %174, %cst_119 {dimension_numbers = #tpu.dot_dimension_numbers<[1], [0], [0], [1], [0, 0, 1, 1], [], []>} : vector<17x32xbf16>, vector<32x8xbf16>, vector<17x8xf32> -> vector<17x8xf32>
    %c1_120 = arith.constant 1 : index
    %c0_121 = arith.constant 0 : index
    %c0_122 = arith.constant 0 : index
    %176 = vector.load %arg5[%c1_120, %c0_121, %c0_122] : memref<2x1x8xf32, #tpu.memory_space<vmem>>, vector<1x1x8xf32>
    %177 = vector.shape_cast %176 : vector<1x1x8xf32> to vector<1x8xf32>
    %178 = vector.broadcast %177 : vector<1x8xf32> to vector<17x8xf32>
    %179 = arith.addf %175, %178 : vector<17x8xf32>
    %c1_123 = arith.constant 1 : index
    %c0_124 = arith.constant 0 : index
    %c0_125 = arith.constant 0 : index
    %180 = vector.load %arg6[%c1_123, %c0_124, %c0_125] : memref<2x32x16xbf16, #tpu.memory_space<vmem>>, vector<1x32x16xbf16>
    %181 = vector.shape_cast %180 : vector<1x32x16xbf16> to vector<32x16xbf16>
    %cst_126 = arith.constant dense<0.000000e+00> : vector<17x16xf32>
    %182 = tpu.matmul %119, %181, %cst_126 {dimension_numbers = #tpu.dot_dimension_numbers<[1], [0], [0], [1], [0, 0, 1, 1], [], []>} : vector<17x32xbf16>, vector<32x16xbf16>, vector<17x16xf32> -> vector<17x16xf32>
    %c1_127 = arith.constant 1 : index
    %c0_128 = arith.constant 0 : index
    %c0_129 = arith.constant 0 : index
    %183 = vector.load %arg7[%c1_127, %c0_128, %c0_129] : memref<2x1x16xf32, #tpu.memory_space<vmem>>, vector<1x1x16xf32>
    %184 = vector.shape_cast %183 : vector<1x1x16xf32> to vector<1x16xf32>
    %185 = vector.broadcast %184 : vector<1x16xf32> to vector<17x16xf32>
    %186 = arith.addf %182, %185 : vector<17x16xf32>
    %c1_130 = arith.constant 1 : index
    %c0_131 = arith.constant 0 : index
    %c0_132 = arith.constant 0 : index
    %187 = vector.load %arg2[%c1_130, %c0_131, %c0_132] : memref<2x32x8xbf16, #tpu.memory_space<vmem>>, vector<1x32x8xbf16>
    %188 = vector.shape_cast %187 : vector<1x32x8xbf16> to vector<32x8xbf16>
    %cst_133 = arith.constant dense<0.000000e+00> : vector<5x8xf32>
    %189 = tpu.matmul %122, %188, %cst_133 {dimension_numbers = #tpu.dot_dimension_numbers<[1], [0], [0], [1], [0, 0, 1, 1], [], []>} : vector<5x32xbf16>, vector<32x8xbf16>, vector<5x8xf32> -> vector<5x8xf32>
    %c1_134 = arith.constant 1 : index
    %c0_135 = arith.constant 0 : index
    %c0_136 = arith.constant 0 : index
    %190 = vector.load %arg3[%c1_134, %c0_135, %c0_136] : memref<2x1x8xf32, #tpu.memory_space<vmem>>, vector<1x1x8xf32>
    %191 = vector.shape_cast %190 : vector<1x1x8xf32> to vector<1x8xf32>
    %192 = vector.broadcast %191 : vector<1x8xf32> to vector<5x8xf32>
    %193 = arith.addf %189, %192 : vector<5x8xf32>
    %194 = arith.truncf %193 : vector<5x8xf32> to vector<5x8xbf16>
    %195 = arith.truncf %179 : vector<17x8xf32> to vector<17x8xbf16>
    %cst_137 = arith.constant dense<0.000000e+00> : vector<5x17xf32>
    %196 = tpu.matmul %194, %195, %cst_137 {dimension_numbers = #tpu.dot_dimension_numbers<[1], [1], [0], [0], [0, 0, 1, 0], [], []>} : vector<5x8xbf16>, vector<17x8xbf16>, vector<5x17xf32> -> vector<5x17xf32>
    %cst_138 = arith.constant dense<0xFF800000> : vector<5xf32>
    %197 = vector.multi_reduction <maximumf>, %196, %cst_138 [1] : vector<5x17xf32> to vector<5xf32>
    %198 = vector.shape_cast %197 : vector<5xf32> to vector<5x1xf32>
    %199 = vector.broadcast %198 : vector<5x1xf32> to vector<5x17xf32>
    %200 = arith.subf %196, %199 : vector<5x17xf32>
    %201 = math.exp %200 : vector<5x17xf32>
    %cst_139 = arith.constant dense<0.000000e+00> : vector<5xf32>
    %202 = vector.multi_reduction <add>, %201, %cst_139 [1] : vector<5x17xf32> to vector<5xf32>
    %203 = vector.shape_cast %202 : vector<5xf32> to vector<5x1xf32>
    %204 = vector.broadcast %203 : vector<5x1xf32> to vector<5x17xf32>
    %205 = arith.divf %201, %204 : vector<5x17xf32>
    %206 = vector.extract_strided_slice %205 {offsets = [0, 0], sizes = [1, 17], strides = [1, 1]} : vector<5x17xf32> to vector<1x17xf32>
    %207 = arith.addf %156, %206 : vector<1x17xf32>
    %208 = arith.truncf %205 : vector<5x17xf32> to vector<5x17xbf16>
    %209 = arith.truncf %186 : vector<17x16xf32> to vector<17x16xbf16>
    %cst_140 = arith.constant dense<0.000000e+00> : vector<5x16xf32>
    %210 = tpu.matmul %208, %209, %cst_140 {dimension_numbers = #tpu.dot_dimension_numbers<[1], [0], [0], [1], [0, 0, 1, 1], [], []>} : vector<5x17xbf16>, vector<17x16xbf16>, vector<5x16xf32> -> vector<5x16xf32>
    %cst_141 = arith.constant 3.000000e+00 : f32
    %211 = vector.broadcast %cst_141 : f32 to vector<5x16xf32>
    %212 = arith.addf %210, %211 : vector<5x16xf32>
    %cst_142 = arith.constant 0.000000e+00 : f32
    %cst_143 = arith.constant 6.000000e+00 : f32
    %213 = vector.broadcast %cst_142 : f32 to vector<5x16xf32>
    %214 = arith.maximumf %213, %212 : vector<5x16xf32>
    %215 = vector.broadcast %cst_143 : f32 to vector<5x16xf32>
    %216 = arith.minimumf %215, %214 : vector<5x16xf32>
    %217 = arith.mulf %210, %216 : vector<5x16xf32>
    %cst_144 = arith.constant 0.166666672 : f32
    %218 = vector.broadcast %cst_144 : f32 to vector<5x16xf32>
    %219 = arith.mulf %217, %218 : vector<5x16xf32>
    %c1_145 = arith.constant 1 : index
    %c0_146 = arith.constant 0 : index
    %c0_147 = arith.constant 0 : index
    %220 = vector.load %arg8[%c1_145, %c0_146, %c0_147] : memref<2x16x48xbf16, #tpu.memory_space<vmem>>, vector<1x16x48xbf16>
    %221 = vector.shape_cast %220 : vector<1x16x48xbf16> to vector<16x48xbf16>
    %222 = arith.truncf %219 : vector<5x16xf32> to vector<5x16xbf16>
    %cst_148 = arith.constant dense<0.000000e+00> : vector<5x48xf32>
    %223 = tpu.matmul %222, %221, %cst_148 {dimension_numbers = #tpu.dot_dimension_numbers<[1], [0], [0], [1], [0, 0, 1, 1], [], []>} : vector<5x16xbf16>, vector<16x48xbf16>, vector<5x48xf32> -> vector<5x48xf32>
    %224 = arith.addf %172, %223 : vector<5x48xf32>
    %c0_149 = arith.constant 0 : index
    %c0_150 = arith.constant 0 : index
    %225 = vector.load %arg9[%c0_149, %c0_150] : memref<1x48xf32, #tpu.memory_space<vmem>>, vector<1x48xf32>
    %226 = vector.broadcast %225 : vector<1x48xf32> to vector<5x48xf32>
    %227 = arith.addf %224, %226 : vector<5x48xf32>
    %c1_151 = arith.constant 1 : index
    %c0_152 = arith.constant 0 : index
    %c0_153 = arith.constant 0 : index
    %228 = vector.load %arg10[%c1_151, %c0_152, %c0_153] : memref<2x5x48xf32, #tpu.memory_space<vmem>>, vector<1x5x48xf32>
    %229 = vector.shape_cast %228 : vector<1x5x48xf32> to vector<5x48xf32>
    %230 = vector.shape_cast %227 : vector<5x48xf32> to vector<1x5x48xf32>
    tpu.vector_store %arg10[%c1_151, %c0_152, %c0_153], %230 {strides = array<i32>} : memref<2x5x48xf32, #tpu.memory_space<vmem>>, vector<1x5x48xf32>,
    %cst_154 = arith.constant 5.000000e-01 : f32
    %231 = vector.broadcast %cst_154 : f32 to vector<1x17xf32>
    %232 = arith.mulf %207, %231 : vector<1x17xf32>
    %c1_155 = arith.constant 1 : index
    %c0_156 = arith.constant 0 : index
    %233 = vector.load %arg11[%c1_155, %c0_156] : memref<2x17xf32, #tpu.memory_space<vmem>>, vector<1x17xf32>
    tpu.vector_store %arg11[%c1_155, %c0_156], %232 {strides = array<i32>} : memref<2x17xf32, #tpu.memory_space<vmem>>, vector<1x17xf32>,
    return
  }
}

module attributes {stable_mosaic.version = 11 : i64} {
  func.func @_mlp_res_kernel(%arg0: memref<10x48xf32, #tpu.memory_space<vmem>>, %arg1: memref<48x96xbf16, #tpu.memory_space<vmem>>, %arg2: memref<1x96xf32, #tpu.memory_space<vmem>>, %arg3: memref<96x48xbf16, #tpu.memory_space<vmem>>, %arg4: memref<1x48xf32, #tpu.memory_space<vmem>>, %arg5: memref<10x48xf32, #tpu.memory_space<vmem>>) attributes {dimension_semantics = [], scalar_prefetch = 0 : i64, scratch_operands = 0 : i64, tpu.core_type = #tpu.core_type<tc>} {
    %c0 = arith.constant 0 : index
    %c0_0 = arith.constant 0 : index
    %0 = vector.load %arg0[%c0, %c0_0] : memref<10x48xf32, #tpu.memory_space<vmem>>, vector<10x48xf32>
    %c0_1 = arith.constant 0 : index
    %c0_2 = arith.constant 0 : index
    %1 = vector.load %arg1[%c0_1, %c0_2] : memref<48x96xbf16, #tpu.memory_space<vmem>>, vector<48x96xbf16>
    %2 = arith.truncf %0 : vector<10x48xf32> to vector<10x48xbf16>
    %cst = arith.constant dense<0.000000e+00> : vector<10x96xf32>
    %3 = tpu.matmul %2, %1, %cst {dimension_numbers = #tpu.dot_dimension_numbers<[1], [0], [0], [1], [0, 0, 1, 1], [], []>} : vector<10x48xbf16>, vector<48x96xbf16>, vector<10x96xf32> -> vector<10x96xf32>
    %c0_3 = arith.constant 0 : index
    %c0_4 = arith.constant 0 : index
    %4 = vector.load %arg2[%c0_3, %c0_4] : memref<1x96xf32, #tpu.memory_space<vmem>>, vector<1x96xf32>
    %5 = vector.broadcast %4 : vector<1x96xf32> to vector<10x96xf32>
    %6 = arith.addf %3, %5 : vector<10x96xf32>
    %cst_5 = arith.constant 3.000000e+00 : f32
    %7 = vector.broadcast %cst_5 : f32 to vector<10x96xf32>
    %8 = arith.addf %6, %7 : vector<10x96xf32>
    %cst_6 = arith.constant 0.000000e+00 : f32
    %cst_7 = arith.constant 6.000000e+00 : f32
    %9 = vector.broadcast %cst_6 : f32 to vector<10x96xf32>
    %10 = arith.maximumf %9, %8 : vector<10x96xf32>
    %11 = vector.broadcast %cst_7 : f32 to vector<10x96xf32>
    %12 = arith.minimumf %11, %10 : vector<10x96xf32>
    %13 = arith.mulf %6, %12 : vector<10x96xf32>
    %cst_8 = arith.constant 0.166666672 : f32
    %14 = vector.broadcast %cst_8 : f32 to vector<10x96xf32>
    %15 = arith.mulf %13, %14 : vector<10x96xf32>
    %c0_9 = arith.constant 0 : index
    %c0_10 = arith.constant 0 : index
    %16 = vector.load %arg3[%c0_9, %c0_10] : memref<96x48xbf16, #tpu.memory_space<vmem>>, vector<96x48xbf16>
    %17 = arith.truncf %15 : vector<10x96xf32> to vector<10x96xbf16>
    %cst_11 = arith.constant dense<0.000000e+00> : vector<10x48xf32>
    %18 = tpu.matmul %17, %16, %cst_11 {dimension_numbers = #tpu.dot_dimension_numbers<[1], [0], [0], [1], [0, 0, 1, 1], [], []>} : vector<10x96xbf16>, vector<96x48xbf16>, vector<10x48xf32> -> vector<10x48xf32>
    %19 = arith.addf %0, %18 : vector<10x48xf32>
    %c0_12 = arith.constant 0 : index
    %c0_13 = arith.constant 0 : index
    %20 = vector.load %arg4[%c0_12, %c0_13] : memref<1x48xf32, #tpu.memory_space<vmem>>, vector<1x48xf32>
    %21 = vector.broadcast %20 : vector<1x48xf32> to vector<10x48xf32>
    %22 = arith.addf %19, %21 : vector<10x48xf32>
    %c0_14 = arith.constant 0 : index
    %c0_15 = arith.constant 0 : index
    %23 = vector.load %arg5[%c0_14, %c0_15] : memref<10x48xf32, #tpu.memory_space<vmem>>, vector<10x48xf32>
    tpu.vector_store %arg5[%c0_14, %c0_15], %22 {strides = array<i32>} : memref<10x48xf32, #tpu.memory_space<vmem>>, vector<10x48xf32>,
    return
  }
}

module attributes {stable_mosaic.version = 11 : i64} {
  func.func @_head_kernel(%arg0: memref<2x5x48xf32, #tpu.memory_space<vmem>>, %arg1: memref<48x10xbf16, #tpu.memory_space<vmem>>, %arg2: memref<1x10xf32, #tpu.memory_space<vmem>>, %arg3: memref<2x10xf32, #tpu.memory_space<vmem>>) attributes {dimension_semantics = [], scalar_prefetch = 0 : i64, scratch_operands = 0 : i64, tpu.core_type = #tpu.core_type<tc>} {
    %c0 = arith.constant 0 : index
    %c0_0 = arith.constant 0 : index
    %c0_1 = arith.constant 0 : index
    %0 = vector.load %arg0[%c0, %c0_0, %c0_1] : memref<2x5x48xf32, #tpu.memory_space<vmem>>, vector<1x5x48xf32>
    %1 = vector.shape_cast %0 : vector<1x5x48xf32> to vector<5x48xf32>
    %2 = vector.extract_strided_slice %1 {offsets = [1, 0], sizes = [4, 48], strides = [1, 1]} : vector<5x48xf32> to vector<4x48xf32>
    %cst = arith.constant dense<0.000000e+00> : vector<48xf32>
    %3 = vector.multi_reduction <add>, %2, %cst [0] : vector<4x48xf32> to vector<48xf32>
    %4 = vector.shape_cast %3 : vector<48xf32> to vector<1x48xf32>
    %cst_2 = arith.constant 2.500000e-01 : f32
    %5 = vector.broadcast %cst_2 : f32 to vector<1x48xf32>
    %6 = arith.mulf %4, %5 : vector<1x48xf32>
    %c1 = arith.constant 1 : index
    %c0_3 = arith.constant 0 : index
    %c0_4 = arith.constant 0 : index
    %7 = vector.load %arg0[%c1, %c0_3, %c0_4] : memref<2x5x48xf32, #tpu.memory_space<vmem>>, vector<1x5x48xf32>
    %8 = vector.shape_cast %7 : vector<1x5x48xf32> to vector<5x48xf32>
    %9 = vector.extract_strided_slice %8 {offsets = [1, 0], sizes = [4, 48], strides = [1, 1]} : vector<5x48xf32> to vector<4x48xf32>
    %cst_5 = arith.constant dense<0.000000e+00> : vector<48xf32>
    %10 = vector.multi_reduction <add>, %9, %cst_5 [0] : vector<4x48xf32> to vector<48xf32>
    %11 = vector.shape_cast %10 : vector<48xf32> to vector<1x48xf32>
    %cst_6 = arith.constant 2.500000e-01 : f32
    %12 = vector.broadcast %cst_6 : f32 to vector<1x48xf32>
    %13 = arith.mulf %11, %12 : vector<1x48xf32>
    %14 = tpu.concatenate %6, %13 in 0 : vector<1x48xf32>, vector<1x48xf32> -> vector<2x48xf32>
    %c0_7 = arith.constant 0 : index
    %c0_8 = arith.constant 0 : index
    %15 = vector.load %arg1[%c0_7, %c0_8] : memref<48x10xbf16, #tpu.memory_space<vmem>>, vector<48x10xbf16>
    %16 = arith.truncf %14 : vector<2x48xf32> to vector<2x48xbf16>
    %cst_9 = arith.constant dense<0.000000e+00> : vector<2x10xf32>
    %17 = tpu.matmul %16, %15, %cst_9 {dimension_numbers = #tpu.dot_dimension_numbers<[1], [0], [0], [1], [0, 0, 1, 1], [], []>} : vector<2x48xbf16>, vector<48x10xbf16>, vector<2x10xf32> -> vector<2x10xf32>
    %c0_10 = arith.constant 0 : index
    %c0_11 = arith.constant 0 : index
    %18 = vector.load %arg2[%c0_10, %c0_11] : memref<1x10xf32, #tpu.memory_space<vmem>>, vector<1x10xf32>
    %19 = vector.broadcast %18 : vector<1x10xf32> to vector<2x10xf32>
    %20 = arith.addf %17, %19 : vector<2x10xf32>
    %c0_12 = arith.constant 0 : index
    %c0_13 = arith.constant 0 : index
    %21 = vector.load %arg3[%c0_12, %c0_13] : memref<2x10xf32, #tpu.memory_space<vmem>>, vector<2x10xf32>
    tpu.vector_store %arg3[%c0_12, %c0_13], %20 {strides = array<i32>} : memref<2x10xf32, #tpu.memory_space<vmem>>, vector<2x10xf32>,
    return
  }
}

module attributes {stable_mosaic.version = 11 : i64} {
  func.func @_layer_kernel(%arg0: memref<2x4x48xf32, #tpu.memory_space<vmem>>, %arg1: memref<2x48x8xbf16, #tpu.memory_space<vmem>>, %arg2: memref<2x1x8xf32, #tpu.memory_space<vmem>>, %arg3: memref<2x48x8xbf16, #tpu.memory_space<vmem>>, %arg4: memref<2x1x8xf32, #tpu.memory_space<vmem>>, %arg5: memref<2x48x16xbf16, #tpu.memory_space<vmem>>, %arg6: memref<2x1x16xf32, #tpu.memory_space<vmem>>, %arg7: memref<2x16x48xbf16, #tpu.memory_space<vmem>>, %arg8: memref<1x48xf32, #tpu.memory_space<vmem>>, %arg9: memref<48x96xbf16, #tpu.memory_space<vmem>>, %arg10: memref<1x96xf32, #tpu.memory_space<vmem>>, %arg11: memref<96x48xbf16, #tpu.memory_space<vmem>>, %arg12: memref<1x48xf32, #tpu.memory_space<vmem>>, %arg13: memref<2x4x48xf32, #tpu.memory_space<vmem>>, %arg14: memref<2x4xf32, #tpu.memory_space<vmem>>, %arg15: memref<2x48xf32, #tpu.memory_space<vmem>>) attributes {dimension_semantics = [], scalar_prefetch = 0 : i64, scratch_operands = 0 : i64, tpu.core_type = #tpu.core_type<tc>} {
    %c0 = arith.constant 0 : index
    %c0_0 = arith.constant 0 : index
    %c0_1 = arith.constant 0 : index
    %0 = vector.load %arg0[%c0, %c0_0, %c0_1] : memref<2x4x48xf32, #tpu.memory_space<vmem>>, vector<1x4x48xf32>
    %1 = vector.shape_cast %0 : vector<1x4x48xf32> to vector<4x48xf32>
    %2 = arith.truncf %1 : vector<4x48xf32> to vector<4x48xbf16>
    %c0_2 = arith.constant 0 : index
    %c0_3 = arith.constant 0 : index
    %c0_4 = arith.constant 0 : index
    %3 = vector.load %arg1[%c0_2, %c0_3, %c0_4] : memref<2x48x8xbf16, #tpu.memory_space<vmem>>, vector<1x48x8xbf16>
    %4 = vector.shape_cast %3 : vector<1x48x8xbf16> to vector<48x8xbf16>
    %cst = arith.constant dense<0.000000e+00> : vector<4x8xf32>
    %5 = tpu.matmul %2, %4, %cst {dimension_numbers = #tpu.dot_dimension_numbers<[1], [0], [0], [1], [0, 0, 1, 1], [], []>} : vector<4x48xbf16>, vector<48x8xbf16>, vector<4x8xf32> -> vector<4x8xf32>
    %c0_5 = arith.constant 0 : index
    %c0_6 = arith.constant 0 : index
    %c0_7 = arith.constant 0 : index
    %6 = vector.load %arg2[%c0_5, %c0_6, %c0_7] : memref<2x1x8xf32, #tpu.memory_space<vmem>>, vector<1x1x8xf32>
    %7 = vector.shape_cast %6 : vector<1x1x8xf32> to vector<1x8xf32>
    %8 = vector.broadcast %7 : vector<1x8xf32> to vector<4x8xf32>
    %9 = arith.addf %5, %8 : vector<4x8xf32>
    %c0_8 = arith.constant 0 : index
    %c0_9 = arith.constant 0 : index
    %c0_10 = arith.constant 0 : index
    %10 = vector.load %arg3[%c0_8, %c0_9, %c0_10] : memref<2x48x8xbf16, #tpu.memory_space<vmem>>, vector<1x48x8xbf16>
    %11 = vector.shape_cast %10 : vector<1x48x8xbf16> to vector<48x8xbf16>
    %cst_11 = arith.constant dense<0.000000e+00> : vector<4x8xf32>
    %12 = tpu.matmul %2, %11, %cst_11 {dimension_numbers = #tpu.dot_dimension_numbers<[1], [0], [0], [1], [0, 0, 1, 1], [], []>} : vector<4x48xbf16>, vector<48x8xbf16>, vector<4x8xf32> -> vector<4x8xf32>
    %c0_12 = arith.constant 0 : index
    %c0_13 = arith.constant 0 : index
    %c0_14 = arith.constant 0 : index
    %13 = vector.load %arg4[%c0_12, %c0_13, %c0_14] : memref<2x1x8xf32, #tpu.memory_space<vmem>>, vector<1x1x8xf32>
    %14 = vector.shape_cast %13 : vector<1x1x8xf32> to vector<1x8xf32>
    %15 = vector.broadcast %14 : vector<1x8xf32> to vector<4x8xf32>
    %16 = arith.addf %12, %15 : vector<4x8xf32>
    %c0_15 = arith.constant 0 : index
    %c0_16 = arith.constant 0 : index
    %c0_17 = arith.constant 0 : index
    %17 = vector.load %arg5[%c0_15, %c0_16, %c0_17] : memref<2x48x16xbf16, #tpu.memory_space<vmem>>, vector<1x48x16xbf16>
    %18 = vector.shape_cast %17 : vector<1x48x16xbf16> to vector<48x16xbf16>
    %cst_18 = arith.constant dense<0.000000e+00> : vector<4x16xf32>
    %19 = tpu.matmul %2, %18, %cst_18 {dimension_numbers = #tpu.dot_dimension_numbers<[1], [0], [0], [1], [0, 0, 1, 1], [], []>} : vector<4x48xbf16>, vector<48x16xbf16>, vector<4x16xf32> -> vector<4x16xf32>
    %c0_19 = arith.constant 0 : index
    %c0_20 = arith.constant 0 : index
    %c0_21 = arith.constant 0 : index
    %20 = vector.load %arg6[%c0_19, %c0_20, %c0_21] : memref<2x1x16xf32, #tpu.memory_space<vmem>>, vector<1x1x16xf32>
    %21 = vector.shape_cast %20 : vector<1x1x16xf32> to vector<1x16xf32>
    %22 = vector.broadcast %21 : vector<1x16xf32> to vector<4x16xf32>
    %23 = arith.addf %19, %22 : vector<4x16xf32>
    %24 = arith.truncf %9 : vector<4x8xf32> to vector<4x8xbf16>
    %25 = arith.truncf %16 : vector<4x8xf32> to vector<4x8xbf16>
    %cst_22 = arith.constant dense<0.000000e+00> : vector<4x4xf32>
    %26 = tpu.matmul %24, %25, %cst_22 {dimension_numbers = #tpu.dot_dimension_numbers<[1], [1], [0], [0], [0, 0, 1, 0], [], []>} : vector<4x8xbf16>, vector<4x8xbf16>, vector<4x4xf32> -> vector<4x4xf32>
    %cst_23 = arith.constant dense<0xFF800000> : vector<4xf32>
    %27 = vector.multi_reduction <maximumf>, %26, %cst_23 [1] : vector<4x4xf32> to vector<4xf32>
    %28 = vector.shape_cast %27 : vector<4xf32> to vector<4x1xf32>
    %29 = vector.broadcast %28 : vector<4x1xf32> to vector<4x4xf32>
    %30 = arith.subf %26, %29 : vector<4x4xf32>
    %31 = math.exp %30 : vector<4x4xf32>
    %cst_24 = arith.constant dense<0.000000e+00> : vector<4xf32>
    %32 = vector.multi_reduction <add>, %31, %cst_24 [1] : vector<4x4xf32> to vector<4xf32>
    %33 = vector.shape_cast %32 : vector<4xf32> to vector<4x1xf32>
    %34 = vector.broadcast %33 : vector<4x1xf32> to vector<4x4xf32>
    %35 = arith.divf %31, %34 : vector<4x4xf32>
    %36 = vector.extract_strided_slice %35 {offsets = [0, 0], sizes = [1, 4], strides = [1, 1]} : vector<4x4xf32> to vector<1x4xf32>
    %37 = arith.truncf %35 : vector<4x4xf32> to vector<4x4xbf16>
    %38 = arith.truncf %23 : vector<4x16xf32> to vector<4x16xbf16>
    %cst_25 = arith.constant dense<0.000000e+00> : vector<4x16xf32>
    %39 = tpu.matmul %37, %38, %cst_25 {dimension_numbers = #tpu.dot_dimension_numbers<[1], [0], [0], [1], [0, 0, 1, 1], [], []>} : vector<4x4xbf16>, vector<4x16xbf16>, vector<4x16xf32> -> vector<4x16xf32>
    %cst_26 = arith.constant 3.000000e+00 : f32
    %40 = vector.broadcast %cst_26 : f32 to vector<4x16xf32>
    %41 = arith.addf %39, %40 : vector<4x16xf32>
    %cst_27 = arith.constant 0.000000e+00 : f32
    %cst_28 = arith.constant 6.000000e+00 : f32
    %42 = vector.broadcast %cst_27 : f32 to vector<4x16xf32>
    %43 = arith.maximumf %42, %41 : vector<4x16xf32>
    %44 = vector.broadcast %cst_28 : f32 to vector<4x16xf32>
    %45 = arith.minimumf %44, %43 : vector<4x16xf32>
    %46 = arith.mulf %39, %45 : vector<4x16xf32>
    %cst_29 = arith.constant 0.166666672 : f32
    %47 = vector.broadcast %cst_29 : f32 to vector<4x16xf32>
    %48 = arith.mulf %46, %47 : vector<4x16xf32>
    %c0_30 = arith.constant 0 : index
    %c0_31 = arith.constant 0 : index
    %c0_32 = arith.constant 0 : index
    %49 = vector.load %arg7[%c0_30, %c0_31, %c0_32] : memref<2x16x48xbf16, #tpu.memory_space<vmem>>, vector<1x16x48xbf16>
    %50 = vector.shape_cast %49 : vector<1x16x48xbf16> to vector<16x48xbf16>
    %51 = arith.truncf %48 : vector<4x16xf32> to vector<4x16xbf16>
    %cst_33 = arith.constant dense<0.000000e+00> : vector<4x48xf32>
    %52 = tpu.matmul %51, %50, %cst_33 {dimension_numbers = #tpu.dot_dimension_numbers<[1], [0], [0], [1], [0, 0, 1, 1], [], []>} : vector<4x16xbf16>, vector<16x48xbf16>, vector<4x48xf32> -> vector<4x48xf32>
    %c1 = arith.constant 1 : index
    %c0_34 = arith.constant 0 : index
    %c0_35 = arith.constant 0 : index
    %53 = vector.load %arg1[%c1, %c0_34, %c0_35] : memref<2x48x8xbf16, #tpu.memory_space<vmem>>, vector<1x48x8xbf16>
    %54 = vector.shape_cast %53 : vector<1x48x8xbf16> to vector<48x8xbf16>
    %cst_36 = arith.constant dense<0.000000e+00> : vector<4x8xf32>
    %55 = tpu.matmul %2, %54, %cst_36 {dimension_numbers = #tpu.dot_dimension_numbers<[1], [0], [0], [1], [0, 0, 1, 1], [], []>} : vector<4x48xbf16>, vector<48x8xbf16>, vector<4x8xf32> -> vector<4x8xf32>
    %c1_37 = arith.constant 1 : index
    %c0_38 = arith.constant 0 : index
    %c0_39 = arith.constant 0 : index
    %56 = vector.load %arg2[%c1_37, %c0_38, %c0_39] : memref<2x1x8xf32, #tpu.memory_space<vmem>>, vector<1x1x8xf32>
    %57 = vector.shape_cast %56 : vector<1x1x8xf32> to vector<1x8xf32>
    %58 = vector.broadcast %57 : vector<1x8xf32> to vector<4x8xf32>
    %59 = arith.addf %55, %58 : vector<4x8xf32>
    %c1_40 = arith.constant 1 : index
    %c0_41 = arith.constant 0 : index
    %c0_42 = arith.constant 0 : index
    %60 = vector.load %arg3[%c1_40, %c0_41, %c0_42] : memref<2x48x8xbf16, #tpu.memory_space<vmem>>, vector<1x48x8xbf16>
    %61 = vector.shape_cast %60 : vector<1x48x8xbf16> to vector<48x8xbf16>
    %cst_43 = arith.constant dense<0.000000e+00> : vector<4x8xf32>
    %62 = tpu.matmul %2, %61, %cst_43 {dimension_numbers = #tpu.dot_dimension_numbers<[1], [0], [0], [1], [0, 0, 1, 1], [], []>} : vector<4x48xbf16>, vector<48x8xbf16>, vector<4x8xf32> -> vector<4x8xf32>
    %c1_44 = arith.constant 1 : index
    %c0_45 = arith.constant 0 : index
    %c0_46 = arith.constant 0 : index
    %63 = vector.load %arg4[%c1_44, %c0_45, %c0_46] : memref<2x1x8xf32, #tpu.memory_space<vmem>>, vector<1x1x8xf32>
    %64 = vector.shape_cast %63 : vector<1x1x8xf32> to vector<1x8xf32>
    %65 = vector.broadcast %64 : vector<1x8xf32> to vector<4x8xf32>
    %66 = arith.addf %62, %65 : vector<4x8xf32>
    %c1_47 = arith.constant 1 : index
    %c0_48 = arith.constant 0 : index
    %c0_49 = arith.constant 0 : index
    %67 = vector.load %arg5[%c1_47, %c0_48, %c0_49] : memref<2x48x16xbf16, #tpu.memory_space<vmem>>, vector<1x48x16xbf16>
    %68 = vector.shape_cast %67 : vector<1x48x16xbf16> to vector<48x16xbf16>
    %cst_50 = arith.constant dense<0.000000e+00> : vector<4x16xf32>
    %69 = tpu.matmul %2, %68, %cst_50 {dimension_numbers = #tpu.dot_dimension_numbers<[1], [0], [0], [1], [0, 0, 1, 1], [], []>} : vector<4x48xbf16>, vector<48x16xbf16>, vector<4x16xf32> -> vector<4x16xf32>
    %c1_51 = arith.constant 1 : index
    %c0_52 = arith.constant 0 : index
    %c0_53 = arith.constant 0 : index
    %70 = vector.load %arg6[%c1_51, %c0_52, %c0_53] : memref<2x1x16xf32, #tpu.memory_space<vmem>>, vector<1x1x16xf32>
    %71 = vector.shape_cast %70 : vector<1x1x16xf32> to vector<1x16xf32>
    %72 = vector.broadcast %71 : vector<1x16xf32> to vector<4x16xf32>
    %73 = arith.addf %69, %72 : vector<4x16xf32>
    %74 = arith.truncf %59 : vector<4x8xf32> to vector<4x8xbf16>
    %75 = arith.truncf %66 : vector<4x8xf32> to vector<4x8xbf16>
    %cst_54 = arith.constant dense<0.000000e+00> : vector<4x4xf32>
    %76 = tpu.matmul %74, %75, %cst_54 {dimension_numbers = #tpu.dot_dimension_numbers<[1], [1], [0], [0], [0, 0, 1, 0], [], []>} : vector<4x8xbf16>, vector<4x8xbf16>, vector<4x4xf32> -> vector<4x4xf32>
    %cst_55 = arith.constant dense<0xFF800000> : vector<4xf32>
    %77 = vector.multi_reduction <maximumf>, %76, %cst_55 [1] : vector<4x4xf32> to vector<4xf32>
    %78 = vector.shape_cast %77 : vector<4xf32> to vector<4x1xf32>
    %79 = vector.broadcast %78 : vector<4x1xf32> to vector<4x4xf32>
    %80 = arith.subf %76, %79 : vector<4x4xf32>
    %81 = math.exp %80 : vector<4x4xf32>
    %cst_56 = arith.constant dense<0.000000e+00> : vector<4xf32>
    %82 = vector.multi_reduction <add>, %81, %cst_56 [1] : vector<4x4xf32> to vector<4xf32>
    %83 = vector.shape_cast %82 : vector<4xf32> to vector<4x1xf32>
    %84 = vector.broadcast %83 : vector<4x1xf32> to vector<4x4xf32>
    %85 = arith.divf %81, %84 : vector<4x4xf32>
    %86 = vector.extract_strided_slice %85 {offsets = [0, 0], sizes = [1, 4], strides = [1, 1]} : vector<4x4xf32> to vector<1x4xf32>
    %87 = arith.addf %36, %86 : vector<1x4xf32>
    %88 = arith.truncf %85 : vector<4x4xf32> to vector<4x4xbf16>
    %89 = arith.truncf %73 : vector<4x16xf32> to vector<4x16xbf16>
    %cst_57 = arith.constant dense<0.000000e+00> : vector<4x16xf32>
    %90 = tpu.matmul %88, %89, %cst_57 {dimension_numbers = #tpu.dot_dimension_numbers<[1], [0], [0], [1], [0, 0, 1, 1], [], []>} : vector<4x4xbf16>, vector<4x16xbf16>, vector<4x16xf32> -> vector<4x16xf32>
    %cst_58 = arith.constant 3.000000e+00 : f32
    %91 = vector.broadcast %cst_58 : f32 to vector<4x16xf32>
    %92 = arith.addf %90, %91 : vector<4x16xf32>
    %cst_59 = arith.constant 0.000000e+00 : f32
    %cst_60 = arith.constant 6.000000e+00 : f32
    %93 = vector.broadcast %cst_59 : f32 to vector<4x16xf32>
    %94 = arith.maximumf %93, %92 : vector<4x16xf32>
    %95 = vector.broadcast %cst_60 : f32 to vector<4x16xf32>
    %96 = arith.minimumf %95, %94 : vector<4x16xf32>
    %97 = arith.mulf %90, %96 : vector<4x16xf32>
    %cst_61 = arith.constant 0.166666672 : f32
    %98 = vector.broadcast %cst_61 : f32 to vector<4x16xf32>
    %99 = arith.mulf %97, %98 : vector<4x16xf32>
    %c1_62 = arith.constant 1 : index
    %c0_63 = arith.constant 0 : index
    %c0_64 = arith.constant 0 : index
    %100 = vector.load %arg7[%c1_62, %c0_63, %c0_64] : memref<2x16x48xbf16, #tpu.memory_space<vmem>>, vector<1x16x48xbf16>
    %101 = vector.shape_cast %100 : vector<1x16x48xbf16> to vector<16x48xbf16>
    %102 = arith.truncf %99 : vector<4x16xf32> to vector<4x16xbf16>
    %cst_65 = arith.constant dense<0.000000e+00> : vector<4x48xf32>
    %103 = tpu.matmul %102, %101, %cst_65 {dimension_numbers = #tpu.dot_dimension_numbers<[1], [0], [0], [1], [0, 0, 1, 1], [], []>} : vector<4x16xbf16>, vector<16x48xbf16>, vector<4x48xf32> -> vector<4x48xf32>
    %104 = arith.addf %52, %103 : vector<4x48xf32>
    %c0_66 = arith.constant 0 : index
    %c0_67 = arith.constant 0 : index
    %105 = vector.load %arg8[%c0_66, %c0_67] : memref<1x48xf32, #tpu.memory_space<vmem>>, vector<1x48xf32>
    %106 = vector.broadcast %105 : vector<1x48xf32> to vector<4x48xf32>
    %107 = arith.addf %104, %106 : vector<4x48xf32>
    %cst_68 = arith.constant 5.000000e-01 : f32
    %108 = vector.broadcast %cst_68 : f32 to vector<1x4xf32>
    %109 = arith.mulf %87, %108 : vector<1x4xf32>
    %c0_69 = arith.constant 0 : index
    %c0_70 = arith.constant 0 : index
    %110 = vector.load %arg14[%c0_69, %c0_70] : memref<2x4xf32, #tpu.memory_space<vmem>>, vector<1x4xf32>
    tpu.vector_store %arg14[%c0_69, %c0_70], %109 {strides = array<i32>} : memref<2x4xf32, #tpu.memory_space<vmem>>, vector<1x4xf32>,
    %111 = arith.addf %1, %107 : vector<4x48xf32>
    %c0_71 = arith.constant 0 : index
    %c0_72 = arith.constant 0 : index
    %112 = vector.load %arg9[%c0_71, %c0_72] : memref<48x96xbf16, #tpu.memory_space<vmem>>, vector<48x96xbf16>
    %113 = arith.truncf %111 : vector<4x48xf32> to vector<4x48xbf16>
    %cst_73 = arith.constant dense<0.000000e+00> : vector<4x96xf32>
    %114 = tpu.matmul %113, %112, %cst_73 {dimension_numbers = #tpu.dot_dimension_numbers<[1], [0], [0], [1], [0, 0, 1, 1], [], []>} : vector<4x48xbf16>, vector<48x96xbf16>, vector<4x96xf32> -> vector<4x96xf32>
    %c0_74 = arith.constant 0 : index
    %c0_75 = arith.constant 0 : index
    %115 = vector.load %arg10[%c0_74, %c0_75] : memref<1x96xf32, #tpu.memory_space<vmem>>, vector<1x96xf32>
    %116 = vector.broadcast %115 : vector<1x96xf32> to vector<4x96xf32>
    %117 = arith.addf %114, %116 : vector<4x96xf32>
    %cst_76 = arith.constant 3.000000e+00 : f32
    %118 = vector.broadcast %cst_76 : f32 to vector<4x96xf32>
    %119 = arith.addf %117, %118 : vector<4x96xf32>
    %cst_77 = arith.constant 0.000000e+00 : f32
    %cst_78 = arith.constant 6.000000e+00 : f32
    %120 = vector.broadcast %cst_77 : f32 to vector<4x96xf32>
    %121 = arith.maximumf %120, %119 : vector<4x96xf32>
    %122 = vector.broadcast %cst_78 : f32 to vector<4x96xf32>
    %123 = arith.minimumf %122, %121 : vector<4x96xf32>
    %124 = arith.mulf %117, %123 : vector<4x96xf32>
    %cst_79 = arith.constant 0.166666672 : f32
    %125 = vector.broadcast %cst_79 : f32 to vector<4x96xf32>
    %126 = arith.mulf %124, %125 : vector<4x96xf32>
    %c0_80 = arith.constant 0 : index
    %c0_81 = arith.constant 0 : index
    %127 = vector.load %arg11[%c0_80, %c0_81] : memref<96x48xbf16, #tpu.memory_space<vmem>>, vector<96x48xbf16>
    %128 = arith.truncf %126 : vector<4x96xf32> to vector<4x96xbf16>
    %cst_82 = arith.constant dense<0.000000e+00> : vector<4x48xf32>
    %129 = tpu.matmul %128, %127, %cst_82 {dimension_numbers = #tpu.dot_dimension_numbers<[1], [0], [0], [1], [0, 0, 1, 1], [], []>} : vector<4x96xbf16>, vector<96x48xbf16>, vector<4x48xf32> -> vector<4x48xf32>
    %c0_83 = arith.constant 0 : index
    %c0_84 = arith.constant 0 : index
    %130 = vector.load %arg12[%c0_83, %c0_84] : memref<1x48xf32, #tpu.memory_space<vmem>>, vector<1x48xf32>
    %131 = vector.broadcast %130 : vector<1x48xf32> to vector<4x48xf32>
    %132 = arith.addf %129, %131 : vector<4x48xf32>
    %133 = arith.addf %111, %132 : vector<4x48xf32>
    %c0_85 = arith.constant 0 : index
    %c0_86 = arith.constant 0 : index
    %c0_87 = arith.constant 0 : index
    %134 = vector.load %arg13[%c0_85, %c0_86, %c0_87] : memref<2x4x48xf32, #tpu.memory_space<vmem>>, vector<1x4x48xf32>
    %135 = vector.shape_cast %134 : vector<1x4x48xf32> to vector<4x48xf32>
    %136 = vector.shape_cast %133 : vector<4x48xf32> to vector<1x4x48xf32>
    tpu.vector_store %arg13[%c0_85, %c0_86, %c0_87], %136 {strides = array<i32>} : memref<2x4x48xf32, #tpu.memory_space<vmem>>, vector<1x4x48xf32>,
    %137 = vector.extract_strided_slice %107 {offsets = [3, 0], sizes = [1, 48], strides = [1, 1]} : vector<4x48xf32> to vector<1x48xf32>
    %138 = vector.extract_strided_slice %132 {offsets = [3, 0], sizes = [1, 48], strides = [1, 1]} : vector<4x48xf32> to vector<1x48xf32>
    %139 = arith.addf %137, %138 : vector<1x48xf32>
    %c0_88 = arith.constant 0 : index
    %c0_89 = arith.constant 0 : index
    %140 = vector.load %arg15[%c0_88, %c0_89] : memref<2x48xf32, #tpu.memory_space<vmem>>, vector<1x48xf32>
    tpu.vector_store %arg15[%c0_88, %c0_89], %139 {strides = array<i32>} : memref<2x48xf32, #tpu.memory_space<vmem>>, vector<1x48xf32>,
    %c1_90 = arith.constant 1 : index
    %c0_91 = arith.constant 0 : index
    %c0_92 = arith.constant 0 : index
    %141 = vector.load %arg0[%c1_90, %c0_91, %c0_92] : memref<2x4x48xf32, #tpu.memory_space<vmem>>, vector<1x4x48xf32>
    %142 = vector.shape_cast %141 : vector<1x4x48xf32> to vector<4x48xf32>
    %143 = arith.truncf %142 : vector<4x48xf32> to vector<4x48xbf16>
    %c0_93 = arith.constant 0 : index
    %c0_94 = arith.constant 0 : index
    %c0_95 = arith.constant 0 : index
    %144 = vector.load %arg1[%c0_93, %c0_94, %c0_95] : memref<2x48x8xbf16, #tpu.memory_space<vmem>>, vector<1x48x8xbf16>
    %145 = vector.shape_cast %144 : vector<1x48x8xbf16> to vector<48x8xbf16>
    %cst_96 = arith.constant dense<0.000000e+00> : vector<4x8xf32>
    %146 = tpu.matmul %143, %145, %cst_96 {dimension_numbers = #tpu.dot_dimension_numbers<[1], [0], [0], [1], [0, 0, 1, 1], [], []>} : vector<4x48xbf16>, vector<48x8xbf16>, vector<4x8xf32> -> vector<4x8xf32>
    %c0_97 = arith.constant 0 : index
    %c0_98 = arith.constant 0 : index
    %c0_99 = arith.constant 0 : index
    %147 = vector.load %arg2[%c0_97, %c0_98, %c0_99] : memref<2x1x8xf32, #tpu.memory_space<vmem>>, vector<1x1x8xf32>
    %148 = vector.shape_cast %147 : vector<1x1x8xf32> to vector<1x8xf32>
    %149 = vector.broadcast %148 : vector<1x8xf32> to vector<4x8xf32>
    %150 = arith.addf %146, %149 : vector<4x8xf32>
    %c0_100 = arith.constant 0 : index
    %c0_101 = arith.constant 0 : index
    %c0_102 = arith.constant 0 : index
    %151 = vector.load %arg3[%c0_100, %c0_101, %c0_102] : memref<2x48x8xbf16, #tpu.memory_space<vmem>>, vector<1x48x8xbf16>
    %152 = vector.shape_cast %151 : vector<1x48x8xbf16> to vector<48x8xbf16>
    %cst_103 = arith.constant dense<0.000000e+00> : vector<4x8xf32>
    %153 = tpu.matmul %143, %152, %cst_103 {dimension_numbers = #tpu.dot_dimension_numbers<[1], [0], [0], [1], [0, 0, 1, 1], [], []>} : vector<4x48xbf16>, vector<48x8xbf16>, vector<4x8xf32> -> vector<4x8xf32>
    %c0_104 = arith.constant 0 : index
    %c0_105 = arith.constant 0 : index
    %c0_106 = arith.constant 0 : index
    %154 = vector.load %arg4[%c0_104, %c0_105, %c0_106] : memref<2x1x8xf32, #tpu.memory_space<vmem>>, vector<1x1x8xf32>
    %155 = vector.shape_cast %154 : vector<1x1x8xf32> to vector<1x8xf32>
    %156 = vector.broadcast %155 : vector<1x8xf32> to vector<4x8xf32>
    %157 = arith.addf %153, %156 : vector<4x8xf32>
    %c0_107 = arith.constant 0 : index
    %c0_108 = arith.constant 0 : index
    %c0_109 = arith.constant 0 : index
    %158 = vector.load %arg5[%c0_107, %c0_108, %c0_109] : memref<2x48x16xbf16, #tpu.memory_space<vmem>>, vector<1x48x16xbf16>
    %159 = vector.shape_cast %158 : vector<1x48x16xbf16> to vector<48x16xbf16>
    %cst_110 = arith.constant dense<0.000000e+00> : vector<4x16xf32>
    %160 = tpu.matmul %143, %159, %cst_110 {dimension_numbers = #tpu.dot_dimension_numbers<[1], [0], [0], [1], [0, 0, 1, 1], [], []>} : vector<4x48xbf16>, vector<48x16xbf16>, vector<4x16xf32> -> vector<4x16xf32>
    %c0_111 = arith.constant 0 : index
    %c0_112 = arith.constant 0 : index
    %c0_113 = arith.constant 0 : index
    %161 = vector.load %arg6[%c0_111, %c0_112, %c0_113] : memref<2x1x16xf32, #tpu.memory_space<vmem>>, vector<1x1x16xf32>
    %162 = vector.shape_cast %161 : vector<1x1x16xf32> to vector<1x16xf32>
    %163 = vector.broadcast %162 : vector<1x16xf32> to vector<4x16xf32>
    %164 = arith.addf %160, %163 : vector<4x16xf32>
    %165 = arith.truncf %150 : vector<4x8xf32> to vector<4x8xbf16>
    %166 = arith.truncf %157 : vector<4x8xf32> to vector<4x8xbf16>
    %cst_114 = arith.constant dense<0.000000e+00> : vector<4x4xf32>
    %167 = tpu.matmul %165, %166, %cst_114 {dimension_numbers = #tpu.dot_dimension_numbers<[1], [1], [0], [0], [0, 0, 1, 0], [], []>} : vector<4x8xbf16>, vector<4x8xbf16>, vector<4x4xf32> -> vector<4x4xf32>
    %cst_115 = arith.constant dense<0xFF800000> : vector<4xf32>
    %168 = vector.multi_reduction <maximumf>, %167, %cst_115 [1] : vector<4x4xf32> to vector<4xf32>
    %169 = vector.shape_cast %168 : vector<4xf32> to vector<4x1xf32>
    %170 = vector.broadcast %169 : vector<4x1xf32> to vector<4x4xf32>
    %171 = arith.subf %167, %170 : vector<4x4xf32>
    %172 = math.exp %171 : vector<4x4xf32>
    %cst_116 = arith.constant dense<0.000000e+00> : vector<4xf32>
    %173 = vector.multi_reduction <add>, %172, %cst_116 [1] : vector<4x4xf32> to vector<4xf32>
    %174 = vector.shape_cast %173 : vector<4xf32> to vector<4x1xf32>
    %175 = vector.broadcast %174 : vector<4x1xf32> to vector<4x4xf32>
    %176 = arith.divf %172, %175 : vector<4x4xf32>
    %177 = vector.extract_strided_slice %176 {offsets = [0, 0], sizes = [1, 4], strides = [1, 1]} : vector<4x4xf32> to vector<1x4xf32>
    %178 = arith.truncf %176 : vector<4x4xf32> to vector<4x4xbf16>
    %179 = arith.truncf %164 : vector<4x16xf32> to vector<4x16xbf16>
    %cst_117 = arith.constant dense<0.000000e+00> : vector<4x16xf32>
    %180 = tpu.matmul %178, %179, %cst_117 {dimension_numbers = #tpu.dot_dimension_numbers<[1], [0], [0], [1], [0, 0, 1, 1], [], []>} : vector<4x4xbf16>, vector<4x16xbf16>, vector<4x16xf32> -> vector<4x16xf32>
    %cst_118 = arith.constant 3.000000e+00 : f32
    %181 = vector.broadcast %cst_118 : f32 to vector<4x16xf32>
    %182 = arith.addf %180, %181 : vector<4x16xf32>
    %cst_119 = arith.constant 0.000000e+00 : f32
    %cst_120 = arith.constant 6.000000e+00 : f32
    %183 = vector.broadcast %cst_119 : f32 to vector<4x16xf32>
    %184 = arith.maximumf %183, %182 : vector<4x16xf32>
    %185 = vector.broadcast %cst_120 : f32 to vector<4x16xf32>
    %186 = arith.minimumf %185, %184 : vector<4x16xf32>
    %187 = arith.mulf %180, %186 : vector<4x16xf32>
    %cst_121 = arith.constant 0.166666672 : f32
    %188 = vector.broadcast %cst_121 : f32 to vector<4x16xf32>
    %189 = arith.mulf %187, %188 : vector<4x16xf32>
    %c0_122 = arith.constant 0 : index
    %c0_123 = arith.constant 0 : index
    %c0_124 = arith.constant 0 : index
    %190 = vector.load %arg7[%c0_122, %c0_123, %c0_124] : memref<2x16x48xbf16, #tpu.memory_space<vmem>>, vector<1x16x48xbf16>
    %191 = vector.shape_cast %190 : vector<1x16x48xbf16> to vector<16x48xbf16>
    %192 = arith.truncf %189 : vector<4x16xf32> to vector<4x16xbf16>
    %cst_125 = arith.constant dense<0.000000e+00> : vector<4x48xf32>
    %193 = tpu.matmul %192, %191, %cst_125 {dimension_numbers = #tpu.dot_dimension_numbers<[1], [0], [0], [1], [0, 0, 1, 1], [], []>} : vector<4x16xbf16>, vector<16x48xbf16>, vector<4x48xf32> -> vector<4x48xf32>
    %c1_126 = arith.constant 1 : index
    %c0_127 = arith.constant 0 : index
    %c0_128 = arith.constant 0 : index
    %194 = vector.load %arg1[%c1_126, %c0_127, %c0_128] : memref<2x48x8xbf16, #tpu.memory_space<vmem>>, vector<1x48x8xbf16>
    %195 = vector.shape_cast %194 : vector<1x48x8xbf16> to vector<48x8xbf16>
    %cst_129 = arith.constant dense<0.000000e+00> : vector<4x8xf32>
    %196 = tpu.matmul %143, %195, %cst_129 {dimension_numbers = #tpu.dot_dimension_numbers<[1], [0], [0], [1], [0, 0, 1, 1], [], []>} : vector<4x48xbf16>, vector<48x8xbf16>, vector<4x8xf32> -> vector<4x8xf32>
    %c1_130 = arith.constant 1 : index
    %c0_131 = arith.constant 0 : index
    %c0_132 = arith.constant 0 : index
    %197 = vector.load %arg2[%c1_130, %c0_131, %c0_132] : memref<2x1x8xf32, #tpu.memory_space<vmem>>, vector<1x1x8xf32>
    %198 = vector.shape_cast %197 : vector<1x1x8xf32> to vector<1x8xf32>
    %199 = vector.broadcast %198 : vector<1x8xf32> to vector<4x8xf32>
    %200 = arith.addf %196, %199 : vector<4x8xf32>
    %c1_133 = arith.constant 1 : index
    %c0_134 = arith.constant 0 : index
    %c0_135 = arith.constant 0 : index
    %201 = vector.load %arg3[%c1_133, %c0_134, %c0_135] : memref<2x48x8xbf16, #tpu.memory_space<vmem>>, vector<1x48x8xbf16>
    %202 = vector.shape_cast %201 : vector<1x48x8xbf16> to vector<48x8xbf16>
    %cst_136 = arith.constant dense<0.000000e+00> : vector<4x8xf32>
    %203 = tpu.matmul %143, %202, %cst_136 {dimension_numbers = #tpu.dot_dimension_numbers<[1], [0], [0], [1], [0, 0, 1, 1], [], []>} : vector<4x48xbf16>, vector<48x8xbf16>, vector<4x8xf32> -> vector<4x8xf32>
    %c1_137 = arith.constant 1 : index
    %c0_138 = arith.constant 0 : index
    %c0_139 = arith.constant 0 : index
    %204 = vector.load %arg4[%c1_137, %c0_138, %c0_139] : memref<2x1x8xf32, #tpu.memory_space<vmem>>, vector<1x1x8xf32>
    %205 = vector.shape_cast %204 : vector<1x1x8xf32> to vector<1x8xf32>
    %206 = vector.broadcast %205 : vector<1x8xf32> to vector<4x8xf32>
    %207 = arith.addf %203, %206 : vector<4x8xf32>
    %c1_140 = arith.constant 1 : index
    %c0_141 = arith.constant 0 : index
    %c0_142 = arith.constant 0 : index
    %208 = vector.load %arg5[%c1_140, %c0_141, %c0_142] : memref<2x48x16xbf16, #tpu.memory_space<vmem>>, vector<1x48x16xbf16>
    %209 = vector.shape_cast %208 : vector<1x48x16xbf16> to vector<48x16xbf16>
    %cst_143 = arith.constant dense<0.000000e+00> : vector<4x16xf32>
    %210 = tpu.matmul %143, %209, %cst_143 {dimension_numbers = #tpu.dot_dimension_numbers<[1], [0], [0], [1], [0, 0, 1, 1], [], []>} : vector<4x48xbf16>, vector<48x16xbf16>, vector<4x16xf32> -> vector<4x16xf32>
    %c1_144 = arith.constant 1 : index
    %c0_145 = arith.constant 0 : index
    %c0_146 = arith.constant 0 : index
    %211 = vector.load %arg6[%c1_144, %c0_145, %c0_146] : memref<2x1x16xf32, #tpu.memory_space<vmem>>, vector<1x1x16xf32>
    %212 = vector.shape_cast %211 : vector<1x1x16xf32> to vector<1x16xf32>
    %213 = vector.broadcast %212 : vector<1x16xf32> to vector<4x16xf32>
    %214 = arith.addf %210, %213 : vector<4x16xf32>
    %215 = arith.truncf %200 : vector<4x8xf32> to vector<4x8xbf16>
    %216 = arith.truncf %207 : vector<4x8xf32> to vector<4x8xbf16>
    %cst_147 = arith.constant dense<0.000000e+00> : vector<4x4xf32>
    %217 = tpu.matmul %215, %216, %cst_147 {dimension_numbers = #tpu.dot_dimension_numbers<[1], [1], [0], [0], [0, 0, 1, 0], [], []>} : vector<4x8xbf16>, vector<4x8xbf16>, vector<4x4xf32> -> vector<4x4xf32>
    %cst_148 = arith.constant dense<0xFF800000> : vector<4xf32>
    %218 = vector.multi_reduction <maximumf>, %217, %cst_148 [1] : vector<4x4xf32> to vector<4xf32>
    %219 = vector.shape_cast %218 : vector<4xf32> to vector<4x1xf32>
    %220 = vector.broadcast %219 : vector<4x1xf32> to vector<4x4xf32>
    %221 = arith.subf %217, %220 : vector<4x4xf32>
    %222 = math.exp %221 : vector<4x4xf32>
    %cst_149 = arith.constant dense<0.000000e+00> : vector<4xf32>
    %223 = vector.multi_reduction <add>, %222, %cst_149 [1] : vector<4x4xf32> to vector<4xf32>
    %224 = vector.shape_cast %223 : vector<4xf32> to vector<4x1xf32>
    %225 = vector.broadcast %224 : vector<4x1xf32> to vector<4x4xf32>
    %226 = arith.divf %222, %225 : vector<4x4xf32>
    %227 = vector.extract_strided_slice %226 {offsets = [0, 0], sizes = [1, 4], strides = [1, 1]} : vector<4x4xf32> to vector<1x4xf32>
    %228 = arith.addf %177, %227 : vector<1x4xf32>
    %229 = arith.truncf %226 : vector<4x4xf32> to vector<4x4xbf16>
    %230 = arith.truncf %214 : vector<4x16xf32> to vector<4x16xbf16>
    %cst_150 = arith.constant dense<0.000000e+00> : vector<4x16xf32>
    %231 = tpu.matmul %229, %230, %cst_150 {dimension_numbers = #tpu.dot_dimension_numbers<[1], [0], [0], [1], [0, 0, 1, 1], [], []>} : vector<4x4xbf16>, vector<4x16xbf16>, vector<4x16xf32> -> vector<4x16xf32>
    %cst_151 = arith.constant 3.000000e+00 : f32
    %232 = vector.broadcast %cst_151 : f32 to vector<4x16xf32>
    %233 = arith.addf %231, %232 : vector<4x16xf32>
    %cst_152 = arith.constant 0.000000e+00 : f32
    %cst_153 = arith.constant 6.000000e+00 : f32
    %234 = vector.broadcast %cst_152 : f32 to vector<4x16xf32>
    %235 = arith.maximumf %234, %233 : vector<4x16xf32>
    %236 = vector.broadcast %cst_153 : f32 to vector<4x16xf32>
    %237 = arith.minimumf %236, %235 : vector<4x16xf32>
    %238 = arith.mulf %231, %237 : vector<4x16xf32>
    %cst_154 = arith.constant 0.166666672 : f32
    %239 = vector.broadcast %cst_154 : f32 to vector<4x16xf32>
    %240 = arith.mulf %238, %239 : vector<4x16xf32>
    %c1_155 = arith.constant 1 : index
    %c0_156 = arith.constant 0 : index
    %c0_157 = arith.constant 0 : index
    %241 = vector.load %arg7[%c1_155, %c0_156, %c0_157] : memref<2x16x48xbf16, #tpu.memory_space<vmem>>, vector<1x16x48xbf16>
    %242 = vector.shape_cast %241 : vector<1x16x48xbf16> to vector<16x48xbf16>
    %243 = arith.truncf %240 : vector<4x16xf32> to vector<4x16xbf16>
    %cst_158 = arith.constant dense<0.000000e+00> : vector<4x48xf32>
    %244 = tpu.matmul %243, %242, %cst_158 {dimension_numbers = #tpu.dot_dimension_numbers<[1], [0], [0], [1], [0, 0, 1, 1], [], []>} : vector<4x16xbf16>, vector<16x48xbf16>, vector<4x48xf32> -> vector<4x48xf32>
    %245 = arith.addf %193, %244 : vector<4x48xf32>
    %c0_159 = arith.constant 0 : index
    %c0_160 = arith.constant 0 : index
    %246 = vector.load %arg8[%c0_159, %c0_160] : memref<1x48xf32, #tpu.memory_space<vmem>>, vector<1x48xf32>
    %247 = vector.broadcast %246 : vector<1x48xf32> to vector<4x48xf32>
    %248 = arith.addf %245, %247 : vector<4x48xf32>
    %cst_161 = arith.constant 5.000000e-01 : f32
    %249 = vector.broadcast %cst_161 : f32 to vector<1x4xf32>
    %250 = arith.mulf %228, %249 : vector<1x4xf32>
    %c1_162 = arith.constant 1 : index
    %c0_163 = arith.constant 0 : index
    %251 = vector.load %arg14[%c1_162, %c0_163] : memref<2x4xf32, #tpu.memory_space<vmem>>, vector<1x4xf32>
    tpu.vector_store %arg14[%c1_162, %c0_163], %250 {strides = array<i32>} : memref<2x4xf32, #tpu.memory_space<vmem>>, vector<1x4xf32>,
    %252 = arith.addf %142, %248 : vector<4x48xf32>
    %c0_164 = arith.constant 0 : index
    %c0_165 = arith.constant 0 : index
    %253 = vector.load %arg9[%c0_164, %c0_165] : memref<48x96xbf16, #tpu.memory_space<vmem>>, vector<48x96xbf16>
    %254 = arith.truncf %252 : vector<4x48xf32> to vector<4x48xbf16>
    %cst_166 = arith.constant dense<0.000000e+00> : vector<4x96xf32>
    %255 = tpu.matmul %254, %253, %cst_166 {dimension_numbers = #tpu.dot_dimension_numbers<[1], [0], [0], [1], [0, 0, 1, 1], [], []>} : vector<4x48xbf16>, vector<48x96xbf16>, vector<4x96xf32> -> vector<4x96xf32>
    %c0_167 = arith.constant 0 : index
    %c0_168 = arith.constant 0 : index
    %256 = vector.load %arg10[%c0_167, %c0_168] : memref<1x96xf32, #tpu.memory_space<vmem>>, vector<1x96xf32>
    %257 = vector.broadcast %256 : vector<1x96xf32> to vector<4x96xf32>
    %258 = arith.addf %255, %257 : vector<4x96xf32>
    %cst_169 = arith.constant 3.000000e+00 : f32
    %259 = vector.broadcast %cst_169 : f32 to vector<4x96xf32>
    %260 = arith.addf %258, %259 : vector<4x96xf32>
    %cst_170 = arith.constant 0.000000e+00 : f32
    %cst_171 = arith.constant 6.000000e+00 : f32
    %261 = vector.broadcast %cst_170 : f32 to vector<4x96xf32>
    %262 = arith.maximumf %261, %260 : vector<4x96xf32>
    %263 = vector.broadcast %cst_171 : f32 to vector<4x96xf32>
    %264 = arith.minimumf %263, %262 : vector<4x96xf32>
    %265 = arith.mulf %258, %264 : vector<4x96xf32>
    %cst_172 = arith.constant 0.166666672 : f32
    %266 = vector.broadcast %cst_172 : f32 to vector<4x96xf32>
    %267 = arith.mulf %265, %266 : vector<4x96xf32>
    %c0_173 = arith.constant 0 : index
    %c0_174 = arith.constant 0 : index
    %268 = vector.load %arg11[%c0_173, %c0_174] : memref<96x48xbf16, #tpu.memory_space<vmem>>, vector<96x48xbf16>
    %269 = arith.truncf %267 : vector<4x96xf32> to vector<4x96xbf16>
    %cst_175 = arith.constant dense<0.000000e+00> : vector<4x48xf32>
    %270 = tpu.matmul %269, %268, %cst_175 {dimension_numbers = #tpu.dot_dimension_numbers<[1], [0], [0], [1], [0, 0, 1, 1], [], []>} : vector<4x96xbf16>, vector<96x48xbf16>, vector<4x48xf32> -> vector<4x48xf32>
    %c0_176 = arith.constant 0 : index
    %c0_177 = arith.constant 0 : index
    %271 = vector.load %arg12[%c0_176, %c0_177] : memref<1x48xf32, #tpu.memory_space<vmem>>, vector<1x48xf32>
    %272 = vector.broadcast %271 : vector<1x48xf32> to vector<4x48xf32>
    %273 = arith.addf %270, %272 : vector<4x48xf32>
    %274 = arith.addf %252, %273 : vector<4x48xf32>
    %c1_178 = arith.constant 1 : index
    %c0_179 = arith.constant 0 : index
    %c0_180 = arith.constant 0 : index
    %275 = vector.load %arg13[%c1_178, %c0_179, %c0_180] : memref<2x4x48xf32, #tpu.memory_space<vmem>>, vector<1x4x48xf32>
    %276 = vector.shape_cast %275 : vector<1x4x48xf32> to vector<4x48xf32>
    %277 = vector.shape_cast %274 : vector<4x48xf32> to vector<1x4x48xf32>
    tpu.vector_store %arg13[%c1_178, %c0_179, %c0_180], %277 {strides = array<i32>} : memref<2x4x48xf32, #tpu.memory_space<vmem>>, vector<1x4x48xf32>,
    %278 = vector.extract_strided_slice %248 {offsets = [3, 0], sizes = [1, 48], strides = [1, 1]} : vector<4x48xf32> to vector<1x48xf32>
    %279 = vector.extract_strided_slice %273 {offsets = [3, 0], sizes = [1, 48], strides = [1, 1]} : vector<4x48xf32> to vector<1x48xf32>
    %280 = arith.addf %278, %279 : vector<1x48xf32>
    %c1_181 = arith.constant 1 : index
    %c0_182 = arith.constant 0 : index
    %281 = vector.load %arg15[%c1_181, %c0_182] : memref<2x48xf32, #tpu.memory_space<vmem>>, vector<1x48xf32>
    tpu.vector_store %arg15[%c1_181, %c0_182], %280 {strides = array<i32>} : memref<2x48xf32, #tpu.memory_space<vmem>>, vector<1x48xf32>,
    return
  }
}

</mosaic_0001>

<bundles_post_ra>
// kernel: levit_forward.8
= control target key start
LH: loop header
LB: loop body
LE: loop exit
PB: predicated region body
PF: predicated region fallthrough
CT: control target
= control target key end

     0   :  { %vm52_vm0 = vcmask 392192   ;;  %vm108_vm1 = vcmask 261120   ;;  %s197_s1 = inlined_call_operand.vmem [shape: bf16[48,32], index: 1, kind: input, shape index: {}]   ;;  %s198_s0 = inlined_call_operand.vmem [shape: f32[32,48], index: 0, kind: input, shape index: {}]   ;;  %s199_s2 = inlined_call_operand.vmem [shape: f32[1,32], index: 2, kind: input, shape index: {}]   ;;  %s200_s3 = inlined_call_operand.vmem [shape: f32[32,32], index: 3, kind: output, shape index: {}]  }
   0x1   :  { %v138_v0 = vld [vmem:[%s197_s1 + $0x10] sm:$0xff]   ;;  %v139_v1 = vld [vmem:[%s197_s1 + $0x8] sm:$0xff]   ;;  %v15_v2 = vld [vmem:[%s198_s0] sm:$0xff] }
   0x2   :  { %128 = vmatprep.subr.bf16.mxu0 %v138_v0  ;;  %v16_v3 = vld [vmem:[%s198_s0 + $0x8] sm:$0xff]  ;;  %v140_v4 = vld [vmem:[%s197_s1] sm:$0xff]   ;;  %v17_v6 = vld [vmem:[%s198_s0 + $0x10] sm:$0xff] }
   0x3   :  { %129 = vmatpush3.bf16.msra.mxu0 %v138_v0  ;;  %v25_v5 = vpack.c.bf16 %v16_v3, %v15_v2  ;;  %v18_v7 = vld [vmem:[%s198_s0 + $0x18] sm:$0xff]  ;;  %v117_v9 = vld [vmem:[%s199_s2] ss:$0 sm:$0xff] }
   0x4   :  { %130 = vmatprep.subr.bf16.mxu0 %v139_v1  ;;  %v26_v8 = vpack.c.bf16 %v18_v7, %v17_v6 }
   0x5   :  { %134 = vmatprep.mubr.msk.bf16.mxu0 %vm52_vm0, %v25_v5 }
   0x7   :  { %131 = vmatpush3.bf16.msra.mxu0 %v139_v1 }
   0x8   :  { %132 = vmatprep.subr.bf16.mxu0 %v140_v4 }
   0xb   :  { %133 = vmatpush3.bf16.msra.mxu0 %v140_v4 }
   0xe   :  { %135 = vmatmul.mubr.msk.bf16.vlgmr.msra.gmra.mxu0 %vm52_vm0, %v26_v8 }
  0xce   :  { %v136_v10 = vpop.f32.mrf.mxu0 }
  0xcf   :  { %v102_v11 = vadd.f32 %v136_v10, %v117_v9 }
  0xd0   :  { %v93_v12 = vpop.f32.mrf.mxu0 }
  0xd1   :  { %111 = vst.msk [vmem:[%s200_s3 + $0x10] sm:$0xff] %vm108_vm1, %v102_v11  ;;  %v94_v13 = vadd.f32 %v117_v9, %v93_v12 }
  0xd2   :  { %v137_v14 = vpop.f32.mrf.mxu0 }
  0xd3   :  { %109 = vst.msk [vmem:[%s200_s3] sm:$0xff] %vm108_vm1, %v94_v13  ;;  %v105_v15 = vadd.f32 %v137_v14, %v117_v9 }
  0xd4   :  { %v96_v16 = vpop.f32.mrf.mxu0 }
  0xd5   :  { %112 = vst.msk [vmem:[%s200_s3 + $0x18] sm:$0xff] %vm108_vm1, %v105_v15  ;;  %v97_v17 = vadd.f32 %v117_v9, %v96_v16 }
  0xd7   :  { %110 = vst.msk [vmem:[%s200_s3 + $0x8] sm:$0xff] %vm108_vm1, %v97_v17 }

// kernel: levit_forward.9
= control target key start
LH: loop header
LB: loop body
LE: loop exit
PB: predicated region body
PF: predicated region fallthrough
CT: control target
= control target key end

     0   :  { %vm77_vm0 = vcmask 261120   ;;  %s3505_s0 = inlined_call_operand.vmem [shape: f32[2,17,32], index: 0, kind: input, shape index: {}]   ;;  %s3506_s1 = inlined_call_operand.vmem [shape: bf16[2,32,8], index: 1, kind: input, shape index: {}]   ;;  %s3507_s2 = inlined_call_operand.vmem [shape: f32[2,1,8], index: 2, kind: input, shape index: {}]   ;;  %s3508_s3 = inlined_call_operand.vmem [shape: bf16[2,32,8], index: 3, kind: input, shape index: {}]   ;;  %s3509_s4 = inlined_call_operand.vmem [shape: f32[2,1,8], index: 4, kind: input, shape index: {}]   ;;  %s3510_s5 = inlined_call_operand.vmem [shape: bf16[2,32,16], index: 5, kind: input, shape index: {}]   ;;  %s3511_s6 = inlined_call_operand.vmem [shape: f32[2,1,16], index: 6, kind: input, shape index: {}]   ;;  %s3512_s7 = inlined_call_operand.vmem [shape: bf16[2,16,32], index: 7, kind: input, shape index: {}]   ;;  %s3513_s8 = inlined_call_operand.vmem [shape: f32[1,32], index: 8, kind: input, shape index: {}]   ;;  %s3514_s9 = inlined_call_operand.vmem [shape: bf16[32,64], index: 9, kind: input, shape index: {}]   ;;  %s3515_s10 = inlined_call_operand.vmem [shape: f32[1,64], index: 10, kind: input, shape index: {}]   ;;  %s3516_s11 = inlined_call_operand.vmem [shape: bf16[64,32], index: 11, kind: input, shape index: {}]   ;;  %s3517_s12 = inlined_call_operand.vmem [shape: f32[1,32], index: 12, kind: input, shape index: {}]   ;;  %s3518_s13 = inlined_call_operand.vmem [shape: f32[2,17,32], index: 13, kind: output, shape index: {0}]   ;;  %s3519_s14 = inlined_call_operand.vmem [shape: f32[2,17], index: 14, kind: output, shape index: {1}]   ;;  %s3520_s15 = inlined_call_operand.hbm [shape: f32[2,32], index: 15, kind: output, shape index: {2}]  }
   0x1   :  { %v2838_v0 = vld [vmem:[%s3506_s1 + $0x8] sm:$0xff]   ;;  %v2839_v1 = vld [vmem:[%s3506_s1] sm:$0xff]   ;;  %v3053_v5 = vld [vmem:[%s3505_s0 + $0x10] sm:$0x1] }
   0x2   :  { %2604 = vmatprep.subr.bf16.mxu1 %v2838_v0  ;;  %v3039_v2 = vld [vmem:[%s3505_s0] sm:$0xff]  ;;  %v3044_v3 = vld [vmem:[%s3505_s0 + $0x8] sm:$0xff]  ;;  %v3064_v7 = vpack.c.bf16 %v3053_v5, %v3053_v5 }
   0x3   :  { %2605 = vmatpush3.bf16.msra.mxu1 %v2838_v0  ;;  %v3048_v4 = vpack.c.bf16 %v3044_v3, %v3039_v2  ;;  %v2840_v6 = vld [vmem:[%s3508_s3 + $0x8] sm:$0xff]   ;;  %v2841_v8 = vld [vmem:[%s3508_s3] sm:$0xff]  }
   0x4   :  { %2606 = vmatprep.subr.bf16.mxu1 %v2839_v1 }
   0x5   :  { %2608 = vmatprep.mubr.msk.bf16.mxu1 %vm77_vm0, %v3048_v4  ;;  %2624 = vmatprep.mubr.msk.bf16.mxu0 %vm77_vm0, %v3048_v4 }
   0x7   :  { %2607 = vmatpush3.bf16.msra.mxu1 %v2839_v1 }
   0x8   :  { %2612 = vmatprep.subr.bf16.mxu1 %v2840_v6 }
   0xa   :  { %2609 = vmatmul.mubr.msk.bf16.vlgmr.msra.gmra.mxu1 %vm77_vm0, %v3064_v7 }
   0xb   :  { %2613 = vmatpush3.bf16.msra.mxu1 %v2840_v6  ;;  %2616 = vmatprep.mubr.msk.bf16.mxu1 %vm77_vm0, %v3048_v4 }
   0xc   :  { %2614 = vmatprep.subr.bf16.mxu1 %v2841_v8 }
   0xf   :  { %2615 = vmatpush3.bf16.msra.mxu1 %v2841_v8 }
  0x12   :  { %2617 = vmatmul.mubr.msk.bf16.vlgmr.msra.gmra.mxu1 %vm77_vm0, %v3064_v7 }
  0x13   :  { %21 = vsyncpa [#allocation3], 0  ;;  %v3078_v12 = vld [vmem:[%s3507_s2] ss:$0 sm:$0xff]  ;;  %vm278_vm1 = vcmask 64512   ;;  %v2842_v31 = vld [vmem:[%s3510_s5 + $0x8] sm:$0xff]  }
  0x14   :  { %v3083_v14 = vld [vmem:[%s3509_s4] ss:$0 sm:$0xff]  ;;  %2620 = vmatprep.subr.bf16.mxu0 %v2842_v31  ;;  %vm346_vm2 = vcmask 131072   ;;  %vm339_vm3 = vcmask 138240   ;;  %vm384_vm4 = vcmask 1040384   ;;  %v2948_v58 = vmov 0  }
  0x15   :  { %v2843_v32 = vld [vmem:[%s3510_s5] sm:$0xff]   ;;  %2621 = vmatpush3.bf16.msra.mxu0 %v2842_v31  ;;  %v3119_v59 = vsel %vm384_vm4, 65535, %v2948_v58  ;;  %v2844_v1 = vld [vmem:[%s3508_s3 + $0x18] sm:$0xff]   ;;  %v2845_v6 = vld [vmem:[%s3508_s3 + $0x10] sm:$0xff]   ;;  %vm861_vm5 = vcmask 130048   ;;  %vm1126_vm6 = vcmask 523264  }
  0x16   :  { %2622 = vmatprep.subr.bf16.mxu0 %v2843_v32  ;;  %v3116_v56 = vld [vmem:[%s3511_s6] ss:$0 sm:$0xff]  ;;  %vm1186_vm7 = vcmask 253952  }
  0x19   :  { %2623 = vmatpush3.bf16.msra.mxu0 %v2843_v32 }
  0x1c   :  { %2625 = vmatmul.mubr.msk.bf16.vlgmr.msra.gmra.mxu0 %vm77_vm0, %v3064_v7 }
  0xca   :  { %v2610_v9 = vpop.f32.mrf.mxu1 }
  0xcb   :  { %v127_v29 = vadd.f32 %v2610_v9, %v3078_v12 }
  0xcc   :  { %v118_v10 = vpop.f32.mrf.mxu1 }
  0xcd   :  { %v119_v15 = vadd.f32 %v3078_v12, %v118_v10  ;;  %v275_v30 = vpack.c.bf16 %v127_v29, %v127_v29 }
  0xce   :  { %v2611_v11 = vpop.f32.mrf.mxu1 }
  0xcf   :  { %v2846_v11 = vld [vmem:[%s3506_s1 + $0x18] sm:$0xff]  }
  0xd0   :  { %v121_v13 = vpop.f32.mrf.mxu1 }
  0xd1   :  { %v122_v16 = vadd.f32 %v3078_v12, %v121_v13 }
  0xd2   :  { %v2618_v17 = vpop.f32.mrf.mxu1 }
  0xd3   :  { %v274_v18 = vpack.c.bf16 %v122_v16, %v119_v15  ;;  %v198_v19 = vadd.f32 %v2618_v17, %v3083_v14 }
  0xd4   :  { %v189_v20 = vpop.f32.mrf.mxu1 }
  0xd5   :  { %v277_v21 = vpack.c.bf16 %v198_v19, %v198_v19  ;;  %2632 = vmatprep.mubr.msk.bf16.mxu1 %vm278_vm1, %v274_v18  ;;  %v190_v25 = vadd.f32 %v3083_v14, %v189_v20 }
  0xd6   :  { %v2619_v22 = vpop.f32.mrf.mxu1 }
  0xd7   :  { %v289_v23 = vsel %vm278_vm1, %v277_v21, 0  ;;  %2828 = vmatprep.subr.msk.bf16.mxu1 %vm278_vm1, %v277_v21 }
  0xd8   :  { %v192_v24 = vpop.f32.mrf.mxu1  ;;  %2629 = vmatpush3.bf16.xpose.msra.mxu1 %v289_v23 }
  0xd9   :  { %v193_v26 = vadd.f32 %v3083_v14, %v192_v24 }
  0xdb   :  { %v276_v27 = vpack.c.bf16 %v193_v26, %v190_v25  ;;  %v2847_v25 = vld [vmem:[%s3506_s1 + $0x10] sm:$0xff]   ;;  %v3152_v26 = vld [vmem:[%s3509_s4 + $0x1] ss:$0 sm:$0xff] }
  0xdc   :  { %v2626_v55 = vpop.f32.mrf.mxu0 }
  0xdd   :  { %2829 = vmatprep.subr.msk.bf16.mxu1 %vm278_vm1, %v276_v27  ;;  %v286_v28 = vsel %vm278_vm1, %v276_v27, 0  ;;  %v269_v57 = vadd.f32 %v2626_v55, %v3116_v56 }
  0xde   :  { %v260_v60 = vpop.f32.mrf.mxu0 }
  0xdf   :  { %v377_v61 = vpack.c.bf16 %v269_v57, %v269_v57  ;;  %v261_v0 = vadd.f32 %v3116_v56, %v260_v60 }
  0xe0   :  { %2631 = vmatpush3.bf16.xpose.msra.mxu1 %v286_v28  ;;  %v2627_v62 = vpop.f32.mrf.mxu0 }
  0xe1   :  { %v388_v63 = vand.u32 %v3119_v59, %v377_v61  ;;  %2652 = vmatprep.subr.bf16.mxu1 %v2844_v1 }
  0xe2   :  { %v263_v8 = vpop.f32.mrf.mxu0 }
  0xe3   :  { %v264_v9 = vadd.f32 %v3116_v56, %v263_v8  ;;  %2636 = vmatprep.subr.bf16.mxu0 %v388_v63 }
  0xe4   :  { %2637 = vmatpush3.bf16.msra.mxu0 %v388_v63 }
  0xe5   :  { %v376_v10 = vpack.c.bf16 %v264_v9, %v261_v0 }
  0xe7   :  { %2633 = vmatmul.mubr.msk.bf16.vlgmr.msra.gmra.mxu1 %vm278_vm1, %v275_v30  ;;  %2638 = vmatprep.subr.bf16.mxu0 %v376_v10 }
  0xe8   :  { %2656 = vmatprep.mubr.msk.bf16.mxu1 %vm77_vm0, %v3048_v4  ;;  %2653 = vmatpush3.bf16.msra.mxu1 %v2844_v1 }
  0xe9   :  { %2654 = vmatprep.subr.bf16.mxu1 %v2845_v6  ;;  %2639 = vmatpush3.bf16.msra.mxu0 %v376_v10 }
  0xea   :  { %2644 = vmatprep.subr.bf16.mxu0 %v2846_v11 }
  0xec   :  { %2655 = vmatpush3.bf16.msra.mxu1 %v2845_v6 }
  0xef   :  { %2657 = vmatmul.mubr.msk.bf16.vlgmr.msra.gmra.mxu1 %vm77_vm0, %v3064_v7 }
 0x1a7   :  { %v2634_v33 = vpop.f32.mrf.mxu1 }
 0x1a8   :  { %v347_v34 = vsel %vm346_vm2, %v2634_v33, -inf }
 0x1a9   :  { %348 = vmax.xlane.f32.xlu1 %v347_v34  ;;  %v325_v35 = vpop.f32.mrf.mxu1 }
 0x1aa   :  { %v340_v36 = vsel %vm339_vm3, %v325_v35, -inf }
 0x1ab   :  { %341 = vmax.xlane.f32.xlu0 %v340_v36  ;;  %v2635_v37 = vpop.f32.mrf.mxu1 }
 0x1ac   :  { %v2848_v37 = vld [vmem:[%s3512_s7] sm:$0xff]  }
 0x1ad   :  { %v328_v38 = vpop.f32.mrf.mxu1 }
 0x1ae   :  { %v343_v39 = vsel %vm339_vm3, %v328_v38, -inf }
 0x1af   :  { %344 = vmax.xlane.f32.xlu0 %v343_v39  ;;  %v2658_v27 = vpop.f32.mrf.mxu1 }
 0x1b0   :  { %v598_v28 = vadd.f32 %v2658_v27, %v3152_v26 }
 0x1b1   :  { %v589_v29 = vpop.f32.mrf.mxu1 }
 0x1b2   :  { %v679_v30 = vpack.c.bf16 %v598_v28, %v598_v28 }
 0x1b3   :  { %v2659_v31 = vpop.f32.mrf.mxu1 }
 0x1b4   :  { %v690_v32 = vsel %vm278_vm1, %v679_v30, 0  ;;  %2830 = vmatprep.subr.msk.bf16.mxu1 %vm278_vm1, %v679_v30 }
 0x1b5   :  { %2669 = vmatpush3.bf16.xpose.msra.mxu1 %v690_v32  ;;  %v592_v34 = vpop.f32.mrf.mxu1 }
 0x232   :  { %v349_v40 = vpop.xlane.xlu1 %348 }
 0x233   :  { %v352_v41 = vsub.f32 %v2634_v33, %v349_v40  ;;  %v590_v33 = vadd.f32 %v3152_v26, %v589_v29 }
 0x234   :  { %v342_v42 = vpop.xlane.xlu0 %341 }
 0x235   :  { %v350_v43 = vsub.f32 %v325_v35, %v342_v42  ;;  %v357_v44 = vmul.f32 1.442695, %v352_v41 }
 0x237   :  { %v353_v45 = vmul.f32 1.442695, %v350_v43 }
 0x238   :  { %v345_v46 = vpop.xlane.xlu0 %344 }
 0x239   :  { %2878 = vpow2.f32 %v353_v45  ;;  %v351_v47 = vsub.f32 %v328_v38, %v345_v46 }
 0x23a   :  { %2880 = vpow2.f32 %v357_v44 }
 0x23b   :  { %v355_v48 = vmul.f32 1.442695, %v351_v47 }
 0x23d   :  { %2882 = vpow2.f32 %v355_v48 }
 0x246   :  { %v2879_v49 = vpop.eup %2878 }
 0x247   :  { %v359_v50 = vsel %vm339_vm3, %v2879_v49, 0.0  ;;  %v2881_v51 = vpop.eup %2880 }
 0x248   :  { %360 = vadd.xlane.f32.xlu1 %v359_v50  ;;  %v365_v53 = vsel %vm346_vm2, %v2881_v51, 0.0 }
 0x24a   :  { %v2883_v52 = vpop.eup %2882 }
 0x24b   :  { %v362_v54 = vsel %vm339_vm3, %v2883_v52, 0.0 }
 0x24c   :  { %366 = vadd.xlane.f32.xlu1 %v365_v53  ;;  %363 = vadd.xlane.f32.xlu0 %v362_v54 }
 0x2d1   :  { %v361_v13 = vpop.xlane.xlu1 %360 }
 0x2d2   :  { %2884 = vrcp.f32 %v361_v13  ;;  %v2849_v13 = vld [vmem:[%s3510_s5 + $0x18] sm:$0xff]  }
 0x2d5   :  { %v367_v15 = vpop.xlane.xlu1 %366  ;;  %v364_v16 = vpop.xlane.xlu0 %363 }
 0x2d6   :  { %2886 = vrcp.f32 %v367_v15  ;;  %v2850_v15 = vld [vmem:[%s3510_s5 + $0x10] sm:$0xff]  }
 0x2d7   :  { %2888 = vrcp.f32 %v364_v16 }
 0x2df   :  { %v2885_v17 = vpop.eup %2884 }
 0x2e0   :  { %v3135_v21 = vmul.f32 %v2885_v17, %v2879_v49 }
 0x2e3   :  { %v2887_v18 = vpop.eup %2886 }
 0x2e4   :  { %v2889_v19 = vpop.eup %2888  ;;  %v373_v20 = vmul.f32 %v2887_v18, %v2881_v51 }
 0x2e5   :  { %v371_v22 = vmul.f32 %v2889_v19, %v2883_v52  ;;  %v3167_v52 = vld [vmem:[%s3507_s2 + $0x1] ss:$0 sm:$0xff] }
 0x2e6   :  { %v375_v23 = vpack.c.bf16 %v373_v20, %v373_v20 }
 0x2e7   :  { %v374_v24 = vpack.c.bf16 %v371_v22, %v3135_v21 }
 0x2e9   :  { %2640 = vmatprep.mubr.msk.bf16.mxu0 %vm339_vm3, %v374_v24 }
 0x2ea   :  { %2641 = vmatmul.mubr.msk.bf16.vlgmr.msra.gmra.mxu0 %vm339_vm3, %v375_v23 }
 0x2eb   :  { %2645 = vmatpush3.bf16.msra.mxu0 %v2846_v11  ;;  %2648 = vmatprep.mubr.msk.bf16.mxu0 %vm77_vm0, %v3048_v4 }
 0x2ec   :  { %2646 = vmatprep.subr.bf16.mxu0 %v2847_v25 }
 0x2ef   :  { %2647 = vmatpush3.bf16.msra.mxu0 %v2847_v25 }
 0x2f0   :  { %2660 = vmatprep.subr.bf16.mxu0 %v2849_v13 }
 0x2f2   :  { %2649 = vmatmul.mubr.msk.bf16.vlgmr.msra.gmra.mxu0 %vm77_vm0, %v3064_v7 }
 0x2f3   :  { %2664 = vmatprep.mubr.msk.bf16.mxu0 %vm77_vm0, %v3048_v4  ;;  %v593_v4 = vadd.f32 %v3152_v26, %v592_v34  ;;  %2661 = vmatpush3.bf16.msra.mxu0 %v2849_v13 }
 0x2f4   :  { %2662 = vmatprep.subr.bf16.mxu0 %v2850_v15 }
 0x2f5   :  { %v678_v35 = vpack.c.bf16 %v593_v4, %v590_v33 }
 0x2f7   :  { %2831 = vmatprep.subr.msk.bf16.mxu1 %vm278_vm1, %v678_v35  ;;  %v687_v36 = vsel %vm278_vm1, %v678_v35, 0  ;;  %2663 = vmatpush3.bf16.msra.mxu0 %v2850_v15 }
 0x2f8   :  { %2671 = vmatpush3.bf16.xpose.msra.mxu1 %v687_v36 }
 0x2f9   :  { %2690 = vmatprep.subr.bf16.mxu1 %v2848_v37 }
 0x2fa   :  { %2665 = vmatmul.mubr.msk.bf16.vlgmr.msra.gmra.mxu0 %vm77_vm0, %v3064_v7 }
 0x3aa   :  { %v2642_v38 = vpop.f32.mrf.mxu0 }
 0x3ab   :  { %v440_v43 = vadd.f32 3.0, %v2642_v38 }
 0x3ac   :  { %v424_v39 = vpop.f32.mrf.mxu0 }
 0x3ad   :  { %v438_v40 = vadd.f32 3.0, %v424_v39  ;;  %v443_v49 = vmax.f32 %v440_v43, 0.0 }
 0x3ae   :  { %v2643_v41 = vpop.f32.mrf.mxu0 }
 0x3af   :  { %v441_v42 = vmax.f32 %v438_v40, 0.0  ;;  %v446_v57 = vmin.f32 %v443_v49, 6.0 }
 0x3b0   :  { %v427_v44 = vpop.f32.mrf.mxu0 }
 0x3b1   :  { %v439_v45 = vadd.f32 3.0, %v427_v44  ;;  %v444_v47 = vmin.f32 %v441_v42, 6.0  ;;  %v449_v6 = vmul.f32 %v2642_v38, %v446_v57  ;;  %v3197_v42 = vld [vmem:[%s3511_s6 + $0x1] ss:$0 sm:$0xff] }
 0x3b2   :  { %v2650_v46 = vpop.f32.mrf.mxu0 }
 0x3b3   :  { %v442_v48 = vmax.f32 %v439_v45, 0.0  ;;  %v447_v54 = vmul.f32 %v444_v47, %v424_v39  ;;  %v525_v58 = vadd.f32 %v2650_v46, %v3167_v52  ;;  %v452_v10 = vmul.f32 0.16666667, %v449_v6 }
 0x3b4   :  { %v516_v50 = vpop.f32.mrf.mxu0 }
 0x3b5   :  { %v445_v51 = vmin.f32 %v442_v48, 6.0  ;;  %v517_v62 = vadd.f32 %v3167_v52, %v516_v50  ;;  %v450_v0 = vmul.f32 0.16666667, %v447_v54  ;;  %v677_v8 = vpack.c.bf16 %v525_v58, %v525_v58 }
 0x3b6   :  { %v2651_v53 = vpop.f32.mrf.mxu0  ;;  %v456_v11 = vpack.c.bf16 %v452_v10, %v452_v10 }
 0x3b7   :  { %v448_v55 = vmul.f32 %v445_v51, %v427_v44 }
 0x3b8   :  { %v519_v60 = vpop.f32.mrf.mxu0 }
 0x3b9   :  { %v451_v61 = vmul.f32 0.16666667, %v448_v55  ;;  %v520_v63 = vadd.f32 %v3167_v52, %v519_v60 }
 0x3ba   :  { %v2666_v41 = vpop.f32.mrf.mxu0 }
 0x3bb   :  { %v676_v1 = vpack.c.bf16 %v520_v63, %v517_v62  ;;  %v455_v9 = vpack.c.bf16 %v451_v61, %v450_v0  ;;  %v671_v43 = vadd.f32 %v2666_v41, %v3197_v42 }
 0x3bc   :  { %v662_v44 = vpop.f32.mrf.mxu0 }
 0x3bd   :  { %2672 = vmatprep.mubr.msk.bf16.mxu1 %vm278_vm1, %v676_v1  ;;  %v777_v45 = vpack.c.bf16 %v671_v43, %v671_v43  ;;  %v663_v48 = vadd.f32 %v3197_v42, %v662_v44 }
 0x3be   :  { %2673 = vmatmul.mubr.msk.bf16.vlgmr.msra.gmra.mxu1 %vm278_vm1, %v677_v8  ;;  %v2667_v46 = vpop.f32.mrf.mxu0 }
 0x3bf   :  { %2692 = vmatprep.mubr.msk.bf16.mxu1 %vm861_vm5, %v455_v9  ;;  %2691 = vmatpush3.bf16.msra.mxu1 %v2848_v37  ;;  %v785_v47 = vand.u32 %v777_v45, %v3119_v59 }
 0x3c0   :  { %v665_v49 = vpop.f32.mrf.mxu0 }
 0x3c1   :  { %v666_v50 = vadd.f32 %v3197_v42, %v665_v49  ;;  %2676 = vmatprep.subr.bf16.mxu0 %v785_v47 }
 0x3c2   :  { %2677 = vmatpush3.bf16.msra.mxu0 %v785_v47 }
 0x3c3   :  { %v776_v51 = vpack.c.bf16 %v666_v50, %v663_v48  ;;  %v3243_v50 = vld [vmem:[%s3505_s0 + $0x18] sm:$0xff] }
 0x3c5   :  { %2678 = vmatprep.subr.bf16.mxu0 %v776_v51 }
 0x3c6   :  { %2693 = vmatmul.mubr.msk.bf16.vlgmr.msra.gmra.mxu1 %vm861_vm5, %v456_v11  ;;  %2679 = vmatpush3.bf16.msra.mxu0 %v776_v51 }
 0x47e   :  { %v2674_v16 = vpop.f32.mrf.mxu1 }
 0x47f   :  { %v746_v22 = vsel %vm346_vm2, %v2674_v16, -inf }
 0x480   :  { %v726_v17 = vpop.f32.mrf.mxu1 }
 0x481   :  { %v740_v18 = vsel %vm339_vm3, %v726_v17, -inf }
 0x482   :  { %741 = vmax.xlane.f32.xlu0 %v740_v18  ;;  %v2675_v19 = vpop.f32.mrf.mxu1 }
 0x484   :  { %v729_v20 = vpop.f32.mrf.mxu1 }
 0x485   :  { %v743_v23 = vsel %vm339_vm3, %v729_v20, -inf }
 0x486   :  { %747 = vmax.xlane.f32.xlu0 %v746_v22  ;;  %744 = vmax.xlane.f32.xlu1 %v743_v23  ;;  %v3187_v24 = vpop.f32.mrf.mxu1 }
 0x488   :  { %v3189_v25 = vpop.f32.mrf.mxu1 }
 0x48a   :  { %v2695_v27 = vpop.f32.mrf.mxu1 }
 0x48c   :  { %v965_v44 = vpop.f32.mrf.mxu1 }
 0x50b   :  { %v742_v28 = vpop.xlane.xlu0 %741 }
 0x50c   :  { %v749_v7 = vsub.f32 %v726_v17, %v742_v28 }
 0x50e   :  { %v752_v29 = vmul.f32 1.442695, %v749_v7 }
 0x50f   :  { %v748_v30 = vpop.xlane.xlu0 %747  ;;  %v745_v31 = vpop.xlane.xlu1 %744 }
 0x510   :  { %2890 = vpow2.f32 %v752_v29  ;;  %v751_v32 = vsub.f32 %v2674_v16, %v748_v30  ;;  %v750_v33 = vsub.f32 %v729_v20, %v745_v31 }
 0x512   :  { %v756_v34 = vmul.f32 1.442695, %v751_v32  ;;  %v754_v4 = vmul.f32 1.442695, %v750_v33 }
 0x514   :  { %2892 = vpow2.f32 %v756_v34 }
 0x515   :  { %2894 = vpow2.f32 %v754_v4  ;;  %v2852_v4 = vld [vmem:[%s3514_s9 + $0x8] sm:$0xff]  }
 0x51d   :  { %v2891_v35 = vpop.eup %2890 }
 0x51e   :  { %v758_v36 = vsel %vm339_vm3, %v2891_v35, 0.0 }
 0x51f   :  { %759 = vadd.xlane.f32.xlu1 %v758_v36  ;;  %v2854_v36 = vld [vmem:[%s3506_s1 + $0x8] sm:$0xff]  }
 0x521   :  { %v2893_v37 = vpop.eup %2892 }
 0x522   :  { %v2895_v38 = vpop.eup %2894  ;;  %v764_v39 = vsel %vm346_vm2, %v2893_v37, 0.0 }
 0x523   :  { %765 = vadd.xlane.f32.xlu1 %v764_v39  ;;  %v761_v40 = vsel %vm339_vm3, %v2895_v38, 0.0 }
 0x524   :  { %762 = vadd.xlane.f32.xlu0 %v761_v40  ;;  %v3228_v40 = vld [vmem:[%s3513_s8] ss:$0 sm:$0xff] }
 0x5a8   :  { %v760_v53 = vpop.xlane.xlu1 %759 }
 0x5a9   :  { %2896 = vrcp.f32 %v760_v53 }
 0x5ac   :  { %v766_v54 = vpop.xlane.xlu1 %765 }
 0x5ad   :  { %v763_v55 = vpop.xlane.xlu0 %762  ;;  %2898 = vrcp.f32 %v766_v54 }
 0x5ae   :  { %2900 = vrcp.f32 %v763_v55 }
 0x5b6   :  { %v2897_v57 = vpop.eup %2896 }
 0x5b7   :  { %v768_v58 = vmul.f32 %v2897_v57, %v2891_v35  ;;  %v2853_v35 = vld [vmem:[%s3514_s9] sm:$0xff]  }
 0x5b8   :  { %v2855_v57 = vld [vmem:[%s3506_s1] sm:$0xff]  }
 0x5b9   :  { %v773_v60 = vadd.f32 %v768_v58, %v3135_v21  ;;  %v2851_v21 = vld [vmem:[%s3512_s7 + $0x8] sm:$0xff]  }
 0x5ba   :  { %v2899_v61 = vpop.eup %2898  ;;  %2684 = vmatprep.subr.bf16.mxu0 %v2851_v21 }
 0x5bb   :  { %v2901_v62 = vpop.eup %2900  ;;  %v986_v63 = vmul.f32 0.5, %v773_v60  ;;  %v772_v0 = vmul.f32 %v2899_v61, %v2893_v37  ;;  %v2857_v60 = vld [vmem:[%s3508_s3] sm:$0xff]   ;;  %v2858_v61 = vld [vmem:[%s3516_s11 + $0x18] sm:$0xff]  }
 0x5bc   :  { %v770_v1 = vmul.f32 %v2901_v62, %v2895_v38  ;;  %2704 = vmatprep.subr.bf16.mxu1 %v2858_v61  ;;  %v2859_v62 = vld [vmem:[%s3516_s11 + $0x10] sm:$0xff]  }
 0x5bd   :  { %987 = vst.msk [vmem:[%s3519_s14] sm:$0x1] %vm346_vm2, %v986_v63  ;;  %v775_v6 = vpack.c.bf16 %v772_v0, %v772_v0  ;;  %2705 = vmatpush3.bf16.msra.mxu1 %v2858_v61  ;;  %v2860_v63 = vld [vmem:[%s3516_s11 + $0x8] sm:$0xff]   ;;  %v2861_v0 = vld [vmem:[%s3516_s11] sm:$0xff]  }
 0x5be   :  { %v774_v8 = vpack.c.bf16 %v770_v1, %v768_v58  ;;  %2706 = vmatprep.subr.bf16.mxu1 %v2859_v62  ;;  %v3307_v1 = vld [vmem:[%s3515_s10] ss:$0 sm:$0xff] }
 0x5c0   :  { %2680 = vmatprep.mubr.msk.bf16.mxu0 %vm339_vm3, %v774_v8 }
 0x5c1   :  { %2681 = vmatmul.mubr.msk.bf16.vlgmr.msra.gmra.mxu0 %vm339_vm3, %v775_v6  ;;  %2707 = vmatpush3.bf16.msra.mxu1 %v2859_v62 }
 0x5c2   :  { %2685 = vmatpush3.bf16.msra.mxu0 %v2851_v21  ;;  %2708 = vmatprep.subr.bf16.mxu1 %v2860_v63 }
 0x5c3   :  { %2696 = vmatprep.subr.bf16.mxu0 %v2852_v4 }
 0x5c5   :  { %2709 = vmatpush3.bf16.msra.mxu1 %v2860_v63  ;;  %v2863_v63 = vld [vmem:[%s3510_s5] sm:$0xff]  }
 0x5c6   :  { %2710 = vmatprep.subr.bf16.mxu1 %v2861_v0 }
 0x5c9   :  { %2711 = vmatpush3.bf16.msra.mxu1 %v2861_v0 }
 0x681   :  { %v2682_v9 = vpop.f32.mrf.mxu0 }
 0x682   :  { %v837_v10 = vadd.f32 3.0, %v2682_v9 }
 0x683   :  { %v821_v11 = vpop.f32.mrf.mxu0 }
 0x684   :  { %v840_v13 = vmax.f32 %v837_v10, 0.0  ;;  %v835_v15 = vadd.f32 3.0, %v821_v11 }
 0x685   :  { %v2683_v16 = vpop.f32.mrf.mxu0 }
 0x686   :  { %v838_v17 = vmax.f32 %v835_v15, 0.0  ;;  %v843_v18 = vmin.f32 %v840_v13, 6.0 }
 0x687   :  { %v824_v19 = vpop.f32.mrf.mxu0 }
 0x688   :  { %v841_v20 = vmin.f32 %v838_v17, 6.0  ;;  %v836_v22 = vadd.f32 3.0, %v824_v19  ;;  %v846_v27 = vmul.f32 %v2682_v9, %v843_v18 }
 0x68a   :  { %v839_v23 = vmax.f32 %v836_v22, 0.0  ;;  %v844_v28 = vmul.f32 %v841_v20, %v821_v11  ;;  %v849_v30 = vmul.f32 0.16666667, %v846_v27 }
 0x68c   :  { %v842_v7 = vmin.f32 %v839_v23, 6.0  ;;  %v847_v31 = vmul.f32 0.16666667, %v844_v28  ;;  %v854_v34 = vpack.c.bf16 %v849_v30, %v849_v30 }
 0x68e   :  { %v845_v29 = vmul.f32 %v842_v7, %v824_v19 }
 0x690   :  { %v848_v32 = vmul.f32 0.16666667, %v845_v29 }
 0x692   :  { %v853_v33 = vpack.c.bf16 %v848_v32, %v847_v31 }
 0x694   :  { %2686 = vmatprep.mubr.msk.bf16.mxu0 %vm861_vm5, %v853_v33 }
 0x695   :  { %2687 = vmatmul.mubr.msk.bf16.vlgmr.msra.gmra.mxu0 %vm861_vm5, %v854_v34 }
 0x696   :  { %2697 = vmatpush3.bf16.msra.mxu0 %v2852_v4 }
 0x697   :  { %2698 = vmatprep.subr.bf16.mxu0 %v2853_v35 }
 0x69a   :  { %2699 = vmatpush3.bf16.msra.mxu0 %v2853_v35 }
 0x69b   :  { %2716 = vmatprep.subr.bf16.mxu0 %v2854_v36 }
 0x755   :  { %v2688_v37 = vpop.f32.mrf.mxu0 }
 0x756   :  { %v971_v38 = vadd.f32 %v3187_v24, %v2688_v37 }
 0x757   :  { %v902_v39 = vpop.f32.mrf.mxu0 }
 0x758   :  { %v963_v41 = vadd.f32 %v3189_v25, %v902_v39  ;;  %v3232_v45 = vadd.f32 %v3228_v40, %v971_v38  ;;  %v3248_v25 = vld [vmem:[%s3505_s0 + $0x20] sm:$0xff] }
 0x759   :  { %v2689_v43 = vpop.f32.mrf.mxu0  ;;  %v3260_v54 = vpack.c.bf16 %v3248_v25, %v3243_v50 }
 0x75a   :  { %v983_v47 = vadd.f32 %v3228_v40, %v963_v41  ;;  %v3238_v24 = vadd.f32 %v3232_v45, %v3053_v5 }
 0x75b   :  { %v905_v46 = vpop.f32.mrf.mxu0 }
 0x75c   :  { %v966_v48 = vadd.f32 %v965_v44, %v905_v46  ;;  %v3251_v51 = vadd.f32 %v983_v47, %v3039_v2  ;;  %v996_v55 = vpack.c.bf16 %v3238_v24, %v3238_v24  ;;  %v3274_v2 = vld [vmem:[%s3505_s0 + $0x28] sm:$0x1] }
 0x75d   :  { %v3281_v58 = vpack.c.bf16 %v3274_v2, %v3274_v2 }
 0x75e   :  { %v984_v49 = vadd.f32 %v3228_v40, %v966_v48 }
 0x760   :  { %v3254_v53 = vadd.f32 %v984_v49, %v3044_v3  ;;  %v2856_v3 = vld [vmem:[%s3508_s3 + $0x8] sm:$0xff]  }
 0x762   :  { %v995_v5 = vpack.c.bf16 %v3254_v53, %v3251_v51 }
 0x764   :  { %2700 = vmatprep.mubr.msk.bf16.mxu0 %vm77_vm0, %v995_v5 }
 0x765   :  { %2701 = vmatmul.mubr.msk.bf16.vlgmr.msra.gmra.mxu0 %vm77_vm0, %v996_v55 }
 0x766   :  { %2717 = vmatpush3.bf16.msra.mxu0 %v2854_v36  ;;  %2720 = vmatprep.mubr.msk.bf16.mxu0 %vm77_vm0, %v3260_v54 }
 0x767   :  { %2718 = vmatprep.subr.bf16.mxu0 %v2855_v57 }
 0x76a   :  { %2719 = vmatpush3.bf16.msra.mxu0 %v2855_v57 }
 0x76b   :  { %2724 = vmatprep.subr.bf16.mxu0 %v2856_v3 }
 0x76d   :  { %2721 = vmatmul.mubr.msk.bf16.vlgmr.msra.gmra.mxu0 %vm77_vm0, %v3281_v58 }
 0x76e   :  { %2725 = vmatpush3.bf16.msra.mxu0 %v2856_v3  ;;  %2728 = vmatprep.mubr.msk.bf16.mxu0 %vm77_vm0, %v3260_v54 }
 0x76f   :  { %2726 = vmatprep.subr.bf16.mxu0 %v2857_v60 }
 0x772   :  { %2727 = vmatpush3.bf16.msra.mxu0 %v2857_v60 }
 0x775   :  { %2729 = vmatmul.mubr.msk.bf16.vlgmr.msra.gmra.mxu0 %vm77_vm0, %v3281_v58 }
 0x825   :  { %v2702_v6 = vpop.f32.mrf.mxu0 }
 0x826   :  { %v1065_v8 = vadd.f32 %v2702_v6, %v3307_v1 }
 0x827   :  { %v1056_v21 = vpop.f32.mrf.mxu0 }
 0x828   :  { %v1072_v9 = vadd.f32 3.0, %v1065_v8  ;;  %v1057_v10 = vadd.f32 %v3307_v1, %v1056_v21 }
 0x829   :  { %v2703_v11 = vpop.f32.mrf.mxu0 }
 0x82a   :  { %v1075_v13 = vmax.f32 %v1072_v9, 0.0  ;;  %v1070_v15 = vadd.f32 3.0, %v1057_v10 }
 0x82b   :  { %v1059_v16 = vpop.f32.mrf.mxu0 }
 0x82c   :  { %v1073_v17 = vmax.f32 %v1070_v15, 0.0  ;;  %v1060_v18 = vadd.f32 %v3307_v1, %v1059_v16  ;;  %v1078_v19 = vmin.f32 %v1075_v13, 6.0 }
 0x82d   :  { %v2722_v20 = vpop.f32.mrf.mxu0 }
 0x82e   :  { %v1076_v22 = vmin.f32 %v1073_v17, 6.0  ;;  %v1071_v23 = vadd.f32 3.0, %v1060_v18  ;;  %v1081_v7 = vmul.f32 %v1078_v19, %v1065_v8  ;;  %v1268_v61 = vadd.f32 %v2722_v20, %v3078_v12 }
 0x82f   :  { %v1259_v27 = vpop.f32.mrf.mxu0 }
 0x830   :  { %v1074_v28 = vmax.f32 %v1071_v23, 0.0  ;;  %v1079_v30 = vmul.f32 %v1076_v22, %v1057_v10  ;;  %v1260_v34 = vadd.f32 %v3078_v12, %v1259_v27  ;;  %v1084_v35 = vmul.f32 0.16666667, %v1081_v7 }
 0x831   :  { %v2723_v29 = vpop.f32.mrf.mxu0  ;;  %v1416_v62 = vpack.c.bf16 %v1268_v61, %v1268_v61 }
 0x832   :  { %v1077_v31 = vmin.f32 %v1074_v28, 6.0  ;;  %v1082_v37 = vmul.f32 0.16666667, %v1079_v30  ;;  %v1094_v47 = vpack.c.bf16 %v1084_v35, %v1084_v35 }
 0x833   :  { %v1262_v32 = vpop.f32.mrf.mxu0 }
 0x834   :  { %v1080_v33 = vmul.f32 %v1077_v31, %v1060_v18  ;;  %v1263_v4 = vadd.f32 %v3078_v12, %v1262_v32  ;;  %v3341_v12 = vld [vmem:[%s3517_s12] ss:$0 sm:$0xff] }
 0x835   :  { %v2730_v36 = vpop.f32.mrf.mxu0 }
 0x836   :  { %v1083_v38 = vmul.f32 0.16666667, %v1080_v33  ;;  %v1415_v39 = vpack.c.bf16 %v1263_v4, %v1260_v34  ;;  %v1339_v41 = vadd.f32 %v2730_v36, %v3083_v14 }
 0x837   :  { %v1330_v43 = vpop.f32.mrf.mxu0 }
 0x838   :  { %v1093_v44 = vpack.c.bf16 %v1083_v38, %v1082_v37  ;;  %v1418_v46 = vpack.c.bf16 %v1339_v41, %v1339_v41  ;;  %2744 = vmatprep.mubr.msk.bf16.mxu0 %vm278_vm1, %v1415_v39  ;;  %v1331_v55 = vadd.f32 %v3083_v14, %v1330_v43 }
 0x839   :  { %v2731_v48 = vpop.f32.mrf.mxu0 }
 0x83a   :  { %v1429_v49 = vsel %vm278_vm1, %v1418_v46, 0  ;;  %2712 = vmatprep.mubr.msk.bf16.mxu1 %vm1126_vm6, %v1093_v44  ;;  %2832 = vmatprep.subr.msk.bf16.mxu0 %vm278_vm1, %v1418_v46  ;;  %v2864_v46 = vld [vmem:[%s3508_s3 + $0x18] sm:$0xff]  }
 0x83b   :  { %2713 = vmatmul.mubr.msk.bf16.vlgmr.msra.gmra.mxu1 %vm1126_vm6, %v1094_v47  ;;  %v1333_v5 = vpop.f32.mrf.mxu0  ;;  %2741 = vmatpush3.bf16.xpose.msra.mxu0 %v1429_v49  ;;  %v2865_v47 = vld [vmem:[%s3508_s3 + $0x10] sm:$0xff]  }
 0x83c   :  { %v1334_v57 = vadd.f32 %v3083_v14, %v1333_v5  ;;  %2736 = vmatprep.mubr.msk.bf16.mxu1 %vm77_vm0, %v3260_v54  ;;  %v2862_v14 = vld [vmem:[%s3510_s5 + $0x8] sm:$0xff]  }
 0x83d   :  { %2732 = vmatprep.subr.bf16.mxu1 %v2862_v14 }
 0x83e   :  { %v1417_v3 = vpack.c.bf16 %v1334_v57, %v1331_v55  ;;  %2733 = vmatpush3.bf16.msra.mxu1 %v2862_v14 }
 0x83f   :  { %2734 = vmatprep.subr.bf16.mxu1 %v2863_v63 }
 0x840   :  { %2833 = vmatprep.subr.msk.bf16.mxu0 %vm278_vm1, %v1417_v3  ;;  %v1426_v60 = vsel %vm278_vm1, %v1417_v3, 0  ;;  %v2866_v3 = vld [vmem:[%s3506_s1 + $0x18] sm:$0xff]  }
 0x842   :  { %2735 = vmatpush3.bf16.msra.mxu1 %v2863_v63 }
 0x843   :  { %2743 = vmatpush3.bf16.xpose.msra.mxu0 %v1426_v60 }
 0x844   :  { %2764 = vmatprep.subr.bf16.mxu0 %v2864_v46 }
 0x845   :  { %2737 = vmatmul.mubr.msk.bf16.vlgmr.msra.gmra.mxu1 %vm77_vm0, %v3281_v58 }
 0x84a   :  { %2745 = vmatmul.mubr.msk.bf16.vlgmr.msra.gmra.mxu0 %vm278_vm1, %v1416_v62 }
 0x84b   :  { %2768 = vmatprep.mubr.msk.bf16.mxu0 %vm77_vm0, %v3260_v54  ;;  %2765 = vmatpush3.bf16.msra.mxu0 %v2864_v46 }
 0x84c   :  { %2766 = vmatprep.subr.bf16.mxu0 %v2865_v47 }
 0x84f   :  { %2767 = vmatpush3.bf16.msra.mxu0 %v2865_v47 }
 0x852   :  { %2769 = vmatmul.mubr.msk.bf16.vlgmr.msra.gmra.mxu0 %vm77_vm0, %v3281_v58 }
 0x8fb   :  { %v2714_v0 = vpop.f32.mrf.mxu1 }
 0x8fc   :  { %v1176_v6 = vadd.f32 %v2714_v0, %v3341_v12 }
 0x8fd   :  { %v1167_v8 = vpop.f32.mrf.mxu1 }
 0x8fe   :  { %v1183_v21 = vadd.f32 %v1176_v6, %v3238_v24  ;;  %v1188_v9 = vadd.f32 %v1176_v6, %v3232_v45  ;;  %v1168_v10 = vadd.f32 %v3341_v12, %v1167_v8 }
 0x8ff   :  { %v2715_v11 = vpop.f32.mrf.mxu1 }
 0x900   :  { %1187 = vst.msk [vmem:[%s3518_s13 + $0x10] sm:$0x1] %vm1186_vm7, %v1183_v21  ;;  %1189 = vst.msk [vmem:[#allocation2] sm:$0x1] %vm1186_vm7, %v1188_v9  ;;  %v1181_v13 = vadd.f32 %v1168_v10, %v3251_v51  ;;  %v2867_v10 = vld [vmem:[%s3506_s1 + $0x10] sm:$0xff]  }
 0x901   :  { %v1170_v15 = vpop.f32.mrf.mxu1 }
 0x902   :  { %1184 = vst.msk [vmem:[%s3518_s13] sm:$0xff] %vm77_vm0, %v1181_v13  ;;  %v1171_v45 = vadd.f32 %v3341_v12, %v1170_v15 }
 0x904   :  { %v1182_v24 = vadd.f32 %v1171_v45, %v3254_v53 }
 0x905   :  { %v2738_v38 = vpop.f32.mrf.mxu1 }
 0x906   :  { %1185 = vst.msk [vmem:[%s3518_s13 + $0x8] sm:$0xff] %vm77_vm0, %v1182_v24  ;;  %v1410_v39 = vadd.f32 %v2738_v38, %v3116_v56 }
 0x907   :  { %v1401_v43 = vpop.f32.mrf.mxu1 }
 0x908   :  { %v1515_v41 = vpack.c.bf16 %v1410_v39, %v1410_v39  ;;  %v1402_v49 = vadd.f32 %v3116_v56, %v1401_v43 }
 0x909   :  { %v2739_v48 = vpop.f32.mrf.mxu1 }
 0x90a   :  { %v2746_v16 = vpop.f32.mrf.mxu0  ;;  %v1523_v44 = vand.u32 %v1515_v41, %v3119_v59 }
 0x90b   :  { %v1485_v20 = vsel %vm346_vm2, %v2746_v16, -inf  ;;  %v1404_v5 = vpop.f32.mrf.mxu1 }
 0x90c   :  { %v1465_v17 = vpop.f32.mrf.mxu0  ;;  %2748 = vmatprep.subr.bf16.mxu1 %v1523_v44  ;;  %v1405_v55 = vadd.f32 %v3116_v56, %v1404_v5 }
 0x90d   :  { %v1479_v18 = vsel %vm339_vm3, %v1465_v17, -inf  ;;  %2749 = vmatpush3.bf16.msra.mxu1 %v1523_v44 }
 0x90e   :  { %1480 = vmax.xlane.f32.xlu0 %v1479_v18  ;;  %v2747_v51 = vpop.f32.mrf.mxu0  ;;  %v1514_v57 = vpack.c.bf16 %v1405_v55, %v1402_v49 }
 0x910   :  { %v1468_v19 = vpop.f32.mrf.mxu0  ;;  %2750 = vmatprep.subr.bf16.mxu1 %v1514_v57 }
 0x911   :  { %v1482_v22 = vsel %vm339_vm3, %v1468_v19, -inf  ;;  %2751 = vmatpush3.bf16.msra.mxu1 %v1514_v57 }
 0x912   :  { %1486 = vmax.xlane.f32.xlu0 %v1485_v20  ;;  %1483 = vmax.xlane.f32.xlu1 %v1482_v22  ;;  %v2770_v11 = vpop.f32.mrf.mxu0  ;;  %v2868_v20 = vld [vmem:[%s3512_s7] sm:$0xff]  }
 0x913   :  { %2756 = vmatprep.subr.bf16.mxu1 %v2866_v3  ;;  %v1729_v13 = vadd.f32 %v2770_v11, %v3152_v26 }
 0x914   :  { %v1720_v15 = vpop.f32.mrf.mxu0 }
 0x915   :  { %v1808_v45 = vpack.c.bf16 %v1729_v13, %v1729_v13 }
 0x916   :  { %v2771_v24 = vpop.f32.mrf.mxu0 }
 0x917   :  { %2834 = vmatprep.subr.msk.bf16.mxu0 %vm278_vm1, %v1808_v45 }
 0x918   :  { %v1723_v18 = vpop.f32.mrf.mxu0 }
 0x919   :  { %v1724_v51 = vadd.f32 %v3152_v26, %v1723_v18 }
 0x997   :  { %v1481_v23 = vpop.xlane.xlu0 %1480 }
 0x998   :  { %v1488_v53 = vsub.f32 %v1465_v17, %v1481_v23  ;;  %v1721_v17 = vadd.f32 %v3152_v26, %v1720_v15 }
 0x99a   :  { %v1491_v27 = vmul.f32 1.442695, %v1488_v53 }
 0x99b   :  { %v1487_v28 = vpop.xlane.xlu0 %1486  ;;  %v1484_v7 = vpop.xlane.xlu1 %1483 }
 0x99c   :  { %2902 = vpow2.f32 %v1491_v27  ;;  %v1490_v29 = vsub.f32 %v2746_v16, %v1487_v28  ;;  %v1489_v30 = vsub.f32 %v1468_v19, %v1484_v7  ;;  %v1819_v16 = vsel %vm278_vm1, %v1808_v45, 0 }
 0x99d   :  { %2781 = vmatpush3.bf16.xpose.msra.mxu0 %v1819_v16  ;;  %v1807_v19 = vpack.c.bf16 %v1724_v51, %v1721_v17 }
 0x99e   :  { %v1495_v31 = vmul.f32 1.442695, %v1490_v29  ;;  %v1493_v32 = vmul.f32 1.442695, %v1489_v30 }
 0x99f   :  { %2835 = vmatprep.subr.msk.bf16.mxu0 %vm278_vm1, %v1807_v19 }
 0x9a0   :  { %2904 = vpow2.f32 %v1495_v31 }
 0x9a1   :  { %2906 = vpow2.f32 %v1493_v32 }
 0x9a9   :  { %v2903_v33 = vpop.eup %2902 }
 0x9aa   :  { %v1497_v34 = vsel %vm339_vm3, %v2903_v33, 0.0 }
 0x9ab   :  { %1498 = vadd.xlane.f32.xlu1 %v1497_v34 }
 0x9ad   :  { %v2905_v4 = vpop.eup %2904 }
 0x9ae   :  { %v2907_v35 = vpop.eup %2906  ;;  %v1503_v36 = vsel %vm346_vm2, %v2905_v4, 0.0 }
 0x9af   :  { %1504 = vadd.xlane.f32.xlu1 %v1503_v36  ;;  %v1500_v37 = vsel %vm339_vm3, %v2907_v35, 0.0 }
 0x9b0   :  { %1501 = vadd.xlane.f32.xlu0 %v1500_v37 }
 0xa34   :  { %v1499_v60 = vpop.xlane.xlu1 %1498 }
 0xa35   :  { %2908 = vrcp.f32 %v1499_v60  ;;  %v2870_v60 = vld [vmem:[%s3510_s5 + $0x10] sm:$0xff]  }
 0xa38   :  { %v1505_v61 = vpop.xlane.xlu1 %1504 }
 0xa39   :  { %v1502_v62 = vpop.xlane.xlu0 %1501  ;;  %2910 = vrcp.f32 %v1505_v61 }
 0xa3a   :  { %2912 = vrcp.f32 %v1502_v62 }
 0xa42   :  { %v2909_v56 = vpop.eup %2908 }
 0xa43   :  { %v3384_v6 = vmul.f32 %v2909_v56, %v2903_v33 }
 0xa46   :  { %v2911_v14 = vpop.eup %2910 }
 0xa47   :  { %v2913_v63 = vpop.eup %2912  ;;  %v1511_v0 = vmul.f32 %v2911_v14, %v2905_v4 }
 0xa48   :  { %v1509_v8 = vmul.f32 %v2913_v63, %v2907_v35 }
 0xa49   :  { %v1513_v21 = vpack.c.bf16 %v1511_v0, %v1511_v0 }
 0xa4a   :  { %v1512_v9 = vpack.c.bf16 %v1509_v8, %v3384_v6 }
 0xa4c   :  { %2752 = vmatprep.mubr.msk.bf16.mxu1 %vm339_vm3, %v1512_v9 }
 0xa4d   :  { %2753 = vmatmul.mubr.msk.bf16.vlgmr.msra.gmra.mxu1 %vm339_vm3, %v1513_v21 }
 0xa4e   :  { %2757 = vmatpush3.bf16.msra.mxu1 %v2866_v3  ;;  %2760 = vmatprep.mubr.msk.bf16.mxu1 %vm77_vm0, %v3260_v54 }
 0xa4f   :  { %2758 = vmatprep.subr.bf16.mxu1 %v2867_v10 }
 0xa52   :  { %2759 = vmatpush3.bf16.msra.mxu1 %v2867_v10 }
 0xa55   :  { %2761 = vmatmul.mubr.msk.bf16.vlgmr.msra.gmra.mxu1 %vm77_vm0, %v3281_v58 }
 0xa56   :  { %2776 = vmatprep.mubr.msk.bf16.mxu1 %vm77_vm0, %v3260_v54  ;;  %v1816_v54 = vsel %vm278_vm1, %v1807_v19, 0 }
 0xa57   :  { %2783 = vmatpush3.bf16.xpose.msra.mxu0 %v1816_v54 }
 0xa58   :  { %2802 = vmatprep.subr.bf16.mxu0 %v2868_v20 }
 0xb0d   :  { %v2754_v22 = vpop.f32.mrf.mxu1 }
 0xb0e   :  { %v1575_v7 = vadd.f32 3.0, %v2754_v22 }
 0xb0f   :  { %v1559_v23 = vpop.f32.mrf.mxu1 }
 0xb10   :  { %v1573_v53 = vadd.f32 3.0, %v1559_v23  ;;  %v1578_v33 = vmax.f32 %v1575_v7, 0.0 }
 0xb11   :  { %v2755_v27 = vpop.f32.mrf.mxu1 }
 0xb12   :  { %v1576_v28 = vmax.f32 %v1573_v53, 0.0  ;;  %v1581_v38 = vmin.f32 %v1578_v33, 6.0 }
 0xb13   :  { %v1562_v29 = vpop.f32.mrf.mxu1 }
 0xb14   :  { %v1574_v30 = vadd.f32 3.0, %v1562_v29  ;;  %v1579_v31 = vmin.f32 %v1576_v28, 6.0  ;;  %v1584_v49 = vmul.f32 %v2754_v22, %v1581_v38 }
 0xb15   :  { %v2762_v26 = vpop.f32.mrf.mxu1 }
 0xb16   :  { %v1577_v32 = vmax.f32 %v1574_v30, 0.0  ;;  %v1582_v36 = vmul.f32 %v1579_v31, %v1559_v23  ;;  %v1658_v39 = vadd.f32 %v2762_v26, %v3167_v52  ;;  %v1587_v57 = vmul.f32 0.16666667, %v1584_v49 }
 0xb17   :  { %v1649_v34 = vpop.f32.mrf.mxu1 }
 0xb18   :  { %v1580_v4 = vmin.f32 %v1577_v32, 6.0  ;;  %v1650_v44 = vadd.f32 %v3167_v52, %v1649_v34  ;;  %v1585_v47 = vmul.f32 0.16666667, %v1582_v36  ;;  %v1806_v5 = vpack.c.bf16 %v1658_v39, %v1658_v39 }
 0xb19   :  { %v2763_v35 = vpop.f32.mrf.mxu1  ;;  %v1591_v3 = vpack.c.bf16 %v1587_v57, %v1587_v57 }
 0xb1a   :  { %v1583_v37 = vmul.f32 %v1580_v4, %v1562_v29 }
 0xb1b   :  { %v1652_v41 = vpop.f32.mrf.mxu1 }
 0xb1c   :  { %v1586_v43 = vmul.f32 0.16666667, %v1583_v37  ;;  %v1653_v46 = vadd.f32 %v3167_v52, %v1652_v41  ;;  %v2869_v52 = vld [vmem:[%s3510_s5 + $0x18] sm:$0xff]  }
 0xb1d   :  { %2772 = vmatprep.subr.bf16.mxu1 %v2869_v52 }
 0xb1e   :  { %v1805_v48 = vpack.c.bf16 %v1653_v46, %v1650_v44  ;;  %v1590_v55 = vpack.c.bf16 %v1586_v43, %v1585_v47  ;;  %2773 = vmatpush3.bf16.msra.mxu1 %v2869_v52 }
 0xb1f   :  { %2774 = vmatprep.subr.bf16.mxu1 %v2870_v60 }
 0xb20   :  { %2784 = vmatprep.mubr.msk.bf16.mxu0 %vm278_vm1, %v1805_v48 }
 0xb21   :  { %2785 = vmatmul.mubr.msk.bf16.vlgmr.msra.gmra.mxu0 %vm278_vm1, %v1806_v5 }
 0xb22   :  { %2804 = vmatprep.mubr.msk.bf16.mxu0 %vm861_vm5, %v1590_v55  ;;  %2803 = vmatpush3.bf16.msra.mxu0 %v2868_v20 }
 0xb23   :  { %2775 = vmatpush3.bf16.msra.mxu1 %v2870_v60 }
 0xb26   :  { %2777 = vmatmul.mubr.msk.bf16.vlgmr.msra.gmra.mxu1 %vm77_vm0, %v3281_v58 }
 0xb29   :  { %2805 = vmatmul.mubr.msk.bf16.vlgmr.msra.gmra.mxu0 %vm861_vm5, %v1591_v3 }
 0xbe1   :  { %v2786_v61 = vpop.f32.mrf.mxu0 }
 0xbe2   :  { %v1875_v0 = vsel %vm346_vm2, %v2786_v61, -inf }
 0xbe3   :  { %v1855_v62 = vpop.f32.mrf.mxu0 }
 0xbe4   :  { %v1869_v56 = vsel %vm339_vm3, %v1855_v62, -inf }
 0xbe5   :  { %1870 = vmax.xlane.f32.xlu0 %v1869_v56  ;;  %v2787_v14 = vpop.f32.mrf.mxu0 }
 0xbe6   :  { %v2778_v53 = vpop.f32.mrf.mxu1 }
 0xbe7   :  { %v1858_v63 = vpop.f32.mrf.mxu0  ;;  %v1800_v27 = vadd.f32 %v2778_v53, %v3197_v42 }
 0xbe8   :  { %v1872_v8 = vsel %vm339_vm3, %v1858_v63, -inf  ;;  %v1791_v28 = vpop.f32.mrf.mxu1 }
 0xbe9   :  { %1876 = vmax.xlane.f32.xlu0 %v1875_v0  ;;  %1873 = vmax.xlane.f32.xlu1 %v1872_v8  ;;  %v3426_v21 = vpop.f32.mrf.mxu0  ;;  %v1906_v7 = vpack.c.bf16 %v1800_v27, %v1800_v27  ;;  %v1792_v26 = vadd.f32 %v3197_v42, %v1791_v28 }
 0xbea   :  { %v2779_v29 = vpop.f32.mrf.mxu1 }
 0xbeb   :  { %v3428_v9 = vpop.f32.mrf.mxu0  ;;  %v1914_v30 = vand.u32 %v1906_v7, %v3119_v59 }
 0xbec   :  { %v1794_v31 = vpop.f32.mrf.mxu1 }
 0xbed   :  { %v2807_v10 = vpop.f32.mrf.mxu0  ;;  %v1795_v32 = vadd.f32 %v3197_v42, %v1794_v31  ;;  %2788 = vmatprep.subr.bf16.mxu1 %v1914_v30 }
 0xbee   :  { %2789 = vmatpush3.bf16.msra.mxu1 %v1914_v30  ;;  %v2874_v30 = vld [vmem:[%s3516_s11 + $0x18] sm:$0xff]  }
 0xbef   :  { %v1905_v33 = vpack.c.bf16 %v1795_v32, %v1792_v26  ;;  %2816 = vmatprep.subr.bf16.mxu0 %v2874_v30 }
 0xbf0   :  { %2817 = vmatpush3.bf16.msra.mxu0 %v2874_v30 }
 0xbf1   :  { %2790 = vmatprep.subr.bf16.mxu1 %v1905_v33 }
 0xbf2   :  { %2791 = vmatpush3.bf16.msra.mxu1 %v1905_v33 }
 0xc6e   :  { %v1871_v11 = vpop.xlane.xlu0 %1870 }
 0xc6f   :  { %v1878_v58 = vsub.f32 %v1855_v62, %v1871_v11 }
 0xc71   :  { %v1881_v13 = vmul.f32 1.442695, %v1878_v58 }
 0xc72   :  { %v1877_v15 = vpop.xlane.xlu0 %1876  ;;  %v1874_v45 = vpop.xlane.xlu1 %1873 }
 0xc73   :  { %2914 = vpow2.f32 %v1881_v13  ;;  %v1880_v24 = vsub.f32 %v2786_v61, %v1877_v15  ;;  %v1879_v16 = vsub.f32 %v1858_v63, %v1874_v45  ;;  %v2872_v45 = vld [vmem:[%s3514_s9 + $0x8] sm:$0xff]  }
 0xc75   :  { %v1885_v17 = vmul.f32 1.442695, %v1880_v24  ;;  %v1883_v18 = vmul.f32 1.442695, %v1879_v16  ;;  %v2873_v24 = vld [vmem:[%s3514_s9] sm:$0xff]  }
 0xc77   :  { %2916 = vpow2.f32 %v1885_v17 }
 0xc78   :  { %2918 = vpow2.f32 %v1883_v18 }
 0xc80   :  { %v2915_v51 = vpop.eup %2914 }
 0xc81   :  { %v1887_v19 = vsel %vm339_vm3, %v2915_v51, 0.0 }
 0xc82   :  { %1888 = vadd.xlane.f32.xlu1 %v1887_v19 }
 0xc84   :  { %v2917_v54 = vpop.eup %2916 }
 0xc85   :  { %v2919_v20 = vpop.eup %2918  ;;  %v1893_v22 = vsel %vm346_vm2, %v2917_v54, 0.0 }
 0xc86   :  { %1894 = vadd.xlane.f32.xlu1 %v1893_v22  ;;  %v1890_v23 = vsel %vm339_vm3, %v2919_v20, 0.0 }
 0xc87   :  { %1891 = vadd.xlane.f32.xlu0 %v1890_v23 }
 0xd0b   :  { %v1889_v34 = vpop.xlane.xlu1 %1888 }
 0xd0c   :  { %2920 = vrcp.f32 %v1889_v34 }
 0xd0f   :  { %v1895_v4 = vpop.xlane.xlu1 %1894 }
 0xd10   :  { %v1892_v35 = vpop.xlane.xlu0 %1891  ;;  %2922 = vrcp.f32 %v1895_v4 }
 0xd11   :  { %2924 = vrcp.f32 %v1892_v35 }
 0xd19   :  { %v2921_v36 = vpop.eup %2920 }
 0xd1a   :  { %v1897_v37 = vmul.f32 %v2921_v36, %v2915_v51 }
 0xd1c   :  { %v1902_v59 = vadd.f32 %v1897_v37, %v3384_v6  ;;  %v2871_v6 = vld [vmem:[%s3512_s7 + $0x8] sm:$0xff]  }
 0xd1d   :  { %v2923_v38 = vpop.eup %2922  ;;  %2796 = vmatprep.subr.bf16.mxu1 %v2871_v6 }
 0xd1e   :  { %v2925_v39 = vpop.eup %2924  ;;  %v2113_v41 = vmul.f32 0.5, %v1902_v59  ;;  %v1901_v43 = vmul.f32 %v2923_v38, %v2917_v54  ;;  %v2092_v54 = vpop.f32.mrf.mxu0 }
 0xd1f   :  { %v1899_v42 = vmul.f32 %v2925_v39, %v2919_v20 }
 0xd20   :  { %2114 = vst.msk [vmem:[%s3519_s14 + $0x1] sm:$0x1] %vm346_vm2, %v2113_v41  ;;  %v1904_v44 = vpack.c.bf16 %v1901_v43, %v1901_v43 }
 0xd21   :  { %v1903_v46 = vpack.c.bf16 %v1899_v42, %v1897_v37 }
 0xd23   :  { %2792 = vmatprep.mubr.msk.bf16.mxu1 %vm339_vm3, %v1903_v46 }
 0xd24   :  { %2793 = vmatmul.mubr.msk.bf16.vlgmr.msra.gmra.mxu1 %vm339_vm3, %v1904_v44 }
 0xd25   :  { %2797 = vmatpush3.bf16.msra.mxu1 %v2871_v6 }
 0xd26   :  { %2808 = vmatprep.subr.bf16.mxu1 %v2872_v45 }
 0xde4   :  { %v2794_v47 = vpop.f32.mrf.mxu1 }
 0xde5   :  { %v1966_v48 = vadd.f32 3.0, %v2794_v47 }
 0xde6   :  { %v1950_v49 = vpop.f32.mrf.mxu1 }
 0xde7   :  { %v1969_v5 = vmax.f32 %v1966_v48, 0.0  ;;  %v1964_v55 = vadd.f32 3.0, %v1950_v49 }
 0xde8   :  { %v2795_v57 = vpop.f32.mrf.mxu1 }
 0xde9   :  { %v1967_v3 = vmax.f32 %v1964_v55, 0.0  ;;  %v1972_v52 = vmin.f32 %v1969_v5, 6.0 }
 0xdea   :  { %v1953_v60 = vpop.f32.mrf.mxu1 }
 0xdeb   :  { %v1970_v61 = vmin.f32 %v1967_v3, 6.0  ;;  %v1965_v62 = vadd.f32 3.0, %v1953_v60  ;;  %v1975_v14 = vmul.f32 %v2794_v47, %v1972_v52 }
 0xded   :  { %v1968_v56 = vmax.f32 %v1965_v62, 0.0  ;;  %v1973_v63 = vmul.f32 %v1970_v61, %v1950_v49  ;;  %v1978_v10 = vmul.f32 0.16666667, %v1975_v14 }
 0xdef   :  { %v1971_v0 = vmin.f32 %v1968_v56, 6.0  ;;  %v1976_v11 = vmul.f32 0.16666667, %v1973_v63  ;;  %v1982_v15 = vpack.c.bf16 %v1978_v10, %v1978_v10 }
 0xdf1   :  { %v1974_v8 = vmul.f32 %v1971_v0, %v1953_v60 }
 0xdf3   :  { %v1977_v58 = vmul.f32 0.16666667, %v1974_v8 }
 0xdf5   :  { %v1981_v13 = vpack.c.bf16 %v1977_v58, %v1976_v11 }
 0xdf7   :  { %2798 = vmatprep.mubr.msk.bf16.mxu1 %vm861_vm5, %v1981_v13 }
 0xdf8   :  { %2799 = vmatmul.mubr.msk.bf16.vlgmr.msra.gmra.mxu1 %vm861_vm5, %v1982_v15 }
 0xdf9   :  { %2809 = vmatpush3.bf16.msra.mxu1 %v2872_v45 }
 0xdfa   :  { %2810 = vmatprep.subr.bf16.mxu1 %v2873_v24 }
 0xdfd   :  { %2811 = vmatpush3.bf16.msra.mxu1 %v2873_v24 }
 0xeb8   :  { %v2800_v16 = vpop.f32.mrf.mxu1 }
 0xeb9   :  { %v2098_v17 = vadd.f32 %v3426_v21, %v2800_v16 }
 0xeba   :  { %v2029_v18 = vpop.f32.mrf.mxu1 }
 0xebb   :  { %v2090_v51 = vadd.f32 %v3428_v9, %v2029_v18  ;;  %v2112_v20 = vadd.f32 %v3228_v40, %v2098_v17 }
 0xebc   :  { %v2801_v19 = vpop.f32.mrf.mxu1 }
 0xebd   :  { %v2110_v23 = vadd.f32 %v3228_v40, %v2090_v51  ;;  %v2117_v28 = vadd.f32 %v3274_v2, %v2112_v20 }
 0xebe   :  { %v2032_v22 = vpop.f32.mrf.mxu1 }
 0xebf   :  { %v2093_v53 = vadd.f32 %v2092_v54, %v2032_v22  ;;  %v2115_v7 = vadd.f32 %v3243_v50, %v2110_v23  ;;  %v2123_v9 = vpack.c.bf16 %v2117_v28, %v2117_v28  ;;  %v2876_v50 = vld [vmem:[%s3516_s11 + $0x8] sm:$0xff]  }
 0xec1   :  { %v2111_v27 = vadd.f32 %v3228_v40, %v2093_v53  ;;  %v2875_v40 = vld [vmem:[%s3516_s11 + $0x10] sm:$0xff]  }
 0xec2   :  { %2818 = vmatprep.subr.bf16.mxu0 %v2875_v40 }
 0xec3   :  { %v3463_v29 = vadd.f32 %v3248_v25, %v2111_v27  ;;  %2819 = vmatpush3.bf16.msra.mxu0 %v2875_v40  ;;  %v2877_v25 = vld [vmem:[%s3516_s11] sm:$0xff]   ;;  %s2949_s11 = smov [#allocation2]  }
 0xec4   :  { %2820 = vmatprep.subr.bf16.mxu0 %v2876_v50  ;;  %s2326_s20 = sshll.u32 %s2949_s11, 4  ;;  %s2327_s20 = int_to_ptr.vmem [resolvable:$true] %s2326_s20 }
 0xec5   :  { %v2122_v21 = vpack.c.bf16 %v3463_v29, %v2115_v7  ;;  %s2926_s3 = scalar_lea.vmem %s2327_s20, 32  ;;  %p2931_p1 = scmp.lt.s32.totalorder %s2327_s20, %s2327_s20 }
 0xec6   :  { %p2927_p0 = scmp.ne.s32.totalorder %s2327_s20, %s2926_s3  ;;  %p2932_p2 = scmp.lt.s32.totalorder %s2926_s3, %s2926_s3 }
 0xec7   :  { %2812 = vmatprep.mubr.msk.bf16.mxu1 %vm77_vm0, %v2122_v21  ;;  %2821 = vmatpush3.bf16.msra.mxu0 %v2876_v50 }
 0xec8   :  { %2813 = vmatmul.mubr.msk.bf16.vlgmr.msra.gmra.mxu1 %vm77_vm0, %v2123_v9  ;;  %2822 = vmatprep.subr.bf16.mxu0 %v2877_v25  ;;  %p2933_p3 = por %p2932_p2, %p2931_p1 }
 0xeca   :  { %p2934_p4 = pnand %p2933_p3, %p2927_p0 }
 0xecb   :  { %2823 = vmatpush3.bf16.msra.mxu0 %v2877_v25 }
 0xf88   :  { %v2814_v2 = vpop.f32.mrf.mxu1 }
 0xf89   :  { %v2192_v26 = vadd.f32 %v2814_v2, %v3307_v1 }
 0xf8a   :  { %v2183_v31 = vpop.f32.mrf.mxu1 }
 0xf8b   :  { %v2199_v32 = vadd.f32 3.0, %v2192_v26  ;;  %v2184_v33 = vadd.f32 %v3307_v1, %v2183_v31 }
 0xf8c   :  { %v2815_v34 = vpop.f32.mrf.mxu1 }
 0xf8d   :  { %v2202_v4 = vmax.f32 %v2199_v32, 0.0  ;;  %v2197_v35 = vadd.f32 3.0, %v2184_v33 }
 0xf8e   :  { %v2186_v36 = vpop.f32.mrf.mxu1 }
 0xf8f   :  { %v2200_v37 = vmax.f32 %v2197_v35, 0.0  ;;  %v2187_v59 = vadd.f32 %v3307_v1, %v2186_v36  ;;  %v2205_v38 = vmin.f32 %v2202_v4, 6.0 }
 0xf91   :  { %v2203_v39 = vmin.f32 %v2200_v37, 6.0  ;;  %v2198_v41 = vadd.f32 3.0, %v2187_v59  ;;  %v2208_v42 = vmul.f32 %v2205_v38, %v2192_v26 }
 0xf93   :  { %v2201_v43 = vmax.f32 %v2198_v41, 0.0  ;;  %v2206_v44 = vmul.f32 %v2203_v39, %v2184_v33  ;;  %v2211_v47 = vmul.f32 0.16666667, %v2208_v42 }
 0xf95   :  { %v2204_v46 = vmin.f32 %v2201_v43, 6.0  ;;  %v2209_v48 = vmul.f32 0.16666667, %v2206_v44  ;;  %v2221_v55 = vpack.c.bf16 %v2211_v47, %v2211_v47 }
 0xf97   :  { %v2207_v6 = vmul.f32 %v2204_v46, %v2187_v59 }
 0xf99   :  { %v2210_v49 = vmul.f32 0.16666667, %v2207_v6 }
 0xf9b   :  { %v2220_v5 = vpack.c.bf16 %v2210_v49, %v2209_v48 }
 0xf9d   :  { %2824 = vmatprep.mubr.msk.bf16.mxu0 %vm1126_vm6, %v2220_v5 }
 0xf9e   :  { %2825 = vmatmul.mubr.msk.bf16.vlgmr.msra.gmra.mxu0 %vm1126_vm6, %v2221_v55 }
0x105e   :  { %v2826_v57 = vpop.f32.mrf.mxu0 }
0x105f   :  { %v2302_v1 = vadd.f32 %v2826_v57, %v3341_v12 }
0x1060   :  { %v2293_v3 = vpop.f32.mrf.mxu0 }
0x1061   :  { %v2309_v52 = vadd.f32 %v2302_v1, %v2117_v28  ;;  %v2314_v60 = vadd.f32 %v2302_v1, %v2112_v20  ;;  %v2294_v61 = vadd.f32 %v3341_v12, %v2293_v3 }
0x1062   :  { %v2827_v62 = vpop.f32.mrf.mxu0 }
0x1063   :  { %2491 = vst.msk [vmem:[%s3518_s13 + $0x28] sm:$0x1] %vm1186_vm7, %v2309_v52  ;;  %2315 = vst.msk [vmem:[#allocation2 + $0x1] sm:$0x1] %vm1186_vm7, %v2314_v60  ;;  %v2307_v56 = vadd.f32 %v2294_v61, %v2115_v7 }
0x1064   :  { %v2296_v14 = vpop.f32.mrf.mxu0 }
0x1065   :  { %2937 = shalt.err (!%p2934_p4)
}
0x1066   :  { %2329 = dma.vmem_to_hbm [thread:$0]  %s2327_s20, 32, %s3520_s15, [#allocation3]   ;;  %2489 = vst.msk [vmem:[%s3518_s13 + $0x18] sm:$0xff] %vm77_vm0, %v2307_v56  ;;  %v2297_v63 = vadd.f32 %v3341_v12, %v2296_v14 }
0x1068   :  { %v2308_v0 = vadd.f32 %v2297_v63, %v3463_v29 }
0x106a   :  { %2490 = vst.msk [vmem:[%s3518_s13 + $0x20] sm:$0xff] %vm77_vm0, %v2308_v0 }
0x106b   :  { %2946 = dma.done.wait [#allocation3], 32  }
0x106c   :  { %2947 = vsyncadd [#allocation3], 4294967264 }
0x106d   :  { %2337 = vsyncpa [#allocation3], 1 }

// kernel: levit_forward.12
= control target key start
LH: loop header
LB: loop body
LE: loop exit
PB: predicated region body
PF: predicated region fallthrough
CT: control target
= control target key end

     0   :  { %v283_v0 = vmov 0.0   ;;  %vm284_vm0 = vmmov 0   ;;  %vm55_vm1 = vcmask 392192   ;;  %vm159_vm2 = vcmask 785408   ;;  %s362_s1 = inlined_call_operand.vmem [shape: bf16[48,96], index: 1, kind: input, shape index: {}]   ;;  %s363_s0 = inlined_call_operand.vmem [shape: f32[10,48], index: 0, kind: input, shape index: {}]   ;;  %s364_s3 = inlined_call_operand.vmem [shape: bf16[96,48], index: 3, kind: input, shape index: {}]   ;;  %s365_s2 = inlined_call_operand.vmem [shape: f32[1,96], index: 2, kind: input, shape index: {}]   ;;  %s366_s4 = inlined_call_operand.vmem [shape: f32[1,48], index: 4, kind: input, shape index: {}]   ;;  %s367_s5 = inlined_call_operand.vmem [shape: f32[10,48], index: 5, kind: output, shape index: {}]  }
   0x1   :  { %246 = vmatprep.subr.bf16.mxu0 %v283_v0  ;;  %v274_v1 = vld [vmem:[%s362_s1 + $0x10] sm:$0xff]   ;;  %252 = vmatprep.mubr.msk.bf16.mxu0 %vm284_vm0, %v283_v0  ;;  %v275_v2 = vld [vmem:[%s362_s1 + $0x8] sm:$0xff]   ;;  %v276_v3 = vld [vmem:[%s362_s1] sm:$0xff]   ;;  %vm216_vm3 = vcmask 386048  }
   0x2   :  { %256 = vmatprep.subr.bf16.mxu1 %v283_v0  ;;  %268 = vmatprep.mubr.msk.bf16.mxu1 %vm284_vm0, %v283_v0  ;;  %v21_v4 = vld [vmem:[%s363_s0] sm:$0xff]  ;;  %v22_v5 = vld [vmem:[%s363_s0 + $0x8] sm:$0x3]  ;;  %v279_v9 = vld [vmem:[%s364_s3 + $0x18] sm:$0xff]  }
   0x3   :  { %247 = vmatpush3.bf16.msra.mxu0 %v274_v1  ;;  %v277_v6 = vld [vmem:[%s364_s3 + $0x28] sm:$0xff]   ;;  %v29_v7 = vpack.c.bf16 %v22_v5, %v21_v4  ;;  %v278_v8 = vld [vmem:[%s364_s3 + $0x20] sm:$0xff]   ;;  %v280_v10 = vld [vmem:[%s364_s3 + $0x10] sm:$0xff]  }
   0x4   :  { %248 = vmatprep.subr.bf16.mxu0 %v283_v0  ;;  %257 = vmatpush3.bf16.msra.mxu1 %v277_v6  ;;  %v281_v11 = vld [vmem:[%s364_s3 + $0x8] sm:$0xff]   ;;  %v282_v12 = vld [vmem:[%s364_s3] sm:$0xff]  }
   0x5   :  { %258 = vmatprep.subr.bf16.mxu1 %v283_v0  ;;  %v222_v13 = vld [vmem:[%s365_s2] ss:$0 sm:$0xff] }
   0x6   :  { %v234_v32 = vld [vmem:[%s366_s4] ss:$0 sm:$0xff] }
   0x7   :  { %249 = vmatpush3.bf16.msra.mxu0 %v275_v2 }
   0x8   :  { %250 = vmatprep.subr.bf16.mxu0 %v283_v0  ;;  %259 = vmatpush3.bf16.msra.mxu1 %v278_v8 }
   0x9   :  { %260 = vmatprep.subr.bf16.mxu1 %v283_v0 }
   0xb   :  { %251 = vmatpush3.bf16.msra.mxu0 %v276_v3 }
   0xc   :  { %261 = vmatpush3.bf16.msra.mxu1 %v279_v9 }
   0xd   :  { %262 = vmatprep.subr.bf16.mxu1 %v283_v0 }
   0xe   :  { %253 = vmatmul.mubr.msk.bf16.vlgmr.msra.gmra.mxu0 %vm55_vm1, %v29_v7 }
  0x10   :  { %263 = vmatpush3.bf16.msra.mxu1 %v280_v10 }
  0x11   :  { %264 = vmatprep.subr.bf16.mxu1 %v283_v0 }
  0x14   :  { %265 = vmatpush3.bf16.msra.mxu1 %v281_v11 }
  0x15   :  { %266 = vmatprep.subr.bf16.mxu1 %v283_v0 }
  0x18   :  { %267 = vmatpush3.bf16.msra.mxu1 %v282_v12 }
  0xce   :  { %v93_v14 = vpop.f32.mrf.mxu0 }
  0xcf   :  { %v94_v15 = vadd.f32 %v222_v13, %v93_v14 }
  0xd0   :  { %v254_v16 = vpop.f32.mrf.mxu0 }
  0xd1   :  { %v100_v17 = vadd.f32 3.0, %v94_v15 }
  0xd2   :  { %v96_v18 = vpop.f32.mrf.mxu0 }
  0xd3   :  { %v102_v19 = vmax.f32 %v100_v17, 0.0  ;;  %v97_v20 = vadd.f32 %v222_v13, %v96_v18 }
  0xd4   :  { %v255_v21 = vpop.f32.mrf.mxu0 }
  0xd5   :  { %v104_v22 = vmin.f32 %v102_v19, 6.0  ;;  %v101_v23 = vadd.f32 3.0, %v97_v20 }
  0xd7   :  { %v103_v24 = vmax.f32 %v101_v23, 0.0  ;;  %v106_v25 = vmul.f32 %v104_v22, %v94_v15 }
  0xd9   :  { %v105_v26 = vmin.f32 %v103_v24, 6.0  ;;  %v108_v28 = vmul.f32 0.16666667, %v106_v25 }
  0xdb   :  { %v107_v27 = vmul.f32 %v105_v26, %v97_v20 }
  0xdd   :  { %v109_v29 = vmul.f32 0.16666667, %v107_v27 }
  0xdf   :  { %v122_v30 = vpack.c.bf16 %v109_v29, %v108_v28 }
  0xe1   :  { %269 = vmatmul.mubr.msk.bf16.vlgmr.msra.gmra.mxu1 %vm159_vm2, %v122_v30 }
 0x1a1   :  { %v197_v31 = vpop.f32.mrf.mxu1 }
 0x1a2   :  { %v204_v33 = vadd.f32 %v197_v31, %v21_v4 }
 0x1a3   :  { %v270_v34 = vpop.f32.mrf.mxu1 }
 0x1a4   :  { %v213_v35 = vadd.f32 %v234_v32, %v204_v33 }
 0x1a5   :  { %v200_v36 = vpop.f32.mrf.mxu1 }
 0x1a6   :  { %215 = vst.msk [vmem:[%s367_s5] sm:$0xff] %vm55_vm1, %v213_v35  ;;  %v205_v37 = vadd.f32 %v200_v36, %v22_v5 }
 0x1a7   :  { %v271_v38 = vpop.f32.mrf.mxu1 }
 0x1a8   :  { %v214_v39 = vadd.f32 %v234_v32, %v205_v37 }
 0x1aa   :  { %217 = vst.msk [vmem:[%s367_s5 + $0x8] sm:$0x3] %vm216_vm3, %v214_v39 }

// kernel: levit_forward.10
= control target key start
LH: loop header
LB: loop body
LE: loop exit
PB: predicated region body
PF: predicated region fallthrough
CT: control target
= control target key end

     0   :  { %v2437_v0 = vmov 0.0   ;;  %vm2438_vm0 = vmmov 0   ;;  %vm74_vm1 = vcmask 261120   ;;  %vm249_vm2 = vcmask 64512   ;;  %s2990_s1 = inlined_call_operand.vmem [shape: bf16[2,32,8], index: 1, kind: input, shape index: {}]   ;;  %s2991_s0 = inlined_call_operand.vmem [shape: f32[2,10,32], index: 0, kind: input, shape index: {}]   ;;  %s2992_s3 = inlined_call_operand.vmem [shape: bf16[2,32,8], index: 3, kind: input, shape index: {}]   ;;  %s2993_s4 = inlined_call_operand.vmem [shape: f32[2,1,8], index: 4, kind: input, shape index: {}]   ;;  %s2994_s2 = inlined_call_operand.vmem [shape: f32[2,1,8], index: 2, kind: input, shape index: {}]   ;;  %s2995_s5 = inlined_call_operand.vmem [shape: bf16[2,32,16], index: 5, kind: input, shape index: {}]   ;;  %s2996_s6 = inlined_call_operand.vmem [shape: f32[2,1,16], index: 6, kind: input, shape index: {}]   ;;  %s2997_s7 = inlined_call_operand.vmem [shape: bf16[2,16,32], index: 7, kind: input, shape index: {}]   ;;  %s2998_s14 = inlined_call_operand.vmem [shape: f32[2,10], index: 14, kind: output, shape index: {1}]   ;;  %s2999_s9 = inlined_call_operand.vmem [shape: bf16[32,64], index: 9, kind: input, shape index: {}]   ;;  %s3000_s8 = inlined_call_operand.vmem [shape: f32[1,32], index: 8, kind: input, shape index: {}]   ;;  %s3001_s11 = inlined_call_operand.vmem [shape: bf16[64,32], index: 11, kind: input, shape index: {}]   ;;  %s3002_s10 = inlined_call_operand.vmem [shape: f32[1,64], index: 10, kind: input, shape index: {}]   ;;  %s3003_s12 = inlined_call_operand.vmem [shape: f32[1,32], index: 12, kind: input, shape index: {}]   ;;  %s3004_s13 = inlined_call_operand.vmem [shape: f32[2,10,32], index: 13, kind: output, shape index: {0}]   ;;  %s3005_s15 = inlined_call_operand.vmem [shape: f32[2,32], index: 15, kind: output, shape index: {2}]  }
   0x1   :  { %2155 = vmatprep.subr.bf16.mxu1 %v2437_v0  ;;  %v2365_v1 = vld [vmem:[%s2990_s1 + $0x8] sm:$0xff]   ;;  %2159 = vmatprep.mubr.msk.bf16.mxu1 %vm2438_vm0, %v2437_v0  ;;  %v2366_v2 = vld [vmem:[%s2990_s1] sm:$0xff]   ;;  %vm297_vm3 = vcmask 80896   ;;  %vm301_vm4 = vcmask 74752   ;;  %vm326_vm5 = vcmask 1044480   ;;  %v2372_v52 = vld [vmem:[%s2990_s1 + $0x18] sm:$0xff]  }
   0x2   :  { %2171 = vmatprep.subr.bf16.mxu0 %v2437_v0  ;;  %2175 = vmatprep.mubr.msk.bf16.mxu0 %vm2438_vm0, %v2437_v0  ;;  %v2534_v3 = vld [vmem:[%s2991_s0] sm:$0xff]  ;;  %v2539_v4 = vld [vmem:[%s2991_s0 + $0x8] sm:$0x3]  ;;  %v2374_v53 = vld [vmem:[%s2990_s1 + $0x10] sm:$0xff]   ;;  %vm828_vm6 = vcmask 73728   ;;  %vm723_vm7 = vcmask 130048  }
   0x3   :  { %2156 = vmatpush3.bf16.msra.mxu1 %v2365_v1  ;;  %v2367_v5 = vld [vmem:[%s2992_s3 + $0x8] sm:$0xff]   ;;  %v2547_v6 = vpack.c.bf16 %v2539_v4, %v2534_v3  ;;  %v2368_v7 = vld [vmem:[%s2992_s3] sm:$0xff]   ;;  %v2371_v60 = vld [vmem:[%s2992_s3 + $0x18] sm:$0xff]   ;;  %vm950_vm8 = vcmask 523264   ;;  %vm998_vm9 = vcmask 254976   ;;  %vm1001_vm10 = vcmask 254977  }
   0x4   :  { %2157 = vmatprep.subr.bf16.mxu1 %v2437_v0  ;;  %v2566_v13 = vld [vmem:[%s2993_s4] ss:$0 sm:$0xff]  ;;  %v2369_v25 = vld [vmem:[%s2995_s5 + $0x8] sm:$0xff]   ;;  %v2373_v62 = vld [vmem:[%s2992_s3 + $0x10] sm:$0xff]  }
   0x5   :  { %v2574_v21 = vld [vmem:[%s2994_s2] ss:$0 sm:$0xff]  ;;  %2172 = vmatpush3.bf16.msra.mxu0 %v2369_v25  ;;  %v2647_v25 = vld [vmem:[%s2993_s4 + $0x1] ss:$0 sm:$0xff] }
   0x6   :  { %v2370_v26 = vld [vmem:[%s2995_s5] sm:$0xff]   ;;  %2173 = vmatprep.subr.bf16.mxu0 %v2437_v0 }
   0x7   :  { %2158 = vmatpush3.bf16.msra.mxu1 %v2366_v2  ;;  %v2601_v45 = vld [vmem:[%s2996_s6] ss:$0 sm:$0xff] }
   0x8   :  { %2163 = vmatprep.subr.bf16.mxu1 %v2437_v0 }
   0x9   :  { %2174 = vmatpush3.bf16.msra.mxu0 %v2370_v26 }
   0xa   :  { %2160 = vmatmul.mubr.msk.bf16.vlgmr.msra.gmra.mxu1 %vm74_vm1, %v2547_v6  ;;  %2185 = vmatprep.subr.bf16.mxu0 %v2437_v0 }
   0xb   :  { %2164 = vmatpush3.bf16.msra.mxu1 %v2367_v5  ;;  %2167 = vmatprep.mubr.msk.bf16.mxu1 %vm2438_vm0, %v2437_v0  ;;  %v2640_v5 = vld [vmem:[%s2994_s2 + $0x1] ss:$0 sm:$0xff] }
   0xc   :  { %2165 = vmatprep.subr.bf16.mxu1 %v2437_v0  ;;  %2176 = vmatmul.mubr.msk.bf16.vlgmr.msra.gmra.mxu0 %vm74_vm1, %v2547_v6 }
   0xd   :  { %2187 = vmatprep.mubr.msk.bf16.mxu0 %vm2438_vm0, %v2437_v0 }
   0xf   :  { %2166 = vmatpush3.bf16.msra.mxu1 %v2368_v7 }
  0x10   :  { %2179 = vmatprep.subr.bf16.mxu1 %v2437_v0 }
  0x12   :  { %2168 = vmatmul.mubr.msk.bf16.vlgmr.msra.gmra.mxu1 %vm74_vm1, %v2547_v6 }
  0x13   :  { %2181 = vmatprep.mubr.msk.bf16.mxu1 %vm2438_vm0, %v2437_v0 }
  0xca   :  { %v112_v8 = vpop.f32.mrf.mxu1 }
  0xcb   :  { %v113_v23 = vadd.f32 %v2574_v21, %v112_v8 }
  0xcc   :  { %v2161_v9 = vpop.f32.mrf.mxu1  ;;  %v240_v33 = vpop.f32.mrf.mxu0 }
  0xcd   :  { %v241_v46 = vadd.f32 %v2601_v45, %v240_v33 }
  0xce   :  { %v115_v10 = vpop.f32.mrf.mxu1  ;;  %v2177_v34 = vpop.f32.mrf.mxu0 }
  0xcf   :  { %v116_v22 = vadd.f32 %v2574_v21, %v115_v10 }
  0xd0   :  { %v2162_v11 = vpop.f32.mrf.mxu1  ;;  %v243_v47 = vpop.f32.mrf.mxu0 }
  0xd1   :  { %v247_v24 = vpack.c.bf16 %v116_v22, %v113_v23  ;;  %v244_v48 = vadd.f32 %v2601_v45, %v243_v47 }
  0xd2   :  { %v176_v12 = vpop.f32.mrf.mxu1  ;;  %v2178_v49 = vpop.f32.mrf.mxu0 }
  0xd3   :  { %v177_v16 = vadd.f32 %v2566_v13, %v176_v12  ;;  %v322_v50 = vpack.c.bf16 %v244_v48, %v241_v46 }
  0xd4   :  { %v2169_v14 = vpop.f32.mrf.mxu1 }
  0xd5   :  { %v328_v51 = vsel %vm326_vm5, %v322_v50, 0 }
  0xd6   :  { %v179_v15 = vpop.f32.mrf.mxu1  ;;  %2186 = vmatpush3.bf16.msra.mxu0 %v328_v51 }
  0xd7   :  { %v180_v17 = vadd.f32 %v2566_v13, %v179_v15  ;;  %2199 = vmatprep.subr.bf16.mxu0 %v2437_v0 }
  0xd8   :  { %v2170_v18 = vpop.f32.mrf.mxu1 }
  0xd9   :  { %v248_v19 = vpack.c.bf16 %v180_v17, %v177_v16 }
  0xdb   :  { %v254_v20 = vsel %vm249_vm2, %v248_v19, 0 }
  0xdc   :  { %2180 = vmatpush3.bf16.xpose.msra.mxu1 %v254_v20 }
  0xdd   :  { %2191 = vmatprep.subr.bf16.mxu1 %v2437_v0 }
  0xe3   :  { %2182 = vmatmul.mubr.msk.bf16.vlgmr.msra.gmra.mxu1 %vm249_vm2, %v247_v24 }
  0xe4   :  { %2195 = vmatprep.mubr.msk.bf16.mxu1 %vm2438_vm0, %v2437_v0  ;;  %2192 = vmatpush3.bf16.msra.mxu1 %v2372_v52 }
  0xe5   :  { %2193 = vmatprep.subr.bf16.mxu1 %v2437_v0 }
  0xe8   :  { %2194 = vmatpush3.bf16.msra.mxu1 %v2374_v53 }
  0xe9   :  { %2207 = vmatprep.subr.bf16.mxu1 %v2437_v0 }
  0xeb   :  { %2196 = vmatmul.mubr.msk.bf16.vlgmr.msra.gmra.mxu1 %vm74_vm1, %v2547_v6 }
  0xec   :  { %2211 = vmatprep.mubr.msk.bf16.mxu1 %vm2438_vm0, %v2437_v0 }
 0x1a3   :  { %v290_v27 = vpop.f32.mrf.mxu1 }
 0x1a4   :  { %v298_v28 = vsel %vm297_vm3, %v290_v27, -inf }
 0x1a5   :  { %299 = vmax.xlane.f32.xlu0 %v298_v28  ;;  %v2183_v29 = vpop.f32.mrf.mxu1 }
 0x1a7   :  { %v293_v30 = vpop.f32.mrf.mxu1 }
 0x1a8   :  { %v302_v31 = vsel %vm301_vm4, %v293_v30, -inf }
 0x1a9   :  { %303 = vmax.xlane.f32.xlu0 %v302_v31  ;;  %v2184_v32 = vpop.f32.mrf.mxu1 }
 0x1ab   :  { %v443_v63 = vpop.f32.mrf.mxu1 }
 0x1ac   :  { %v444_v7 = vadd.f32 %v2640_v5, %v443_v63 }
 0x1ad   :  { %v2197_v1 = vpop.f32.mrf.mxu1 }
 0x1af   :  { %v446_v2 = vpop.f32.mrf.mxu1 }
 0x1b0   :  { %v447_v8 = vadd.f32 %v2640_v5, %v446_v2 }
 0x1b1   :  { %v2198_v9 = vpop.f32.mrf.mxu1 }
 0x1b2   :  { %v582_v10 = vpack.c.bf16 %v447_v8, %v444_v7 }
 0x22e   :  { %v300_v35 = vpop.xlane.xlu0 %299 }
 0x22f   :  { %v305_v36 = vsub.f32 %v290_v27, %v300_v35 }
 0x231   :  { %v307_v37 = vmul.f32 1.442695, %v305_v36 }
 0x232   :  { %v304_v38 = vpop.xlane.xlu0 %303 }
 0x233   :  { %2405 = vpow2.f32 %v307_v37  ;;  %v306_v39 = vsub.f32 %v293_v30, %v304_v38  ;;  %v2375_v37 = vld [vmem:[%s2995_s5 + $0x18] sm:$0xff]   ;;  %v2376_v38 = vld [vmem:[%s2995_s5 + $0x10] sm:$0xff]  }
 0x234   :  { %2208 = vmatpush3.bf16.msra.mxu1 %v2375_v37 }
 0x235   :  { %v309_v40 = vmul.f32 1.442695, %v306_v39  ;;  %2209 = vmatprep.subr.bf16.mxu1 %v2437_v0 }
 0x237   :  { %2407 = vpow2.f32 %v309_v40 }
 0x238   :  { %2210 = vmatpush3.bf16.msra.mxu1 %v2376_v38  ;;  %v2379_v38 = vld [vmem:[%s2999_s9 + $0x8] sm:$0xff]  }
 0x239   :  { %2221 = vmatprep.subr.bf16.mxu1 %v2437_v0 }
 0x23b   :  { %2212 = vmatmul.mubr.msk.bf16.vlgmr.msra.gmra.mxu1 %vm74_vm1, %v2547_v6 }
 0x23c   :  { %2223 = vmatprep.mubr.msk.bf16.mxu1 %vm2438_vm0, %v2437_v0 }
 0x240   :  { %v2406_v41 = vpop.eup %2405 }
 0x241   :  { %v311_v42 = vsel %vm297_vm3, %v2406_v41, 0.0 }
 0x242   :  { %312 = vadd.xlane.f32.xlu1 %v311_v42 }
 0x244   :  { %v2408_v43 = vpop.eup %2407 }
 0x245   :  { %v314_v44 = vsel %vm301_vm4, %v2408_v43, 0.0 }
 0x246   :  { %315 = vadd.xlane.f32.xlu1 %v314_v44 }
 0x2cb   :  { %v313_v54 = vpop.xlane.xlu1 %312 }
 0x2cc   :  { %2409 = vrcp.f32 %v313_v54 }
 0x2cf   :  { %v316_v55 = vpop.xlane.xlu1 %315 }
 0x2d0   :  { %2411 = vrcp.f32 %v316_v55  ;;  %v2681_v55 = vld [vmem:[%s2996_s6 + $0x1] ss:$0 sm:$0xff] }
 0x2d9   :  { %v2410_v56 = vpop.eup %2409 }
 0x2da   :  { %v2619_v58 = vmul.f32 %v2410_v56, %v2406_v41 }
 0x2dd   :  { %v2412_v57 = vpop.eup %2411 }
 0x2de   :  { %v320_v59 = vmul.f32 %v2412_v57, %v2408_v43 }
 0x2e0   :  { %v321_v61 = vpack.c.bf16 %v320_v59, %v2619_v58 }
 0x2e2   :  { %2188 = vmatmul.mubr.msk.bf16.vlgmr.msra.gmra.mxu0 %vm297_vm3, %v321_v61 }
 0x2e3   :  { %2200 = vmatpush3.bf16.msra.mxu0 %v2371_v60  ;;  %2203 = vmatprep.mubr.msk.bf16.mxu0 %vm2438_vm0, %v2437_v0 }
 0x2e4   :  { %2201 = vmatprep.subr.bf16.mxu0 %v2437_v0 }
 0x2e7   :  { %2202 = vmatpush3.bf16.msra.mxu0 %v2373_v62 }
 0x2e8   :  { %2215 = vmatprep.subr.bf16.mxu0 %v2437_v0 }
 0x2ea   :  { %2204 = vmatmul.mubr.msk.bf16.vlgmr.msra.gmra.mxu0 %vm74_vm1, %v2547_v6 }
 0x2eb   :  { %2217 = vmatprep.mubr.msk.bf16.mxu0 %vm2438_vm0, %v2437_v0 }
 0x2fb   :  { %v575_v56 = vpop.f32.mrf.mxu1 }
 0x2fc   :  { %v576_v59 = vadd.f32 %v2681_v55, %v575_v56  ;;  %v2383_v56 = vld [vmem:[%s2992_s3 + $0x8] sm:$0xff]  }
 0x2fd   :  { %v2213_v57 = vpop.f32.mrf.mxu1 }
 0x2fe   :  { %v2384_v57 = vld [vmem:[%s2992_s3] sm:$0xff]  }
 0x2ff   :  { %v578_v60 = vpop.f32.mrf.mxu1 }
 0x300   :  { %v579_v61 = vadd.f32 %v2681_v55, %v578_v60  ;;  %v2386_v60 = vld [vmem:[%s3001_s11 + $0x10] sm:$0xff]  }
 0x301   :  { %v2214_v62 = vpop.f32.mrf.mxu1 }
 0x302   :  { %v655_v63 = vpack.c.bf16 %v579_v61, %v576_v59  ;;  %v2385_v59 = vld [vmem:[%s3001_s11 + $0x18] sm:$0xff]   ;;  %v2387_v61 = vld [vmem:[%s3001_s11 + $0x8] sm:$0xff]   ;;  %v2388_v62 = vld [vmem:[%s3001_s11] sm:$0xff]  }
 0x304   :  { %v660_v1 = vsel %vm326_vm5, %v655_v63, 0  ;;  %v2798_v63 = vld [vmem:[%s3002_s10] ss:$0 sm:$0xff] }
 0x305   :  { %2222 = vmatpush3.bf16.msra.mxu1 %v660_v1 }
 0x306   :  { %2233 = vmatprep.subr.bf16.mxu1 %v2437_v0 }
 0x3a2   :  { %v364_v11 = vpop.f32.mrf.mxu0 }
 0x3a3   :  { %v371_v12 = vadd.f32 3.0, %v364_v11 }
 0x3a4   :  { %v2189_v14 = vpop.f32.mrf.mxu0 }
 0x3a5   :  { %v373_v15 = vmax.f32 %v371_v12, 0.0 }
 0x3a6   :  { %v367_v16 = vpop.f32.mrf.mxu0 }
 0x3a7   :  { %v375_v17 = vmin.f32 %v373_v15, 6.0  ;;  %v372_v18 = vadd.f32 3.0, %v367_v16  ;;  %v2377_v15 = vld [vmem:[%s2997_s7] sm:$0xff]  }
 0x3a8   :  { %v2190_v19 = vpop.f32.mrf.mxu0 }
 0x3a9   :  { %v374_v20 = vmax.f32 %v372_v18, 0.0  ;;  %v377_v23 = vmul.f32 %v375_v17, %v364_v11 }
 0x3aa   :  { %v509_v22 = vpop.f32.mrf.mxu0 }
 0x3ab   :  { %v376_v24 = vmin.f32 %v374_v20, 6.0  ;;  %v2649_v29 = vmul.f32 0.16666667, %v377_v23  ;;  %v510_v31 = vadd.f32 %v2647_v25, %v509_v22 }
 0x3ac   :  { %v2205_v26 = vpop.f32.mrf.mxu0 }
 0x3ad   :  { %v378_v27 = vmul.f32 %v376_v24, %v367_v16 }
 0x3ae   :  { %v512_v28 = vpop.f32.mrf.mxu0 }
 0x3af   :  { %v2651_v30 = vmul.f32 0.16666667, %v378_v27  ;;  %v513_v32 = vadd.f32 %v2647_v25, %v512_v28 }
 0x3b0   :  { %v2206_v33 = vpop.f32.mrf.mxu0 }
 0x3b1   :  { %v383_v34 = vpack.c.bf16 %v2651_v30, %v2649_v29  ;;  %v583_v35 = vpack.c.bf16 %v513_v32, %v510_v31 }
 0x3b3   :  { %v588_v36 = vsel %vm249_vm2, %v583_v35, 0 }
 0x3b4   :  { %2216 = vmatpush3.bf16.xpose.msra.mxu0 %v588_v36 }
 0x3b5   :  { %2227 = vmatprep.subr.bf16.mxu0 %v2437_v0 }
 0x3bb   :  { %2218 = vmatmul.mubr.msk.bf16.vlgmr.msra.gmra.mxu0 %vm249_vm2, %v582_v10 }
 0x3bc   :  { %2229 = vmatprep.mubr.msk.bf16.mxu0 %vm2438_vm0, %v2437_v0 }
 0x47b   :  { %v624_v39 = vpop.f32.mrf.mxu0 }
 0x47c   :  { %v631_v40 = vsel %vm297_vm3, %v624_v39, -inf }
 0x47d   :  { %632 = vmax.xlane.f32.xlu0 %v631_v40  ;;  %v2219_v41 = vpop.f32.mrf.mxu0 }
 0x47f   :  { %v627_v42 = vpop.f32.mrf.mxu0 }
 0x480   :  { %v634_v43 = vsel %vm301_vm4, %v627_v42, -inf }
 0x481   :  { %635 = vmax.xlane.f32.xlu1 %v634_v43  ;;  %v2220_v44 = vpop.f32.mrf.mxu0 }
 0x506   :  { %v633_v46 = vpop.xlane.xlu0 %632 }
 0x507   :  { %v637_v47 = vsub.f32 %v624_v39, %v633_v46  ;;  %v2380_v39 = vld [vmem:[%s2999_s9] sm:$0xff]  }
 0x509   :  { %v639_v48 = vmul.f32 1.442695, %v637_v47 }
 0x50a   :  { %v636_v49 = vpop.xlane.xlu1 %635 }
 0x50b   :  { %2413 = vpow2.f32 %v639_v48  ;;  %v638_v50 = vsub.f32 %v627_v42, %v636_v49  ;;  %v2723_v42 = vld [vmem:[%s3000_s8] ss:$0 sm:$0xff] }
 0x50d   :  { %v641_v6 = vmul.f32 1.442695, %v638_v50 }
 0x50f   :  { %2415 = vpow2.f32 %v641_v6 }
 0x518   :  { %v2414_v51 = vpop.eup %2413 }
 0x519   :  { %v643_v52 = vsel %vm297_vm3, %v2414_v51, 0.0 }
 0x51a   :  { %644 = vadd.xlane.f32.xlu0 %v643_v52 }
 0x51c   :  { %v2416_v53 = vpop.eup %2415 }
 0x51d   :  { %v646_v54 = vsel %vm301_vm4, %v2416_v53, 0.0 }
 0x51e   :  { %647 = vadd.xlane.f32.xlu1 %v646_v54 }
 0x5a3   :  { %v645_v2 = vpop.xlane.xlu0 %644 }
 0x5a4   :  { %2417 = vrcp.f32 %v645_v2 }
 0x5a7   :  { %v648_v7 = vpop.xlane.xlu1 %647 }
 0x5a8   :  { %2419 = vrcp.f32 %v648_v7 }
 0x5b1   :  { %v2418_v8 = vpop.eup %2417 }
 0x5b2   :  { %v650_v9 = vmul.f32 %v2418_v8, %v2414_v51  ;;  %v2381_v51 = vld [vmem:[%s2990_s1 + $0x8] sm:$0xff]  }
 0x5b4   :  { %v653_v10 = vadd.f32 %v650_v9, %v2619_v58  ;;  %v2378_v58 = vld [vmem:[%s2997_s7 + $0x8] sm:$0xff]  }
 0x5b5   :  { %v2420_v11 = vpop.eup %2419  ;;  %2228 = vmatpush3.bf16.msra.mxu0 %v2378_v58 }
 0x5b6   :  { %v652_v12 = vmul.f32 %v2420_v11, %v2416_v53  ;;  %v827_v14 = vmul.f32 0.5, %v653_v10  ;;  %2239 = vmatprep.subr.bf16.mxu0 %v2437_v0  ;;  %v2382_v53 = vld [vmem:[%s2990_s1] sm:$0xff]  }
 0x5b8   :  { %v654_v16 = vpack.c.bf16 %v652_v12, %v650_v9  ;;  %829 = vst.msk [vmem:[%s2998_s14] sm:$0x1] %vm828_vm6, %v827_v14 }
 0x5ba   :  { %2224 = vmatmul.mubr.msk.bf16.vlgmr.msra.gmra.mxu1 %vm297_vm3, %v654_v16 }
 0x5bb   :  { %2234 = vmatpush3.bf16.msra.mxu1 %v2377_v15  ;;  %2235 = vmatprep.mubr.msk.bf16.mxu1 %vm2438_vm0, %v2437_v0 }
 0x5bc   :  { %2247 = vmatprep.subr.bf16.mxu1 %v2437_v0 }
 0x5c2   :  { %2236 = vmatmul.mubr.msk.bf16.vlgmr.msra.gmra.mxu1 %vm723_vm7, %v383_v34 }
 0x5c3   :  { %2255 = vmatprep.mubr.msk.bf16.mxu1 %vm2438_vm0, %v2437_v0  ;;  %2248 = vmatpush3.bf16.msra.mxu1 %v2385_v59 }
 0x5c4   :  { %2249 = vmatprep.subr.bf16.mxu1 %v2437_v0 }
 0x5c7   :  { %2250 = vmatpush3.bf16.msra.mxu1 %v2386_v60 }
 0x5c8   :  { %2251 = vmatprep.subr.bf16.mxu1 %v2437_v0 }
 0x5cb   :  { %2252 = vmatpush3.bf16.msra.mxu1 %v2387_v61 }
 0x5cc   :  { %2253 = vmatprep.subr.bf16.mxu1 %v2437_v0 }
 0x5cf   :  { %2254 = vmatpush3.bf16.msra.mxu1 %v2388_v62 }
 0x5d0   :  { %2275 = vmatprep.subr.bf16.mxu1 %v2437_v0 }
 0x67a   :  { %v696_v17 = vpop.f32.mrf.mxu1 }
 0x67b   :  { %v703_v18 = vadd.f32 3.0, %v696_v17 }
 0x67c   :  { %v2225_v19 = vpop.f32.mrf.mxu1 }
 0x67d   :  { %v705_v20 = vmax.f32 %v703_v18, 0.0 }
 0x67e   :  { %v699_v22 = vpop.f32.mrf.mxu1 }
 0x67f   :  { %v707_v23 = vmin.f32 %v705_v20, 6.0  ;;  %v704_v24 = vadd.f32 3.0, %v699_v22 }
 0x680   :  { %v2226_v26 = vpop.f32.mrf.mxu1 }
 0x681   :  { %v706_v27 = vmax.f32 %v704_v24, 0.0  ;;  %v709_v29 = vmul.f32 %v707_v23, %v696_v17 }
 0x682   :  { %v811_v28 = vpop.f32.mrf.mxu1 }
 0x683   :  { %v708_v30 = vmin.f32 %v706_v27, 6.0  ;;  %v711_v34 = vmul.f32 0.16666667, %v709_v29 }
 0x684   :  { %v2237_v31 = vpop.f32.mrf.mxu1 }
 0x685   :  { %v710_v32 = vmul.f32 %v708_v30, %v699_v22 }
 0x686   :  { %v814_v33 = vpop.f32.mrf.mxu1 }
 0x687   :  { %v712_v35 = vmul.f32 0.16666667, %v710_v32 }
 0x688   :  { %v2238_v36 = vpop.f32.mrf.mxu1 }
 0x689   :  { %v716_v37 = vpack.c.bf16 %v712_v35, %v711_v34 }
 0x68b   :  { %2230 = vmatmul.mubr.msk.bf16.vlgmr.msra.gmra.mxu0 %vm723_vm7, %v716_v37 }
 0x68c   :  { %2243 = vmatprep.mubr.msk.bf16.mxu0 %vm2438_vm0, %v2437_v0  ;;  %2240 = vmatpush3.bf16.msra.mxu0 %v2379_v38 }
 0x68d   :  { %2241 = vmatprep.subr.bf16.mxu0 %v2437_v0 }
 0x690   :  { %2242 = vmatpush3.bf16.msra.mxu0 %v2380_v39  ;;  %v2390_v39 = vld [vmem:[%s2995_s5] sm:$0xff]  }
 0x691   :  { %2259 = vmatprep.subr.bf16.mxu0 %v2437_v0 }
 0x74b   :  { %v761_v40 = vpop.f32.mrf.mxu0 }
 0x74c   :  { %v812_v41 = vadd.f32 %v811_v28, %v761_v40 }
 0x74d   :  { %v2231_v43 = vpop.f32.mrf.mxu0 }
 0x74e   :  { %v825_v46 = vadd.f32 %v2723_v42, %v812_v41 }
 0x74f   :  { %v764_v44 = vpop.f32.mrf.mxu0 }
 0x750   :  { %v815_v47 = vadd.f32 %v814_v33, %v764_v44  ;;  %v2730_v50 = vadd.f32 %v825_v46, %v2534_v3  ;;  %v2750_v3 = vld [vmem:[%s2991_s0 + $0x10] sm:$0xff] }
 0x751   :  { %v2232_v48 = vpop.f32.mrf.mxu0 }
 0x752   :  { %v2727_v49 = vadd.f32 %v2723_v42, %v815_v47 }
 0x754   :  { %v2734_v6 = vadd.f32 %v2727_v49, %v2539_v4  ;;  %v2755_v4 = vld [vmem:[%s2991_s0 + $0x18] sm:$0x3] }
 0x755   :  { %v2760_v54 = vpack.c.bf16 %v2755_v4, %v2750_v3 }
 0x756   :  { %v836_v52 = vpack.c.bf16 %v2734_v6, %v2730_v50 }
 0x758   :  { %2244 = vmatmul.mubr.msk.bf16.vlgmr.msra.gmra.mxu0 %vm74_vm1, %v836_v52 }
 0x759   :  { %2260 = vmatpush3.bf16.msra.mxu0 %v2381_v51  ;;  %2263 = vmatprep.mubr.msk.bf16.mxu0 %vm2438_vm0, %v2437_v0 }
 0x75a   :  { %2261 = vmatprep.subr.bf16.mxu0 %v2437_v0 }
 0x75d   :  { %2262 = vmatpush3.bf16.msra.mxu0 %v2382_v53 }
 0x75e   :  { %2267 = vmatprep.subr.bf16.mxu0 %v2437_v0 }
 0x760   :  { %2264 = vmatmul.mubr.msk.bf16.vlgmr.msra.gmra.mxu0 %vm74_vm1, %v2760_v54 }
 0x761   :  { %2268 = vmatpush3.bf16.msra.mxu0 %v2383_v56  ;;  %2271 = vmatprep.mubr.msk.bf16.mxu0 %vm2438_vm0, %v2437_v0 }
 0x762   :  { %2269 = vmatprep.subr.bf16.mxu0 %v2437_v0 }
 0x765   :  { %2270 = vmatpush3.bf16.msra.mxu0 %v2384_v57 }
 0x766   :  { %2283 = vmatprep.subr.bf16.mxu0 %v2437_v0 }
 0x768   :  { %2272 = vmatmul.mubr.msk.bf16.vlgmr.msra.gmra.mxu0 %vm74_vm1, %v2760_v54 }
 0x769   :  { %2285 = vmatprep.mubr.msk.bf16.mxu0 %vm2438_vm0, %v2437_v0 }
 0x818   :  { %v893_v1 = vpop.f32.mrf.mxu0 }
 0x819   :  { %v894_v2 = vadd.f32 %v2798_v63, %v893_v1 }
 0x81a   :  { %v2245_v7 = vpop.f32.mrf.mxu0 }
 0x81b   :  { %v900_v8 = vadd.f32 3.0, %v894_v2 }
 0x81c   :  { %v896_v9 = vpop.f32.mrf.mxu0 }
 0x81d   :  { %v902_v10 = vmax.f32 %v900_v8, 0.0  ;;  %v897_v11 = vadd.f32 %v2798_v63, %v896_v9 }
 0x81e   :  { %v2246_v12 = vpop.f32.mrf.mxu0 }
 0x81f   :  { %v904_v14 = vmin.f32 %v902_v10, 6.0  ;;  %v901_v15 = vadd.f32 3.0, %v897_v11 }
 0x820   :  { %v1067_v16 = vpop.f32.mrf.mxu0 }
 0x821   :  { %v903_v58 = vmax.f32 %v901_v15, 0.0  ;;  %v906_v18 = vmul.f32 %v904_v14, %v894_v2  ;;  %v1068_v37 = vadd.f32 %v2574_v21, %v1067_v16 }
 0x822   :  { %v2265_v17 = vpop.f32.mrf.mxu0 }
 0x823   :  { %v905_v19 = vmin.f32 %v903_v58, 6.0  ;;  %v908_v24 = vmul.f32 0.16666667, %v906_v18 }
 0x824   :  { %v1070_v20 = vpop.f32.mrf.mxu0 }
 0x825   :  { %v907_v22 = vmul.f32 %v905_v19, %v897_v11  ;;  %v1071_v36 = vadd.f32 %v2574_v21, %v1070_v20  ;;  %v2829_v21 = vld [vmem:[%s3003_s12] ss:$0 sm:$0xff]  ;;  %v2392_v19 = vld [vmem:[%s2990_s1 + $0x18] sm:$0xff]   ;;  %v2394_v20 = vld [vmem:[%s2990_s1 + $0x10] sm:$0xff]  }
 0x826   :  { %v2266_v23 = vpop.f32.mrf.mxu0 }
 0x827   :  { %v909_v26 = vmul.f32 0.16666667, %v907_v22  ;;  %v1202_v38 = vpack.c.bf16 %v1071_v36, %v1068_v37 }
 0x828   :  { %v1131_v27 = vpop.f32.mrf.mxu0 }
 0x829   :  { %v918_v28 = vpack.c.bf16 %v909_v26, %v908_v24  ;;  %v1132_v31 = vadd.f32 %v2566_v13, %v1131_v27 }
 0x82a   :  { %v2273_v29 = vpop.f32.mrf.mxu0 }
 0x82b   :  { %2256 = vmatmul.mubr.msk.bf16.vlgmr.msra.gmra.mxu1 %vm950_vm8, %v918_v28  ;;  %v2391_v28 = vld [vmem:[%s2992_s3 + $0x18] sm:$0xff]  }
 0x82c   :  { %v1134_v30 = vpop.f32.mrf.mxu0  ;;  %2279 = vmatprep.mubr.msk.bf16.mxu1 %vm2438_vm0, %v2437_v0 }
 0x82d   :  { %v1135_v32 = vadd.f32 %v2566_v13, %v1134_v30  ;;  %v2389_v13 = vld [vmem:[%s2995_s5 + $0x8] sm:$0xff]   ;;  %v2393_v30 = vld [vmem:[%s2992_s3 + $0x10] sm:$0xff]  }
 0x82e   :  { %v2274_v33 = vpop.f32.mrf.mxu0  ;;  %2276 = vmatpush3.bf16.msra.mxu1 %v2389_v13 }
 0x82f   :  { %v1203_v34 = vpack.c.bf16 %v1135_v32, %v1132_v31  ;;  %2277 = vmatprep.subr.bf16.mxu1 %v2437_v0 }
 0x831   :  { %v1208_v35 = vsel %vm249_vm2, %v1203_v34, 0 }
 0x832   :  { %2284 = vmatpush3.bf16.xpose.msra.mxu0 %v1208_v35  ;;  %2278 = vmatpush3.bf16.msra.mxu1 %v2390_v39 }
 0x833   :  { %2295 = vmatprep.subr.bf16.mxu0 %v2437_v0  ;;  %2289 = vmatprep.subr.bf16.mxu1 %v2437_v0 }
 0x835   :  { %2280 = vmatmul.mubr.msk.bf16.vlgmr.msra.gmra.mxu1 %vm74_vm1, %v2760_v54 }
 0x836   :  { %2291 = vmatprep.mubr.msk.bf16.mxu1 %vm2438_vm0, %v2437_v0 }
 0x839   :  { %2286 = vmatmul.mubr.msk.bf16.vlgmr.msra.gmra.mxu0 %vm249_vm2, %v1202_v38 }
 0x83a   :  { %2299 = vmatprep.mubr.msk.bf16.mxu0 %vm2438_vm0, %v2437_v0  ;;  %2296 = vmatpush3.bf16.msra.mxu0 %v2392_v19 }
 0x83b   :  { %2297 = vmatprep.subr.bf16.mxu0 %v2437_v0 }
 0x83e   :  { %2298 = vmatpush3.bf16.msra.mxu0 %v2394_v20 }
 0x83f   :  { %2311 = vmatprep.subr.bf16.mxu0 %v2437_v0 }
 0x841   :  { %2300 = vmatmul.mubr.msk.bf16.vlgmr.msra.gmra.mxu0 %vm74_vm1, %v2760_v54 }
 0x842   :  { %2315 = vmatprep.mubr.msk.bf16.mxu0 %vm2438_vm0, %v2437_v0 }
 0x8eb   :  { %v988_v40 = vpop.f32.mrf.mxu1 }
 0x8ec   :  { %v989_v41 = vadd.f32 %v2829_v21, %v988_v40 }
 0x8ed   :  { %v2257_v43 = vpop.f32.mrf.mxu1 }
 0x8ee   :  { %v995_v44 = vadd.f32 %v989_v41, %v2730_v50 }
 0x8ef   :  { %v991_v46 = vpop.f32.mrf.mxu1 }
 0x8f0   :  { %997 = vst.msk [vmem:[%s3004_s13] sm:$0xff] %vm74_vm1, %v995_v44  ;;  %v992_v47 = vadd.f32 %v2829_v21, %v991_v46 }
 0x8f1   :  { %v2258_v48 = vpop.f32.mrf.mxu1 }
 0x8f2   :  { %v996_v51 = vadd.f32 %v992_v47, %v2734_v6  ;;  %v1000_v52 = vadd.f32 %v992_v47, %v2727_v49 }
 0x8f4   :  { %999 = vst.msk [vmem:[%s3004_s13 + $0x8] sm:$0x3] %vm998_vm9, %v996_v51 }
 0x8f5   :  { %1002 = vst.msk [vmem:[%s3005_s15 - $0x1] sm:$0x2] %vm1001_vm10, %v1000_v52  ;;  %v1195_v11 = vpop.f32.mrf.mxu1 }
 0x8f6   :  { %v1196_v14 = vadd.f32 %v2601_v45, %v1195_v11 }
 0x8f7   :  { %v2281_v12 = vpop.f32.mrf.mxu1 }
 0x8f9   :  { %v1244_v50 = vpop.f32.mrf.mxu0  ;;  %v1198_v15 = vpop.f32.mrf.mxu1 }
 0x8fa   :  { %v1251_v53 = vsel %vm297_vm3, %v1244_v50, -inf  ;;  %v1199_v16 = vadd.f32 %v2601_v45, %v1198_v15 }
 0x8fb   :  { %1252 = vmax.xlane.f32.xlu0 %v1251_v53  ;;  %v2287_v56 = vpop.f32.mrf.mxu0  ;;  %v2282_v58 = vpop.f32.mrf.mxu1 }
 0x8fc   :  { %v1274_v17 = vpack.c.bf16 %v1199_v16, %v1196_v14 }
 0x8fd   :  { %v1247_v57 = vpop.f32.mrf.mxu0 }
 0x8fe   :  { %v1254_v6 = vsel %vm301_vm4, %v1247_v57, -inf  ;;  %v1279_v18 = vsel %vm326_vm5, %v1274_v17, 0 }
 0x8ff   :  { %1255 = vmax.xlane.f32.xlu1 %v1254_v6  ;;  %v2288_v49 = vpop.f32.mrf.mxu0  ;;  %2290 = vmatpush3.bf16.msra.mxu1 %v1279_v18 }
 0x900   :  { %2303 = vmatprep.subr.bf16.mxu1 %v2437_v0 }
 0x901   :  { %v1392_v31 = vpop.f32.mrf.mxu0 }
 0x902   :  { %v1393_v34 = vadd.f32 %v2640_v5, %v1392_v31 }
 0x903   :  { %v2301_v32 = vpop.f32.mrf.mxu0 }
 0x905   :  { %v1395_v33 = vpop.f32.mrf.mxu0 }
 0x906   :  { %v1396_v35 = vadd.f32 %v2640_v5, %v1395_v33 }
 0x907   :  { %v2302_v36 = vpop.f32.mrf.mxu0 }
 0x908   :  { %v1527_v37 = vpack.c.bf16 %v1396_v35, %v1393_v34 }
 0x984   :  { %v1253_v59 = vpop.xlane.xlu0 %1252 }
 0x985   :  { %v1257_v60 = vsub.f32 %v1244_v50, %v1253_v59 }
 0x987   :  { %v1259_v61 = vmul.f32 1.442695, %v1257_v60 }
 0x988   :  { %v1256_v62 = vpop.xlane.xlu1 %1255 }
 0x989   :  { %2421 = vpow2.f32 %v1259_v61  ;;  %v1258_v1 = vsub.f32 %v1247_v57, %v1256_v62 }
 0x98b   :  { %v1261_v2 = vmul.f32 1.442695, %v1258_v1  ;;  %v2395_v1 = vld [vmem:[%s2995_s5 + $0x18] sm:$0xff]  }
 0x98c   :  { %2312 = vmatpush3.bf16.msra.mxu0 %v2395_v1 }
 0x98d   :  { %2423 = vpow2.f32 %v1261_v2  ;;  %2313 = vmatprep.subr.bf16.mxu0 %v2437_v0 }
 0x996   :  { %v2422_v7 = vpop.eup %2421 }
 0x997   :  { %v1263_v8 = vsel %vm297_vm3, %v2422_v7, 0.0 }
 0x998   :  { %1264 = vadd.xlane.f32.xlu0 %v1263_v8 }
 0x99a   :  { %v2424_v9 = vpop.eup %2423 }
 0x99b   :  { %v1266_v10 = vsel %vm301_vm4, %v2424_v9, 0.0 }
 0x99c   :  { %1267 = vadd.xlane.f32.xlu1 %v1266_v10 }
 0xa21   :  { %v1265_v45 = vpop.xlane.xlu0 %1264 }
 0xa22   :  { %2425 = vrcp.f32 %v1265_v45 }
 0xa25   :  { %v1268_v22 = vpop.xlane.xlu1 %1267 }
 0xa26   :  { %2427 = vrcp.f32 %v1268_v22 }
 0xa2f   :  { %v2426_v23 = vpop.eup %2425 }
 0xa30   :  { %v2868_v26 = vmul.f32 %v2426_v23, %v2422_v7 }
 0xa33   :  { %v2428_v24 = vpop.eup %2427 }
 0xa34   :  { %v1272_v27 = vmul.f32 %v2428_v24, %v2424_v9 }
 0xa36   :  { %v1273_v29 = vpack.c.bf16 %v1272_v27, %v2868_v26 }
 0xa38   :  { %2292 = vmatmul.mubr.msk.bf16.vlgmr.msra.gmra.mxu1 %vm297_vm3, %v1273_v29 }
 0xa39   :  { %2304 = vmatpush3.bf16.msra.mxu1 %v2391_v28  ;;  %2307 = vmatprep.mubr.msk.bf16.mxu1 %vm2438_vm0, %v2437_v0 }
 0xa3a   :  { %2305 = vmatprep.subr.bf16.mxu1 %v2437_v0 }
 0xa3d   :  { %2306 = vmatpush3.bf16.msra.mxu1 %v2393_v30 }
 0xa3e   :  { %2319 = vmatprep.subr.bf16.mxu1 %v2437_v0 }
 0xa40   :  { %2308 = vmatmul.mubr.msk.bf16.vlgmr.msra.gmra.mxu1 %vm74_vm1, %v2760_v54 }
 0xa41   :  { %2321 = vmatprep.mubr.msk.bf16.mxu1 %vm2438_vm0, %v2437_v0 }
 0xaf8   :  { %v1315_v38 = vpop.f32.mrf.mxu1 }
 0xaf9   :  { %v1322_v13 = vadd.f32 3.0, %v1315_v38 }
 0xafa   :  { %v2293_v39 = vpop.f32.mrf.mxu1 }
 0xafb   :  { %v1324_v40 = vmax.f32 %v1322_v13, 0.0 }
 0xafc   :  { %v1318_v41 = vpop.f32.mrf.mxu1 }
 0xafd   :  { %v1326_v43 = vmin.f32 %v1324_v40, 6.0  ;;  %v1323_v44 = vadd.f32 3.0, %v1318_v41 }
 0xafe   :  { %v2294_v46 = vpop.f32.mrf.mxu1 }
 0xaff   :  { %v1325_v47 = vmax.f32 %v1323_v44, 0.0  ;;  %v1328_v51 = vmul.f32 %v1326_v43, %v1315_v38 }
 0xb00   :  { %v1456_v48 = vpop.f32.mrf.mxu1 }
 0xb01   :  { %v1327_v52 = vmin.f32 %v1325_v47, 6.0  ;;  %v2888_v57 = vmul.f32 0.16666667, %v1328_v51  ;;  %v1457_v6 = vadd.f32 %v2647_v25, %v1456_v48 }
 0xb02   :  { %v2309_v50 = vpop.f32.mrf.mxu1 }
 0xb03   :  { %v1329_v53 = vmul.f32 %v1327_v52, %v1318_v41 }
 0xb04   :  { %v1459_v56 = vpop.f32.mrf.mxu1 }
 0xb05   :  { %v2890_v5 = vmul.f32 0.16666667, %v1329_v53  ;;  %v1460_v49 = vadd.f32 %v2647_v25, %v1459_v56  ;;  %v2396_v25 = vld [vmem:[%s2995_s5 + $0x10] sm:$0xff]  }
 0xb06   :  { %v2310_v59 = vpop.f32.mrf.mxu1  ;;  %2314 = vmatpush3.bf16.msra.mxu0 %v2396_v25 }
 0xb07   :  { %v1334_v60 = vpack.c.bf16 %v2890_v5, %v2888_v57  ;;  %v1528_v61 = vpack.c.bf16 %v1460_v49, %v1457_v6  ;;  %2325 = vmatprep.subr.bf16.mxu0 %v2437_v0 }
 0xb09   :  { %v1533_v62 = vsel %vm249_vm2, %v1528_v61, 0  ;;  %2316 = vmatmul.mubr.msk.bf16.vlgmr.msra.gmra.mxu0 %vm74_vm1, %v2760_v54  ;;  %v2399_v61 = vld [vmem:[%s2999_s9 + $0x8] sm:$0xff]  }
 0xb0a   :  { %2320 = vmatpush3.bf16.xpose.msra.mxu1 %v1533_v62  ;;  %2327 = vmatprep.mubr.msk.bf16.mxu0 %vm2438_vm0, %v2437_v0  ;;  %v2400_v62 = vld [vmem:[%s2999_s9] sm:$0xff]  }
 0xb0b   :  { %2331 = vmatprep.subr.bf16.mxu1 %v2437_v0 }
 0xb11   :  { %2322 = vmatmul.mubr.msk.bf16.vlgmr.msra.gmra.mxu1 %vm249_vm2, %v1527_v37 }
 0xb12   :  { %2333 = vmatprep.mubr.msk.bf16.mxu1 %vm2438_vm0, %v2437_v0 }
 0xbc9   :  { %v1520_v12 = vpop.f32.mrf.mxu0 }
 0xbca   :  { %v1521_v24 = vadd.f32 %v2681_v55, %v1520_v12 }
 0xbcb   :  { %v2317_v14 = vpop.f32.mrf.mxu0 }
 0xbcd   :  { %v1523_v23 = vpop.f32.mrf.mxu0 }
 0xbce   :  { %v1524_v28 = vadd.f32 %v2681_v55, %v1523_v23  ;;  %v2397_v55 = vld [vmem:[%s2997_s7] sm:$0xff]  }
 0xbcf   :  { %v2318_v27 = vpop.f32.mrf.mxu0 }
 0xbd0   :  { %v1600_v29 = vpack.c.bf16 %v1524_v28, %v1521_v24 }
 0xbd1   :  { %v1569_v2 = vpop.f32.mrf.mxu1 }
 0xbd2   :  { %v1576_v7 = vsel %vm297_vm3, %v1569_v2, -inf  ;;  %v1605_v30 = vsel %vm326_vm5, %v1600_v29, 0 }
 0xbd3   :  { %1577 = vmax.xlane.f32.xlu0 %v1576_v7  ;;  %v2323_v8 = vpop.f32.mrf.mxu1  ;;  %2326 = vmatpush3.bf16.msra.mxu0 %v1605_v30 }
 0xbd4   :  { %2337 = vmatprep.subr.bf16.mxu0 %v2437_v0 }
 0xbd5   :  { %v1572_v9 = vpop.f32.mrf.mxu1 }
 0xbd6   :  { %v1579_v10 = vsel %vm301_vm4, %v1572_v9, -inf }
 0xbd7   :  { %1580 = vmax.xlane.f32.xlu1 %v1579_v10  ;;  %v2324_v11 = vpop.f32.mrf.mxu1 }
 0xc5c   :  { %v1578_v15 = vpop.xlane.xlu0 %1577 }
 0xc5d   :  { %v1582_v16 = vsub.f32 %v1569_v2, %v1578_v15 }
 0xc5f   :  { %v1584_v58 = vmul.f32 1.442695, %v1582_v16  ;;  %v2401_v16 = vld [vmem:[%s3001_s11 + $0x18] sm:$0xff]  }
 0xc60   :  { %v1581_v17 = vpop.xlane.xlu1 %1580 }
 0xc61   :  { %2429 = vpow2.f32 %v1584_v58  ;;  %v1583_v54 = vsub.f32 %v1572_v9, %v1581_v17  ;;  %v2402_v58 = vld [vmem:[%s3001_s11 + $0x10] sm:$0xff]  }
 0xc63   :  { %v1586_v18 = vmul.f32 1.442695, %v1583_v54 }
 0xc65   :  { %2431 = vpow2.f32 %v1586_v18 }
 0xc6e   :  { %v2430_v19 = vpop.eup %2429 }
 0xc6f   :  { %v1588_v20 = vsel %vm297_vm3, %v2430_v19, 0.0 }
 0xc70   :  { %1589 = vadd.xlane.f32.xlu0 %v1588_v20 }
 0xc72   :  { %v2432_v45 = vpop.eup %2431 }
 0xc73   :  { %v1591_v22 = vsel %vm301_vm4, %v2432_v45, 0.0 }
 0xc74   :  { %1592 = vadd.xlane.f32.xlu1 %v1591_v22 }
 0xcf9   :  { %v1590_v31 = vpop.xlane.xlu0 %1589 }
 0xcfa   :  { %2433 = vrcp.f32 %v1590_v31 }
 0xcfd   :  { %v1593_v32 = vpop.xlane.xlu1 %1592 }
 0xcfe   :  { %2435 = vrcp.f32 %v1593_v32 }
 0xd07   :  { %v2434_v33 = vpop.eup %2433 }
 0xd08   :  { %v1595_v34 = vmul.f32 %v2434_v33, %v2430_v19 }
 0xd0a   :  { %v1598_v35 = vadd.f32 %v1595_v34, %v2868_v26  ;;  %v2398_v26 = vld [vmem:[%s2997_s7 + $0x8] sm:$0xff]  }
 0xd0b   :  { %v2436_v36 = vpop.eup %2435  ;;  %2332 = vmatpush3.bf16.msra.mxu1 %v2398_v26 }
 0xd0c   :  { %v1770_v37 = vmul.f32 0.5, %v1598_v35  ;;  %v1597_v38 = vmul.f32 %v2436_v36, %v2432_v45  ;;  %2343 = vmatprep.subr.bf16.mxu1 %v2437_v0 }
 0xd0e   :  { %1771 = vst.msk [vmem:[%s2998_s14 + $0x1] sm:$0x1] %vm828_vm6, %v1770_v37  ;;  %v1599_v13 = vpack.c.bf16 %v1597_v38, %v1595_v34 }
 0xd10   :  { %2328 = vmatmul.mubr.msk.bf16.vlgmr.msra.gmra.mxu0 %vm297_vm3, %v1599_v13 }
 0xd11   :  { %2338 = vmatpush3.bf16.msra.mxu0 %v2397_v55  ;;  %2339 = vmatprep.mubr.msk.bf16.mxu0 %vm2438_vm0, %v2437_v0 }
 0xd12   :  { %2351 = vmatprep.subr.bf16.mxu0 %v2437_v0 }
 0xd18   :  { %2340 = vmatmul.mubr.msk.bf16.vlgmr.msra.gmra.mxu0 %vm723_vm7, %v1334_v60 }
 0xd19   :  { %2359 = vmatprep.mubr.msk.bf16.mxu0 %vm2438_vm0, %v2437_v0  ;;  %2352 = vmatpush3.bf16.msra.mxu0 %v2401_v16 }
 0xd1a   :  { %2353 = vmatprep.subr.bf16.mxu0 %v2437_v0 }
 0xd1d   :  { %2354 = vmatpush3.bf16.msra.mxu0 %v2402_v58 }
 0xd1e   :  { %2355 = vmatprep.subr.bf16.mxu0 %v2437_v0 }
 0xdd0   :  { %v1641_v39 = vpop.f32.mrf.mxu0 }
 0xdd1   :  { %v1648_v40 = vadd.f32 3.0, %v1641_v39 }
 0xdd2   :  { %v2329_v41 = vpop.f32.mrf.mxu0 }
 0xdd3   :  { %v1650_v43 = vmax.f32 %v1648_v40, 0.0 }
 0xdd4   :  { %v1644_v44 = vpop.f32.mrf.mxu0 }
 0xdd5   :  { %v1652_v46 = vmin.f32 %v1650_v43, 6.0  ;;  %v1649_v47 = vadd.f32 3.0, %v1644_v44 }
 0xdd6   :  { %v2330_v48 = vpop.f32.mrf.mxu0 }
 0xdd7   :  { %v1651_v51 = vmax.f32 %v1649_v47, 0.0  ;;  %v1654_v50 = vmul.f32 %v1652_v46, %v1641_v39 }
 0xdd8   :  { %v1754_v52 = vpop.f32.mrf.mxu0 }
 0xdd9   :  { %v1653_v53 = vmin.f32 %v1651_v51, 6.0  ;;  %v1656_v6 = vmul.f32 0.16666667, %v1654_v50 }
 0xdda   :  { %v2341_v56 = vpop.f32.mrf.mxu0 }
 0xddb   :  { %v1655_v57 = vmul.f32 %v1653_v53, %v1644_v44 }
 0xddc   :  { %v1757_v5 = vpop.f32.mrf.mxu0 }
 0xddd   :  { %v1657_v49 = vmul.f32 0.16666667, %v1655_v57 }
 0xdde   :  { %v2342_v59 = vpop.f32.mrf.mxu0 }
 0xddf   :  { %v1660_v60 = vpack.c.bf16 %v1657_v49, %v1656_v6 }
 0xde1   :  { %2334 = vmatmul.mubr.msk.bf16.vlgmr.msra.gmra.mxu1 %vm723_vm7, %v1660_v60 }
 0xde2   :  { %2347 = vmatprep.mubr.msk.bf16.mxu1 %vm2438_vm0, %v2437_v0  ;;  %2344 = vmatpush3.bf16.msra.mxu1 %v2399_v61 }
 0xde3   :  { %2345 = vmatprep.subr.bf16.mxu1 %v2437_v0 }
 0xde6   :  { %2346 = vmatpush3.bf16.msra.mxu1 %v2400_v62 }
 0xea1   :  { %v1704_v1 = vpop.f32.mrf.mxu1 }
 0xea2   :  { %v1755_v25 = vadd.f32 %v1754_v52, %v1704_v1 }
 0xea3   :  { %v2335_v2 = vpop.f32.mrf.mxu1 }
 0xea4   :  { %v1768_v8 = vadd.f32 %v2723_v42, %v1755_v25 }
 0xea5   :  { %v1707_v7 = vpop.f32.mrf.mxu1 }
 0xea6   :  { %v1758_v9 = vadd.f32 %v1757_v5, %v1707_v7  ;;  %v1772_v12 = vadd.f32 %v2750_v3, %v1768_v8  ;;  %v2404_v3 = vld [vmem:[%s3001_s11] sm:$0xff]  }
 0xea7   :  { %v2336_v10 = vpop.f32.mrf.mxu1 }
 0xea8   :  { %v1769_v11 = vadd.f32 %v2723_v42, %v1758_v9  ;;  %v2403_v42 = vld [vmem:[%s3001_s11 + $0x8] sm:$0xff]  }
 0xea9   :  { %2356 = vmatpush3.bf16.msra.mxu0 %v2403_v42 }
 0xeaa   :  { %v1773_v14 = vadd.f32 %v2755_v4, %v1769_v11  ;;  %2357 = vmatprep.subr.bf16.mxu0 %v2437_v0 }
 0xeac   :  { %v1778_v15 = vpack.c.bf16 %v1773_v14, %v1772_v12 }
 0xead   :  { %2358 = vmatpush3.bf16.msra.mxu0 %v2404_v3 }
 0xeae   :  { %2348 = vmatmul.mubr.msk.bf16.vlgmr.msra.gmra.mxu1 %vm74_vm1, %v1778_v15 }
 0xf6e   :  { %v1835_v4 = vpop.f32.mrf.mxu1 }
 0xf6f   :  { %v1836_v17 = vadd.f32 %v2798_v63, %v1835_v4 }
 0xf70   :  { %v2349_v54 = vpop.f32.mrf.mxu1 }
 0xf71   :  { %v1842_v18 = vadd.f32 3.0, %v1836_v17 }
 0xf72   :  { %v1838_v19 = vpop.f32.mrf.mxu1 }
 0xf73   :  { %v1844_v20 = vmax.f32 %v1842_v18, 0.0  ;;  %v1839_v45 = vadd.f32 %v2798_v63, %v1838_v19 }
 0xf74   :  { %v2350_v22 = vpop.f32.mrf.mxu1 }
 0xf75   :  { %v1846_v23 = vmin.f32 %v1844_v20, 6.0  ;;  %v1843_v24 = vadd.f32 3.0, %v1839_v45 }
 0xf77   :  { %v1845_v27 = vmax.f32 %v1843_v24, 0.0  ;;  %v1848_v28 = vmul.f32 %v1846_v23, %v1836_v17 }
 0xf79   :  { %v1847_v0 = vmin.f32 %v1845_v27, 6.0  ;;  %v1850_v30 = vmul.f32 0.16666667, %v1848_v28 }
 0xf7b   :  { %v1849_v29 = vmul.f32 %v1847_v0, %v1839_v45 }
 0xf7d   :  { %v1851_v31 = vmul.f32 0.16666667, %v1849_v29 }
 0xf7f   :  { %v1860_v32 = vpack.c.bf16 %v1851_v31, %v1850_v30 }
 0xf81   :  { %2360 = vmatmul.mubr.msk.bf16.vlgmr.msra.gmra.mxu0 %vm950_vm8, %v1860_v32 }
0x1041   :  { %v1929_v33 = vpop.f32.mrf.mxu0 }
0x1042   :  { %v1930_v34 = vadd.f32 %v2829_v21, %v1929_v33 }
0x1043   :  { %v2361_v35 = vpop.f32.mrf.mxu0 }
0x1044   :  { %v1936_v36 = vadd.f32 %v1930_v34, %v1772_v12 }
0x1045   :  { %v1932_v37 = vpop.f32.mrf.mxu0 }
0x1046   :  { %2077 = vst.msk [vmem:[%s3004_s13 + $0x10] sm:$0xff] %vm74_vm1, %v1936_v36  ;;  %v1933_v63 = vadd.f32 %v2829_v21, %v1932_v37 }
0x1047   :  { %v2362_v38 = vpop.f32.mrf.mxu0 }
0x1048   :  { %v1937_v55 = vadd.f32 %v1933_v63, %v1773_v14  ;;  %v1941_v13 = vadd.f32 %v1933_v63, %v1769_v11 }
0x104a   :  { %2078 = vst.msk [vmem:[%s3004_s13 + $0x18] sm:$0x3] %vm998_vm9, %v1937_v55 }
0x104b   :  { %1942 = vst.msk [vmem:[%s3005_s15] sm:$0x2] %vm1001_vm10, %v1941_v13 }

// kernel: levit_forward.11
= control target key start
LH: loop header
LB: loop body
LE: loop exit
PB: predicated region body
PF: predicated region fallthrough
CT: control target
= control target key end

     0   :  { %vm68_vm0 = vcmask 261120   ;;  %v2038_v10 = vmov 0.0   ;;  %vm2039_vm1 = vmmov 0   ;;  %vm263_vm2 = vcmask 64512   ;;  %s2449_s4 = inlined_call_operand.vmem [shape: bf16[2,32,8], index: 4, kind: input, shape index: {}]   ;;  %s2450_s0 = inlined_call_operand.vmem [shape: f32[2,17,32], index: 0, kind: input, shape index: {}]   ;;  %s2451_s2 = inlined_call_operand.vmem [shape: bf16[2,32,8], index: 2, kind: input, shape index: {}]   ;;  %s2452_s6 = inlined_call_operand.vmem [shape: bf16[2,32,16], index: 6, kind: input, shape index: {}]   ;;  %s2453_s1 = inlined_call_operand.vmem [shape: f32[2,5,32], index: 1, kind: input, shape index: {}]   ;;  %s2454_s5 = inlined_call_operand.vmem [shape: f32[2,1,8], index: 5, kind: input, shape index: {}]   ;;  %s2455_s7 = inlined_call_operand.vmem [shape: f32[2,1,16], index: 7, kind: input, shape index: {}]   ;;  %s2456_s3 = inlined_call_operand.vmem [shape: f32[2,1,8], index: 3, kind: input, shape index: {}]   ;;  %s2457_s8 = inlined_call_operand.vmem [shape: bf16[2,16,48], index: 8, kind: input, shape index: {}]   ;;  %s2458_s11 = inlined_call_operand.vmem [shape: f32[2,17], index: 11, kind: output, shape index: {1}]   ;;  %s2459_s9 = inlined_call_operand.vmem [shape: f32[1,48], index: 9, kind: input, shape index: {}]   ;;  %s2460_s10 = inlined_call_operand.vmem [shape: f32[2,5,48], index: 10, kind: output, shape index: {0}]  }
   0x1   :  { %v1994_v0 = vld [vmem:[%s2449_s4 + $0x8] sm:$0xff]   ;;  %v1995_v1 = vld [vmem:[%s2449_s4] sm:$0xff]   ;;  %v40_v5 = vld [vmem:[%s2450_s0 + $0x10] sm:$0x1]  ;;  %vm332_vm3 = vcmask 1040384   ;;  %v2040_v28 = vmov 0  }
   0x2   :  { %1807 = vmatprep.subr.bf16.mxu0 %v1994_v0  ;;  %v38_v2 = vld [vmem:[%s2450_s0] sm:$0xff]  ;;  %v39_v3 = vld [vmem:[%s2450_s0 + $0x8] sm:$0xff]  ;;  %v2125_v7 = vpack.c.bf16 %v40_v5, %v40_v5  ;;  %v2173_v29 = vsel %vm332_vm3, 65535, %v2040_v28  ;;  %vm313_vm4 = vcmask 135168   ;;  %v2000_v56 = vld [vmem:[%s2449_s4 + $0x18] sm:$0xff]   ;;  %vm328_vm5 = vcmask 138240  }
   0x3   :  { %1808 = vmatpush3.bf16.msra.mxu0 %v1994_v0  ;;  %v2113_v4 = vpack.c.bf16 %v39_v3, %v38_v2  ;;  %v1996_v6 = vld [vmem:[%s2451_s2 + $0x8] sm:$0xff]   ;;  %v1999_v9 = vld [vmem:[%s2452_s6] sm:$0xff]   ;;  %v2001_v61 = vld [vmem:[%s2449_s4 + $0x10] sm:$0xff]   ;;  %vm725_vm6 = vcmask 130048   ;;  %vm829_vm7 = vcmask 131072   ;;  %vm826_vm8 = vcmask 389120  }
   0x4   :  { %1809 = vmatprep.subr.bf16.mxu0 %v1995_v1  ;;  %v1998_v8 = vld [vmem:[%s2452_s6 + $0x8] sm:$0xff]   ;;  %v1997_v11 = vld [vmem:[%s2451_s2] sm:$0xff]   ;;  %v2002_v62 = vld [vmem:[%s2451_s2 + $0x18] sm:$0xff]  }
   0x5   :  { %1811 = vmatprep.mubr.msk.bf16.mxu0 %vm68_vm0, %v2113_v4  ;;  %1819 = vmatprep.mubr.msk.bf16.mxu1 %vm68_vm0, %v2113_v4  ;;  %v43_v12 = vld [vmem:[%s2453_s1] sm:$0x1f]  ;;  %v2003_v63 = vld [vmem:[%s2451_s2 + $0x10] sm:$0xff]   ;;  %v2004_v0 = vld [vmem:[%s2452_s6 + $0x18] sm:$0xff]  }
   0x6   :  { %1815 = vmatprep.subr.bf16.mxu1 %v1998_v8  ;;  %v2145_v13 = vpack.c.bf16 %v43_v12, %v43_v12  ;;  %v2160_v14 = vld [vmem:[%s2454_s5] ss:$0 sm:$0xff] }
   0x7   :  { %1810 = vmatpush3.bf16.msra.mxu0 %v1995_v1  ;;  %1816 = vmatpush3.bf16.msra.mxu1 %v1998_v8  ;;  %v2166_v20 = vld [vmem:[%s2455_s7] ss:$0 sm:$0xff]  ;;  %v2005_v1 = vld [vmem:[%s2452_s6 + $0x10] sm:$0xff]  }
   0x8   :  { %1823 = vmatprep.subr.bf16.mxu0 %v2038_v10  ;;  %1817 = vmatprep.subr.bf16.mxu1 %v1999_v9  ;;  %v2178_v33 = vld [vmem:[%s2456_s3] ss:$0 sm:$0xff] }
   0xa   :  { %1812 = vmatmul.mubr.msk.bf16.vlgmr.msra.gmra.mxu0 %vm68_vm0, %v2125_v7 }
   0xb   :  { %1824 = vmatpush3.bf16.msra.mxu0 %v1996_v6  ;;  %1827 = vmatprep.mubr.msk.bf16.mxu0 %vm2039_vm1, %v2038_v10  ;;  %v2235_v6 = vld [vmem:[%s2454_s5 + $0x1] ss:$0 sm:$0xff] }
   0xc   :  { %1825 = vmatprep.subr.bf16.mxu0 %v2038_v10  ;;  %1818 = vmatpush3.bf16.msra.mxu1 %v1999_v9 }
   0xd   :  { %1831 = vmatprep.subr.bf16.mxu1 %v2038_v10 }
   0xf   :  { %1826 = vmatpush3.bf16.msra.mxu0 %v1997_v11  ;;  %1820 = vmatmul.mubr.msk.bf16.vlgmr.msra.gmra.mxu1 %vm68_vm0, %v2125_v7 }
  0x10   :  { %1839 = vmatprep.subr.bf16.mxu0 %v2038_v10  ;;  %1835 = vmatprep.mubr.msk.bf16.mxu1 %vm2039_vm1, %v2038_v10 }
  0x12   :  { %1828 = vmatmul.mubr.msk.bf16.vlgmr.msra.gmra.mxu0 %vm68_vm0, %v2145_v13 }
  0x13   :  { %1843 = vmatprep.mubr.msk.bf16.mxu0 %vm2039_vm1, %v2038_v10 }
  0xca   :  { %v1813_v15 = vpop.f32.mrf.mxu0 }
  0xcb   :  { %v118_v16 = vadd.f32 %v1813_v15, %v2160_v14 }
  0xcc   :  { %v109_v17 = vpop.f32.mrf.mxu0 }
  0xcd   :  { %v262_v18 = vpack.c.bf16 %v118_v16, %v118_v16  ;;  %v110_v24 = vadd.f32 %v2160_v14, %v109_v17 }
  0xce   :  { %v1814_v19 = vpop.f32.mrf.mxu0 }
  0xcf   :  { %v271_v21 = vsel %vm263_vm2, %v262_v18, 0  ;;  %v1821_v23 = vpop.f32.mrf.mxu1 }
  0xd0   :  { %v112_v22 = vpop.f32.mrf.mxu0  ;;  %1832 = vmatpush3.bf16.xpose.msra.mxu1 %v271_v21  ;;  %v189_v26 = vadd.f32 %v1821_v23, %v2166_v20 }
  0xd1   :  { %v113_v25 = vadd.f32 %v2160_v14, %v112_v22  ;;  %1833 = vmatprep.subr.bf16.mxu1 %v2038_v10  ;;  %v180_v30 = vpop.f32.mrf.mxu1  ;;  %v2245_v22 = vld [vmem:[%s2456_s3 + $0x1] ss:$0 sm:$0xff] }
  0xd2   :  { %v254_v27 = vpop.f32.mrf.mxu0  ;;  %v327_v32 = vpack.c.bf16 %v189_v26, %v189_v26  ;;  %v181_v37 = vadd.f32 %v2166_v20, %v180_v30 }
  0xd3   :  { %v261_v31 = vpack.c.bf16 %v113_v25, %v110_v24  ;;  %v1822_v35 = vpop.f32.mrf.mxu1  ;;  %v255_v40 = vadd.f32 %v2178_v33, %v254_v27 }
  0xd4   :  { %v1829_v34 = vpop.f32.mrf.mxu0  ;;  %v336_v36 = vand.u32 %v2173_v29, %v327_v32  ;;  %v2006_v32 = vld [vmem:[%s2457_s8] sm:$0xff]  }
  0xd5   :  { %v183_v39 = vpop.f32.mrf.mxu1  ;;  %v268_v41 = vsel %vm263_vm2, %v261_v31, 0  ;;  %v260_v45 = vpack.c.bf16 %v255_v40, %v255_v40 }
  0xd6   :  { %v257_v38 = vpop.f32.mrf.mxu0  ;;  %v184_v42 = vadd.f32 %v2166_v20, %v183_v39  ;;  %1840 = vmatpush3.bf16.msra.mxu0 %v336_v36 }
  0xd7   :  { %1841 = vmatprep.subr.bf16.mxu0 %v2038_v10 }
  0xd8   :  { %1834 = vmatpush3.bf16.xpose.msra.mxu1 %v268_v41  ;;  %v1830_v43 = vpop.f32.mrf.mxu0  ;;  %v326_v44 = vpack.c.bf16 %v184_v42, %v181_v37  ;;  %v2260_v37 = vld [vmem:[%s2455_s7 + $0x1] ss:$0 sm:$0xff] }
  0xd9   :  { %1855 = vmatprep.subr.bf16.mxu1 %v2004_v0 }
  0xda   :  { %1842 = vmatpush3.bf16.msra.mxu0 %v326_v44 }
  0xdb   :  { %1847 = vmatprep.subr.bf16.mxu0 %v2000_v56 }
  0xdf   :  { %1836 = vmatmul.mubr.msk.bf16.vlgmr.msra.gmra.mxu1 %vm263_vm2, %v260_v45 }
  0xe0   :  { %1859 = vmatprep.mubr.msk.bf16.mxu1 %vm68_vm0, %v2113_v4  ;;  %1856 = vmatpush3.bf16.msra.mxu1 %v2004_v0 }
  0xe1   :  { %1857 = vmatprep.subr.bf16.mxu1 %v2005_v1 }
  0xe4   :  { %1858 = vmatpush3.bf16.msra.mxu1 %v2005_v1 }
  0xe5   :  { %1871 = vmatprep.subr.bf16.mxu1 %v2038_v10 }
  0xe7   :  { %1860 = vmatmul.mubr.msk.bf16.vlgmr.msra.gmra.mxu1 %vm68_vm0, %v2125_v7 }
  0xe8   :  { %1875 = vmatprep.mubr.msk.bf16.mxu1 %vm2039_vm1, %v2038_v10 }
 0x19f   :  { %v307_v46 = vpop.f32.mrf.mxu1 }
 0x1a0   :  { %v314_v47 = vsel %vm313_vm4, %v307_v46, -inf }
 0x1a1   :  { %315 = vmax.xlane.f32.xlu0 %v314_v47  ;;  %v1837_v48 = vpop.f32.mrf.mxu1 }
 0x1a3   :  { %v310_v49 = vpop.f32.mrf.mxu1 }
 0x1a5   :  { %v1838_v50 = vpop.f32.mrf.mxu1 }
 0x1a7   :  { %v1861_v38 = vpop.f32.mrf.mxu1 }
 0x1a8   :  { %v527_v39 = vadd.f32 %v1861_v38, %v2260_v37 }
 0x1a9   :  { %v518_v40 = vpop.f32.mrf.mxu1 }
 0x1aa   :  { %v663_v41 = vpack.c.bf16 %v527_v39, %v527_v39  ;;  %v519_v44 = vadd.f32 %v2260_v37, %v518_v40 }
 0x1ab   :  { %v1862_v42 = vpop.f32.mrf.mxu1 }
 0x1ac   :  { %v668_v43 = vand.u32 %v663_v41, %v2173_v29 }
 0x1ad   :  { %v521_v45 = vpop.f32.mrf.mxu1 }
 0x22a   :  { %v316_v51 = vpop.xlane.xlu0 %315 }
 0x22b   :  { %v317_v52 = vsub.f32 %v307_v46, %v316_v51  ;;  %v522_v46 = vadd.f32 %v2260_v37, %v521_v45 }
 0x22d   :  { %v318_v53 = vmul.f32 1.442695, %v317_v52  ;;  %v662_v47 = vpack.c.bf16 %v522_v46, %v519_v44 }
 0x22f   :  { %2022 = vpow2.f32 %v318_v53 }
 0x23c   :  { %v2023_v54 = vpop.eup %2022 }
 0x23d   :  { %v320_v55 = vsel %vm313_vm4, %v2023_v54, 0.0 }
 0x23e   :  { %321 = vadd.xlane.f32.xlu0 %v320_v55 }
 0x2c7   :  { %v322_v57 = vpop.xlane.xlu0 %321 }
 0x2c8   :  { %2024 = vrcp.f32 %v322_v57 }
 0x2d5   :  { %v2025_v58 = vpop.eup %2024 }
 0x2d6   :  { %v2194_v59 = vmul.f32 %v2025_v58, %v2023_v54 }
 0x2d8   :  { %v325_v60 = vpack.c.bf16 %v2194_v59, %v2194_v59 }
 0x2da   :  { %1844 = vmatmul.mubr.msk.bf16.vlgmr.msra.gmra.mxu0 %vm328_vm5, %v325_v60 }
 0x2db   :  { %1848 = vmatpush3.bf16.msra.mxu0 %v2000_v56  ;;  %1851 = vmatprep.mubr.msk.bf16.mxu0 %vm68_vm0, %v2113_v4 }
 0x2dc   :  { %1849 = vmatprep.subr.bf16.mxu0 %v2001_v61 }
 0x2df   :  { %1850 = vmatpush3.bf16.msra.mxu0 %v2001_v61 }
 0x2e0   :  { %1863 = vmatprep.subr.bf16.mxu0 %v2038_v10 }
 0x2e2   :  { %1852 = vmatmul.mubr.msk.bf16.vlgmr.msra.gmra.mxu0 %vm68_vm0, %v2125_v7 }
 0x2e3   :  { %1864 = vmatpush3.bf16.msra.mxu0 %v2002_v62  ;;  %1867 = vmatprep.mubr.msk.bf16.mxu0 %vm2039_vm1, %v2038_v10 }
 0x2e4   :  { %1865 = vmatprep.subr.bf16.mxu0 %v2038_v10 }
 0x2e7   :  { %1866 = vmatpush3.bf16.msra.mxu0 %v2003_v63 }
 0x2e8   :  { %1879 = vmatprep.subr.bf16.mxu0 %v2038_v10 }
 0x2ea   :  { %1868 = vmatmul.mubr.msk.bf16.vlgmr.msra.gmra.mxu0 %vm68_vm0, %v2145_v13 }
 0x2eb   :  { %1883 = vmatprep.mubr.msk.bf16.mxu0 %vm2039_vm1, %v2038_v10  ;;  %1880 = vmatpush3.bf16.msra.mxu0 %v668_v43 }
 0x2ec   :  { %1881 = vmatprep.subr.bf16.mxu0 %v2038_v10 }
 0x2ef   :  { %1882 = vmatpush3.bf16.msra.mxu0 %v662_v47 }
 0x2f0   :  { %1887 = vmatprep.subr.bf16.mxu0 %v2038_v10 }
 0x39a   :  { %v372_v2 = vpop.f32.mrf.mxu0 }
 0x39b   :  { %v378_v16 = vadd.f32 3.0, %v372_v2 }
 0x39c   :  { %v1845_v3 = vpop.f32.mrf.mxu0 }
 0x39d   :  { %v379_v24 = vmax.f32 %v378_v16, 0.0 }
 0x39e   :  { %v375_v4 = vpop.f32.mrf.mxu0 }
 0x39f   :  { %v380_v30 = vmin.f32 %v379_v24, 6.0  ;;  %v2009_v24 = vld [vmem:[%s2449_s4] sm:$0xff]  }
 0x3a0   :  { %v1846_v5 = vpop.f32.mrf.mxu0 }
 0x3a1   :  { %v381_v34 = vmul.f32 %v380_v30, %v372_v2  ;;  %v2007_v5 = vld [vmem:[%s2457_s8 + $0x8] sm:$0xff]  }
 0x3a2   :  { %v1853_v8 = vpop.f32.mrf.mxu0  ;;  %v1675_v30 = vld [vmem:[%s2453_s1 + $0x8] sm:$0x1f] }
 0x3a3   :  { %v454_v9 = vadd.f32 %v1853_v8, %v2235_v6  ;;  %v382_v35 = vmul.f32 0.16666667, %v381_v34  ;;  %v1672_v8 = vld [vmem:[%s2450_s0 + $0x18] sm:$0xff]  ;;  %v2013_v34 = vld [vmem:[%s2452_s6] sm:$0xff]  }
 0x3a4   :  { %v445_v11 = vpop.f32.mrf.mxu0 }
 0x3a5   :  { %v599_v12 = vpack.c.bf16 %v454_v9, %v454_v9  ;;  %v446_v17 = vadd.f32 %v2235_v6, %v445_v11  ;;  %v385_v36 = vpack.c.bf16 %v382_v35, %v382_v35  ;;  %v1673_v9 = vld [vmem:[%s2450_s0 + $0x20] sm:$0xff] }
 0x3a6   :  { %v1854_v13 = vpop.f32.mrf.mxu0  ;;  %v2292_v11 = vpack.c.bf16 %v1673_v9, %v1672_v8 }
 0x3a7   :  { %v607_v7 = vsel %vm263_vm2, %v599_v12, 0 }
 0x3a8   :  { %v448_v15 = vpop.f32.mrf.mxu0  ;;  %1872 = vmatpush3.bf16.xpose.msra.mxu1 %v607_v7 }
 0x3a9   :  { %v449_v18 = vadd.f32 %v2235_v6, %v448_v15  ;;  %1873 = vmatprep.subr.bf16.mxu1 %v2038_v10 }
 0x3aa   :  { %v591_v19 = vpop.f32.mrf.mxu0 }
 0x3ab   :  { %v598_v21 = vpack.c.bf16 %v449_v18, %v446_v17  ;;  %v592_v26 = vadd.f32 %v2245_v22, %v591_v19 }
 0x3ac   :  { %v1869_v23 = vpop.f32.mrf.mxu0 }
 0x3ad   :  { %v604_v27 = vsel %vm263_vm2, %v598_v21, 0  ;;  %v597_v31 = vpack.c.bf16 %v592_v26, %v592_v26 }
 0x3ae   :  { %v594_v25 = vpop.f32.mrf.mxu0 }
 0x3af   :  { %v1674_v25 = vld [vmem:[%s2450_s0 + $0x28] sm:$0x1] }
 0x3b0   :  { %1874 = vmatpush3.bf16.xpose.msra.mxu1 %v604_v27  ;;  %v1870_v28 = vpop.f32.mrf.mxu0  ;;  %v2305_v26 = vpack.c.bf16 %v1674_v25, %v1674_v25  ;;  %v2010_v27 = vld [vmem:[%s2451_s2 + $0x8] sm:$0xff]   ;;  %v2016_v25 = vld [vmem:[%s2451_s2 + $0x18] sm:$0xff]  }
 0x3b1   :  { %1893 = vmatprep.subr.bf16.mxu1 %v2038_v10  ;;  %v2011_v28 = vld [vmem:[%s2451_s2] sm:$0xff]  }
 0x3b7   :  { %1876 = vmatmul.mubr.msk.bf16.vlgmr.msra.gmra.mxu1 %vm263_vm2, %v597_v31  ;;  %v2322_v31 = vpack.c.bf16 %v1675_v30, %v1675_v30 }
 0x3b8   :  { %1894 = vmatpush3.bf16.msra.mxu1 %v2006_v32  ;;  %1895 = vmatprep.mubr.msk.bf16.mxu1 %vm2039_vm1, %v2038_v10  ;;  %v2012_v32 = vld [vmem:[%s2452_s6 + $0x8] sm:$0xff]  }
 0x3b9   :  { %1907 = vmatprep.subr.bf16.mxu1 %v2012_v32 }
 0x3bf   :  { %1896 = vmatmul.mubr.msk.bf16.vlgmr.msra.gmra.mxu1 %vm725_vm6, %v385_v36  ;;  %v2343_v36 = vld [vmem:[%s2459_s9] ss:$0 sm:$0xff] }
 0x3c0   :  { %1911 = vmatprep.mubr.msk.bf16.mxu1 %vm68_vm0, %v2292_v11  ;;  %1908 = vmatpush3.bf16.msra.mxu1 %v2012_v32 }
 0x3c1   :  { %1909 = vmatprep.subr.bf16.mxu1 %v2013_v34 }
 0x3c4   :  { %1910 = vmatpush3.bf16.msra.mxu1 %v2013_v34 }
 0x3c5   :  { %1923 = vmatprep.subr.bf16.mxu1 %v2038_v10 }
 0x3c7   :  { %1912 = vmatmul.mubr.msk.bf16.vlgmr.msra.gmra.mxu1 %vm68_vm0, %v2305_v26 }
 0x3c8   :  { %1927 = vmatprep.mubr.msk.bf16.mxu1 %vm2039_vm1, %v2038_v10 }
 0x477   :  { %v643_v48 = vpop.f32.mrf.mxu1 }
 0x478   :  { %v649_v49 = vsel %vm313_vm4, %v643_v48, -inf }
 0x479   :  { %650 = vmax.xlane.f32.xlu1 %v649_v49  ;;  %v1877_v50 = vpop.f32.mrf.mxu1 }
 0x47b   :  { %v646_v51 = vpop.f32.mrf.mxu1 }
 0x47d   :  { %v1878_v52 = vpop.f32.mrf.mxu1 }
 0x47f   :  { %v2269_v53 = vpop.f32.mrf.mxu1 }
 0x481   :  { %v1897_v54 = vpop.f32.mrf.mxu1 }
 0x483   :  { %v815_v55 = vpop.f32.mrf.mxu1 }
 0x485   :  { %v1898_v56 = vpop.f32.mrf.mxu1 }
 0x502   :  { %v651_v57 = vpop.xlane.xlu1 %650 }
 0x503   :  { %v652_v58 = vsub.f32 %v643_v48, %v651_v57 }
 0x505   :  { %v653_v60 = vmul.f32 1.442695, %v652_v58 }
 0x507   :  { %2026 = vpow2.f32 %v653_v60 }
 0x514   :  { %v2027_v61 = vpop.eup %2026 }
 0x515   :  { %v655_v62 = vsel %vm313_vm4, %v2027_v61, 0.0 }
 0x516   :  { %656 = vadd.xlane.f32.xlu1 %v655_v62 }
 0x59f   :  { %v657_v63 = vpop.xlane.xlu1 %656 }
 0x5a0   :  { %2028 = vrcp.f32 %v657_v63 }
 0x5ad   :  { %v2029_v0 = vpop.eup %2028 }
 0x5ae   :  { %v659_v1 = vmul.f32 %v2029_v0, %v2027_v61  ;;  %v1913_v61 = vpop.f32.mrf.mxu1 }
 0x5b0   :  { %v660_v2 = vadd.f32 %v659_v1, %v2194_v59  ;;  %v661_v3 = vpack.c.bf16 %v659_v1, %v659_v1  ;;  %v2008_v59 = vld [vmem:[%s2449_s4 + $0x8] sm:$0xff]   ;;  %v974_v62 = vpop.f32.mrf.mxu1 }
 0x5b2   :  { %1884 = vmatmul.mubr.msk.bf16.vlgmr.msra.gmra.mxu0 %vm328_vm5, %v661_v3  ;;  %v828_v4 = vmul.f32 0.5, %v660_v2  ;;  %v1914_v0 = vpop.f32.mrf.mxu1 }
 0x5b3   :  { %1889 = vmatprep.mubr.msk.bf16.mxu0 %vm2039_vm1, %v2038_v10  ;;  %1888 = vmatpush3.bf16.msra.mxu0 %v2007_v5 }
 0x5b4   :  { %830 = vst.msk [vmem:[%s2458_s11] sm:$0x1] %vm829_vm7, %v828_v4  ;;  %1899 = vmatprep.subr.bf16.mxu0 %v2008_v59  ;;  %v977_v2 = vpop.f32.mrf.mxu1 }
 0x5b5   :  { %v978_v3 = vadd.f32 %v2166_v20, %v977_v2 }
 0x672   :  { %v704_v12 = vpop.f32.mrf.mxu0 }
 0x673   :  { %v710_v13 = vadd.f32 3.0, %v704_v12 }
 0x674   :  { %v1885_v7 = vpop.f32.mrf.mxu0 }
 0x675   :  { %v711_v15 = vmax.f32 %v710_v13, 0.0 }
 0x676   :  { %v707_v16 = vpop.f32.mrf.mxu0 }
 0x677   :  { %v712_v17 = vmin.f32 %v711_v15, 6.0 }
 0x678   :  { %v1886_v18 = vpop.f32.mrf.mxu0 }
 0x679   :  { %v713_v19 = vmul.f32 %v712_v17, %v704_v12 }
 0x67b   :  { %v714_v21 = vmul.f32 0.16666667, %v713_v19 }
 0x67d   :  { %v718_v23 = vpack.c.bf16 %v714_v21, %v714_v21 }
 0x67f   :  { %1890 = vmatmul.mubr.msk.bf16.vlgmr.msra.gmra.mxu0 %vm725_vm6, %v718_v23 }
 0x680   :  { %1900 = vmatpush3.bf16.msra.mxu0 %v2008_v59  ;;  %1903 = vmatprep.mubr.msk.bf16.mxu0 %vm68_vm0, %v2292_v11 }
 0x681   :  { %1901 = vmatprep.subr.bf16.mxu0 %v2009_v24 }
 0x684   :  { %1902 = vmatpush3.bf16.msra.mxu0 %v2009_v24  ;;  %v2015_v24 = vld [vmem:[%s2449_s4 + $0x10] sm:$0xff]  }
 0x685   :  { %1915 = vmatprep.subr.bf16.mxu0 %v2038_v10 }
 0x687   :  { %1904 = vmatmul.mubr.msk.bf16.vlgmr.msra.gmra.mxu0 %vm68_vm0, %v2305_v26 }
 0x688   :  { %1916 = vmatpush3.bf16.msra.mxu0 %v2010_v27  ;;  %1919 = vmatprep.mubr.msk.bf16.mxu0 %vm2039_vm1, %v2038_v10  ;;  %v2017_v27 = vld [vmem:[%s2451_s2 + $0x10] sm:$0xff]  }
 0x689   :  { %1917 = vmatprep.subr.bf16.mxu0 %v2038_v10 }
 0x68c   :  { %1918 = vmatpush3.bf16.msra.mxu0 %v2011_v28  ;;  %v2019_v28 = vld [vmem:[%s2452_s6 + $0x10] sm:$0xff]  }
 0x68d   :  { %1931 = vmatprep.subr.bf16.mxu0 %v2038_v10 }
 0x68f   :  { %1920 = vmatmul.mubr.msk.bf16.vlgmr.msra.gmra.mxu0 %vm68_vm0, %v2322_v31 }
 0x690   :  { %1935 = vmatprep.mubr.msk.bf16.mxu0 %vm2039_vm1, %v2038_v10 }
 0x73f   :  { %v763_v35 = vpop.f32.mrf.mxu0 }
 0x740   :  { %v813_v38 = vadd.f32 %v2269_v53, %v763_v35 }
 0x741   :  { %v1891_v39 = vpop.f32.mrf.mxu0 }
 0x742   :  { %v825_v40 = vadd.f32 %v2343_v36, %v813_v38 }
 0x743   :  { %v766_v41 = vpop.f32.mrf.mxu0 }
 0x744   :  { %827 = vst.msk [vmem:[%s2460_s10] sm:$0x1f] %vm826_vm8, %v825_v40 }
 0x745   :  { %v1892_v42 = vpop.f32.mrf.mxu0 }
 0x747   :  { %v1905_v43 = vpop.f32.mrf.mxu0 }
 0x748   :  { %v912_v44 = vadd.f32 %v1905_v43, %v2160_v14 }
 0x749   :  { %v903_v45 = vpop.f32.mrf.mxu0 }
 0x74a   :  { %v1056_v46 = vpack.c.bf16 %v912_v44, %v912_v44  ;;  %v904_v50 = vadd.f32 %v2160_v14, %v903_v45 }
 0x74b   :  { %v1906_v47 = vpop.f32.mrf.mxu0 }
 0x74c   :  { %v1064_v48 = vsel %vm263_vm2, %v1056_v46, 0 }
 0x74d   :  { %v906_v49 = vpop.f32.mrf.mxu0  ;;  %1924 = vmatpush3.bf16.xpose.msra.mxu1 %v1064_v48 }
 0x74e   :  { %v907_v51 = vadd.f32 %v2160_v14, %v906_v49  ;;  %1925 = vmatprep.subr.bf16.mxu1 %v2038_v10  ;;  %v983_v14 = vadd.f32 %v1913_v61, %v2166_v20 }
 0x74f   :  { %v1048_v52 = vpop.f32.mrf.mxu0 }
 0x750   :  { %v1055_v53 = vpack.c.bf16 %v907_v51, %v904_v50  ;;  %v1049_v56 = vadd.f32 %v2178_v33, %v1048_v52  ;;  %v1119_v63 = vpack.c.bf16 %v983_v14, %v983_v14  ;;  %v975_v33 = vadd.f32 %v2166_v20, %v974_v62  ;;  %v2014_v20 = vld [vmem:[%s2449_s4 + $0x18] sm:$0xff]  }
 0x751   :  { %v1921_v54 = vpop.f32.mrf.mxu0 }
 0x752   :  { %v1061_v57 = vsel %vm263_vm2, %v1055_v53, 0  ;;  %v1054_v60 = vpack.c.bf16 %v1049_v56, %v1049_v56  ;;  %v1124_v1 = vand.u32 %v1119_v63, %v2173_v29  ;;  %v1118_v4 = vpack.c.bf16 %v978_v3, %v975_v33 }
 0x753   :  { %v1051_v55 = vpop.f32.mrf.mxu0 }
 0x754   :  { %1932 = vmatpush3.bf16.msra.mxu0 %v1124_v1 }
 0x755   :  { %1926 = vmatpush3.bf16.xpose.msra.mxu1 %v1061_v57  ;;  %v1922_v58 = vpop.f32.mrf.mxu0  ;;  %1933 = vmatprep.subr.bf16.mxu0 %v2038_v10 }
 0x758   :  { %1934 = vmatpush3.bf16.msra.mxu0 %v1118_v4 }
 0x759   :  { %1939 = vmatprep.subr.bf16.mxu0 %v2014_v20 }
 0x75c   :  { %1928 = vmatmul.mubr.msk.bf16.vlgmr.msra.gmra.mxu1 %vm263_vm2, %v1054_v60 }
 0x75d   :  { %1951 = vmatprep.mubr.msk.bf16.mxu1 %vm68_vm0, %v2292_v11 }
 0x81c   :  { %v1100_v5 = vpop.f32.mrf.mxu1 }
 0x81d   :  { %v1106_v59 = vsel %vm313_vm4, %v1100_v5, -inf }
 0x81e   :  { %1107 = vmax.xlane.f32.xlu0 %v1106_v59  ;;  %v1929_v8 = vpop.f32.mrf.mxu1 }
 0x820   :  { %v1103_v9 = vpop.f32.mrf.mxu1 }
 0x822   :  { %v1930_v12 = vpop.f32.mrf.mxu1 }
 0x8a7   :  { %v1108_v13 = vpop.xlane.xlu0 %1107 }
 0x8a8   :  { %v1109_v7 = vsub.f32 %v1100_v5, %v1108_v13 }
 0x8aa   :  { %v1110_v15 = vmul.f32 1.442695, %v1109_v7 }
 0x8ac   :  { %2030 = vpow2.f32 %v1110_v15 }
 0x8b9   :  { %v2031_v16 = vpop.eup %2030 }
 0x8ba   :  { %v1112_v17 = vsel %vm313_vm4, %v2031_v16, 0.0 }
 0x8bb   :  { %1113 = vadd.xlane.f32.xlu1 %v1112_v17 }
 0x944   :  { %v1114_v18 = vpop.xlane.xlu1 %1113 }
 0x945   :  { %2032 = vrcp.f32 %v1114_v18 }
 0x952   :  { %v2033_v19 = vpop.eup %2032 }
 0x953   :  { %v2371_v21 = vmul.f32 %v2033_v19, %v2031_v16 }
 0x955   :  { %v1117_v23 = vpack.c.bf16 %v2371_v21, %v2371_v21 }
 0x957   :  { %1936 = vmatmul.mubr.msk.bf16.vlgmr.msra.gmra.mxu0 %vm328_vm5, %v1117_v23 }
 0x958   :  { %1940 = vmatpush3.bf16.msra.mxu0 %v2014_v20  ;;  %1943 = vmatprep.mubr.msk.bf16.mxu0 %vm68_vm0, %v2292_v11  ;;  %v2018_v11 = vld [vmem:[%s2452_s6 + $0x18] sm:$0xff]  }
 0x959   :  { %1941 = vmatprep.subr.bf16.mxu0 %v2015_v24  ;;  %1947 = vmatprep.subr.bf16.mxu1 %v2018_v11 }
 0x95a   :  { %1948 = vmatpush3.bf16.msra.mxu1 %v2018_v11 }
 0x95b   :  { %1949 = vmatprep.subr.bf16.mxu1 %v2019_v28 }
 0x95c   :  { %1942 = vmatpush3.bf16.msra.mxu0 %v2015_v24 }
 0x95d   :  { %1955 = vmatprep.subr.bf16.mxu0 %v2038_v10 }
 0x95e   :  { %1950 = vmatpush3.bf16.msra.mxu1 %v2019_v28 }
 0x95f   :  { %1944 = vmatmul.mubr.msk.bf16.vlgmr.msra.gmra.mxu0 %vm68_vm0, %v2305_v26  ;;  %1963 = vmatprep.subr.bf16.mxu1 %v2038_v10 }
 0x960   :  { %1956 = vmatpush3.bf16.msra.mxu0 %v2016_v25  ;;  %1959 = vmatprep.mubr.msk.bf16.mxu0 %vm2039_vm1, %v2038_v10 }
 0x961   :  { %1957 = vmatprep.subr.bf16.mxu0 %v2038_v10  ;;  %1952 = vmatmul.mubr.msk.bf16.vlgmr.msra.gmra.mxu1 %vm68_vm0, %v2305_v26 }
 0x962   :  { %1967 = vmatprep.mubr.msk.bf16.mxu1 %vm2039_vm1, %v2038_v10 }
 0x964   :  { %1958 = vmatpush3.bf16.msra.mxu0 %v2017_v27  ;;  %v2021_v27 = vld [vmem:[%s2457_s8 + $0x8] sm:$0xff]  }
 0x965   :  { %1971 = vmatprep.subr.bf16.mxu0 %v2038_v10 }
 0x967   :  { %1960 = vmatmul.mubr.msk.bf16.vlgmr.msra.gmra.mxu0 %vm68_vm0, %v2322_v31 }
 0x968   :  { %1975 = vmatprep.mubr.msk.bf16.mxu0 %vm2039_vm1, %v2038_v10 }
 0xa17   :  { %v1160_v30 = vpop.f32.mrf.mxu0 }
 0xa18   :  { %v1166_v44 = vadd.f32 3.0, %v1160_v30 }
 0xa19   :  { %v1937_v31 = vpop.f32.mrf.mxu0 }
 0xa1a   :  { %v1167_v49 = vmax.f32 %v1166_v44, 0.0 }
 0xa1b   :  { %v1163_v32 = vpop.f32.mrf.mxu0 }
 0xa1c   :  { %v1168_v54 = vmin.f32 %v1167_v49, 6.0 }
 0xa1d   :  { %v1938_v34 = vpop.f32.mrf.mxu0 }
 0xa1e   :  { %v1169_v56 = vmul.f32 %v1168_v54, %v1160_v30 }
 0xa1f   :  { %v1945_v35 = vpop.f32.mrf.mxu0 }
 0xa20   :  { %v1240_v38 = vadd.f32 %v1945_v35, %v2235_v6 }
 0xa21   :  { %v1231_v39 = vpop.f32.mrf.mxu0  ;;  %v1953_v58 = vpop.f32.mrf.mxu1 }
 0xa22   :  { %v1381_v40 = vpack.c.bf16 %v1240_v38, %v1240_v38  ;;  %v1232_v26 = vadd.f32 %v2235_v6, %v1231_v39  ;;  %v1311_v60 = vadd.f32 %v1953_v58, %v2260_v37 }
 0xa23   :  { %v1946_v41 = vpop.f32.mrf.mxu0  ;;  %v1302_v61 = vpop.f32.mrf.mxu1 }
 0xa24   :  { %v1389_v42 = vsel %vm263_vm2, %v1381_v40, 0  ;;  %v1445_v14 = vpack.c.bf16 %v1311_v60, %v1311_v60  ;;  %v1303_v0 = vadd.f32 %v2260_v37, %v1302_v61 }
 0xa25   :  { %v1234_v43 = vpop.f32.mrf.mxu0  ;;  %1964 = vmatpush3.bf16.xpose.msra.mxu1 %v1389_v42  ;;  %v1954_v62 = vpop.f32.mrf.mxu1 }
 0xa26   :  { %v1235_v45 = vadd.f32 %v2235_v6, %v1234_v43  ;;  %1965 = vmatprep.subr.bf16.mxu1 %v2038_v10  ;;  %v2020_v6 = vld [vmem:[%s2457_s8] sm:$0xff]   ;;  %v1450_v63 = vand.u32 %v1445_v14, %v2173_v29 }
 0xa27   :  { %v1373_v46 = vpop.f32.mrf.mxu0  ;;  %v1305_v1 = vpop.f32.mrf.mxu1 }
 0xa28   :  { %v1380_v47 = vpack.c.bf16 %v1235_v45, %v1232_v26  ;;  %v1374_v51 = vadd.f32 %v2245_v22, %v1373_v46  ;;  %v1170_v22 = vmul.f32 0.16666667, %v1169_v56  ;;  %v1306_v33 = vadd.f32 %v2260_v37, %v1305_v1  ;;  %1972 = vmatpush3.bf16.msra.mxu0 %v1450_v63 }
 0xa29   :  { %v1961_v48 = vpop.f32.mrf.mxu0  ;;  %1973 = vmatprep.subr.bf16.mxu0 %v2038_v10 }
 0xa2a   :  { %v1386_v52 = vsel %vm263_vm2, %v1380_v47, 0  ;;  %v1379_v55 = vpack.c.bf16 %v1374_v51, %v1374_v51  ;;  %v1173_v57 = vpack.c.bf16 %v1170_v22, %v1170_v22  ;;  %v1444_v2 = vpack.c.bf16 %v1306_v33, %v1303_v0 }
 0xa2b   :  { %v1376_v50 = vpop.f32.mrf.mxu0 }
 0xa2c   :  { %1974 = vmatpush3.bf16.msra.mxu0 %v1444_v2 }
 0xa2d   :  { %1966 = vmatpush3.bf16.xpose.msra.mxu1 %v1386_v52  ;;  %v1962_v53 = vpop.f32.mrf.mxu0  ;;  %1979 = vmatprep.subr.bf16.mxu0 %v2038_v10 }
 0xa2e   :  { %1985 = vmatprep.subr.bf16.mxu1 %v2038_v10 }
 0xa34   :  { %1968 = vmatmul.mubr.msk.bf16.vlgmr.msra.gmra.mxu1 %vm263_vm2, %v1379_v55 }
 0xa35   :  { %1986 = vmatpush3.bf16.msra.mxu1 %v2020_v6  ;;  %1987 = vmatprep.mubr.msk.bf16.mxu1 %vm2039_vm1, %v2038_v10 }
 0xa3c   :  { %1988 = vmatmul.mubr.msk.bf16.vlgmr.msra.gmra.mxu1 %vm725_vm6, %v1173_v57 }
 0xaf4   :  { %v1425_v3 = vpop.f32.mrf.mxu1 }
 0xaf5   :  { %v1431_v4 = vsel %vm313_vm4, %v1425_v3, -inf }
 0xaf6   :  { %1432 = vmax.xlane.f32.xlu0 %v1431_v4  ;;  %v1969_v5 = vpop.f32.mrf.mxu1 }
 0xaf8   :  { %v1428_v59 = vpop.f32.mrf.mxu1 }
 0xafa   :  { %v1970_v8 = vpop.f32.mrf.mxu1 }
 0xafc   :  { %v1592_v29 = vpop.f32.mrf.mxu1 }
 0xafe   :  { %v1989_v9 = vpop.f32.mrf.mxu1 }
 0xb00   :  { %v1595_v12 = vpop.f32.mrf.mxu1 }
 0xb02   :  { %v1990_v13 = vpop.f32.mrf.mxu1 }
 0xb7f   :  { %v1433_v7 = vpop.xlane.xlu0 %1432 }
 0xb80   :  { %v1434_v37 = vsub.f32 %v1425_v3, %v1433_v7 }
 0xb82   :  { %v1435_v15 = vmul.f32 1.442695, %v1434_v37 }
 0xb84   :  { %2034 = vpow2.f32 %v1435_v15 }
 0xb91   :  { %v2035_v16 = vpop.eup %2034 }
 0xb92   :  { %v1437_v17 = vsel %vm313_vm4, %v2035_v16, 0.0 }
 0xb93   :  { %1438 = vadd.xlane.f32.xlu1 %v1437_v17 }
 0xc1c   :  { %v1439_v20 = vpop.xlane.xlu1 %1438 }
 0xc1d   :  { %2036 = vrcp.f32 %v1439_v20 }
 0xc2a   :  { %v2037_v18 = vpop.eup %2036 }
 0xc2b   :  { %v1441_v19 = vmul.f32 %v2037_v18, %v2035_v16 }
 0xc2d   :  { %v1442_v23 = vadd.f32 %v1441_v19, %v2371_v21  ;;  %v1443_v24 = vpack.c.bf16 %v1441_v19, %v1441_v19 }
 0xc2f   :  { %v1608_v25 = vmul.f32 0.5, %v1442_v23  ;;  %1976 = vmatmul.mubr.msk.bf16.vlgmr.msra.gmra.mxu0 %vm328_vm5, %v1443_v24 }
 0xc30   :  { %1981 = vmatprep.mubr.msk.bf16.mxu0 %vm2039_vm1, %v2038_v10  ;;  %1980 = vmatpush3.bf16.msra.mxu0 %v2021_v27 }
 0xc31   :  { %1609 = vst.msk [vmem:[%s2458_s11 + $0x1] sm:$0x1] %vm829_vm7, %v1608_v25 }
 0xcef   :  { %v1486_v11 = vpop.f32.mrf.mxu0 }
 0xcf0   :  { %v1492_v28 = vadd.f32 3.0, %v1486_v11 }
 0xcf1   :  { %v1977_v21 = vpop.f32.mrf.mxu0 }
 0xcf2   :  { %v1493_v30 = vmax.f32 %v1492_v28, 0.0 }
 0xcf3   :  { %v1489_v31 = vpop.f32.mrf.mxu0 }
 0xcf4   :  { %v1494_v32 = vmin.f32 %v1493_v30, 6.0 }
 0xcf5   :  { %v1978_v34 = vpop.f32.mrf.mxu0 }
 0xcf6   :  { %v1495_v35 = vmul.f32 %v1494_v32, %v1486_v11 }
 0xcf8   :  { %v1496_v38 = vmul.f32 0.16666667, %v1495_v35 }
 0xcfa   :  { %v1499_v10 = vpack.c.bf16 %v1496_v38, %v1496_v38 }
 0xcfc   :  { %1982 = vmatmul.mubr.msk.bf16.vlgmr.msra.gmra.mxu0 %vm725_vm6, %v1499_v10 }
 0xdbc   :  { %v1543_v39 = vpop.f32.mrf.mxu0 }
 0xdbd   :  { %v1593_v40 = vadd.f32 %v1592_v29, %v1543_v39 }
 0xdbe   :  { %v1983_v41 = vpop.f32.mrf.mxu0 }
 0xdbf   :  { %v1605_v42 = vadd.f32 %v2343_v36, %v1593_v40 }
 0xdc0   :  { %v1546_v43 = vpop.f32.mrf.mxu0 }
 0xdc1   :  { %1730 = vst.msk [vmem:[%s2460_s10 + $0x8] sm:$0x1f] %vm826_vm8, %v1605_v42 }
 0xdc2   :  { %v1984_v44 = vpop.f32.mrf.mxu0 }

// kernel: levit_forward.15
= control target key start
LH: loop header
LB: loop body
LE: loop exit
PB: predicated region body
PF: predicated region fallthrough
CT: control target
= control target key end

     0   :  { %v184_v1 = vmov 0.0   ;;  %vm185_vm0 = vmmov 0   ;;  %vm20_vm1 = vcmask 388096   ;;  %s228_s0 = inlined_call_operand.vmem [shape: f32[2,5,48], index: 0, kind: input, shape index: {}]   ;;  %s229_s1 = inlined_call_operand.vmem [shape: bf16[48,10], index: 1, kind: input, shape index: {}]   ;;  %s230_s2 = inlined_call_operand.vmem [shape: f32[1,10], index: 2, kind: input, shape index: {}]   ;;  %s231_s3 = inlined_call_operand.hbm [shape: f32[2,10], index: 3, kind: output, shape index: {}]  }
   0x1   :  { %v159_v0 = vld [vmem:[%s229_s1 + $0x10] sm:$0xff]   ;;  %146 = vmatprep.subr.bf16.mxu0 %v184_v1  ;;  %v160_v2 = vld [vmem:[%s229_s1 + $0x8] sm:$0xff]   ;;  %152 = vmatprep.mubr.msk.bf16.mxu0 %vm185_vm0, %v184_v1  ;;  %v16_v3 = vld [vmem:[%s228_s0] sm:$0x1f] }
   0x2   :  { %147 = vmatpush3.bf16.msra.mxu0 %v159_v0  ;;  %v136_v4 = vld [vmem:[%s228_s0 + $0x8] sm:$0x1f]  ;;  %v18_v5 = vrot.slane %v16_v3, 1 }
   0x3   :  { %148 = vmatprep.subr.bf16.mxu0 %v184_v1  ;;  %v32_v6 = vrot.slane %v136_v4, 1 }
   0x4   :  { %8 = vsyncpa [#allocation3], 0  ;;  %v161_v7 = vld [vmem:[%s229_s1] sm:$0xff]   ;;  %v21_v8 = vsel %vm20_vm1, %v18_v5, 0.0  ;;  %vm42_vm2 = vcmask 1040384   ;;  %vm76_vm3 = vcmask 392192  }
   0x5   :  { %v34_v9 = vsel %vm20_vm1, %v32_v6, 0.0  ;;  %v22_v10 = vrot.slane %v21_v8, 4  ;;  %v137_v26 = vld [vmem:[%s230_s2] ss:$0 sm:$0xff]  ;;  %s186_s22 = smov [#allocation2]   ;;  %vm120_vm4 = vcmask 74752  }
   0x6   :  { %149 = vmatpush3.bf16.msra.mxu0 %v160_v2  ;;  %v35_v11 = vrot.slane %v34_v9, 4  ;;  %s128_s23 = sshll.u32 %s186_s22, 4  ;;  %s129_s23 = int_to_ptr.vmem [resolvable:$true] %s128_s23 }
   0x7   :  { %150 = vmatprep.subr.bf16.mxu0 %v184_v1  ;;  %v23_v12 = vadd.f32 %v22_v10, %v21_v8  ;;  %s162_s24 = scalar_lea.vmem %s129_s23, 32  ;;  %p167_p1 = scmp.lt.s32.totalorder %s129_s23, %s129_s23 }
   0x8   :  { %v36_v13 = vadd.f32 %v35_v11, %v34_v9  ;;  %p163_p0 = scmp.ne.s32.totalorder %s129_s23, %s162_s24  ;;  %p168_p2 = scmp.lt.s32.totalorder %s162_s24, %s162_s24 }
   0x9   :  { %v24_v14 = vrot.slane %v23_v12, 2 }
   0xa   :  { %151 = vmatpush3.bf16.msra.mxu0 %v161_v7  ;;  %v37_v15 = vrot.slane %v36_v13, 2  ;;  %p169_p3 = por %p168_p2, %p167_p1 }
   0xb   :  { %v25_v16 = vadd.f32 %v24_v14, %v23_v12 }
   0xc   :  { %v38_v17 = vadd.f32 %v37_v15, %v36_v13  ;;  %p170_p4 = pnand %p169_p3, %p163_p0 }
   0xd   :  { %v26_v18 = vrot.slane %v25_v16, 1 }
   0xe   :  { %v39_v19 = vrot.slane %v38_v17, 1 }
   0xf   :  { %v27_v20 = vadd.f32 %v26_v18, %v25_v16 }
  0x10   :  { %v40_v21 = vadd.f32 %v39_v19, %v38_v17 }
  0x11   :  { %v28_v22 = vmul.f32 0.25, %v27_v20 }
  0x12   :  { %v41_v23 = vmul.f32 0.25, %v40_v21 }
  0x14   :  { %v43_v24 = vsel %vm42_vm2, %v28_v22, %v41_v23 }
  0x15   :  { %v50_v25 = vpack.c.bf16 %v43_v24, %v43_v24 }
  0x17   :  { %153 = vmatmul.mubr.msk.bf16.vlgmr.msra.gmra.mxu0 %vm76_vm3, %v50_v25 }
  0xd7   :  { %v114_v27 = vpop.f32.mrf.mxu0 }
  0xd8   :  { %v115_v28 = vadd.f32 %v137_v26, %v114_v27 }
  0xd9   :  { %v154_v29 = vpop.f32.mrf.mxu0 }
  0xda   :  { %121 = vst.msk [vmem:[#allocation2] sm:$0x3] %vm120_vm4, %v115_v28 }
  0xdb   :  { %v117_v30 = vpop.f32.mrf.mxu0 }
  0xdc   :  { %173 = shalt.err (!%p170_p4)
}
  0xdd   :  { %131 = dma.vmem_to_hbm [thread:$0]  %s129_s23, 32, %s231_s3, [#allocation3]   ;;  %v155_v31 = vpop.f32.mrf.mxu0 }
  0xde   :  { %182 = dma.done.wait [#allocation3], 32  }
  0xdf   :  { %183 = vsyncadd [#allocation3], 4294967264 }
  0xe0   :  { %135 = vsyncpa [#allocation3], 1 }

// kernel: levit_forward.13
= control target key start
LH: loop header
LB: loop body
LE: loop exit
PB: predicated region body
PF: predicated region fallthrough
CT: control target
= control target key end

     0   :  { %v2587_v1 = vmov 0.0   ;;  %vm2588_vm0 = vmmov 0   ;;  %vm82_vm1 = vcmask 392192   ;;  %s3145_s0 = inlined_call_operand.vmem [shape: f32[2,4,48], index: 0, kind: input, shape index: {}]   ;;  %s3146_s1 = inlined_call_operand.vmem [shape: bf16[2,48,8], index: 1, kind: input, shape index: {}]   ;;  %s3147_s2 = inlined_call_operand.vmem [shape: f32[2,1,8], index: 2, kind: input, shape index: {}]   ;;  %s3148_s3 = inlined_call_operand.vmem [shape: bf16[2,48,8], index: 3, kind: input, shape index: {}]   ;;  %s3149_s4 = inlined_call_operand.vmem [shape: f32[2,1,8], index: 4, kind: input, shape index: {}]   ;;  %s3150_s5 = inlined_call_operand.vmem [shape: bf16[2,48,16], index: 5, kind: input, shape index: {}]   ;;  %s3151_s6 = inlined_call_operand.vmem [shape: f32[2,1,16], index: 6, kind: input, shape index: {}]   ;;  %s3152_s7 = inlined_call_operand.vmem [shape: bf16[2,16,48], index: 7, kind: input, shape index: {}]   ;;  %s3153_s8 = inlined_call_operand.vmem [shape: f32[1,48], index: 8, kind: input, shape index: {}]   ;;  %s3154_s9 = inlined_call_operand.vmem [shape: bf16[48,96], index: 9, kind: input, shape index: {}]   ;;  %s3155_s10 = inlined_call_operand.vmem [shape: f32[1,96], index: 10, kind: input, shape index: {}]   ;;  %s3156_s11 = inlined_call_operand.vmem [shape: bf16[96,48], index: 11, kind: input, shape index: {}]   ;;  %s3157_s12 = inlined_call_operand.vmem [shape: f32[1,48], index: 12, kind: input, shape index: {}]   ;;  %s3158_s13 = inlined_call_operand.vmem [shape: f32[2,4,48], index: 13, kind: output, shape index: {0}]   ;;  %s3159_s14 = inlined_call_operand.hbm [shape: f32[2,4], index: 14, kind: output, shape index: {1}]   ;;  %s3160_s15 = inlined_call_operand.vmem [shape: f32[2,48], index: 15, kind: output, shape index: {2}]  }
   0x1   :  { %v2491_v0 = vld [vmem:[%s3148_s3 + $0x10] sm:$0xff]   ;;  %2254 = vmatprep.subr.bf16.mxu1 %v2587_v1  ;;  %2244 = vmatprep.subr.bf16.mxu0 %v2587_v1  ;;  %v2493_v3 = vld [vmem:[%s3148_s3 + $0x8] sm:$0xff]   ;;  %v2495_v5 = vld [vmem:[%s3148_s3] sm:$0xff]  }
   0x2   :  { %v2492_v2 = vld [vmem:[%s3146_s1 + $0x10] sm:$0xff]   ;;  %2255 = vmatpush3.bf16.msra.mxu1 %v2491_v0  ;;  %2260 = vmatprep.mubr.msk.bf16.mxu1 %vm2588_vm0, %v2587_v1  ;;  %v2494_v4 = vld [vmem:[%s3146_s1 + $0x8] sm:$0xff]   ;;  %v2696_v6 = vld [vmem:[%s3145_s0] sm:$0xf] }
   0x3   :  { %2245 = vmatpush3.bf16.msra.mxu0 %v2492_v2  ;;  %2256 = vmatprep.subr.bf16.mxu1 %v2587_v1  ;;  %v2496_v7 = vld [vmem:[%s3146_s1] sm:$0xff]   ;;  %v2705_v8 = vpack.c.bf16 %v2696_v6, %v2696_v6  ;;  %v2497_v9 = vld [vmem:[%s3150_s5 + $0x10] sm:$0xff]   ;;  %v2498_v10 = vld [vmem:[%s3150_s5 + $0x8] sm:$0xff]  }
   0x4   :  { %2246 = vmatprep.subr.bf16.mxu0 %v2587_v1  ;;  %2250 = vmatprep.mubr.msk.bf16.mxu0 %vm2588_vm0, %v2587_v1  ;;  %v2499_v11 = vld [vmem:[%s3150_s5] sm:$0xff]  }
   0x6   :  { %2257 = vmatpush3.bf16.msra.mxu1 %v2493_v3 }
   0x7   :  { %2247 = vmatpush3.bf16.msra.mxu0 %v2494_v4  ;;  %2258 = vmatprep.subr.bf16.mxu1 %v2587_v1 }
   0x8   :  { %2248 = vmatprep.subr.bf16.mxu0 %v2587_v1 }
   0xa   :  { %2259 = vmatpush3.bf16.msra.mxu1 %v2495_v5 }
   0xb   :  { %2249 = vmatpush3.bf16.msra.mxu0 %v2496_v7  ;;  %2280 = vmatprep.subr.bf16.mxu1 %v2587_v1 }
   0xc   :  { %2264 = vmatprep.subr.bf16.mxu0 %v2587_v1 }
   0xd   :  { %2261 = vmatmul.mubr.msk.bf16.vlgmr.msra.gmra.mxu1 %vm82_vm1, %v2705_v8 }
   0xe   :  { %2251 = vmatmul.mubr.msk.bf16.vlgmr.msra.gmra.mxu0 %vm82_vm1, %v2705_v8  ;;  %2282 = vmatprep.mubr.msk.bf16.mxu1 %vm2588_vm0, %v2587_v1 }
   0xf   :  { %2265 = vmatpush3.bf16.msra.mxu0 %v2497_v9  ;;  %2270 = vmatprep.mubr.msk.bf16.mxu0 %vm2588_vm0, %v2587_v1 }
  0x10   :  { %2266 = vmatprep.subr.bf16.mxu0 %v2587_v1 }
  0x13   :  { %2267 = vmatpush3.bf16.msra.mxu0 %v2498_v10 }
  0x14   :  { %2268 = vmatprep.subr.bf16.mxu0 %v2587_v1 }
  0x17   :  { %2269 = vmatpush3.bf16.msra.mxu0 %v2499_v11 }
  0x18   :  { %2274 = vmatprep.subr.bf16.mxu0 %v2587_v1 }
  0x1a   :  { %2271 = vmatmul.mubr.msk.bf16.vlgmr.msra.gmra.mxu0 %vm82_vm1, %v2705_v8 }
  0x1b   :  { %2276 = vmatprep.mubr.msk.bf16.mxu0 %vm2588_vm0, %v2587_v1 }
  0x1c   :  { %21 = vsyncpa [#allocation3], 0  ;;  %v2736_v12 = vld [vmem:[%s3149_s4] ss:$0 sm:$0xff]  ;;  %vm270_vm2 = vcmask 64512   ;;  %vm335_vm3 = vcmask 1041408  }
  0x1d   :  { %v2742_v16 = vld [vmem:[%s3147_s2] ss:$0 sm:$0xff]  ;;  %vm317_vm4 = vcmask 27648   ;;  %v2501_v45 = vld [vmem:[%s3146_s1 + $0x28] sm:$0xff]   ;;  %v2505_v47 = vld [vmem:[%s3146_s1 + $0x18] sm:$0xff]   ;;  %vm331_vm5 = vcmask 31744  }
  0x1e   :  { %v2750_v27 = vld [vmem:[%s3151_s6] ss:$0 sm:$0xff]  ;;  %v2500_v51 = vld [vmem:[%s3148_s3 + $0x28] sm:$0xff]   ;;  %v2504_v54 = vld [vmem:[%s3148_s3 + $0x18] sm:$0xff]   ;;  %vm831_vm6 = vcmask 24576   ;;  %vm729_vm7 = vcmask 130048  }
  0x1f   :  { %v2503_v46 = vld [vmem:[%s3146_s1 + $0x20] sm:$0xff]   ;;  %vm970_vm8 = vcmask 785408   ;;  %vm1015_vm9 = vcmask 388096   ;;  %vm1018_vm10 = vcmask 388099   ;;  %s2589_s21 = smov [#allocation2]  }
  0x20   :  { %v2502_v53 = vld [vmem:[%s3148_s3 + $0x20] sm:$0xff]   ;;  %s1984_s22 = sshll.u32 %s2589_s21, 4  ;;  %s1985_s22 = int_to_ptr.vmem [resolvable:$true] %s1984_s22 }
  0x21   :  { %v2802_v63 = vld [vmem:[%s3149_s4 + $0x1] ss:$0 sm:$0xff]  ;;  %s2565_s23 = scalar_lea.vmem %s1985_s22, 32  ;;  %p2570_p1 = scmp.lt.s32.totalorder %s1985_s22, %s1985_s22 }
  0x22   :  { %v2808_v3 = vld [vmem:[%s3147_s2 + $0x1] ss:$0 sm:$0xff]  ;;  %p2566_p0 = scmp.ne.s32.totalorder %s1985_s22, %s2565_s23  ;;  %p2571_p2 = scmp.lt.s32.totalorder %s2565_s23, %s2565_s23 }
  0x24   :  { %p2572_p3 = por %p2571_p2, %p2570_p1 }
  0x26   :  { %p2573_p4 = pnand %p2572_p3, %p2566_p0 }
  0xcd   :  { %v191_v13 = vpop.f32.mrf.mxu1 }
  0xce   :  { %v192_v14 = vadd.f32 %v2736_v12, %v191_v13  ;;  %v120_v15 = vpop.f32.mrf.mxu0 }
  0xcf   :  { %v2262_v17 = vpop.f32.mrf.mxu1  ;;  %v121_v22 = vadd.f32 %v2742_v16, %v120_v15  ;;  %v2507_v15 = vld [vmem:[%s3150_s5 + $0x20] sm:$0xff]  }
  0xd0   :  { %v269_v18 = vpack.c.bf16 %v192_v14, %v192_v14  ;;  %v2252_v19 = vpop.f32.mrf.mxu0  ;;  %v2506_v14 = vld [vmem:[%s3150_s5 + $0x28] sm:$0xff]   ;;  %v2508_v17 = vld [vmem:[%s3150_s5 + $0x18] sm:$0xff]  }
  0xd1   :  { %v194_v20 = vpop.f32.mrf.mxu1  ;;  %v268_v26 = vpack.c.bf16 %v121_v22, %v121_v22 }
  0xd2   :  { %v275_v21 = vsel %vm270_vm2, %v269_v18, 0  ;;  %v123_v23 = vpop.f32.mrf.mxu0 }
  0xd3   :  { %v2263_v24 = vpop.f32.mrf.mxu1  ;;  %2275 = vmatpush3.bf16.xpose.msra.mxu0 %v275_v21 }
  0xd4   :  { %v2253_v25 = vpop.f32.mrf.mxu0  ;;  %2286 = vmatprep.subr.bf16.mxu0 %v2587_v1 }
  0xda   :  { %2277 = vmatmul.mubr.msk.bf16.vlgmr.msra.gmra.mxu0 %vm270_vm2, %v268_v26  ;;  %v262_v28 = vpop.f32.mrf.mxu0 }
  0xdb   :  { %v263_v29 = vadd.f32 %v2750_v27, %v262_v28  ;;  %2292 = vmatprep.mubr.msk.bf16.mxu0 %vm2588_vm0, %v2587_v1  ;;  %2287 = vmatpush3.bf16.msra.mxu0 %v2501_v45 }
  0xdc   :  { %v2272_v30 = vpop.f32.mrf.mxu0  ;;  %2288 = vmatprep.subr.bf16.mxu0 %v2587_v1 }
  0xdd   :  { %v330_v31 = vpack.c.bf16 %v263_v29, %v263_v29 }
  0xde   :  { %v265_v32 = vpop.f32.mrf.mxu0 }
  0xdf   :  { %v337_v33 = vsel %vm335_vm3, %v330_v31, 0  ;;  %2289 = vmatpush3.bf16.msra.mxu0 %v2503_v46 }
  0xe0   :  { %v2273_v34 = vpop.f32.mrf.mxu0  ;;  %2281 = vmatpush3.bf16.msra.mxu1 %v337_v33  ;;  %2290 = vmatprep.subr.bf16.mxu0 %v2587_v1 }
  0xe1   :  { %2296 = vmatprep.subr.bf16.mxu1 %v2587_v1 }
  0xe3   :  { %2291 = vmatpush3.bf16.msra.mxu0 %v2505_v47 }
  0xe4   :  { %2306 = vmatprep.subr.bf16.mxu0 %v2587_v1 }
  0xe6   :  { %2293 = vmatmul.mubr.msk.bf16.vlgmr.msra.gmra.mxu0 %vm82_vm1, %v2705_v8 }
  0xe7   :  { %2312 = vmatprep.mubr.msk.bf16.mxu0 %vm2588_vm0, %v2587_v1  ;;  %2307 = vmatpush3.bf16.msra.mxu0 %v2506_v14 }
  0xe8   :  { %2308 = vmatprep.subr.bf16.mxu0 %v2587_v1 }
  0xeb   :  { %2309 = vmatpush3.bf16.msra.mxu0 %v2507_v15 }
  0xec   :  { %2310 = vmatprep.subr.bf16.mxu0 %v2587_v1 }
  0xef   :  { %2311 = vmatpush3.bf16.msra.mxu0 %v2508_v17 }
  0xf0   :  { %2322 = vmatprep.subr.bf16.mxu0 %v2587_v1 }
  0xf2   :  { %2313 = vmatmul.mubr.msk.bf16.vlgmr.msra.gmra.mxu0 %vm82_vm1, %v2705_v8 }
  0xf3   :  { %2324 = vmatprep.mubr.msk.bf16.mxu0 %vm2588_vm0, %v2587_v1 }
 0x19a   :  { %v311_v35 = vpop.f32.mrf.mxu0 }
 0x19b   :  { %v318_v36 = vsel %vm317_vm4, %v311_v35, -inf }
 0x19c   :  { %319 = vmax.xlane.f32.xlu0 %v318_v36  ;;  %v2278_v37 = vpop.f32.mrf.mxu0 }
 0x19e   :  { %v314_v38 = vpop.f32.mrf.mxu0 }
 0x1a0   :  { %v2279_v39 = vpop.f32.mrf.mxu0 }
 0x1a6   :  { %v454_v55 = vpop.f32.mrf.mxu0 }
 0x1a7   :  { %v455_v10 = vadd.f32 %v2808_v3, %v454_v55 }
 0x1a8   :  { %v2294_v56 = vpop.f32.mrf.mxu0 }
 0x1a9   :  { %v606_v13 = vpack.c.bf16 %v455_v10, %v455_v10 }
 0x1aa   :  { %v457_v57 = vpop.f32.mrf.mxu0 }
 0x1ac   :  { %v2295_v58 = vpop.f32.mrf.mxu0 }
 0x1b2   :  { %v600_v29 = vpop.f32.mrf.mxu0 }
 0x1b4   :  { %v2314_v31 = vpop.f32.mrf.mxu0 }
 0x1b5   :  { %v2524_v31 = vld [vmem:[%s3156_s11 + $0x8] sm:$0xff]  }
 0x1b6   :  { %v603_v33 = vpop.f32.mrf.mxu0 }
 0x1b7   :  { %v2958_v33 = vld [vmem:[%s3155_s10] ss:$0 sm:$0xff] }
 0x225   :  { %v320_v40 = vpop.xlane.xlu0 %319 }
 0x226   :  { %v321_v41 = vsub.f32 %v311_v35, %v320_v40  ;;  %v2315_v35 = vpop.f32.mrf.mxu0 }
 0x228   :  { %v322_v42 = vmul.f32 1.442695, %v321_v41 }
 0x22a   :  { %2549 = vpow2.f32 %v322_v42  ;;  %v2509_v42 = vld [vmem:[%s3152_s7] sm:$0xff]  }
 0x237   :  { %v2550_v43 = vpop.eup %2549 }
 0x238   :  { %v324_v44 = vsel %vm317_vm4, %v2550_v43, 0.0 }
 0x239   :  { %325 = vadd.xlane.f32.xlu0 %v324_v44 }
 0x2c2   :  { %v326_v48 = vpop.xlane.xlu0 %325 }
 0x2c3   :  { %2551 = vrcp.f32 %v326_v48 }
 0x2d0   :  { %v2552_v49 = vpop.eup %2551 }
 0x2d1   :  { %v2776_v50 = vmul.f32 %v2552_v49, %v2550_v43  ;;  %v2510_v49 = vld [vmem:[%s3152_s7 + $0x8] sm:$0xff]  }
 0x2d3   :  { %v329_v52 = vpack.c.bf16 %v2776_v50, %v2776_v50 }
 0x2d5   :  { %2283 = vmatmul.mubr.msk.bf16.vlgmr.msra.gmra.mxu1 %vm331_vm5, %v329_v52 }
 0x2d6   :  { %2297 = vmatpush3.bf16.msra.mxu1 %v2500_v51  ;;  %2302 = vmatprep.mubr.msk.bf16.mxu1 %vm2588_vm0, %v2587_v1 }
 0x2d7   :  { %2298 = vmatprep.subr.bf16.mxu1 %v2587_v1 }
 0x2da   :  { %2299 = vmatpush3.bf16.msra.mxu1 %v2502_v53 }
 0x2db   :  { %2300 = vmatprep.subr.bf16.mxu1 %v2587_v1 }
 0x2de   :  { %2301 = vmatpush3.bf16.msra.mxu1 %v2504_v54 }
 0x2df   :  { %2316 = vmatprep.subr.bf16.mxu1 %v2587_v1 }
 0x2e1   :  { %2303 = vmatmul.mubr.msk.bf16.vlgmr.msra.gmra.mxu1 %vm82_vm1, %v2705_v8  ;;  %v2837_v8 = vld [vmem:[%s3151_s6 + $0x1] ss:$0 sm:$0xff] }
 0x2e2   :  { %2318 = vmatprep.mubr.msk.bf16.mxu1 %vm2588_vm0, %v2587_v1  ;;  %v601_v30 = vadd.f32 %v2837_v8, %v600_v29  ;;  %v2522_v29 = vld [vmem:[%s3156_s11 + $0x18] sm:$0xff]  }
 0x2e4   :  { %v667_v32 = vpack.c.bf16 %v601_v30, %v601_v30  ;;  %v2523_v30 = vld [vmem:[%s3156_s11 + $0x10] sm:$0xff]  }
 0x2e6   :  { %v672_v34 = vsel %vm335_vm3, %v667_v32, 0  ;;  %v2525_v32 = vld [vmem:[%s3156_s11] sm:$0xff]  }
 0x2e7   :  { %2323 = vmatpush3.bf16.msra.mxu0 %v672_v34 }
 0x2e8   :  { %2334 = vmatprep.subr.bf16.mxu0 %v2587_v1 }
 0x395   :  { %v373_v59 = vpop.f32.mrf.mxu1 }
 0x396   :  { %v379_v37 = vadd.f32 3.0, %v373_v59 }
 0x397   :  { %v2284_v60 = vpop.f32.mrf.mxu1 }
 0x398   :  { %v380_v38 = vmax.f32 %v379_v37, 0.0 }
 0x399   :  { %v376_v61 = vpop.f32.mrf.mxu1 }
 0x39a   :  { %v381_v39 = vmin.f32 %v380_v38, 6.0  ;;  %v2511_v61 = vld [vmem:[%s3154_s9 + $0x10] sm:$0xff]  }
 0x39b   :  { %v2285_v62 = vpop.f32.mrf.mxu1 }
 0x39c   :  { %v382_v43 = vmul.f32 %v381_v39, %v373_v59 }
 0x39e   :  { %v383_v47 = vmul.f32 0.16666667, %v382_v43 }
 0x3a0   :  { %v386_v48 = vpack.c.bf16 %v383_v47, %v383_v47 }
 0x3a1   :  { %v527_v0 = vpop.f32.mrf.mxu1 }
 0x3a2   :  { %v528_v2 = vadd.f32 %v2802_v63, %v527_v0 }
 0x3a3   :  { %v2304_v4 = vpop.f32.mrf.mxu1 }
 0x3a4   :  { %v607_v5 = vpack.c.bf16 %v528_v2, %v528_v2  ;;  %v2512_v4 = vld [vmem:[%s3154_s9 + $0x8] sm:$0xff]  }
 0x3a5   :  { %v530_v7 = vpop.f32.mrf.mxu1 }
 0x3a6   :  { %v612_v9 = vsel %vm270_vm2, %v607_v5, 0  ;;  %v2513_v5 = vld [vmem:[%s3154_s9] sm:$0xff]   ;;  %v2520_v7 = vld [vmem:[%s3156_s11 + $0x28] sm:$0xff]  }
 0x3a7   :  { %v2305_v11 = vpop.f32.mrf.mxu1  ;;  %2317 = vmatpush3.bf16.xpose.msra.mxu1 %v612_v9  ;;  %v2521_v9 = vld [vmem:[%s3156_s11 + $0x20] sm:$0xff]  }
 0x3a8   :  { %2328 = vmatprep.subr.bf16.mxu1 %v2587_v1  ;;  %v2884_v11 = vld [vmem:[%s3153_s8] ss:$0 sm:$0xff] }
 0x3ae   :  { %2319 = vmatmul.mubr.msk.bf16.vlgmr.msra.gmra.mxu1 %vm270_vm2, %v606_v13 }
 0x3af   :  { %2330 = vmatprep.mubr.msk.bf16.mxu1 %vm2588_vm0, %v2587_v1  ;;  %2329 = vmatpush3.bf16.msra.mxu1 %v2510_v49 }
 0x3b0   :  { %2340 = vmatprep.subr.bf16.mxu1 %v2587_v1 }
 0x46e   :  { %v648_v18 = vpop.f32.mrf.mxu1 }
 0x46f   :  { %v654_v19 = vsel %vm317_vm4, %v648_v18, -inf }
 0x470   :  { %655 = vmax.xlane.f32.xlu1 %v654_v19  ;;  %v2320_v20 = vpop.f32.mrf.mxu1 }
 0x471   :  { %v2514_v20 = vld [vmem:[%s3146_s1 + $0x10] sm:$0xff]  }
 0x472   :  { %v651_v21 = vpop.f32.mrf.mxu1 }
 0x474   :  { %v2321_v22 = vpop.f32.mrf.mxu1 }
 0x475   :  { %v2515_v22 = vld [vmem:[%s3146_s1 + $0x8] sm:$0xff]  }
 0x4f9   :  { %v656_v23 = vpop.xlane.xlu1 %655 }
 0x4fa   :  { %v657_v24 = vsub.f32 %v648_v18, %v656_v23  ;;  %v2911_v23 = vld [vmem:[%s3145_s0 + $0x4] sm:$0xf] }
 0x4fc   :  { %v658_v25 = vmul.f32 1.442695, %v657_v24  ;;  %v2916_v24 = vpack.c.bf16 %v2911_v23, %v2911_v23 }
 0x4fe   :  { %2553 = vpow2.f32 %v658_v25  ;;  %v2517_v25 = vld [vmem:[%s3148_s3 + $0x10] sm:$0xff]  }
 0x50b   :  { %v2554_v26 = vpop.eup %2553 }
 0x50c   :  { %v660_v28 = vsel %vm317_vm4, %v2554_v26, 0.0 }
 0x50d   :  { %661 = vadd.xlane.f32.xlu1 %v660_v28  ;;  %v2519_v28 = vld [vmem:[%s3148_s3] sm:$0xff]  }
 0x596   :  { %v662_v36 = vpop.xlane.xlu1 %661 }
 0x597   :  { %2555 = vrcp.f32 %v662_v36 }
 0x5a4   :  { %v2556_v40 = vpop.eup %2555 }
 0x5a5   :  { %v664_v41 = vmul.f32 %v2556_v40, %v2554_v26  ;;  %v2518_v26 = vld [vmem:[%s3148_s3 + $0x8] sm:$0xff]  }
 0x5a7   :  { %v666_v44 = vpack.c.bf16 %v664_v41, %v664_v41  ;;  %v665_v45 = vadd.f32 %v664_v41, %v2776_v50 }
 0x5a9   :  { %2325 = vmatmul.mubr.msk.bf16.vlgmr.msra.gmra.mxu0 %vm331_vm5, %v666_v44  ;;  %v830_v46 = vmul.f32 0.5, %v665_v45 }
 0x5aa   :  { %2335 = vmatpush3.bf16.msra.mxu0 %v2509_v42  ;;  %2336 = vmatprep.mubr.msk.bf16.mxu0 %vm2588_vm0, %v2587_v1 }
 0x5ab   :  { %2350 = vmatprep.subr.bf16.mxu0 %v2587_v1  ;;  %832 = vst.msk [vmem:[#allocation2] sm:$0x1] %vm831_vm6, %v830_v46 }
 0x5b1   :  { %2337 = vmatmul.mubr.msk.bf16.vlgmr.msra.gmra.mxu0 %vm729_vm7, %v386_v48 }
 0x5b2   :  { %2362 = vmatprep.mubr.msk.bf16.mxu0 %vm2588_vm0, %v2587_v1  ;;  %2351 = vmatpush3.bf16.msra.mxu0 %v2520_v7 }
 0x5b3   :  { %2352 = vmatprep.subr.bf16.mxu0 %v2587_v1 }
 0x5b6   :  { %2353 = vmatpush3.bf16.msra.mxu0 %v2521_v9 }
 0x5b7   :  { %2354 = vmatprep.subr.bf16.mxu0 %v2587_v1 }
 0x5ba   :  { %2355 = vmatpush3.bf16.msra.mxu0 %v2522_v29 }
 0x5bb   :  { %2356 = vmatprep.subr.bf16.mxu0 %v2587_v1 }
 0x5be   :  { %2357 = vmatpush3.bf16.msra.mxu0 %v2523_v30  ;;  %v2530_v30 = vld [vmem:[%s3146_s1 + $0x28] sm:$0xff]  }
 0x5bf   :  { %2358 = vmatprep.subr.bf16.mxu0 %v2587_v1 }
 0x5c2   :  { %2359 = vmatpush3.bf16.msra.mxu0 %v2524_v31  ;;  %v2534_v31 = vld [vmem:[%s3146_s1 + $0x18] sm:$0xff]  }
 0x5c3   :  { %2360 = vmatprep.subr.bf16.mxu0 %v2587_v1 }
 0x5c6   :  { %2361 = vmatpush3.bf16.msra.mxu0 %v2525_v32 }
 0x5c7   :  { %2386 = vmatprep.subr.bf16.mxu0 %v2587_v1 }
 0x669   :  { %v708_v50 = vpop.f32.mrf.mxu0 }
 0x66a   :  { %v714_v51 = vadd.f32 3.0, %v708_v50 }
 0x66b   :  { %v2326_v52 = vpop.f32.mrf.mxu0 }
 0x66c   :  { %v715_v53 = vmax.f32 %v714_v51, 0.0 }
 0x66d   :  { %v711_v54 = vpop.f32.mrf.mxu0 }
 0x66e   :  { %v716_v55 = vmin.f32 %v715_v53, 6.0 }
 0x66f   :  { %v2327_v56 = vpop.f32.mrf.mxu0 }
 0x670   :  { %v717_v57 = vmul.f32 %v716_v55, %v708_v50 }
 0x671   :  { %v816_v58 = vpop.f32.mrf.mxu0 }
 0x672   :  { %v718_v59 = vmul.f32 0.16666667, %v717_v57 }
 0x673   :  { %v2338_v60 = vpop.f32.mrf.mxu0 }
 0x674   :  { %v722_v62 = vpack.c.bf16 %v718_v59, %v718_v59  ;;  %v2990_v59 = vld [vmem:[%s3157_s12] ss:$0 sm:$0xff] }
 0x675   :  { %v819_v0 = vpop.f32.mrf.mxu0 }
 0x676   :  { %2331 = vmatmul.mubr.msk.bf16.vlgmr.msra.gmra.mxu1 %vm729_vm7, %v722_v62 }
 0x677   :  { %v2339_v2 = vpop.f32.mrf.mxu0  ;;  %2341 = vmatpush3.bf16.msra.mxu1 %v2511_v61  ;;  %2346 = vmatprep.mubr.msk.bf16.mxu1 %vm2588_vm0, %v2587_v1 }
 0x678   :  { %2342 = vmatprep.subr.bf16.mxu1 %v2587_v1 }
 0x67b   :  { %2343 = vmatpush3.bf16.msra.mxu1 %v2512_v4 }
 0x67c   :  { %2344 = vmatprep.subr.bf16.mxu1 %v2587_v1 }
 0x67f   :  { %2345 = vmatpush3.bf16.msra.mxu1 %v2513_v5 }
 0x680   :  { %2366 = vmatprep.subr.bf16.mxu1 %v2587_v1 }
 0x736   :  { %v767_v10 = vpop.f32.mrf.mxu1 }
 0x737   :  { %v817_v13 = vadd.f32 %v816_v58, %v767_v10  ;;  %v2527_v58 = vld [vmem:[%s3150_s5 + $0x8] sm:$0xff]  }
 0x738   :  { %v2332_v14 = vpop.f32.mrf.mxu1 }
 0x739   :  { %v2887_v15 = vadd.f32 %v2884_v11, %v817_v13 }
 0x73a   :  { %v770_v17 = vpop.f32.mrf.mxu1 }
 0x73b   :  { %v2891_v18 = vadd.f32 %v2887_v15, %v2696_v6  ;;  %v2516_v6 = vld [vmem:[%s3146_s1] sm:$0xff]  }
 0x73c   :  { %v2333_v19 = vpop.f32.mrf.mxu1 }
 0x73d   :  { %v840_v21 = vpack.c.bf16 %v2891_v18, %v2891_v18 }
 0x73f   :  { %2347 = vmatmul.mubr.msk.bf16.vlgmr.msra.gmra.mxu1 %vm82_vm1, %v840_v21 }
 0x740   :  { %2367 = vmatpush3.bf16.msra.mxu1 %v2514_v20  ;;  %2372 = vmatprep.mubr.msk.bf16.mxu1 %vm2588_vm0, %v2587_v1 }
 0x741   :  { %2368 = vmatprep.subr.bf16.mxu1 %v2587_v1 }
 0x744   :  { %2369 = vmatpush3.bf16.msra.mxu1 %v2515_v22 }
 0x745   :  { %2370 = vmatprep.subr.bf16.mxu1 %v2587_v1 }
 0x748   :  { %2371 = vmatpush3.bf16.msra.mxu1 %v2516_v6 }
 0x749   :  { %2376 = vmatprep.subr.bf16.mxu1 %v2587_v1 }
 0x74b   :  { %2373 = vmatmul.mubr.msk.bf16.vlgmr.msra.gmra.mxu1 %vm82_vm1, %v2916_v24 }
 0x74c   :  { %2377 = vmatpush3.bf16.msra.mxu1 %v2517_v25  ;;  %2382 = vmatprep.mubr.msk.bf16.mxu1 %vm2588_vm0, %v2587_v1 }
 0x74d   :  { %2378 = vmatprep.subr.bf16.mxu1 %v2587_v1 }
 0x750   :  { %2379 = vmatpush3.bf16.msra.mxu1 %v2518_v26 }
 0x751   :  { %2380 = vmatprep.subr.bf16.mxu1 %v2587_v1 }
 0x754   :  { %2381 = vmatpush3.bf16.msra.mxu1 %v2519_v28 }
 0x755   :  { %2396 = vmatprep.subr.bf16.mxu1 %v2587_v1 }
 0x757   :  { %2383 = vmatmul.mubr.msk.bf16.vlgmr.msra.gmra.mxu1 %vm82_vm1, %v2916_v24 }
 0x758   :  { %2398 = vmatprep.mubr.msk.bf16.mxu1 %vm2588_vm0, %v2587_v1 }
 0x7ff   :  { %v903_v34 = vpop.f32.mrf.mxu1 }
 0x800   :  { %v904_v35 = vadd.f32 %v2958_v33, %v903_v34 }
 0x801   :  { %v2348_v36 = vpop.f32.mrf.mxu1 }
 0x802   :  { %v909_v37 = vadd.f32 3.0, %v904_v35  ;;  %v2529_v36 = vld [vmem:[%s3148_s3 + $0x28] sm:$0xff]  }
 0x803   :  { %v906_v38 = vpop.f32.mrf.mxu1 }
 0x804   :  { %v910_v39 = vmax.f32 %v909_v37, 0.0  ;;  %v2531_v38 = vld [vmem:[%s3148_s3 + $0x20] sm:$0xff]  }
 0x805   :  { %v2349_v40 = vpop.f32.mrf.mxu1 }
 0x806   :  { %v911_v41 = vmin.f32 %v910_v39, 6.0  ;;  %v2533_v39 = vld [vmem:[%s3148_s3 + $0x18] sm:$0xff]  }
 0x808   :  { %v912_v42 = vmul.f32 %v911_v41, %v904_v35 }
 0x80a   :  { %v913_v43 = vmul.f32 0.16666667, %v912_v42 }
 0x80b   :  { %v1091_v44 = vpop.f32.mrf.mxu1 }
 0x80c   :  { %v926_v45 = vpack.c.bf16 %v913_v43, %v913_v43  ;;  %v1092_v56 = vadd.f32 %v2742_v16, %v1091_v44  ;;  %v2528_v16 = vld [vmem:[%s3150_s5] sm:$0xff]  }
 0x80d   :  { %v2374_v46 = vpop.f32.mrf.mxu1 }
 0x80e   :  { %2363 = vmatmul.mubr.msk.bf16.vlgmr.msra.gmra.mxu0 %vm970_vm8, %v926_v45  ;;  %v1239_v57 = vpack.c.bf16 %v1092_v56, %v1092_v56 }
 0x80f   :  { %v1094_v47 = vpop.f32.mrf.mxu1  ;;  %2392 = vmatprep.mubr.msk.bf16.mxu0 %vm2588_vm0, %v2587_v1 }
 0x811   :  { %v2375_v48 = vpop.f32.mrf.mxu1 }
 0x817   :  { %v1162_v49 = vpop.f32.mrf.mxu1 }
 0x818   :  { %v1163_v50 = vadd.f32 %v2736_v12, %v1162_v49  ;;  %v2526_v12 = vld [vmem:[%s3150_s5 + $0x10] sm:$0xff]  }
 0x819   :  { %v2384_v51 = vpop.f32.mrf.mxu1  ;;  %2387 = vmatpush3.bf16.msra.mxu0 %v2526_v12 }
 0x81a   :  { %v1240_v52 = vpack.c.bf16 %v1163_v50, %v1163_v50  ;;  %2388 = vmatprep.subr.bf16.mxu0 %v2587_v1 }
 0x81b   :  { %v1165_v53 = vpop.f32.mrf.mxu1 }
 0x81c   :  { %v1245_v54 = vsel %vm270_vm2, %v1240_v52, 0 }
 0x81d   :  { %v2385_v55 = vpop.f32.mrf.mxu1  ;;  %2397 = vmatpush3.bf16.xpose.msra.mxu1 %v1245_v54  ;;  %2389 = vmatpush3.bf16.msra.mxu0 %v2527_v58 }
 0x81e   :  { %2408 = vmatprep.subr.bf16.mxu1 %v2587_v1  ;;  %2390 = vmatprep.subr.bf16.mxu0 %v2587_v1 }
 0x821   :  { %2391 = vmatpush3.bf16.msra.mxu0 %v2528_v16 }
 0x822   :  { %2402 = vmatprep.subr.bf16.mxu0 %v2587_v1 }
 0x824   :  { %2399 = vmatmul.mubr.msk.bf16.vlgmr.msra.gmra.mxu1 %vm270_vm2, %v1239_v57  ;;  %2393 = vmatmul.mubr.msk.bf16.vlgmr.msra.gmra.mxu0 %vm82_vm1, %v2916_v24  ;;  %v2536_v57 = vld [vmem:[%s3150_s5 + $0x20] sm:$0xff]  }
 0x825   :  { %2414 = vmatprep.mubr.msk.bf16.mxu1 %vm2588_vm0, %v2587_v1  ;;  %2404 = vmatprep.mubr.msk.bf16.mxu0 %vm2588_vm0, %v2587_v1 }
 0x826   :  { %2409 = vmatpush3.bf16.msra.mxu1 %v2530_v30 }
 0x827   :  { %2410 = vmatprep.subr.bf16.mxu1 %v2587_v1 }
 0x8ce   :  { %v1008_v60 = vpop.f32.mrf.mxu0 }
 0x8cf   :  { %v1009_v61 = vadd.f32 %v2990_v59, %v1008_v60 }
 0x8d0   :  { %v2364_v62 = vpop.f32.mrf.mxu0 }
 0x8d1   :  { %v1014_v0 = vadd.f32 %v1009_v61, %v2891_v18  ;;  %v1017_v2 = vadd.f32 %v1009_v61, %v2887_v15 }
 0x8d2   :  { %v1011_v4 = vpop.f32.mrf.mxu0 }
 0x8d3   :  { %1016 = vst.msk [vmem:[%s3158_s13] sm:$0xf] %vm1015_vm9, %v1014_v0 }
 0x8d4   :  { %1019 = vst.msk [vmem:[%s3160_s15 - $0x3] sm:$0x8] %vm1018_vm10, %v1017_v2  ;;  %v2365_v5 = vpop.f32.mrf.mxu0 }
 0x8e4   :  { %v1281_v7 = vpop.f32.mrf.mxu1  ;;  %v1233_v21 = vpop.f32.mrf.mxu0 }
 0x8e5   :  { %v1287_v9 = vsel %vm317_vm4, %v1281_v7, -inf  ;;  %v1234_v22 = vadd.f32 %v2750_v27, %v1233_v21  ;;  %v2532_v27 = vld [vmem:[%s3146_s1 + $0x20] sm:$0xff]  }
 0x8e6   :  { %1288 = vmax.xlane.f32.xlu0 %v1287_v9  ;;  %v2400_v10 = vpop.f32.mrf.mxu1  ;;  %v2394_v6 = vpop.f32.mrf.mxu0  ;;  %2411 = vmatpush3.bf16.msra.mxu1 %v2532_v27  ;;  %v2539_v27 = vld [vmem:[%s3152_s7 + $0x8] sm:$0xff]  }
 0x8e7   :  { %v1299_v25 = vpack.c.bf16 %v1234_v22, %v1234_v22  ;;  %2412 = vmatprep.subr.bf16.mxu1 %v2587_v1  ;;  %v2538_v22 = vld [vmem:[%s3152_s7] sm:$0xff]  }
 0x8e8   :  { %v1284_v13 = vpop.f32.mrf.mxu1  ;;  %v1236_v26 = vpop.f32.mrf.mxu0 }
 0x8e9   :  { %v1304_v28 = vsel %vm335_vm3, %v1299_v25, 0 }
 0x8ea   :  { %v2401_v14 = vpop.f32.mrf.mxu1  ;;  %v2395_v29 = vpop.f32.mrf.mxu0  ;;  %2403 = vmatpush3.bf16.msra.mxu0 %v1304_v28  ;;  %2413 = vmatpush3.bf16.msra.mxu1 %v2534_v31 }
 0x8eb   :  { %2418 = vmatprep.subr.bf16.mxu0 %v2587_v1  ;;  %2428 = vmatprep.subr.bf16.mxu1 %v2587_v1 }
 0x8ed   :  { %2415 = vmatmul.mubr.msk.bf16.vlgmr.msra.gmra.mxu1 %vm82_vm1, %v2916_v24 }
 0x8ee   :  { %2434 = vmatprep.mubr.msk.bf16.mxu1 %vm2588_vm0, %v2587_v1 }
 0x96f   :  { %v1289_v15 = vpop.xlane.xlu0 %1288 }
 0x970   :  { %v1290_v17 = vsub.f32 %v1281_v7, %v1289_v15 }
 0x972   :  { %v1291_v18 = vmul.f32 1.442695, %v1290_v17 }
 0x974   :  { %2557 = vpow2.f32 %v1291_v18 }
 0x981   :  { %v2558_v19 = vpop.eup %2557 }
 0x982   :  { %v1293_v20 = vsel %vm317_vm4, %v2558_v19, 0.0 }
 0x983   :  { %1294 = vadd.xlane.f32.xlu1 %v1293_v20 }
 0x9ad   :  { %v1419_v40 = vpop.f32.mrf.mxu1 }
 0x9ae   :  { %v1420_v54 = vadd.f32 %v2808_v3, %v1419_v40  ;;  %v2537_v3 = vld [vmem:[%s3150_s5 + $0x18] sm:$0xff]  }
 0x9af   :  { %v2416_v41 = vpop.f32.mrf.mxu1 }
 0x9b0   :  { %v1567_v56 = vpack.c.bf16 %v1420_v54, %v1420_v54 }
 0x9b1   :  { %v1422_v42 = vpop.f32.mrf.mxu1 }
 0x9b3   :  { %v2417_v43 = vpop.f32.mrf.mxu1 }
 0x9b4   :  { %v2540_v43 = vld [vmem:[%s3154_s9 + $0x10] sm:$0xff]  }
 0xa0c   :  { %v1295_v32 = vpop.xlane.xlu1 %1294 }
 0xa0d   :  { %2559 = vrcp.f32 %v1295_v32 }
 0xa1a   :  { %v2560_v34 = vpop.eup %2559 }
 0xa1b   :  { %v3024_v35 = vmul.f32 %v2560_v34, %v2558_v19 }
 0xa1d   :  { %v1298_v37 = vpack.c.bf16 %v3024_v35, %v3024_v35 }
 0xa1f   :  { %2405 = vmatmul.mubr.msk.bf16.vlgmr.msra.gmra.mxu0 %vm331_vm5, %v1298_v37 }
 0xa20   :  { %2419 = vmatpush3.bf16.msra.mxu0 %v2529_v36  ;;  %2424 = vmatprep.mubr.msk.bf16.mxu0 %vm2588_vm0, %v2587_v1 }
 0xa21   :  { %2420 = vmatprep.subr.bf16.mxu0 %v2587_v1 }
 0xa24   :  { %2421 = vmatpush3.bf16.msra.mxu0 %v2531_v38 }
 0xa25   :  { %2422 = vmatprep.subr.bf16.mxu0 %v2587_v1 }
 0xa28   :  { %2423 = vmatpush3.bf16.msra.mxu0 %v2533_v39 }
 0xa29   :  { %2438 = vmatprep.subr.bf16.mxu0 %v2587_v1 }
 0xa2b   :  { %2425 = vmatmul.mubr.msk.bf16.vlgmr.msra.gmra.mxu0 %vm82_vm1, %v2916_v24 }
 0xa2c   :  { %2440 = vmatprep.mubr.msk.bf16.mxu0 %vm2588_vm0, %v2587_v1 }
 0xadf   :  { %v1340_v44 = vpop.f32.mrf.mxu0 }
 0xae1   :  { %v2406_v45 = vpop.f32.mrf.mxu0 }
 0xae3   :  { %v1343_v46 = vpop.f32.mrf.mxu0 }
 0xae5   :  { %v2407_v47 = vpop.f32.mrf.mxu0 }
 0xae6   :  { %v2541_v47 = vld [vmem:[%s3154_s9 + $0x8] sm:$0xff]  }
 0xaeb   :  { %v1490_v48 = vpop.f32.mrf.mxu0 }
 0xaec   :  { %v1491_v49 = vadd.f32 %v2802_v63, %v1490_v48  ;;  %v2535_v63 = vld [vmem:[%s3150_s5 + $0x28] sm:$0xff]   ;;  %v2542_v48 = vld [vmem:[%s3154_s9] sm:$0xff]  }
 0xaed   :  { %v2426_v50 = vpop.f32.mrf.mxu0  ;;  %2429 = vmatpush3.bf16.msra.mxu1 %v2535_v63 }
 0xaee   :  { %v1568_v51 = vpack.c.bf16 %v1491_v49, %v1491_v49  ;;  %2430 = vmatprep.subr.bf16.mxu1 %v2587_v1  ;;  %v2543_v49 = vld [vmem:[%s3156_s11 + $0x28] sm:$0xff]   ;;  %v2544_v50 = vld [vmem:[%s3156_s11 + $0x20] sm:$0xff]  }
 0xaef   :  { %v1493_v52 = vpop.f32.mrf.mxu0 }
 0xaf0   :  { %v1573_v53 = vsel %vm270_vm2, %v1568_v51, 0 }
 0xaf1   :  { %v2427_v55 = vpop.f32.mrf.mxu0  ;;  %2439 = vmatpush3.bf16.xpose.msra.mxu0 %v1573_v53  ;;  %2431 = vmatpush3.bf16.msra.mxu1 %v2536_v57 }
 0xaf2   :  { %2450 = vmatprep.subr.bf16.mxu0 %v2587_v1  ;;  %2432 = vmatprep.subr.bf16.mxu1 %v2587_v1 }
 0xaf5   :  { %2433 = vmatpush3.bf16.msra.mxu1 %v2537_v3  ;;  %v2545_v3 = vld [vmem:[%s3156_s11 + $0x18] sm:$0xff]  }
 0xaf6   :  { %2444 = vmatprep.subr.bf16.mxu1 %v2587_v1 }
 0xaf8   :  { %2441 = vmatmul.mubr.msk.bf16.vlgmr.msra.gmra.mxu0 %vm270_vm2, %v1567_v56  ;;  %2435 = vmatmul.mubr.msk.bf16.vlgmr.msra.gmra.mxu1 %vm82_vm1, %v2916_v24 }
 0xaf9   :  { %2452 = vmatprep.mubr.msk.bf16.mxu0 %vm2588_vm0, %v2587_v1  ;;  %2446 = vmatprep.mubr.msk.bf16.mxu1 %vm2588_vm0, %v2587_v1 }
 0xafa   :  { %2451 = vmatpush3.bf16.msra.mxu0 %v2539_v27 }
 0xafb   :  { %2462 = vmatprep.subr.bf16.mxu0 %v2587_v1 }
 0xbb8   :  { %v1609_v12 = vpop.f32.mrf.mxu0  ;;  %v1561_v62 = vpop.f32.mrf.mxu1 }
 0xbb9   :  { %v1615_v58 = vsel %vm317_vm4, %v1609_v12, -inf  ;;  %v1562_v0 = vadd.f32 %v2837_v8, %v1561_v62  ;;  %v1346_v8 = vadd.f32 3.0, %v1340_v44 }
 0xbba   :  { %1616 = vmax.xlane.f32.xlu0 %v1615_v58  ;;  %v2442_v16 = vpop.f32.mrf.mxu0  ;;  %v2436_v2 = vpop.f32.mrf.mxu1 }
 0xbbb   :  { %v1628_v4 = vpack.c.bf16 %v1562_v0, %v1562_v0  ;;  %v1347_v18 = vmax.f32 %v1346_v8, 0.0 }
 0xbbc   :  { %v1612_v60 = vpop.f32.mrf.mxu0  ;;  %v1564_v5 = vpop.f32.mrf.mxu1 }
 0xbbd   :  { %v1633_v7 = vsel %vm335_vm3, %v1628_v4, 0  ;;  %v1348_v19 = vmin.f32 %v1347_v18, 6.0 }
 0xbbe   :  { %v2443_v61 = vpop.f32.mrf.mxu0  ;;  %v2437_v9 = vpop.f32.mrf.mxu1  ;;  %2445 = vmatpush3.bf16.msra.mxu1 %v1633_v7 }
 0xbbf   :  { %2456 = vmatprep.subr.bf16.mxu1 %v2587_v1  ;;  %v1349_v6 = vmul.f32 %v1348_v19, %v1340_v44 }
 0xbc1   :  { %v1350_v29 = vmul.f32 0.16666667, %v1349_v6 }
 0xbc3   :  { %v1353_v30 = vpack.c.bf16 %v1350_v29, %v1350_v29 }
 0xc43   :  { %v1617_v24 = vpop.xlane.xlu0 %1616 }
 0xc44   :  { %v1618_v10 = vsub.f32 %v1609_v12, %v1617_v24  ;;  %v2546_v12 = vld [vmem:[%s3156_s11 + $0x10] sm:$0xff]  }
 0xc46   :  { %v1619_v13 = vmul.f32 1.442695, %v1618_v10 }
 0xc48   :  { %2561 = vpow2.f32 %v1619_v13 }
 0xc55   :  { %v2562_v14 = vpop.eup %2561 }
 0xc56   :  { %v1621_v15 = vsel %vm317_vm4, %v2562_v14, 0.0 }
 0xc57   :  { %1622 = vadd.xlane.f32.xlu1 %v1621_v15 }
 0xce0   :  { %v1623_v17 = vpop.xlane.xlu1 %1622 }
 0xce1   :  { %2563 = vrcp.f32 %v1623_v17 }
 0xcee   :  { %v2564_v20 = vpop.eup %2563 }
 0xcef   :  { %v1625_v21 = vmul.f32 %v2564_v20, %v2562_v14 }
 0xcf1   :  { %v1627_v25 = vpack.c.bf16 %v1625_v21, %v1625_v21  ;;  %v1626_v26 = vadd.f32 %v1625_v21, %v3024_v35 }
 0xcf3   :  { %2447 = vmatmul.mubr.msk.bf16.vlgmr.msra.gmra.mxu1 %vm331_vm5, %v1627_v25  ;;  %v1789_v28 = vmul.f32 0.5, %v1626_v26 }
 0xcf4   :  { %2457 = vmatpush3.bf16.msra.mxu1 %v2538_v22  ;;  %2458 = vmatprep.mubr.msk.bf16.mxu1 %vm2588_vm0, %v2587_v1 }
 0xcf5   :  { %2472 = vmatprep.subr.bf16.mxu1 %v2587_v1  ;;  %1790 = vst.msk [vmem:[#allocation2 + $0x1] sm:$0x1] %vm831_vm6, %v1789_v28 }
 0xcfb   :  { %2459 = vmatmul.mubr.msk.bf16.vlgmr.msra.gmra.mxu1 %vm729_vm7, %v1353_v30 }
 0xcfc   :  { %2484 = vmatprep.mubr.msk.bf16.mxu1 %vm2588_vm0, %v2587_v1  ;;  %2473 = vmatpush3.bf16.msra.mxu1 %v2543_v49 }
 0xcfd   :  { %2474 = vmatprep.subr.bf16.mxu1 %v2587_v1 }
 0xd00   :  { %2475 = vmatpush3.bf16.msra.mxu1 %v2544_v50 }
 0xd01   :  { %2476 = vmatprep.subr.bf16.mxu1 %v2587_v1 }
 0xd04   :  { %2477 = vmatpush3.bf16.msra.mxu1 %v2545_v3 }
 0xd05   :  { %2478 = vmatprep.subr.bf16.mxu1 %v2587_v1 }
 0xd08   :  { %2479 = vmatpush3.bf16.msra.mxu1 %v2546_v12 }
 0xd09   :  { %2480 = vmatprep.subr.bf16.mxu1 %v2587_v1 }
 0xdb3   :  { %v1669_v31 = vpop.f32.mrf.mxu1 }
 0xdb4   :  { %v1675_v32 = vadd.f32 3.0, %v1669_v31 }
 0xdb5   :  { %v2448_v34 = vpop.f32.mrf.mxu1 }
 0xdb6   :  { %v1676_v35 = vmax.f32 %v1675_v32, 0.0 }
 0xdb7   :  { %v1672_v36 = vpop.f32.mrf.mxu1 }
 0xdb8   :  { %v1677_v37 = vmin.f32 %v1676_v35, 6.0 }
 0xdb9   :  { %v2449_v38 = vpop.f32.mrf.mxu1 }
 0xdba   :  { %v1678_v39 = vmul.f32 %v1677_v37, %v1669_v31 }
 0xdbb   :  { %v1775_v40 = vpop.f32.mrf.mxu1 }
 0xdbc   :  { %v1679_v41 = vmul.f32 0.16666667, %v1678_v39 }
 0xdbd   :  { %v2460_v42 = vpop.f32.mrf.mxu1 }
 0xdbe   :  { %v1682_v44 = vpack.c.bf16 %v1679_v41, %v1679_v41 }
 0xdbf   :  { %v1778_v45 = vpop.f32.mrf.mxu1 }
 0xdc0   :  { %2453 = vmatmul.mubr.msk.bf16.vlgmr.msra.gmra.mxu0 %vm729_vm7, %v1682_v44 }
 0xdc1   :  { %v2461_v46 = vpop.f32.mrf.mxu1  ;;  %2463 = vmatpush3.bf16.msra.mxu0 %v2540_v43  ;;  %2468 = vmatprep.mubr.msk.bf16.mxu0 %vm2588_vm0, %v2587_v1 }
 0xdc2   :  { %2464 = vmatprep.subr.bf16.mxu0 %v2587_v1 }
 0xdc5   :  { %2465 = vmatpush3.bf16.msra.mxu0 %v2541_v47 }
 0xdc6   :  { %2466 = vmatprep.subr.bf16.mxu0 %v2587_v1 }
 0xdc9   :  { %2467 = vmatpush3.bf16.msra.mxu0 %v2542_v48 }
 0xe80   :  { %v1726_v51 = vpop.f32.mrf.mxu0 }
 0xe81   :  { %v1776_v52 = vadd.f32 %v1775_v40, %v1726_v51 }
 0xe82   :  { %v2454_v53 = vpop.f32.mrf.mxu0 }
 0xe83   :  { %v1788_v54 = vadd.f32 %v2884_v11, %v1776_v52  ;;  %v2547_v11 = vld [vmem:[%s3156_s11 + $0x8] sm:$0xff]  }
 0xe84   :  { %v1729_v55 = vpop.f32.mrf.mxu0  ;;  %2481 = vmatpush3.bf16.msra.mxu1 %v2547_v11 }
 0xe85   :  { %v1791_v56 = vadd.f32 %v2911_v23, %v1788_v54  ;;  %2482 = vmatprep.subr.bf16.mxu1 %v2587_v1  ;;  %v2548_v23 = vld [vmem:[%s3156_s11] sm:$0xff]  }
 0xe86   :  { %v2455_v63 = vpop.f32.mrf.mxu0 }
 0xe87   :  { %v1798_v57 = vpack.c.bf16 %v1791_v56, %v1791_v56 }
 0xe88   :  { %2483 = vmatpush3.bf16.msra.mxu1 %v2548_v23 }
 0xe89   :  { %2469 = vmatmul.mubr.msk.bf16.vlgmr.msra.gmra.mxu0 %vm82_vm1, %v1798_v57 }
 0xf49   :  { %v1861_v58 = vpop.f32.mrf.mxu0 }
 0xf4a   :  { %v1862_v16 = vadd.f32 %v2958_v33, %v1861_v58 }
 0xf4b   :  { %v2470_v60 = vpop.f32.mrf.mxu0 }
 0xf4c   :  { %v1867_v61 = vadd.f32 3.0, %v1862_v16 }
 0xf4d   :  { %v1864_v62 = vpop.f32.mrf.mxu0 }
 0xf4e   :  { %v1868_v0 = vmax.f32 %v1867_v61, 0.0 }
 0xf4f   :  { %v2471_v2 = vpop.f32.mrf.mxu0 }
 0xf50   :  { %v1869_v4 = vmin.f32 %v1868_v0, 6.0 }
 0xf52   :  { %v1870_v5 = vmul.f32 %v1869_v4, %v1862_v16 }
 0xf54   :  { %v1871_v7 = vmul.f32 0.16666667, %v1870_v5 }
 0xf56   :  { %v1884_v9 = vpack.c.bf16 %v1871_v7, %v1871_v7 }
 0xf58   :  { %2485 = vmatmul.mubr.msk.bf16.vlgmr.msra.gmra.mxu1 %vm970_vm8, %v1884_v9 }
 0xf59   :  { %2576 = shalt.err (!%p2573_p4)
}
 0xf5a   :  { %1987 = dma.vmem_to_hbm [thread:$0]  %s1985_s22, 32, %s3159_s14, [#allocation3]  }
0x1018   :  { %v1965_v1 = vpop.f32.mrf.mxu1 }
0x1019   :  { %v1966_v33 = vadd.f32 %v2990_v59, %v1965_v1 }
0x101a   :  { %v2486_v24 = vpop.f32.mrf.mxu1 }
0x101b   :  { %v1971_v10 = vadd.f32 %v1966_v33, %v1791_v56  ;;  %v1974_v13 = vadd.f32 %v1966_v33, %v1788_v54 }
0x101c   :  { %v1968_v14 = vpop.f32.mrf.mxu1 }
0x101d   :  { %2149 = vst.msk [vmem:[%s3158_s13 + $0x4] sm:$0xf] %vm1015_vm9, %v1971_v10 }
0x101e   :  { %1975 = vst.msk [vmem:[%s3160_s15 - $0x2] sm:$0x8] %vm1018_vm10, %v1974_v13  ;;  %v2487_v15 = vpop.f32.mrf.mxu1 }
0x101f   :  { %2585 = dma.done.wait [#allocation3], 32  }
0x1020   :  { %2586 = vsyncadd [#allocation3], 4294967264 }
0x1021   :  { %1997 = vsyncpa [#allocation3], 1 }

</bundles_post_ra>
